<compile_context>
chip_gen: v7x
topology: tpu7x:2x2x1
jax: 0.10.0
libtpu: 0.0.40
codegen_flags: <defaults>
</compile_context>

<pallas_src>
import math
from functools import partial

import jax
import jax.numpy as jnp
from jax.experimental import pallas as pl
from jax.experimental.pallas import tpu as pltpu

_VMEM_LIMIT = 48 * 1024 * 1024


def _round_up(x, m):
    return (x + m - 1) // m * m


# ----------------------------------------------------------------------------
# Tiled bf16 matmul with f32 accumulation
# ----------------------------------------------------------------------------
def _mm_kernel(a_ref, b_ref, o_ref, acc_ref):
    @pl.when(pl.program_id(2) == 0)
    def _():
        acc_ref[...] = jnp.zeros_like(acc_ref)

    acc_ref[...] += jnp.dot(a_ref[...], b_ref[...],
                            preferred_element_type=jnp.float32)

    @pl.when(pl.program_id(2) == pl.num_programs(2) - 1)
    def _():
        o_ref[...] = acc_ref[...].astype(o_ref.dtype)


def pallas_matmul(a, b, tm=256, tn=256, tk=512):
    """(M,K)@(K,N) -> (M,N) f32; bf16 MXU inputs, tiled + pipelined."""
    M, K = a.shape
    K2, N = b.shape
    assert K2 == K
    tm = min(tm, _round_up(M, 8))
    tn = min(tn, _round_up(N, 128))
    tk = min(tk, _round_up(K, 128))
    Mp, Kp, Np = _round_up(M, tm), _round_up(K, tk), _round_up(N, tn)
    a_p = jnp.pad(a.astype(jnp.bfloat16), ((0, Mp - M), (0, Kp - K)))
    b_p = jnp.pad(b.astype(jnp.bfloat16), ((0, Kp - K), (0, Np - N)))
    out = pl.pallas_call(
        _mm_kernel,
        grid=(Mp // tm, Np // tn, Kp // tk),
        in_specs=[pl.BlockSpec((tm, tk), lambda i, j, k: (i, k)),
                  pl.BlockSpec((tk, tn), lambda i, j, k: (k, j))],
        out_specs=pl.BlockSpec((tm, tn), lambda i, j, k: (i, j)),
        out_shape=jax.ShapeDtypeStruct((Mp, Np), jnp.float32),
        scratch_shapes=[pltpu.VMEM((tm, tn), jnp.float32)],
        compiler_params=pltpu.CompilerParams(
            dimension_semantics=("parallel", "parallel", "arbitrary"),
            vmem_limit_bytes=_VMEM_LIMIT),
    )(a_p, b_p)
    return out[:M, :N]


# ----------------------------------------------------------------------------
# Row-tiled LayerNorm and fused LN/gate + projection kernels
# ----------------------------------------------------------------------------
def _ln_kernel(x_ref, g_ref, b_ref, o_ref, *, eps):
    x = x_ref[...]
    mu = jnp.mean(x, axis=-1, keepdims=True)
    xc = x - mu
    var = jnp.mean(xc * xc, axis=-1, keepdims=True)
    o_ref[...] = xc * jax.lax.rsqrt(var + eps) * g_ref[...] + b_ref[...]


def pallas_layernorm(x2d, gamma, beta, eps, tm=1024):
    M, C = x2d.shape
    tm = min(tm, _round_up(M, 8))
    Mp = _round_up(M, tm)
    xp = jnp.pad(x2d, ((0, Mp - M), (0, 0)))
    out = pl.pallas_call(
        partial(_ln_kernel, eps=eps),
        grid=(Mp // tm,),
        in_specs=[pl.BlockSpec((tm, C), lambda i: (i, 0)),
                  pl.BlockSpec((1, C), lambda i: (0, 0)),
                  pl.BlockSpec((1, C), lambda i: (0, 0))],
        out_specs=pl.BlockSpec((tm, C), lambda i: (i, 0)),
        out_shape=jax.ShapeDtypeStruct((Mp, C), jnp.float32),
        compiler_params=pltpu.CompilerParams(
            dimension_semantics=("parallel",),
            vmem_limit_bytes=_VMEM_LIMIT),
    )(xp, gamma.reshape(1, C).astype(jnp.float32),
      beta.reshape(1, C).astype(jnp.float32))
    return out[:M]


def _ln_matmul_kernel(x_ref, g_ref, b_ref, w_ref, o_ref, *, eps):
    x = x_ref[...]
    mu = jnp.mean(x, axis=-1, keepdims=True)
    xc = x - mu
    var = jnp.mean(xc * xc, axis=-1, keepdims=True)
    xn = xc * jax.lax.rsqrt(var + eps) * g_ref[...] + b_ref[...]
    o_ref[...] = jnp.dot(xn.astype(jnp.bfloat16), w_ref[...],
                         preferred_element_type=jnp.float32)


def pallas_ln_matmul(x2d, gamma, beta, w_bf16, eps, tm=512):
    """LayerNorm over channels fused with a (C, N) projection (ln_1 + in_proj)."""
    M, C = x2d.shape
    N = w_bf16.shape[1]
    tm = min(tm, _round_up(M, 8))
    Mp = _round_up(M, tm)
    xp = jnp.pad(x2d, ((0, Mp - M), (0, 0)))
    out = pl.pallas_call(
        partial(_ln_matmul_kernel, eps=eps),
        grid=(Mp // tm,),
        in_specs=[pl.BlockSpec((tm, C), lambda i: (i, 0)),
                  pl.BlockSpec((1, C), lambda i: (0, 0)),
                  pl.BlockSpec((1, C), lambda i: (0, 0)),
                  pl.BlockSpec((C, N), lambda i: (0, 0))],
        out_specs=pl.BlockSpec((tm, N), lambda i: (i, 0)),
        out_shape=jax.ShapeDtypeStruct((Mp, N), jnp.float32),
        compiler_params=pltpu.CompilerParams(
            dimension_semantics=("parallel",),
            vmem_limit_bytes=_VMEM_LIMIT),
    )(xp, gamma.reshape(1, C).astype(jnp.float32),
      beta.reshape(1, C).astype(jnp.float32), w_bf16)
    return out[:M]


def _out_gate_proj_kernel(y_ref, z_ref, g_ref, b_ref, w_ref, o_ref, *, eps):
    y = y_ref[...]
    mu = jnp.mean(y, axis=-1, keepdims=True)
    yc = y - mu
    var = jnp.mean(yc * yc, axis=-1, keepdims=True)
    yn = yc * jax.lax.rsqrt(var + eps) * g_ref[...] + b_ref[...]
    z = z_ref[...]
    gated = yn * (z * (1.0 / (1.0 + jnp.exp(-z))))       # y * SiLU(z)
    o_ref[...] = jnp.dot(gated.astype(jnp.bfloat16), w_ref[...],
                         preferred_element_type=jnp.float32)


def pallas_out_gate_proj(y2d, z2d, gamma, beta, w_bf16, eps, tm=512):
    """out_norm + silu(z) gating + out_proj fused into one pass."""
    M, Di = y2d.shape
    C = w_bf16.shape[1]
    tm = min(tm, _round_up(M, 8))
    Mp = _round_up(M, tm)
    yp = jnp.pad(y2d, ((0, Mp - M), (0, 0)))
    zp = jnp.pad(z2d, ((0, Mp - M), (0, 0)))
    out = pl.pallas_call(
        partial(_out_gate_proj_kernel, eps=eps),
        grid=(Mp // tm,),
        in_specs=[pl.BlockSpec((tm, Di), lambda i: (i, 0)),
                  pl.BlockSpec((tm, Di), lambda i: (i, 0)),
                  pl.BlockSpec((1, Di), lambda i: (0, 0)),
                  pl.BlockSpec((1, Di), lambda i: (0, 0)),
                  pl.BlockSpec((Di, C), lambda i: (0, 0))],
        out_specs=pl.BlockSpec((tm, C), lambda i: (i, 0)),
        out_shape=jax.ShapeDtypeStruct((Mp, C), jnp.float32),
        compiler_params=pltpu.CompilerParams(
            dimension_semantics=("parallel",),
            vmem_limit_bytes=_VMEM_LIMIT),
    )(yp, zp, gamma.reshape(1, Di).astype(jnp.float32),
      beta.reshape(1, Di).astype(jnp.float32), w_bf16)
    return out[:M]


# ----------------------------------------------------------------------------
# Depthwise 3x3 conv + SiLU (SS2D conv2d) and dense 3x3 conv (CAB), no im2col
# ----------------------------------------------------------------------------
def _dwconv_silu_kernel(x_ref, w_ref, b_ref, o_ref):
    H, W, C = o_ref.shape
    acc = jnp.zeros((H, W, C), jnp.float32)
    for dh in range(3):
        for dw in range(3):
            tap = w_ref[pl.ds(dh * 3 + dw, 1), :].reshape(1, 1, C)
            acc = acc + x_ref[dh:dh + H, dw:dw + W, :] * tap
    acc = acc + b_ref[...].reshape(1, 1, C)
    o_ref[...] = acc * (1.0 / (1.0 + jnp.exp(-acc)))      # SiLU


def pallas_dwconv_silu(x_nhwc, w, b):
    """Depthwise 3x3 conv (padding=1, bias) followed by SiLU.  w: (C,1,3,3)."""
    BF, H, W, C = x_nhwc.shape
    xp = jnp.pad(x_nhwc, ((0, 0), (1, 1), (1, 1), (0, 0)))
    wk = jnp.transpose(w[:, 0], (1, 2, 0)).reshape(9, C)  # [dh*3+dw, c]
    return pl.pallas_call(
        _dwconv_silu_kernel,
        grid=(BF,),
        in_specs=[pl.BlockSpec((None, H + 2, W + 2, C), lambda i: (i, 0, 0, 0)),
                  pl.BlockSpec((9, C), lambda i: (0, 0)),
                  pl.BlockSpec((1, C), lambda i: (0, 0))],
        out_specs=pl.BlockSpec((None, H, W, C), lambda i: (i, 0, 0, 0)),
        out_shape=jax.ShapeDtypeStruct((BF, H, W, C), jnp.float32),
        compiler_params=pltpu.CompilerParams(
            dimension_semantics=("parallel",),
            vmem_limit_bytes=_VMEM_LIMIT),
    )(xp, wk, b.reshape(1, C))


def _conv3x3_kernel(x_ref, w_ref, b_ref, o_ref, *, H, W):
    # x_ref: (H+2, W+2, Cin) padded image; w_ref: (9*Cin, Cout) bf16;
    # o_ref: (H*W, Cout).  9 shifted MXU matmuls, f32 accumulation.
    Cin = x_ref.shape[-1]
    Cout = o_ref.shape[-1]
    acc = jnp.zeros((H * W, Cout), jnp.float32)
    for dh in range(3):
        for dw in range(3):
            patch = x_ref[dh:dh + H, dw:dw + W, :].reshape(H * W, Cin)
            wk = w_ref[(dh * 3 + dw) * Cin:(dh * 3 + dw + 1) * Cin, :]
            acc = acc + jnp.dot(patch.astype(jnp.bfloat16), wk,
                                preferred_element_type=jnp.float32)
    o_ref[...] = acc + b_ref[...]


def pallas_conv3x3(x_nhwc, w_flat, bias):
    """Dense 3x3 conv, padding=1, bias.  w_flat: (9*Cin, Cout)."""
    BF, H, W, Cin = x_nhwc.shape
    Cout = w_flat.shape[1]
    xp = jnp.pad(x_nhwc, ((0, 0), (1, 1), (1, 1), (0, 0)))
    out = pl.pallas_call(
        partial(_conv3x3_kernel, H=H, W=W),
        grid=(BF,),
        in_specs=[pl.BlockSpec((None, H + 2, W + 2, Cin), lambda i: (i, 0, 0, 0)),
                  pl.BlockSpec((9 * Cin, Cout), lambda i: (0, 0)),
                  pl.BlockSpec((1, Cout), lambda i: (0, 0))],
        out_specs=pl.BlockSpec((None, H * W, Cout), lambda i: (i, 0, 0)),
        out_shape=jax.ShapeDtypeStruct((BF, H * W, Cout), jnp.float32),
        compiler_params=pltpu.CompilerParams(
            dimension_semantics=("parallel",),
            vmem_limit_bytes=_VMEM_LIMIT),
    )(xp, w_flat.astype(jnp.bfloat16),
      bias.reshape(1, Cout).astype(jnp.float32))
    return out.reshape(BF, H, W, Cout)


# ----------------------------------------------------------------------------
# Selective scan: group-form B/C, L-chunked, h carried in VMEM scratch
# ----------------------------------------------------------------------------
def _scan_kernel(u_ref, d_ref, at_ref, bg_ref, cg_ref, dp_ref, db_ref, e_ref,
                 y_ref, h_ref, bexp_ref, cexp_ref, *, n_state, tl):
    """One (batch, L-chunk) step of the mamba recurrence.

    u/d/y blocks : (TL, D)     D = K*d_inner on lanes
    at           : (N, D)      A transposed (per scan-channel)
    bg/cg blocks : (TL*N, K)   group-form B/C (shared across d_inner)
    dp/db        : (1, D)      D skip / dt bias
    e            : (K, D)      expansion matrix E[k, k*d_inner + c] = 1
    scratches    : h (N, D), bexp/cexp (TL*N, D)
    """
    @pl.when(pl.program_id(1) == 0)
    def _():
        h_ref[...] = jnp.zeros_like(h_ref)

    a_t = at_ref[...]
    dp = dp_ref[...]
    db = db_ref[...]
    Dd = a_t.shape[1]

    # Expand group-form B/C across d_inner once per chunk (tiny MXU matmul);
    # HBM traffic stays in group form (d_inner x smaller than pre-expansion).
    bexp_ref[...] = jnp.dot(bg_ref[...], e_ref[...],
                            preferred_element_type=jnp.float32)
    cexp_ref[...] = jnp.dot(cg_ref[...], e_ref[...],
                            preferred_element_type=jnp.float32)

    rows8 = jax.lax.broadcasted_iota(jnp.int32, (8, Dd), 0)

    def softplus(raw):
        return jnp.where(raw > 20.0, raw,
                         jnp.log(1.0 + jnp.exp(jnp.minimum(raw, 20.0))))

    def step(h, ut, dlt, bt, ct):
        h = jnp.exp(dlt * a_t) * h + (dlt * ut) * bt
        yt = jnp.sum(ct * h, axis=0, keepdims=True) + dp * ut
        return h, yt

    nb8 = tl // 8
    rem = tl - nb8 * 8

    def sub_block(sb, h):
        t0 = pl.multiple_of(sb * 8, 8)
        ub = u_ref[pl.ds(t0, 8), :]                         # (8, D)
        dlb = softplus(d_ref[pl.ds(t0, 8), :] + db)         # vectorised softplus
        r0 = pl.multiple_of(t0 * n_state, 8)
        yblk = jnp.zeros((8, Dd), jnp.float32)
        for i in range(8):
            bt = bexp_ref[pl.ds(r0 + i * n_state, n_state), :]
            ct = cexp_ref[pl.ds(r0 + i * n_state, n_state), :]
            h, yt = step(h, ub[i:i + 1, :], dlb[i:i + 1, :], bt, ct)
            yblk = jnp.where(rows8 == i, yt, yblk)
        y_ref[pl.ds(t0, 8), :] = yblk                       # one full store / 8 steps
        return h

    h = jax.lax.fori_loop(0, nb8, sub_block, h_ref[...])

    # static remainder when TL is not a multiple of 8
    for i in range(rem):
        t = nb8 * 8 + i
        ut = u_ref[pl.ds(t, 1), :]
        dlt = softplus(d_ref[pl.ds(t, 1), :] + db)
        bt = bexp_ref[pl.ds(t * n_state, n_state), :]
        ct = cexp_ref[pl.ds(t * n_state, n_state), :]
        h, yt = step(h, ut, dlt, bt, ct)
        y_ref[pl.ds(t, 1), :] = yt

    h_ref[...] = h


def _pick_chunk(L, cap=256):
    best = None
    t = 8
    while t <= min(L, cap):
        if L % t == 0:
            best = t
        t += 8
    return best if best is not None else L


def pallas_selective_scan(u, delta, A_T, Bg, Cg, Dp, dbias, E):
    BF, L, D = u.shape
    N = A_T.shape[0]
    K = E.shape[0]
    TL = _pick_chunk(L)
    nchunks = L // TL
    return pl.pallas_call(
        partial(_scan_kernel, n_state=N, tl=TL),
        grid=(BF, nchunks),
        in_specs=[
            pl.BlockSpec((None, TL, D), lambda b, l: (b, l, 0)),
            pl.BlockSpec((None, TL, D), lambda b, l: (b, l, 0)),
            pl.BlockSpec((N, D), lambda b, l: (0, 0)),
            pl.BlockSpec((None, TL * N, K), lambda b, l: (b, l, 0)),
            pl.BlockSpec((None, TL * N, K), lambda b, l: (b, l, 0)),
            pl.BlockSpec((1, D), lambda b, l: (0, 0)),
            pl.BlockSpec((1, D), lambda b, l: (0, 0)),
            pl.BlockSpec((K, D), lambda b, l: (0, 0)),
        ],
        out_specs=pl.BlockSpec((None, TL, D), lambda b, l: (b, l, 0)),
        out_shape=jax.ShapeDtypeStruct((BF, L, D), jnp.float32),
        scratch_shapes=[pltpu.VMEM((N, D), jnp.float32),
                        pltpu.VMEM((TL * N, D), jnp.float32),
                        pltpu.VMEM((TL * N, D), jnp.float32)],
        compiler_params=pltpu.CompilerParams(
            dimension_semantics=("parallel", "arbitrary"),
            vmem_limit_bytes=_VMEM_LIMIT),
    )(u, delta, A_T, Bg, Cg, Dp, dbias, E)


# ----------------------------------------------------------------------------
# Module forward (glue in plain JAX, hot paths in Pallas)
# ----------------------------------------------------------------------------
def cab_forward(x_nhwc, p):
    """CAB: conv3x3 -> GELU -> conv3x3 -> ChannelAttention (NHWC)."""
    BF, H, W, C = x_nhwc.shape
    cmid = p["cab_w1"].shape[0]
    w1 = jnp.transpose(p["cab_w1"], (2, 3, 1, 0)).reshape(9 * C, cmid)
    h1 = pallas_conv3x3(x_nhwc, w1, p["cab_b1"])
    # TODO(synk): exact (erf) GELU kept at the JAX level; erf has no guaranteed Mosaic lowering.
    h1 = jax.nn.gelu(h1, approximate=False)
    w2 = jnp.transpose(p["cab_w2"], (2, 3, 1, 0)).reshape(9 * cmid, C)
    h2 = pallas_conv3x3(h1, w2, p["cab_b2"])
    # Channel attention (squeeze path is tiny -> plain JAX glue)
    pooled = jnp.mean(h2, axis=(1, 2))
    a = jnp.maximum(pooled @ p["ca_w1"][:, :, 0, 0].T + p["ca_b1"], 0.0)
    s = jax.nn.sigmoid(a @ p["ca_w2"][:, :, 0, 0].T + p["ca_b2"])
    return h2 * s[:, None, None, :]


def ss2d_forward(x_nhwc, p):
    BF, H, W, C = x_nhwc.shape
    d_inner = p["in_proj_w"].shape[0] // 2
    d_state = p["A_logs"].shape[1]
    dt_rank = p["dt_projs_w"].shape[2]
    K = 4
    L = H * W
    D = K * d_inner
    CW = dt_rank + 2 * d_state

    # ln_1 (eps=1e-6) fused into in_proj: one pass over the (BF*L, C) slab.
    xz = pallas_ln_matmul(x_nhwc.reshape(-1, C), p["ln1_g"], p["ln1_b"],
                          p["in_proj_w"].T.astype(jnp.bfloat16), eps=1e-6)
    x_in, z = xz[:, :d_inner], xz[:, d_inner:]

    xconv = pallas_dwconv_silu(x_in.reshape(BF, H, W, d_inner),
                               p["dw_w"], p["dw_b"])
    x_hw = xconv.reshape(BF, L, d_inner)            # direction-0 (row-major) order

    # All 4 direction x_proj's as ONE lane-dense matmul (done in hw order;
    # the direction reordering is applied afterwards to the narrow outputs).
    Wcat = p["x_proj_w"].reshape(K * CW, d_inner)
    xdbl = pallas_matmul(x_hw.reshape(BF * L, d_inner), Wcat.T)    # (BF*L, K*CW)

    # dt low-rank -> d_inner via a single block-diagonal matmul for all 4 dirs.
    dtr = jnp.concatenate([xdbl[:, k * CW:k * CW + dt_rank] for k in range(K)],
                          axis=-1)                                 # (BF*L, K*dt_rank)
    dt_bd = jnp.zeros((K * dt_rank, K * d_inner), jnp.float32)
    for k in range(K):
        dt_bd = dt_bd.at[k * dt_rank:(k + 1) * dt_rank,
                         k * d_inner:(k + 1) * d_inner].set(p["dt_projs_w"][k].T)
    dt_all = pallas_matmul(dtr, dt_bd)                             # (BF*L, K*d_inner)

    Bs_hw = jnp.stack([xdbl[:, k * CW + dt_rank:k * CW + dt_rank + d_state]
                       for k in range(K)], axis=1).reshape(BF, L, K, d_state)
    Cs_hw = jnp.stack([xdbl[:, k * CW + dt_rank + d_state:k * CW + CW]
                       for k in range(K)], axis=1).reshape(BF, L, K, d_state)
    dt_hw = dt_all.reshape(BF, L, K, d_inner)

    def apply_dir(v, k):      # hw order -> direction-k time order
        if k % 2 == 1:
            F_ = v.shape[-1]
            v = v.reshape(BF, H, W, F_).transpose(0, 2, 1, 3).reshape(BF, L, F_)
        if k >= 2:
            v = jnp.flip(v, axis=1)
        return v

    def undo_dir(v, k):       # direction-k time order -> hw order
        if k >= 2:
            v = jnp.flip(v, axis=1)
        if k % 2 == 1:
            F_ = v.shape[-1]
            v = v.reshape(BF, W, H, F_).transpose(0, 2, 1, 3).reshape(BF, L, F_)
        return v

    u = jnp.concatenate([apply_dir(x_hw, k) for k in range(K)], axis=-1)
    delta = jnp.concatenate([apply_dir(dt_hw[:, :, k, :], k) for k in range(K)],
                            axis=-1)
    Bg = jnp.stack([apply_dir(Bs_hw[:, :, k, :], k) for k in range(K)],
                   axis=-1).reshape(BF, L * d_state, K)            # group form
    Cg = jnp.stack([apply_dir(Cs_hw[:, :, k, :], k) for k in range(K)],
                   axis=-1).reshape(BF, L * d_state, K)

    A_T = (-jnp.exp(p["A_logs"].astype(jnp.float32))).T            # (N, D)
    Dp = p["Ds"].reshape(1, D).astype(jnp.float32)
    dbias = p["dt_projs_b"].reshape(1, D).astype(jnp.float32)
    E = jnp.repeat(jnp.eye(K, dtype=jnp.float32), d_inner, axis=1)  # (K, D)

    y_scan = pallas_selective_scan(u, delta, A_T, Bg, Cg, Dp, dbias, E)

    y_dirs = y_scan.reshape(BF, L, K, d_inner)
    y_hw = undo_dir(y_dirs[:, :, 0, :], 0)
    for k in range(1, K):
        y_hw = y_hw + undo_dir(y_dirs[:, :, k, :], k)

    # out_norm (eps=1e-5) + silu(z) gating + out_proj fused into one kernel.
    out = pallas_out_gate_proj(y_hw.reshape(BF * L, d_inner), z,
                               p["out_norm_g"], p["out_norm_b"],
                               p["out_proj_w"].T.astype(jnp.bfloat16), eps=1e-5)
    return out.reshape(BF, H, W, C)


def vss_block_forward(inp, p):
    B, F_, C, H, W = inp.shape
    BF = B * F_
    # torch does .reshape(B*F, H, W, C) on an NCHW-contiguous tensor -- a pure
    # row-major reinterpretation.  jnp.reshape matches it exactly.
    x0 = inp.reshape(BF, H, W, C).astype(jnp.float32)

    attn = ss2d_forward(x0, p)                  # ln_1 fused inside
    # drop_path(0.) is identity
    x = x0 * p["skip_scale"] + attn

    xn2 = pallas_layernorm(x.reshape(-1, C), p["ln2_g"], p["ln2_b"], 1e-5)
    cab = cab_forward(xn2.reshape(BF, H, W, C), p)
    x = x * p["skip_scale2"] + cab

    return x.reshape(B, F_, C, H, W)


# ----------------------------------------------------------------------------
# Deterministic parameter initialization (shapes follow the module __init__)
# ----------------------------------------------------------------------------
def init_params(key, hidden_dim=32, d_state=16, expand=2.0,
                compress_ratio=3, squeeze_factor=30):
    d_inner = int(expand * hidden_dim)
    dt_rank = math.ceil(hidden_dim / 16)
    ks = jax.random.split(key, 16)
    n = lambda k, s, sc=0.02: sc * jax.random.normal(k, s, jnp.float32)

    p = {
        "ln1_g": jnp.ones((hidden_dim,), jnp.float32),
        "ln1_b": jnp.zeros((hidden_dim,), jnp.float32),
        "ln2_g": jnp.ones((hidden_dim,), jnp.float32),
        "ln2_b": jnp.zeros((hidden_dim,), jnp.float32),
        "skip_scale": jnp.ones((hidden_dim,), jnp.float32),
        "skip_scale2": jnp.ones((hidden_dim,), jnp.float32),
        # SS2D
        "in_proj_w": n(ks[0], (2 * d_inner, hidden_dim)),
        "dw_w": n(ks[1], (d_inner, 1, 3, 3), 0.1),
        "dw_b": n(ks[2], (d_inner,), 0.01),
        "x_proj_w": n(ks[3], (4, dt_rank + 2 * d_state, d_inner)),
        "out_norm_g": jnp.ones((d_inner,), jnp.float32),
        "out_norm_b": jnp.zeros((d_inner,), jnp.float32),
        "out_proj_w": n(ks[4], (hidden_dim, d_inner)),
        "Ds": jnp.ones((4 * d_inner,), jnp.float32),
        # CAB
        "cab_w1": n(ks[5], (hidden_dim // compress_ratio, hidden_dim, 3, 3), 0.05),
        "cab_b1": n(ks[6], (hidden_dim // compress_ratio,), 0.01),
        "cab_w2": n(ks[7], (hidden_dim, hidden_dim // compress_ratio, 3, 3), 0.05),
        "cab_b2": n(ks[8], (hidden_dim,), 0.01),
        "ca_w1": n(ks[9], (hidden_dim // squeeze_factor, hidden_dim, 1, 1), 0.05),
        "ca_b1": jnp.zeros((hidden_dim // squeeze_factor,), jnp.float32),
        "ca_w2": n(ks[10], (hidden_dim, hidden_dim // squeeze_factor, 1, 1), 0.05),
        "ca_b2": jnp.zeros((hidden_dim,), jnp.float32),
    }
    # dt projections (following SS2D.dt_init formulas, deterministic keys)
    dt_init_std = dt_rank ** -0.5
    p["dt_projs_w"] = jax.random.uniform(
        ks[11], (4, d_inner, dt_rank), jnp.float32,
        minval=-dt_init_std, maxval=dt_init_std)
    dt = jnp.exp(jax.random.uniform(ks[12], (4, d_inner), jnp.float32)
                 * (math.log(0.1) - math.log(0.001)) + math.log(0.001))
    dt = jnp.maximum(dt, 1e-4)
    p["dt_projs_b"] = dt + jnp.log(-jnp.expm1(-dt))
    # A_logs: log(arange(1..d_state)) repeated 4x over d_inner rows
    A = jnp.tile(jnp.arange(1, d_state + 1, dtype=jnp.float32)[None, :],
                 (d_inner, 1))
    p["A_logs"] = jnp.tile(jnp.log(A), (4, 1))
    return p


# ----------------------------------------------------------------------------
if __name__ == "__main__":
    B, F_, C, H, W = 1, 2, 32, 8, 8      # hidden_dim=32 -> d_inner=64, dt_rank=2
    x = jax.random.normal(jax.random.PRNGKey(0), (B, F_, C, H, W), jnp.float32)
    params = init_params(jax.random.PRNGKey(42), hidden_dim=C)

    fwd = jax.jit(vss_block_forward)
    out = fwd(x, params)
    jax.block_until_ready(out)
    assert out.shape == (B, F_, C, H, W) and out.dtype == jnp.float32
    assert bool(jnp.all(jnp.isfinite(out)))
    print("KERNEL_OK")
</pallas_src>

<mosaic_0001>
module attributes {stable_mosaic.version = 11 : i64} {
  func.func @_ln_matmul_kernel(%arg0: i32, %arg1: memref<128x32xf32, #tpu.memory_space<vmem>>, %arg2: memref<1x32xf32, #tpu.memory_space<vmem>>, %arg3: memref<1x32xf32, #tpu.memory_space<vmem>>, %arg4: memref<32x128xbf16, #tpu.memory_space<vmem>>, %arg5: memref<128x128xf32, #tpu.memory_space<vmem>>) attributes {dimension_semantics = [#tpu.dimension_semantics<parallel>], iteration_bounds = array<i64: 1>, scalar_prefetch = 0 : i64, scratch_operands = 0 : i64, tpu.core_type = #tpu.core_type<tc>, window_params = [{transform_indices = @transform_0, window_bounds = array<i64: 128, 32>}, {pipeline_mode = #tpu.pipeline_mode<synchronous>, transform_indices = @transform_1, window_bounds = array<i64: 1, 32>}, {pipeline_mode = #tpu.pipeline_mode<synchronous>, transform_indices = @transform_2, window_bounds = array<i64: 1, 32>}, {pipeline_mode = #tpu.pipeline_mode<synchronous>, transform_indices = @transform_3, window_bounds = array<i64: 32, 128>}, {transform_indices = @transform_4, window_bounds = array<i64: 128, 128>}]} {
    %c0 = arith.constant 0 : index
    %c0_0 = arith.constant 0 : index
    %0 = vector.load %arg1[%c0, %c0_0] : memref<128x32xf32, #tpu.memory_space<vmem>>, vector<128x32xf32>
    %cst = arith.constant dense<0.000000e+00> : vector<128xf32>
    %1 = vector.multi_reduction <add>, %0, %cst [1] : vector<128x32xf32> to vector<128xf32>
    %2 = vector.shape_cast %1 : vector<128xf32> to vector<128x1xf32>
    %cst_1 = arith.constant 3.200000e+01 : f32
    %3 = vector.broadcast %cst_1 : f32 to vector<128x1xf32>
    %4 = arith.divf %2, %3 : vector<128x1xf32>
    %5 = vector.broadcast %4 : vector<128x1xf32> to vector<128x32xf32>
    %6 = arith.subf %0, %5 : vector<128x32xf32>
    %7 = arith.mulf %6, %6 : vector<128x32xf32>
    %cst_2 = arith.constant dense<0.000000e+00> : vector<128xf32>
    %8 = vector.multi_reduction <add>, %7, %cst_2 [1] : vector<128x32xf32> to vector<128xf32>
    %9 = vector.shape_cast %8 : vector<128xf32> to vector<128x1xf32>
    %cst_3 = arith.constant 3.200000e+01 : f32
    %10 = vector.broadcast %cst_3 : f32 to vector<128x1xf32>
    %11 = arith.divf %9, %10 : vector<128x1xf32>
    %cst_4 = arith.constant 9.99999997E-7 : f32
    %12 = vector.broadcast %cst_4 : f32 to vector<128x1xf32>
    %13 = arith.addf %11, %12 : vector<128x1xf32>
    %14 = math.rsqrt %13 : vector<128x1xf32>
    %15 = vector.broadcast %14 : vector<128x1xf32> to vector<128x32xf32>
    %16 = arith.mulf %6, %15 : vector<128x32xf32>
    %c0_5 = arith.constant 0 : index
    %c0_6 = arith.constant 0 : index
    %17 = vector.load %arg2[%c0_5, %c0_6] : memref<1x32xf32, #tpu.memory_space<vmem>>, vector<1x32xf32>
    %18 = vector.broadcast %17 : vector<1x32xf32> to vector<128x32xf32>
    %19 = arith.mulf %16, %18 : vector<128x32xf32>
    %c0_7 = arith.constant 0 : index
    %c0_8 = arith.constant 0 : index
    %20 = vector.load %arg3[%c0_7, %c0_8] : memref<1x32xf32, #tpu.memory_space<vmem>>, vector<1x32xf32>
    %21 = vector.broadcast %20 : vector<1x32xf32> to vector<128x32xf32>
    %22 = arith.addf %19, %21 : vector<128x32xf32>
    %23 = arith.truncf %22 : vector<128x32xf32> to vector<128x32xbf16>
    %c0_9 = arith.constant 0 : index
    %c0_10 = arith.constant 0 : index
    %24 = vector.load %arg4[%c0_9, %c0_10] : memref<32x128xbf16, #tpu.memory_space<vmem>>, vector<32x128xbf16>
    %cst_11 = arith.constant dense<0.000000e+00> : vector<128x128xf32>
    %25 = tpu.matmul %23, %24, %cst_11 {dimension_numbers = #tpu.dot_dimension_numbers<[1], [0], [0], [1], [0, 0, 1, 1], [], []>} : vector<128x32xbf16>, vector<32x128xbf16>, vector<128x128xf32> -> vector<128x128xf32>
    %c0_12 = arith.constant 0 : index
    %c0_13 = arith.constant 0 : index
    %26 = vector.load %arg5[%c0_12, %c0_13] : memref<128x128xf32, #tpu.memory_space<vmem>>, vector<128x128xf32>
    tpu.vector_store %arg5[%c0_12, %c0_13], %25 {strides = array<i32>} : memref<128x128xf32, #tpu.memory_space<vmem>>, vector<128x128xf32>,
    return
  }
  func.func @transform_0(%arg0: i32) -> (i32, i32) {
    %c0_i32 = arith.constant 0 : i32
    %c0_i32_0 = arith.constant 0 : i32
    return %arg0, %c0_i32 : i32, i32
  }
  func.func @transform_1(%arg0: i32) -> (i32, i32) {
    %c0_i32 = arith.constant 0 : i32
    %c0_i32_0 = arith.constant 0 : i32
    %c0_i32_1 = arith.constant 0 : i32
    return %c0_i32, %c0_i32_0 : i32, i32
  }
  func.func @transform_2(%arg0: i32) -> (i32, i32) {
    %c0_i32 = arith.constant 0 : i32
    %c0_i32_0 = arith.constant 0 : i32
    %c0_i32_1 = arith.constant 0 : i32
    return %c0_i32, %c0_i32_0 : i32, i32
  }
  func.func @transform_3(%arg0: i32) -> (i32, i32) {
    %c0_i32 = arith.constant 0 : i32
    %c0_i32_0 = arith.constant 0 : i32
    %c0_i32_1 = arith.constant 0 : i32
    return %c0_i32, %c0_i32_0 : i32, i32
  }
  func.func @transform_4(%arg0: i32) -> (i32, i32) {
    %c0_i32 = arith.constant 0 : i32
    %c0_i32_0 = arith.constant 0 : i32
    return %arg0, %c0_i32 : i32, i32
  }
}

module attributes {stable_mosaic.version = 11 : i64} {
  func.func @_dwconv_silu_kernel(%arg0: i32, %arg1: memref<1x10x10x64xf32, #tpu.memory_space<vmem>>, %arg2: memref<9x64xf32, #tpu.memory_space<vmem>>, %arg3: memref<1x64xf32, #tpu.memory_space<vmem>>, %arg4: memref<1x8x8x64xf32, #tpu.memory_space<vmem>>) attributes {dimension_semantics = [#tpu.dimension_semantics<parallel>], iteration_bounds = array<i64: 2>, scalar_prefetch = 0 : i64, scratch_operands = 0 : i64, tpu.core_type = #tpu.core_type<tc>, window_params = [{transform_indices = @transform_0, window_bounds = array<i64: 1, 10, 10, 64>}, {pipeline_mode = #tpu.pipeline_mode<synchronous>, transform_indices = @transform_1, window_bounds = array<i64: 9, 64>}, {pipeline_mode = #tpu.pipeline_mode<synchronous>, transform_indices = @transform_2, window_bounds = array<i64: 1, 64>}, {transform_indices = @transform_3, window_bounds = array<i64: 1, 8, 8, 64>}]} {
    %cst = arith.constant 0.000000e+00 : f32
    %0 = vector.broadcast %cst : f32 to vector<8x8x64xf32>
    %c0 = arith.constant 0 : index
    %c0_0 = arith.constant 0 : index
    %1 = vector.load %arg2[%c0, %c0_0] : memref<9x64xf32, #tpu.memory_space<vmem>>, vector<1x64xf32>
    %2 = vector.shape_cast %1 : vector<1x64xf32> to vector<1x1x64xf32>
    %c0_1 = arith.constant 0 : index
    %c0_2 = arith.constant 0 : index
    %c0_3 = arith.constant 0 : index
    %c0_4 = arith.constant 0 : index
    %3 = vector.load %arg1[%c0_1, %c0_2, %c0_3, %c0_4] : memref<1x10x10x64xf32, #tpu.memory_space<vmem>>, vector<1x8x8x64xf32>
    %4 = vector.shape_cast %3 : vector<1x8x8x64xf32> to vector<8x8x64xf32>
    %5 = vector.broadcast %2 : vector<1x1x64xf32> to vector<8x8x64xf32>
    %6 = arith.mulf %4, %5 : vector<8x8x64xf32>
    %7 = arith.addf %0, %6 : vector<8x8x64xf32>
    %c1 = arith.constant 1 : index
    %c0_5 = arith.constant 0 : index
    %8 = vector.load %arg2[%c1, %c0_5] : memref<9x64xf32, #tpu.memory_space<vmem>>, vector<1x64xf32>
    %9 = vector.shape_cast %8 : vector<1x64xf32> to vector<1x1x64xf32>
    %c0_6 = arith.constant 0 : index
    %c0_7 = arith.constant 0 : index
    %c1_8 = arith.constant 1 : index
    %c0_9 = arith.constant 0 : index
    %10 = vector.load %arg1[%c0_6, %c0_7, %c1_8, %c0_9] : memref<1x10x10x64xf32, #tpu.memory_space<vmem>>, vector<1x8x8x64xf32>
    %11 = vector.shape_cast %10 : vector<1x8x8x64xf32> to vector<8x8x64xf32>
    %12 = vector.broadcast %9 : vector<1x1x64xf32> to vector<8x8x64xf32>
    %13 = arith.mulf %11, %12 : vector<8x8x64xf32>
    %14 = arith.addf %7, %13 : vector<8x8x64xf32>
    %c2 = arith.constant 2 : index
    %c0_10 = arith.constant 0 : index
    %15 = vector.load %arg2[%c2, %c0_10] : memref<9x64xf32, #tpu.memory_space<vmem>>, vector<1x64xf32>
    %16 = vector.shape_cast %15 : vector<1x64xf32> to vector<1x1x64xf32>
    %c0_11 = arith.constant 0 : index
    %c0_12 = arith.constant 0 : index
    %c2_13 = arith.constant 2 : index
    %c0_14 = arith.constant 0 : index
    %17 = vector.load %arg1[%c0_11, %c0_12, %c2_13, %c0_14] : memref<1x10x10x64xf32, #tpu.memory_space<vmem>>, vector<1x8x8x64xf32>
    %18 = vector.shape_cast %17 : vector<1x8x8x64xf32> to vector<8x8x64xf32>
    %19 = vector.broadcast %16 : vector<1x1x64xf32> to vector<8x8x64xf32>
    %20 = arith.mulf %18, %19 : vector<8x8x64xf32>
    %21 = arith.addf %14, %20 : vector<8x8x64xf32>
    %c3 = arith.constant 3 : index
    %c0_15 = arith.constant 0 : index
    %22 = vector.load %arg2[%c3, %c0_15] : memref<9x64xf32, #tpu.memory_space<vmem>>, vector<1x64xf32>
    %23 = vector.shape_cast %22 : vector<1x64xf32> to vector<1x1x64xf32>
    %c0_16 = arith.constant 0 : index
    %c1_17 = arith.constant 1 : index
    %c0_18 = arith.constant 0 : index
    %c0_19 = arith.constant 0 : index
    %24 = vector.load %arg1[%c0_16, %c1_17, %c0_18, %c0_19] : memref<1x10x10x64xf32, #tpu.memory_space<vmem>>, vector<1x8x8x64xf32>
    %25 = vector.shape_cast %24 : vector<1x8x8x64xf32> to vector<8x8x64xf32>
    %26 = vector.broadcast %23 : vector<1x1x64xf32> to vector<8x8x64xf32>
    %27 = arith.mulf %25, %26 : vector<8x8x64xf32>
    %28 = arith.addf %21, %27 : vector<8x8x64xf32>
    %c4 = arith.constant 4 : index
    %c0_20 = arith.constant 0 : index
    %29 = vector.load %arg2[%c4, %c0_20] : memref<9x64xf32, #tpu.memory_space<vmem>>, vector<1x64xf32>
    %30 = vector.shape_cast %29 : vector<1x64xf32> to vector<1x1x64xf32>
    %c0_21 = arith.constant 0 : index
    %c1_22 = arith.constant 1 : index
    %c1_23 = arith.constant 1 : index
    %c0_24 = arith.constant 0 : index
    %31 = vector.load %arg1[%c0_21, %c1_22, %c1_23, %c0_24] : memref<1x10x10x64xf32, #tpu.memory_space<vmem>>, vector<1x8x8x64xf32>
    %32 = vector.shape_cast %31 : vector<1x8x8x64xf32> to vector<8x8x64xf32>
    %33 = vector.broadcast %30 : vector<1x1x64xf32> to vector<8x8x64xf32>
    %34 = arith.mulf %32, %33 : vector<8x8x64xf32>
    %35 = arith.addf %28, %34 : vector<8x8x64xf32>
    %c5 = arith.constant 5 : index
    %c0_25 = arith.constant 0 : index
    %36 = vector.load %arg2[%c5, %c0_25] : memref<9x64xf32, #tpu.memory_space<vmem>>, vector<1x64xf32>
    %37 = vector.shape_cast %36 : vector<1x64xf32> to vector<1x1x64xf32>
    %c0_26 = arith.constant 0 : index
    %c1_27 = arith.constant 1 : index
    %c2_28 = arith.constant 2 : index
    %c0_29 = arith.constant 0 : index
    %38 = vector.load %arg1[%c0_26, %c1_27, %c2_28, %c0_29] : memref<1x10x10x64xf32, #tpu.memory_space<vmem>>, vector<1x8x8x64xf32>
    %39 = vector.shape_cast %38 : vector<1x8x8x64xf32> to vector<8x8x64xf32>
    %40 = vector.broadcast %37 : vector<1x1x64xf32> to vector<8x8x64xf32>
    %41 = arith.mulf %39, %40 : vector<8x8x64xf32>
    %42 = arith.addf %35, %41 : vector<8x8x64xf32>
    %c6 = arith.constant 6 : index
    %c0_30 = arith.constant 0 : index
    %43 = vector.load %arg2[%c6, %c0_30] : memref<9x64xf32, #tpu.memory_space<vmem>>, vector<1x64xf32>
    %44 = vector.shape_cast %43 : vector<1x64xf32> to vector<1x1x64xf32>
    %c0_31 = arith.constant 0 : index
    %c2_32 = arith.constant 2 : index
    %c0_33 = arith.constant 0 : index
    %c0_34 = arith.constant 0 : index
    %45 = vector.load %arg1[%c0_31, %c2_32, %c0_33, %c0_34] : memref<1x10x10x64xf32, #tpu.memory_space<vmem>>, vector<1x8x8x64xf32>
    %46 = vector.shape_cast %45 : vector<1x8x8x64xf32> to vector<8x8x64xf32>
    %47 = vector.broadcast %44 : vector<1x1x64xf32> to vector<8x8x64xf32>
    %48 = arith.mulf %46, %47 : vector<8x8x64xf32>
    %49 = arith.addf %42, %48 : vector<8x8x64xf32>
    %c7 = arith.constant 7 : index
    %c0_35 = arith.constant 0 : index
    %50 = vector.load %arg2[%c7, %c0_35] : memref<9x64xf32, #tpu.memory_space<vmem>>, vector<1x64xf32>
    %51 = vector.shape_cast %50 : vector<1x64xf32> to vector<1x1x64xf32>
    %c0_36 = arith.constant 0 : index
    %c2_37 = arith.constant 2 : index
    %c1_38 = arith.constant 1 : index
    %c0_39 = arith.constant 0 : index
    %52 = vector.load %arg1[%c0_36, %c2_37, %c1_38, %c0_39] : memref<1x10x10x64xf32, #tpu.memory_space<vmem>>, vector<1x8x8x64xf32>
    %53 = vector.shape_cast %52 : vector<1x8x8x64xf32> to vector<8x8x64xf32>
    %54 = vector.broadcast %51 : vector<1x1x64xf32> to vector<8x8x64xf32>
    %55 = arith.mulf %53, %54 : vector<8x8x64xf32>
    %56 = arith.addf %49, %55 : vector<8x8x64xf32>
    %c8 = arith.constant 8 : index
    %c0_40 = arith.constant 0 : index
    %57 = vector.load %arg2[%c8, %c0_40] : memref<9x64xf32, #tpu.memory_space<vmem>>, vector<1x64xf32>
    %58 = vector.shape_cast %57 : vector<1x64xf32> to vector<1x1x64xf32>
    %c0_41 = arith.constant 0 : index
    %c2_42 = arith.constant 2 : index
    %c2_43 = arith.constant 2 : index
    %c0_44 = arith.constant 0 : index
    %59 = vector.load %arg1[%c0_41, %c2_42, %c2_43, %c0_44] : memref<1x10x10x64xf32, #tpu.memory_space<vmem>>, vector<1x8x8x64xf32>
    %60 = vector.shape_cast %59 : vector<1x8x8x64xf32> to vector<8x8x64xf32>
    %61 = vector.broadcast %58 : vector<1x1x64xf32> to vector<8x8x64xf32>
    %62 = arith.mulf %60, %61 : vector<8x8x64xf32>
    %63 = arith.addf %56, %62 : vector<8x8x64xf32>
    %c0_45 = arith.constant 0 : index
    %c0_46 = arith.constant 0 : index
    %64 = vector.load %arg3[%c0_45, %c0_46] : memref<1x64xf32, #tpu.memory_space<vmem>>, vector<1x64xf32>
    %65 = vector.shape_cast %64 : vector<1x64xf32> to vector<1x1x64xf32>
    %66 = vector.broadcast %65 : vector<1x1x64xf32> to vector<8x8x64xf32>
    %67 = arith.addf %63, %66 : vector<8x8x64xf32>
    %cst_47 = arith.constant 0.000000e+00 : f32
    %68 = vector.broadcast %cst_47 : f32 to vector<8x8x64xf32>
    %69 = arith.subf %68, %67 : vector<8x8x64xf32>
    %70 = math.exp %69 : vector<8x8x64xf32>
    %cst_48 = arith.constant 1.000000e+00 : f32
    %71 = vector.broadcast %cst_48 : f32 to vector<8x8x64xf32>
    %72 = arith.addf %71, %70 : vector<8x8x64xf32>
    %cst_49 = arith.constant 1.000000e+00 : f32
    %73 = vector.broadcast %cst_49 : f32 to vector<8x8x64xf32>
    %74 = arith.divf %73, %72 : vector<8x8x64xf32>
    %75 = arith.mulf %67, %74 : vector<8x8x64xf32>
    %c0_50 = arith.constant 0 : index
    %c0_51 = arith.constant 0 : index
    %c0_52 = arith.constant 0 : index
    %c0_53 = arith.constant 0 : index
    %76 = vector.load %arg4[%c0_50, %c0_51, %c0_52, %c0_53] : memref<1x8x8x64xf32, #tpu.memory_space<vmem>>, vector<1x8x8x64xf32>
    %77 = vector.shape_cast %76 : vector<1x8x8x64xf32> to vector<8x8x64xf32>
    %78 = vector.shape_cast %75 : vector<8x8x64xf32> to vector<1x8x8x64xf32>
    tpu.vector_store %arg4[%c0_50, %c0_51, %c0_52, %c0_53], %78 {strides = array<i32>} : memref<1x8x8x64xf32, #tpu.memory_space<vmem>>, vector<1x8x8x64xf32>,
    return
  }
  func.func @transform_0(%arg0: i32) -> (i32, i32, i32, i32) {
    %c0_i32 = arith.constant 0 : i32
    %c0_i32_0 = arith.constant 0 : i32
    %c0_i32_1 = arith.constant 0 : i32
    %c0_i32_2 = arith.constant 0 : i32
    return %arg0, %c0_i32, %c0_i32_0, %c0_i32_1 : i32, i32, i32, i32
  }
  func.func @transform_1(%arg0: i32) -> (i32, i32) {
    %c0_i32 = arith.constant 0 : i32
    %c0_i32_0 = arith.constant 0 : i32
    %c0_i32_1 = arith.constant 0 : i32
    return %c0_i32, %c0_i32_0 : i32, i32
  }
  func.func @transform_2(%arg0: i32) -> (i32, i32) {
    %c0_i32 = arith.constant 0 : i32
    %c0_i32_0 = arith.constant 0 : i32
    %c0_i32_1 = arith.constant 0 : i32
    return %c0_i32, %c0_i32_0 : i32, i32
  }
  func.func @transform_3(%arg0: i32) -> (i32, i32, i32, i32) {
    %c0_i32 = arith.constant 0 : i32
    %c0_i32_0 = arith.constant 0 : i32
    %c0_i32_1 = arith.constant 0 : i32
    %c0_i32_2 = arith.constant 0 : i32
    return %arg0, %c0_i32, %c0_i32_0, %c0_i32_1 : i32, i32, i32, i32
  }
}

module attributes {stable_mosaic.version = 11 : i64} {
  func.func @_mm_kernel(%arg0: i32, %arg1: i32, %arg2: i32, %arg3: memref<128x128xbf16, #tpu.memory_space<vmem>>, %arg4: memref<128x256xbf16, #tpu.memory_space<vmem>>, %arg5: memref<128x256xf32, #tpu.memory_space<vmem>>, %arg6: memref<128x256xf32, #tpu.memory_space<vmem>>) attributes {dimension_semantics = [#tpu.dimension_semantics<parallel>, #tpu.dimension_semantics<parallel>, #tpu.dimension_semantics<arbitrary>], iteration_bounds = array<i64: 1, 1, 1>, scalar_prefetch = 0 : i64, scratch_operands = 1 : i64, tpu.core_type = #tpu.core_type<tc>, window_params = [{transform_indices = @transform_0, window_bounds = array<i64: 128, 128>}, {transform_indices = @transform_1, window_bounds = array<i64: 128, 256>}, {transform_indices = @transform_2, window_bounds = array<i64: 128, 256>}]} {
    %c0_i32 = arith.constant 0 : i32
    %0 = arith.cmpi eq, %arg2, %c0_i32 : i32
    %1 = arith.extui %0 : i1 to i32
    %c0_i32_0 = arith.constant 0 : i32
    %2 = arith.cmpi ne, %1, %c0_i32_0 : i32
    scf.if %2 {
      %cst_10 = arith.constant 0.000000e+00 : f32
      %12 = vector.broadcast %cst_10 : f32 to vector<128x256xf32>
      %c0_11 = arith.constant 0 : index
      %c0_12 = arith.constant 0 : index
      %13 = vector.load %arg6[%c0_11, %c0_12] : memref<128x256xf32, #tpu.memory_space<vmem>>, vector<128x256xf32>
      tpu.vector_store %arg6[%c0_11, %c0_12], %12 {strides = array<i32>} : memref<128x256xf32, #tpu.memory_space<vmem>>, vector<128x256xf32>,
    } else {
    }
    %c0 = arith.constant 0 : index
    %c0_1 = arith.constant 0 : index
    %3 = vector.load %arg6[%c0, %c0_1] : memref<128x256xf32, #tpu.memory_space<vmem>>, vector<128x256xf32>
    %c0_2 = arith.constant 0 : index
    %c0_3 = arith.constant 0 : index
    %4 = vector.load %arg3[%c0_2, %c0_3] : memref<128x128xbf16, #tpu.memory_space<vmem>>, vector<128x128xbf16>
    %c0_4 = arith.constant 0 : index
    %c0_5 = arith.constant 0 : index
    %5 = vector.load %arg4[%c0_4, %c0_5] : memref<128x256xbf16, #tpu.memory_space<vmem>>, vector<128x256xbf16>
    %cst = arith.constant dense<0.000000e+00> : vector<128x256xf32>
    %6 = tpu.matmul %4, %5, %cst {dimension_numbers = #tpu.dot_dimension_numbers<[1], [0], [0], [1], [0, 0, 1, 1], [], []>} : vector<128x128xbf16>, vector<128x256xbf16>, vector<128x256xf32> -> vector<128x256xf32>
    %7 = arith.addf %3, %6 : vector<128x256xf32>
    %c0_6 = arith.constant 0 : index
    %c0_7 = arith.constant 0 : index
    %8 = vector.load %arg6[%c0_6, %c0_7] : memref<128x256xf32, #tpu.memory_space<vmem>>, vector<128x256xf32>
    tpu.vector_store %arg6[%c0_6, %c0_7], %7 {strides = array<i32>} : memref<128x256xf32, #tpu.memory_space<vmem>>, vector<128x256xf32>,
    %c0_i32_8 = arith.constant 0 : i32
    %9 = arith.cmpi eq, %arg2, %c0_i32_8 : i32
    %10 = arith.extui %9 : i1 to i32
    %c0_i32_9 = arith.constant 0 : i32
    %11 = arith.cmpi ne, %10, %c0_i32_9 : i32
    scf.if %11 {
      %c0_10 = arith.constant 0 : index
      %c0_11 = arith.constant 0 : index
      %12 = vector.load %arg6[%c0_10, %c0_11] : memref<128x256xf32, #tpu.memory_space<vmem>>, vector<128x256xf32>
      %c0_12 = arith.constant 0 : index
      %c0_13 = arith.constant 0 : index
      %13 = vector.load %arg5[%c0_12, %c0_13] : memref<128x256xf32, #tpu.memory_space<vmem>>, vector<128x256xf32>
      tpu.vector_store %arg5[%c0_12, %c0_13], %12 {strides = array<i32>} : memref<128x256xf32, #tpu.memory_space<vmem>>, vector<128x256xf32>,
    } else {
    }
    return
  }
  func.func @transform_0(%arg0: i32, %arg1: i32, %arg2: i32) -> (i32, i32) {
    %c0_i32 = arith.constant 0 : i32
    return %arg0, %arg2 : i32, i32
  }
  func.func @transform_1(%arg0: i32, %arg1: i32, %arg2: i32) -> (i32, i32) {
    %c0_i32 = arith.constant 0 : i32
    return %arg2, %arg1 : i32, i32
  }
  func.func @transform_2(%arg0: i32, %arg1: i32, %arg2: i32) -> (i32, i32) {
    %c0_i32 = arith.constant 0 : i32
    return %arg0, %arg1 : i32, i32
  }
}

module attributes {stable_mosaic.version = 11 : i64} {
  func.func @_scan_kernel(%arg0: i32, %arg1: i32, %arg2: memref<1x64x256xf32, #tpu.memory_space<vmem>>, %arg3: memref<1x64x256xf32, #tpu.memory_space<vmem>>, %arg4: memref<16x256xf32, #tpu.memory_space<vmem>>, %arg5: memref<1x1024x4xf32, #tpu.memory_space<vmem>>, %arg6: memref<1x1024x4xf32, #tpu.memory_space<vmem>>, %arg7: memref<1x256xf32, #tpu.memory_space<vmem>>, %arg8: memref<1x256xf32, #tpu.memory_space<vmem>>, %arg9: memref<4x256xf32, #tpu.memory_space<vmem>>, %arg10: memref<1x64x256xf32, #tpu.memory_space<vmem>>, %arg11: memref<16x256xf32, #tpu.memory_space<vmem>>, %arg12: memref<1024x256xf32, #tpu.memory_space<vmem>>, %arg13: memref<1024x256xf32, #tpu.memory_space<vmem>>) attributes {dimension_semantics = [#tpu.dimension_semantics<parallel>, #tpu.dimension_semantics<arbitrary>], iteration_bounds = array<i64: 2, 1>, scalar_prefetch = 0 : i64, scratch_operands = 3 : i64, tpu.core_type = #tpu.core_type<tc>, window_params = [{transform_indices = @transform_0, window_bounds = array<i64: 1, 64, 256>}, {transform_indices = @transform_1, window_bounds = array<i64: 1, 64, 256>}, {pipeline_mode = #tpu.pipeline_mode<synchronous>, transform_indices = @transform_2, window_bounds = array<i64: 16, 256>}, {transform_indices = @transform_3, window_bounds = array<i64: 1, 1024, 4>}, {transform_indices = @transform_4, window_bounds = array<i64: 1, 1024, 4>}, {pipeline_mode = #tpu.pipeline_mode<synchronous>, transform_indices = @transform_5, window_bounds = array<i64: 1, 256>}, {pipeline_mode = #tpu.pipeline_mode<synchronous>, transform_indices = @transform_6, window_bounds = array<i64: 1, 256>}, {pipeline_mode = #tpu.pipeline_mode<synchronous>, transform_indices = @transform_7, window_bounds = array<i64: 4, 256>}, {transform_indices = @transform_8, window_bounds = array<i64: 1, 64, 256>}]} {
    %c0_i32 = arith.constant 0 : i32
    %0 = arith.cmpi eq, %arg1, %c0_i32 : i32
    %1 = arith.extui %0 : i1 to i32
    %c0_i32_0 = arith.constant 0 : i32
    %2 = arith.cmpi ne, %1, %c0_i32_0 : i32
    scf.if %2 {
      %cst_27 = arith.constant 0.000000e+00 : f32
      %21 = vector.broadcast %cst_27 : f32 to vector<16x256xf32>
      %c0_28 = arith.constant 0 : index
      %c0_29 = arith.constant 0 : index
      %22 = vector.load %arg11[%c0_28, %c0_29] : memref<16x256xf32, #tpu.memory_space<vmem>>, vector<16x256xf32>
      tpu.vector_store %arg11[%c0_28, %c0_29], %21 {strides = array<i32>} : memref<16x256xf32, #tpu.memory_space<vmem>>, vector<16x256xf32>,
    } else {
    }
    %c0 = arith.constant 0 : index
    %c0_1 = arith.constant 0 : index
    %3 = vector.load %arg4[%c0, %c0_1] : memref<16x256xf32, #tpu.memory_space<vmem>>, vector<16x256xf32>
    %c0_2 = arith.constant 0 : index
    %c0_3 = arith.constant 0 : index
    %4 = vector.load %arg7[%c0_2, %c0_3] : memref<1x256xf32, #tpu.memory_space<vmem>>, vector<1x256xf32>
    %c0_4 = arith.constant 0 : index
    %c0_5 = arith.constant 0 : index
    %5 = vector.load %arg8[%c0_4, %c0_5] : memref<1x256xf32, #tpu.memory_space<vmem>>, vector<1x256xf32>
    %c0_6 = arith.constant 0 : index
    %c0_7 = arith.constant 0 : index
    %c0_8 = arith.constant 0 : index
    %6 = vector.load %arg5[%c0_6, %c0_7, %c0_8] : memref<1x1024x4xf32, #tpu.memory_space<vmem>>, vector<1x1024x4xf32>
    %7 = vector.shape_cast %6 : vector<1x1024x4xf32> to vector<1024x4xf32>
    %c0_9 = arith.constant 0 : index
    %c0_10 = arith.constant 0 : index
    %8 = vector.load %arg9[%c0_9, %c0_10] : memref<4x256xf32, #tpu.memory_space<vmem>>, vector<4x256xf32>
    %cst = arith.constant dense<0.000000e+00> : vector<1024x256xf32>
    %9 = tpu.matmul %7, %8, %cst {dimension_numbers = #tpu.dot_dimension_numbers<[1], [0], [0], [1], [0, 0, 1, 1], [], []>} : vector<1024x4xf32>, vector<4x256xf32>, vector<1024x256xf32> -> vector<1024x256xf32>
    %c0_11 = arith.constant 0 : index
    %c0_12 = arith.constant 0 : index
    %10 = vector.load %arg12[%c0_11, %c0_12] : memref<1024x256xf32, #tpu.memory_space<vmem>>, vector<1024x256xf32>
    tpu.vector_store %arg12[%c0_11, %c0_12], %9 {strides = array<i32>} : memref<1024x256xf32, #tpu.memory_space<vmem>>, vector<1024x256xf32>,
    %c0_13 = arith.constant 0 : index
    %c0_14 = arith.constant 0 : index
    %c0_15 = arith.constant 0 : index
    %11 = vector.load %arg6[%c0_13, %c0_14, %c0_15] : memref<1x1024x4xf32, #tpu.memory_space<vmem>>, vector<1x1024x4xf32>
    %12 = vector.shape_cast %11 : vector<1x1024x4xf32> to vector<1024x4xf32>
    %c0_16 = arith.constant 0 : index
    %c0_17 = arith.constant 0 : index
    %13 = vector.load %arg9[%c0_16, %c0_17] : memref<4x256xf32, #tpu.memory_space<vmem>>, vector<4x256xf32>
    %cst_18 = arith.constant dense<0.000000e+00> : vector<1024x256xf32>
    %14 = tpu.matmul %12, %13, %cst_18 {dimension_numbers = #tpu.dot_dimension_numbers<[1], [0], [0], [1], [0, 0, 1, 1], [], []>} : vector<1024x4xf32>, vector<4x256xf32>, vector<1024x256xf32> -> vector<1024x256xf32>
    %c0_19 = arith.constant 0 : index
    %c0_20 = arith.constant 0 : index
    %15 = vector.load %arg13[%c0_19, %c0_20] : memref<1024x256xf32, #tpu.memory_space<vmem>>, vector<1024x256xf32>
    tpu.vector_store %arg13[%c0_19, %c0_20], %14 {strides = array<i32>} : memref<1024x256xf32, #tpu.memory_space<vmem>>, vector<1024x256xf32>,
    %16 = tpu.iota {dimensions = array<i32: 0>} : vector<8x256xi32>
    %c0_21 = arith.constant 0 : index
    %c0_22 = arith.constant 0 : index
    %17 = vector.load %arg11[%c0_21, %c0_22] : memref<16x256xf32, #tpu.memory_space<vmem>>, vector<16x256xf32>
    %c0_i32_23 = arith.constant 0 : i32
    %c8_i32 = arith.constant 8 : i32
    %18 = arith.addi %c0_i32_23, %c8_i32 : i32
    %c1_i32 = arith.constant 1 : i32
    %19 = scf.for %arg14 = %c0_i32_23 to %18 step %c1_i32 iter_args(%arg15 = %17) -> (vector<16x256xf32>)  : i32 {
      %c8_i32_27 = arith.constant 8 : i32
      %21 = arith.muli %arg14, %c8_i32_27 : i32
      %22 = tpu.assume_multiple %21, 8 : i32
      %c0_28 = arith.constant 0 : index
      %23 = arith.index_cast %22 : i32 to index
      %c0_29 = arith.constant 0 : index
      %24 = vector.load %arg2[%c0_28, %23, %c0_29] : memref<1x64x256xf32, #tpu.memory_space<vmem>>, vector<1x8x256xf32>
      %25 = vector.shape_cast %24 : vector<1x8x256xf32> to vector<8x256xf32>
      %c0_30 = arith.constant 0 : index
      %26 = arith.index_cast %22 : i32 to index
      %c0_31 = arith.constant 0 : index
      %27 = vector.load %arg3[%c0_30, %26, %c0_31] : memref<1x64x256xf32, #tpu.memory_space<vmem>>, vector<1x8x256xf32>
      %28 = vector.shape_cast %27 : vector<1x8x256xf32> to vector<8x256xf32>
      %29 = vector.broadcast %5 : vector<1x256xf32> to vector<8x256xf32>
      %30 = arith.addf %28, %29 : vector<8x256xf32>
      %cst_32 = arith.constant 2.000000e+01 : f32
      %31 = vector.broadcast %cst_32 : f32 to vector<8x256xf32>
      %32 = arith.cmpf ogt, %30, %31 : vector<8x256xf32>
      %cst_33 = arith.constant 2.000000e+01 : f32
      %33 = vector.broadcast %cst_33 : f32 to vector<8x256xf32>
      %34 = arith.minimumf %30, %33 : vector<8x256xf32>
      %35 = math.exp %34 : vector<8x256xf32>
      %cst_34 = arith.constant 1.000000e+00 : f32
      %36 = vector.broadcast %cst_34 : f32 to vector<8x256xf32>
      %37 = arith.addf %36, %35 : vector<8x256xf32>
      %38 = math.log %37 : vector<8x256xf32>
      %39 = arith.select %32, %30, %38 : vector<8x256xi1>, vector<8x256xf32>
      %c16_i32 = arith.constant 16 : i32
      %40 = arith.muli %22, %c16_i32 : i32
      %41 = tpu.assume_multiple %40, 8 : i32
      %cst_35 = arith.constant 0.000000e+00 : f32
      %42 = vector.broadcast %cst_35 : f32 to vector<8x256xf32>
      %c0_i32_36 = arith.constant 0 : i32
      %43 = arith.addi %41, %c0_i32_36 : i32
      %44 = arith.index_cast %43 : i32 to index
      %c0_37 = arith.constant 0 : index
      %45 = vector.load %arg12[%44, %c0_37] : memref<1024x256xf32, #tpu.memory_space<vmem>>, vector<16x256xf32>
      %c0_i32_38 = arith.constant 0 : i32
      %46 = arith.addi %41, %c0_i32_38 : i32
      %47 = arith.index_cast %46 : i32 to index
      %c0_39 = arith.constant 0 : index
      %48 = vector.load %arg13[%47, %c0_39] : memref<1024x256xf32, #tpu.memory_space<vmem>>, vector<16x256xf32>
      %49 = vector.extract_strided_slice %25 {offsets = [0, 0], sizes = [1, 256], strides = [1, 1]} : vector<8x256xf32> to vector<1x256xf32>
      %50 = vector.extract_strided_slice %39 {offsets = [0, 0], sizes = [1, 256], strides = [1, 1]} : vector<8x256xf32> to vector<1x256xf32>
      %51 = vector.broadcast %50 : vector<1x256xf32> to vector<16x256xf32>
      %52 = arith.mulf %51, %3 : vector<16x256xf32>
      %53 = math.exp %52 : vector<16x256xf32>
      %54 = arith.mulf %53, %arg15 : vector<16x256xf32>
      %55 = arith.mulf %50, %49 : vector<1x256xf32>
      %56 = vector.broadcast %55 : vector<1x256xf32> to vector<16x256xf32>
      %57 = arith.mulf %56, %45 : vector<16x256xf32>
      %58 = arith.addf %54, %57 : vector<16x256xf32>
      %59 = arith.mulf %48, %58 : vector<16x256xf32>
      %cst_40 = arith.constant dense<0.000000e+00> : vector<256xf32>
      %60 = vector.multi_reduction <add>, %59, %cst_40 [0] : vector<16x256xf32> to vector<256xf32>
      %61 = vector.shape_cast %60 : vector<256xf32> to vector<1x256xf32>
      %62 = arith.mulf %4, %49 : vector<1x256xf32>
      %63 = arith.addf %61, %62 : vector<1x256xf32>
      %c0_i32_41 = arith.constant 0 : i32
      %64 = vector.broadcast %c0_i32_41 : i32 to vector<8x256xi32>
      %65 = arith.cmpi eq, %16, %64 : vector<8x256xi32>
      %66 = vector.shape_cast %63 : vector<1x256xf32> to vector<1x256xf32>
      %67 = vector.broadcast %66 : vector<1x256xf32> to vector<8x256xf32>
      %68 = arith.select %65, %67, %42 : vector<8x256xi1>, vector<8x256xf32>
      %c16_i32_42 = arith.constant 16 : i32
      %69 = arith.addi %41, %c16_i32_42 : i32
      %70 = arith.index_cast %69 : i32 to index
      %c0_43 = arith.constant 0 : index
      %71 = vector.load %arg12[%70, %c0_43] : memref<1024x256xf32, #tpu.memory_space<vmem>>, vector<16x256xf32>
      %c16_i32_44 = arith.constant 16 : i32
      %72 = arith.addi %41, %c16_i32_44 : i32
      %73 = arith.index_cast %72 : i32 to index
      %c0_45 = arith.constant 0 : index
      %74 = vector.load %arg13[%73, %c0_45] : memref<1024x256xf32, #tpu.memory_space<vmem>>, vector<16x256xf32>
      %75 = vector.extract_strided_slice %25 {offsets = [1, 0], sizes = [1, 256], strides = [1, 1]} : vector<8x256xf32> to vector<1x256xf32>
      %76 = vector.extract_strided_slice %39 {offsets = [1, 0], sizes = [1, 256], strides = [1, 1]} : vector<8x256xf32> to vector<1x256xf32>
      %77 = vector.broadcast %76 : vector<1x256xf32> to vector<16x256xf32>
      %78 = arith.mulf %77, %3 : vector<16x256xf32>
      %79 = math.exp %78 : vector<16x256xf32>
      %80 = arith.mulf %79, %58 : vector<16x256xf32>
      %81 = arith.mulf %76, %75 : vector<1x256xf32>
      %82 = vector.broadcast %81 : vector<1x256xf32> to vector<16x256xf32>
      %83 = arith.mulf %82, %71 : vector<16x256xf32>
      %84 = arith.addf %80, %83 : vector<16x256xf32>
      %85 = arith.mulf %74, %84 : vector<16x256xf32>
      %cst_46 = arith.constant dense<0.000000e+00> : vector<256xf32>
      %86 = vector.multi_reduction <add>, %85, %cst_46 [0] : vector<16x256xf32> to vector<256xf32>
      %87 = vector.shape_cast %86 : vector<256xf32> to vector<1x256xf32>
      %88 = arith.mulf %4, %75 : vector<1x256xf32>
      %89 = arith.addf %87, %88 : vector<1x256xf32>
      %c1_i32_47 = arith.constant 1 : i32
      %90 = vector.broadcast %c1_i32_47 : i32 to vector<8x256xi32>
      %91 = arith.cmpi eq, %16, %90 : vector<8x256xi32>
      %92 = vector.shape_cast %89 : vector<1x256xf32> to vector<1x256xf32>
      %93 = vector.broadcast %92 : vector<1x256xf32> to vector<8x256xf32>
      %94 = arith.select %91, %93, %68 : vector<8x256xi1>, vector<8x256xf32>
      %c32_i32 = arith.constant 32 : i32
      %95 = arith.addi %41, %c32_i32 : i32
      %96 = arith.index_cast %95 : i32 to index
      %c0_48 = arith.constant 0 : index
      %97 = vector.load %arg12[%96, %c0_48] : memref<1024x256xf32, #tpu.memory_space<vmem>>, vector<16x256xf32>
      %c32_i32_49 = arith.constant 32 : i32
      %98 = arith.addi %41, %c32_i32_49 : i32
      %99 = arith.index_cast %98 : i32 to index
      %c0_50 = arith.constant 0 : index
      %100 = vector.load %arg13[%99, %c0_50] : memref<1024x256xf32, #tpu.memory_space<vmem>>, vector<16x256xf32>
      %101 = vector.extract_strided_slice %25 {offsets = [2, 0], sizes = [1, 256], strides = [1, 1]} : vector<8x256xf32> to vector<1x256xf32>
      %102 = vector.extract_strided_slice %39 {offsets = [2, 0], sizes = [1, 256], strides = [1, 1]} : vector<8x256xf32> to vector<1x256xf32>
      %103 = vector.broadcast %102 : vector<1x256xf32> to vector<16x256xf32>
      %104 = arith.mulf %103, %3 : vector<16x256xf32>
      %105 = math.exp %104 : vector<16x256xf32>
      %106 = arith.mulf %105, %84 : vector<16x256xf32>
      %107 = arith.mulf %102, %101 : vector<1x256xf32>
      %108 = vector.broadcast %107 : vector<1x256xf32> to vector<16x256xf32>
      %109 = arith.mulf %108, %97 : vector<16x256xf32>
      %110 = arith.addf %106, %109 : vector<16x256xf32>
      %111 = arith.mulf %100, %110 : vector<16x256xf32>
      %cst_51 = arith.constant dense<0.000000e+00> : vector<256xf32>
      %112 = vector.multi_reduction <add>, %111, %cst_51 [0] : vector<16x256xf32> to vector<256xf32>
      %113 = vector.shape_cast %112 : vector<256xf32> to vector<1x256xf32>
      %114 = arith.mulf %4, %101 : vector<1x256xf32>
      %115 = arith.addf %113, %114 : vector<1x256xf32>
      %c2_i32 = arith.constant 2 : i32
      %116 = vector.broadcast %c2_i32 : i32 to vector<8x256xi32>
      %117 = arith.cmpi eq, %16, %116 : vector<8x256xi32>
      %118 = vector.shape_cast %115 : vector<1x256xf32> to vector<1x256xf32>
      %119 = vector.broadcast %118 : vector<1x256xf32> to vector<8x256xf32>
      %120 = arith.select %117, %119, %94 : vector<8x256xi1>, vector<8x256xf32>
      %c48_i32 = arith.constant 48 : i32
      %121 = arith.addi %41, %c48_i32 : i32
      %122 = arith.index_cast %121 : i32 to index
      %c0_52 = arith.constant 0 : index
      %123 = vector.load %arg12[%122, %c0_52] : memref<1024x256xf32, #tpu.memory_space<vmem>>, vector<16x256xf32>
      %c48_i32_53 = arith.constant 48 : i32
      %124 = arith.addi %41, %c48_i32_53 : i32
      %125 = arith.index_cast %124 : i32 to index
      %c0_54 = arith.constant 0 : index
      %126 = vector.load %arg13[%125, %c0_54] : memref<1024x256xf32, #tpu.memory_space<vmem>>, vector<16x256xf32>
      %127 = vector.extract_strided_slice %25 {offsets = [3, 0], sizes = [1, 256], strides = [1, 1]} : vector<8x256xf32> to vector<1x256xf32>
      %128 = vector.extract_strided_slice %39 {offsets = [3, 0], sizes = [1, 256], strides = [1, 1]} : vector<8x256xf32> to vector<1x256xf32>
      %129 = vector.broadcast %128 : vector<1x256xf32> to vector<16x256xf32>
      %130 = arith.mulf %129, %3 : vector<16x256xf32>
      %131 = math.exp %130 : vector<16x256xf32>
      %132 = arith.mulf %131, %110 : vector<16x256xf32>
      %133 = arith.mulf %128, %127 : vector<1x256xf32>
      %134 = vector.broadcast %133 : vector<1x256xf32> to vector<16x256xf32>
      %135 = arith.mulf %134, %123 : vector<16x256xf32>
      %136 = arith.addf %132, %135 : vector<16x256xf32>
      %137 = arith.mulf %126, %136 : vector<16x256xf32>
      %cst_55 = arith.constant dense<0.000000e+00> : vector<256xf32>
      %138 = vector.multi_reduction <add>, %137, %cst_55 [0] : vector<16x256xf32> to vector<256xf32>
      %139 = vector.shape_cast %138 : vector<256xf32> to vector<1x256xf32>
      %140 = arith.mulf %4, %127 : vector<1x256xf32>
      %141 = arith.addf %139, %140 : vector<1x256xf32>
      %c3_i32 = arith.constant 3 : i32
      %142 = vector.broadcast %c3_i32 : i32 to vector<8x256xi32>
      %143 = arith.cmpi eq, %16, %142 : vector<8x256xi32>
      %144 = vector.shape_cast %141 : vector<1x256xf32> to vector<1x256xf32>
      %145 = vector.broadcast %144 : vector<1x256xf32> to vector<8x256xf32>
      %146 = arith.select %143, %145, %120 : vector<8x256xi1>, vector<8x256xf32>
      %c64_i32 = arith.constant 64 : i32
      %147 = arith.addi %41, %c64_i32 : i32
      %148 = arith.index_cast %147 : i32 to index
      %c0_56 = arith.constant 0 : index
      %149 = vector.load %arg12[%148, %c0_56] : memref<1024x256xf32, #tpu.memory_space<vmem>>, vector<16x256xf32>
      %c64_i32_57 = arith.constant 64 : i32
      %150 = arith.addi %41, %c64_i32_57 : i32
      %151 = arith.index_cast %150 : i32 to index
      %c0_58 = arith.constant 0 : index
      %152 = vector.load %arg13[%151, %c0_58] : memref<1024x256xf32, #tpu.memory_space<vmem>>, vector<16x256xf32>
      %153 = vector.extract_strided_slice %25 {offsets = [4, 0], sizes = [1, 256], strides = [1, 1]} : vector<8x256xf32> to vector<1x256xf32>
      %154 = vector.extract_strided_slice %39 {offsets = [4, 0], sizes = [1, 256], strides = [1, 1]} : vector<8x256xf32> to vector<1x256xf32>
      %155 = vector.broadcast %154 : vector<1x256xf32> to vector<16x256xf32>
      %156 = arith.mulf %155, %3 : vector<16x256xf32>
      %157 = math.exp %156 : vector<16x256xf32>
      %158 = arith.mulf %157, %136 : vector<16x256xf32>
      %159 = arith.mulf %154, %153 : vector<1x256xf32>
      %160 = vector.broadcast %159 : vector<1x256xf32> to vector<16x256xf32>
      %161 = arith.mulf %160, %149 : vector<16x256xf32>
      %162 = arith.addf %158, %161 : vector<16x256xf32>
      %163 = arith.mulf %152, %162 : vector<16x256xf32>
      %cst_59 = arith.constant dense<0.000000e+00> : vector<256xf32>
      %164 = vector.multi_reduction <add>, %163, %cst_59 [0] : vector<16x256xf32> to vector<256xf32>
      %165 = vector.shape_cast %164 : vector<256xf32> to vector<1x256xf32>
      %166 = arith.mulf %4, %153 : vector<1x256xf32>
      %167 = arith.addf %165, %166 : vector<1x256xf32>
      %c4_i32 = arith.constant 4 : i32
      %168 = vector.broadcast %c4_i32 : i32 to vector<8x256xi32>
      %169 = arith.cmpi eq, %16, %168 : vector<8x256xi32>
      %170 = vector.shape_cast %167 : vector<1x256xf32> to vector<1x256xf32>
      %171 = vector.broadcast %170 : vector<1x256xf32> to vector<8x256xf32>
      %172 = arith.select %169, %171, %146 : vector<8x256xi1>, vector<8x256xf32>
      %c80_i32 = arith.constant 80 : i32
      %173 = arith.addi %41, %c80_i32 : i32
      %174 = arith.index_cast %173 : i32 to index
      %c0_60 = arith.constant 0 : index
      %175 = vector.load %arg12[%174, %c0_60] : memref<1024x256xf32, #tpu.memory_space<vmem>>, vector<16x256xf32>
      %c80_i32_61 = arith.constant 80 : i32
      %176 = arith.addi %41, %c80_i32_61 : i32
      %177 = arith.index_cast %176 : i32 to index
      %c0_62 = arith.constant 0 : index
      %178 = vector.load %arg13[%177, %c0_62] : memref<1024x256xf32, #tpu.memory_space<vmem>>, vector<16x256xf32>
      %179 = vector.extract_strided_slice %25 {offsets = [5, 0], sizes = [1, 256], strides = [1, 1]} : vector<8x256xf32> to vector<1x256xf32>
      %180 = vector.extract_strided_slice %39 {offsets = [5, 0], sizes = [1, 256], strides = [1, 1]} : vector<8x256xf32> to vector<1x256xf32>
      %181 = vector.broadcast %180 : vector<1x256xf32> to vector<16x256xf32>
      %182 = arith.mulf %181, %3 : vector<16x256xf32>
      %183 = math.exp %182 : vector<16x256xf32>
      %184 = arith.mulf %183, %162 : vector<16x256xf32>
      %185 = arith.mulf %180, %179 : vector<1x256xf32>
      %186 = vector.broadcast %185 : vector<1x256xf32> to vector<16x256xf32>
      %187 = arith.mulf %186, %175 : vector<16x256xf32>
      %188 = arith.addf %184, %187 : vector<16x256xf32>
      %189 = arith.mulf %178, %188 : vector<16x256xf32>
      %cst_63 = arith.constant dense<0.000000e+00> : vector<256xf32>
      %190 = vector.multi_reduction <add>, %189, %cst_63 [0] : vector<16x256xf32> to vector<256xf32>
      %191 = vector.shape_cast %190 : vector<256xf32> to vector<1x256xf32>
      %192 = arith.mulf %4, %179 : vector<1x256xf32>
      %193 = arith.addf %191, %192 : vector<1x256xf32>
      %c5_i32 = arith.constant 5 : i32
      %194 = vector.broadcast %c5_i32 : i32 to vector<8x256xi32>
      %195 = arith.cmpi eq, %16, %194 : vector<8x256xi32>
      %196 = vector.shape_cast %193 : vector<1x256xf32> to vector<1x256xf32>
      %197 = vector.broadcast %196 : vector<1x256xf32> to vector<8x256xf32>
      %198 = arith.select %195, %197, %172 : vector<8x256xi1>, vector<8x256xf32>
      %c96_i32 = arith.constant 96 : i32
      %199 = arith.addi %41, %c96_i32 : i32
      %200 = arith.index_cast %199 : i32 to index
      %c0_64 = arith.constant 0 : index
      %201 = vector.load %arg12[%200, %c0_64] : memref<1024x256xf32, #tpu.memory_space<vmem>>, vector<16x256xf32>
      %c96_i32_65 = arith.constant 96 : i32
      %202 = arith.addi %41, %c96_i32_65 : i32
      %203 = arith.index_cast %202 : i32 to index
      %c0_66 = arith.constant 0 : index
      %204 = vector.load %arg13[%203, %c0_66] : memref<1024x256xf32, #tpu.memory_space<vmem>>, vector<16x256xf32>
      %205 = vector.extract_strided_slice %25 {offsets = [6, 0], sizes = [1, 256], strides = [1, 1]} : vector<8x256xf32> to vector<1x256xf32>
      %206 = vector.extract_strided_slice %39 {offsets = [6, 0], sizes = [1, 256], strides = [1, 1]} : vector<8x256xf32> to vector<1x256xf32>
      %207 = vector.broadcast %206 : vector<1x256xf32> to vector<16x256xf32>
      %208 = arith.mulf %207, %3 : vector<16x256xf32>
      %209 = math.exp %208 : vector<16x256xf32>
      %210 = arith.mulf %209, %188 : vector<16x256xf32>
      %211 = arith.mulf %206, %205 : vector<1x256xf32>
      %212 = vector.broadcast %211 : vector<1x256xf32> to vector<16x256xf32>
      %213 = arith.mulf %212, %201 : vector<16x256xf32>
      %214 = arith.addf %210, %213 : vector<16x256xf32>
      %215 = arith.mulf %204, %214 : vector<16x256xf32>
      %cst_67 = arith.constant dense<0.000000e+00> : vector<256xf32>
      %216 = vector.multi_reduction <add>, %215, %cst_67 [0] : vector<16x256xf32> to vector<256xf32>
      %217 = vector.shape_cast %216 : vector<256xf32> to vector<1x256xf32>
      %218 = arith.mulf %4, %205 : vector<1x256xf32>
      %219 = arith.addf %217, %218 : vector<1x256xf32>
      %c6_i32 = arith.constant 6 : i32
      %220 = vector.broadcast %c6_i32 : i32 to vector<8x256xi32>
      %221 = arith.cmpi eq, %16, %220 : vector<8x256xi32>
      %222 = vector.shape_cast %219 : vector<1x256xf32> to vector<1x256xf32>
      %223 = vector.broadcast %222 : vector<1x256xf32> to vector<8x256xf32>
      %224 = arith.select %221, %223, %198 : vector<8x256xi1>, vector<8x256xf32>
      %c112_i32 = arith.constant 112 : i32
      %225 = arith.addi %41, %c112_i32 : i32
      %226 = arith.index_cast %225 : i32 to index
      %c0_68 = arith.constant 0 : index
      %227 = vector.load %arg12[%226, %c0_68] : memref<1024x256xf32, #tpu.memory_space<vmem>>, vector<16x256xf32>
      %c112_i32_69 = arith.constant 112 : i32
      %228 = arith.addi %41, %c112_i32_69 : i32
      %229 = arith.index_cast %228 : i32 to index
      %c0_70 = arith.constant 0 : index
      %230 = vector.load %arg13[%229, %c0_70] : memref<1024x256xf32, #tpu.memory_space<vmem>>, vector<16x256xf32>
      %231 = vector.extract_strided_slice %25 {offsets = [7, 0], sizes = [1, 256], strides = [1, 1]} : vector<8x256xf32> to vector<1x256xf32>
      %232 = vector.extract_strided_slice %39 {offsets = [7, 0], sizes = [1, 256], strides = [1, 1]} : vector<8x256xf32> to vector<1x256xf32>
      %233 = vector.broadcast %232 : vector<1x256xf32> to vector<16x256xf32>
      %234 = arith.mulf %233, %3 : vector<16x256xf32>
      %235 = math.exp %234 : vector<16x256xf32>
      %236 = arith.mulf %235, %214 : vector<16x256xf32>
      %237 = arith.mulf %232, %231 : vector<1x256xf32>
      %238 = vector.broadcast %237 : vector<1x256xf32> to vector<16x256xf32>
      %239 = arith.mulf %238, %227 : vector<16x256xf32>
      %240 = arith.addf %236, %239 : vector<16x256xf32>
      %241 = arith.mulf %230, %240 : vector<16x256xf32>
      %cst_71 = arith.constant dense<0.000000e+00> : vector<256xf32>
      %242 = vector.multi_reduction <add>, %241, %cst_71 [0] : vector<16x256xf32> to vector<256xf32>
      %243 = vector.shape_cast %242 : vector<256xf32> to vector<1x256xf32>
      %244 = arith.mulf %4, %231 : vector<1x256xf32>
      %245 = arith.addf %243, %244 : vector<1x256xf32>
      %c7_i32 = arith.constant 7 : i32
      %246 = vector.broadcast %c7_i32 : i32 to vector<8x256xi32>
      %247 = arith.cmpi eq, %16, %246 : vector<8x256xi32>
      %248 = vector.shape_cast %245 : vector<1x256xf32> to vector<1x256xf32>
      %249 = vector.broadcast %248 : vector<1x256xf32> to vector<8x256xf32>
      %250 = arith.select %247, %249, %224 : vector<8x256xi1>, vector<8x256xf32>
      %c0_72 = arith.constant 0 : index
      %251 = arith.index_cast %22 : i32 to index
      %c0_73 = arith.constant 0 : index
      %252 = vector.load %arg10[%c0_72, %251, %c0_73] : memref<1x64x256xf32, #tpu.memory_space<vmem>>, vector<1x8x256xf32>
      %253 = vector.shape_cast %252 : vector<1x8x256xf32> to vector<8x256xf32>
      %254 = vector.shape_cast %250 : vector<8x256xf32> to vector<1x8x256xf32>
      tpu.vector_store %arg10[%c0_72, %251, %c0_73], %254 {strides = array<i32>} : memref<1x64x256xf32, #tpu.memory_space<vmem>>, vector<1x8x256xf32>,
      scf.yield %240 : vector<16x256xf32>
    }
    %c8_i32_24 = arith.constant 8 : i32
    %c0_25 = arith.constant 0 : index
    %c0_26 = arith.constant 0 : index
    %20 = vector.load %arg11[%c0_25, %c0_26] : memref<16x256xf32, #tpu.memory_space<vmem>>, vector<16x256xf32>
    tpu.vector_store %arg11[%c0_25, %c0_26], %19 {strides = array<i32>} : memref<16x256xf32, #tpu.memory_space<vmem>>, vector<16x256xf32>,
    return
  }
  func.func @transform_0(%arg0: i32, %arg1: i32) -> (i32, i32, i32) {
    %c0_i32 = arith.constant 0 : i32
    %c0_i32_0 = arith.constant 0 : i32
    return %arg0, %arg1, %c0_i32 : i32, i32, i32
  }
  func.func @transform_1(%arg0: i32, %arg1: i32) -> (i32, i32, i32) {
    %c0_i32 = arith.constant 0 : i32
    %c0_i32_0 = arith.constant 0 : i32
    return %arg0, %arg1, %c0_i32 : i32, i32, i32
  }
  func.func @transform_2(%arg0: i32, %arg1: i32) -> (i32, i32) {
    %c0_i32 = arith.constant 0 : i32
    %c0_i32_0 = arith.constant 0 : i32
    %c0_i32_1 = arith.constant 0 : i32
    return %c0_i32, %c0_i32_0 : i32, i32
  }
  func.func @transform_3(%arg0: i32, %arg1: i32) -> (i32, i32, i32) {
    %c0_i32 = arith.constant 0 : i32
    %c0_i32_0 = arith.constant 0 : i32
    return %arg0, %arg1, %c0_i32 : i32, i32, i32
  }
  func.func @transform_4(%arg0: i32, %arg1: i32) -> (i32, i32, i32) {
    %c0_i32 = arith.constant 0 : i32
    %c0_i32_0 = arith.constant 0 : i32
    return %arg0, %arg1, %c0_i32 : i32, i32, i32
  }
  func.func @transform_5(%arg0: i32, %arg1: i32) -> (i32, i32) {
    %c0_i32 = arith.constant 0 : i32
    %c0_i32_0 = arith.constant 0 : i32
    %c0_i32_1 = arith.constant 0 : i32
    return %c0_i32, %c0_i32_0 : i32, i32
  }
  func.func @transform_6(%arg0: i32, %arg1: i32) -> (i32, i32) {
    %c0_i32 = arith.constant 0 : i32
    %c0_i32_0 = arith.constant 0 : i32
    %c0_i32_1 = arith.constant 0 : i32
    return %c0_i32, %c0_i32_0 : i32, i32
  }
  func.func @transform_7(%arg0: i32, %arg1: i32) -> (i32, i32) {
    %c0_i32 = arith.constant 0 : i32
    %c0_i32_0 = arith.constant 0 : i32
    %c0_i32_1 = arith.constant 0 : i32
    return %c0_i32, %c0_i32_0 : i32, i32
  }
  func.func @transform_8(%arg0: i32, %arg1: i32) -> (i32, i32, i32) {
    %c0_i32 = arith.constant 0 : i32
    %c0_i32_0 = arith.constant 0 : i32
    return %arg0, %arg1, %c0_i32 : i32, i32, i32
  }
}

module attributes {stable_mosaic.version = 11 : i64} {
  func.func @_out_gate_proj_kernel(%arg0: i32, %arg1: memref<128x64xf32, #tpu.memory_space<vmem>>, %arg2: memref<128x64xf32, #tpu.memory_space<vmem>>, %arg3: memref<1x64xf32, #tpu.memory_space<vmem>>, %arg4: memref<1x64xf32, #tpu.memory_space<vmem>>, %arg5: memref<64x32xbf16, #tpu.memory_space<vmem>>, %arg6: memref<128x32xf32, #tpu.memory_space<vmem>>) attributes {dimension_semantics = [#tpu.dimension_semantics<parallel>], iteration_bounds = array<i64: 1>, scalar_prefetch = 0 : i64, scratch_operands = 0 : i64, tpu.core_type = #tpu.core_type<tc>, window_params = [{transform_indices = @transform_0, window_bounds = array<i64: 128, 64>}, {transform_indices = @transform_1, window_bounds = array<i64: 128, 64>}, {pipeline_mode = #tpu.pipeline_mode<synchronous>, transform_indices = @transform_2, window_bounds = array<i64: 1, 64>}, {pipeline_mode = #tpu.pipeline_mode<synchronous>, transform_indices = @transform_3, window_bounds = array<i64: 1, 64>}, {pipeline_mode = #tpu.pipeline_mode<synchronous>, transform_indices = @transform_4, window_bounds = array<i64: 64, 32>}, {transform_indices = @transform_5, window_bounds = array<i64: 128, 32>}]} {
    %c0 = arith.constant 0 : index
    %c0_0 = arith.constant 0 : index
    %0 = vector.load %arg1[%c0, %c0_0] : memref<128x64xf32, #tpu.memory_space<vmem>>, vector<128x64xf32>
    %cst = arith.constant dense<0.000000e+00> : vector<128xf32>
    %1 = vector.multi_reduction <add>, %0, %cst [1] : vector<128x64xf32> to vector<128xf32>
    %2 = vector.shape_cast %1 : vector<128xf32> to vector<128x1xf32>
    %cst_1 = arith.constant 6.400000e+01 : f32
    %3 = vector.broadcast %cst_1 : f32 to vector<128x1xf32>
    %4 = arith.divf %2, %3 : vector<128x1xf32>
    %5 = vector.broadcast %4 : vector<128x1xf32> to vector<128x64xf32>
    %6 = arith.subf %0, %5 : vector<128x64xf32>
    %7 = arith.mulf %6, %6 : vector<128x64xf32>
    %cst_2 = arith.constant dense<0.000000e+00> : vector<128xf32>
    %8 = vector.multi_reduction <add>, %7, %cst_2 [1] : vector<128x64xf32> to vector<128xf32>
    %9 = vector.shape_cast %8 : vector<128xf32> to vector<128x1xf32>
    %cst_3 = arith.constant 6.400000e+01 : f32
    %10 = vector.broadcast %cst_3 : f32 to vector<128x1xf32>
    %11 = arith.divf %9, %10 : vector<128x1xf32>
    %cst_4 = arith.constant 9.99999974E-6 : f32
    %12 = vector.broadcast %cst_4 : f32 to vector<128x1xf32>
    %13 = arith.addf %11, %12 : vector<128x1xf32>
    %14 = math.rsqrt %13 : vector<128x1xf32>
    %15 = vector.broadcast %14 : vector<128x1xf32> to vector<128x64xf32>
    %16 = arith.mulf %6, %15 : vector<128x64xf32>
    %c0_5 = arith.constant 0 : index
    %c0_6 = arith.constant 0 : index
    %17 = vector.load %arg3[%c0_5, %c0_6] : memref<1x64xf32, #tpu.memory_space<vmem>>, vector<1x64xf32>
    %18 = vector.broadcast %17 : vector<1x64xf32> to vector<128x64xf32>
    %19 = arith.mulf %16, %18 : vector<128x64xf32>
    %c0_7 = arith.constant 0 : index
    %c0_8 = arith.constant 0 : index
    %20 = vector.load %arg4[%c0_7, %c0_8] : memref<1x64xf32, #tpu.memory_space<vmem>>, vector<1x64xf32>
    %21 = vector.broadcast %20 : vector<1x64xf32> to vector<128x64xf32>
    %22 = arith.addf %19, %21 : vector<128x64xf32>
    %c0_9 = arith.constant 0 : index
    %c0_10 = arith.constant 0 : index
    %23 = vector.load %arg2[%c0_9, %c0_10] : memref<128x64xf32, #tpu.memory_space<vmem>>, vector<128x64xf32>
    %cst_11 = arith.constant 0.000000e+00 : f32
    %24 = vector.broadcast %cst_11 : f32 to vector<128x64xf32>
    %25 = arith.subf %24, %23 : vector<128x64xf32>
    %26 = math.exp %25 : vector<128x64xf32>
    %cst_12 = arith.constant 1.000000e+00 : f32
    %27 = vector.broadcast %cst_12 : f32 to vector<128x64xf32>
    %28 = arith.addf %27, %26 : vector<128x64xf32>
    %cst_13 = arith.constant 1.000000e+00 : f32
    %29 = vector.broadcast %cst_13 : f32 to vector<128x64xf32>
    %30 = arith.divf %29, %28 : vector<128x64xf32>
    %31 = arith.mulf %23, %30 : vector<128x64xf32>
    %32 = arith.mulf %22, %31 : vector<128x64xf32>
    %33 = arith.truncf %32 : vector<128x64xf32> to vector<128x64xbf16>
    %c0_14 = arith.constant 0 : index
    %c0_15 = arith.constant 0 : index
    %34 = vector.load %arg5[%c0_14, %c0_15] : memref<64x32xbf16, #tpu.memory_space<vmem>>, vector<64x32xbf16>
    %cst_16 = arith.constant dense<0.000000e+00> : vector<128x32xf32>
    %35 = tpu.matmul %33, %34, %cst_16 {dimension_numbers = #tpu.dot_dimension_numbers<[1], [0], [0], [1], [0, 0, 1, 1], [], []>} : vector<128x64xbf16>, vector<64x32xbf16>, vector<128x32xf32> -> vector<128x32xf32>
    %c0_17 = arith.constant 0 : index
    %c0_18 = arith.constant 0 : index
    %36 = vector.load %arg6[%c0_17, %c0_18] : memref<128x32xf32, #tpu.memory_space<vmem>>, vector<128x32xf32>
    tpu.vector_store %arg6[%c0_17, %c0_18], %35 {strides = array<i32>} : memref<128x32xf32, #tpu.memory_space<vmem>>, vector<128x32xf32>,
    return
  }
  func.func @transform_0(%arg0: i32) -> (i32, i32) {
    %c0_i32 = arith.constant 0 : i32
    %c0_i32_0 = arith.constant 0 : i32
    return %arg0, %c0_i32 : i32, i32
  }
  func.func @transform_1(%arg0: i32) -> (i32, i32) {
    %c0_i32 = arith.constant 0 : i32
    %c0_i32_0 = arith.constant 0 : i32
    return %arg0, %c0_i32 : i32, i32
  }
  func.func @transform_2(%arg0: i32) -> (i32, i32) {
    %c0_i32 = arith.constant 0 : i32
    %c0_i32_0 = arith.constant 0 : i32
    %c0_i32_1 = arith.constant 0 : i32
    return %c0_i32, %c0_i32_0 : i32, i32
  }
  func.func @transform_3(%arg0: i32) -> (i32, i32) {
    %c0_i32 = arith.constant 0 : i32
    %c0_i32_0 = arith.constant 0 : i32
    %c0_i32_1 = arith.constant 0 : i32
    return %c0_i32, %c0_i32_0 : i32, i32
  }
  func.func @transform_4(%arg0: i32) -> (i32, i32) {
    %c0_i32 = arith.constant 0 : i32
    %c0_i32_0 = arith.constant 0 : i32
    %c0_i32_1 = arith.constant 0 : i32
    return %c0_i32, %c0_i32_0 : i32, i32
  }
  func.func @transform_5(%arg0: i32) -> (i32, i32) {
    %c0_i32 = arith.constant 0 : i32
    %c0_i32_0 = arith.constant 0 : i32
    return %arg0, %c0_i32 : i32, i32
  }
}

module attributes {stable_mosaic.version = 11 : i64} {
  func.func @_ln_kernel(%arg0: i32, %arg1: memref<128x32xf32, #tpu.memory_space<vmem>>, %arg2: memref<1x32xf32, #tpu.memory_space<vmem>>, %arg3: memref<1x32xf32, #tpu.memory_space<vmem>>, %arg4: memref<128x32xf32, #tpu.memory_space<vmem>>) attributes {dimension_semantics = [#tpu.dimension_semantics<parallel>], iteration_bounds = array<i64: 1>, scalar_prefetch = 0 : i64, scratch_operands = 0 : i64, tpu.core_type = #tpu.core_type<tc>, window_params = [{transform_indices = @transform_0, window_bounds = array<i64: 128, 32>}, {pipeline_mode = #tpu.pipeline_mode<synchronous>, transform_indices = @transform_1, window_bounds = array<i64: 1, 32>}, {pipeline_mode = #tpu.pipeline_mode<synchronous>, transform_indices = @transform_2, window_bounds = array<i64: 1, 32>}, {transform_indices = @transform_3, window_bounds = array<i64: 128, 32>}]} {
    %c0 = arith.constant 0 : index
    %c0_0 = arith.constant 0 : index
    %0 = vector.load %arg1[%c0, %c0_0] : memref<128x32xf32, #tpu.memory_space<vmem>>, vector<128x32xf32>
    %cst = arith.constant dense<0.000000e+00> : vector<128xf32>
    %1 = vector.multi_reduction <add>, %0, %cst [1] : vector<128x32xf32> to vector<128xf32>
    %2 = vector.shape_cast %1 : vector<128xf32> to vector<128x1xf32>
    %cst_1 = arith.constant 3.200000e+01 : f32
    %3 = vector.broadcast %cst_1 : f32 to vector<128x1xf32>
    %4 = arith.divf %2, %3 : vector<128x1xf32>
    %5 = vector.broadcast %4 : vector<128x1xf32> to vector<128x32xf32>
    %6 = arith.subf %0, %5 : vector<128x32xf32>
    %7 = arith.mulf %6, %6 : vector<128x32xf32>
    %cst_2 = arith.constant dense<0.000000e+00> : vector<128xf32>
    %8 = vector.multi_reduction <add>, %7, %cst_2 [1] : vector<128x32xf32> to vector<128xf32>
    %9 = vector.shape_cast %8 : vector<128xf32> to vector<128x1xf32>
    %cst_3 = arith.constant 3.200000e+01 : f32
    %10 = vector.broadcast %cst_3 : f32 to vector<128x1xf32>
    %11 = arith.divf %9, %10 : vector<128x1xf32>
    %cst_4 = arith.constant 9.99999974E-6 : f32
    %12 = vector.broadcast %cst_4 : f32 to vector<128x1xf32>
    %13 = arith.addf %11, %12 : vector<128x1xf32>
    %14 = math.rsqrt %13 : vector<128x1xf32>
    %15 = vector.broadcast %14 : vector<128x1xf32> to vector<128x32xf32>
    %16 = arith.mulf %6, %15 : vector<128x32xf32>
    %c0_5 = arith.constant 0 : index
    %c0_6 = arith.constant 0 : index
    %17 = vector.load %arg2[%c0_5, %c0_6] : memref<1x32xf32, #tpu.memory_space<vmem>>, vector<1x32xf32>
    %18 = vector.broadcast %17 : vector<1x32xf32> to vector<128x32xf32>
    %19 = arith.mulf %16, %18 : vector<128x32xf32>
    %c0_7 = arith.constant 0 : index
    %c0_8 = arith.constant 0 : index
    %20 = vector.load %arg3[%c0_7, %c0_8] : memref<1x32xf32, #tpu.memory_space<vmem>>, vector<1x32xf32>
    %21 = vector.broadcast %20 : vector<1x32xf32> to vector<128x32xf32>
    %22 = arith.addf %19, %21 : vector<128x32xf32>
    %c0_9 = arith.constant 0 : index
    %c0_10 = arith.constant 0 : index
    %23 = vector.load %arg4[%c0_9, %c0_10] : memref<128x32xf32, #tpu.memory_space<vmem>>, vector<128x32xf32>
    tpu.vector_store %arg4[%c0_9, %c0_10], %22 {strides = array<i32>} : memref<128x32xf32, #tpu.memory_space<vmem>>, vector<128x32xf32>,
    return
  }
  func.func @transform_0(%arg0: i32) -> (i32, i32) {
    %c0_i32 = arith.constant 0 : i32
    %c0_i32_0 = arith.constant 0 : i32
    return %arg0, %c0_i32 : i32, i32
  }
  func.func @transform_1(%arg0: i32) -> (i32, i32) {
    %c0_i32 = arith.constant 0 : i32
    %c0_i32_0 = arith.constant 0 : i32
    %c0_i32_1 = arith.constant 0 : i32
    return %c0_i32, %c0_i32_0 : i32, i32
  }
  func.func @transform_2(%arg0: i32) -> (i32, i32) {
    %c0_i32 = arith.constant 0 : i32
    %c0_i32_0 = arith.constant 0 : i32
    %c0_i32_1 = arith.constant 0 : i32
    return %c0_i32, %c0_i32_0 : i32, i32
  }
  func.func @transform_3(%arg0: i32) -> (i32, i32) {
    %c0_i32 = arith.constant 0 : i32
    %c0_i32_0 = arith.constant 0 : i32
    return %arg0, %c0_i32 : i32, i32
  }
}

module attributes {stable_mosaic.version = 11 : i64} {
  func.func @_conv3x3_kernel(%arg0: i32, %arg1: memref<1x10x10x32xf32, #tpu.memory_space<vmem>>, %arg2: memref<288x10xbf16, #tpu.memory_space<vmem>>, %arg3: memref<1x10xf32, #tpu.memory_space<vmem>>, %arg4: memref<1x64x10xf32, #tpu.memory_space<vmem>>) attributes {dimension_semantics = [#tpu.dimension_semantics<parallel>], iteration_bounds = array<i64: 2>, scalar_prefetch = 0 : i64, scratch_operands = 0 : i64, tpu.core_type = #tpu.core_type<tc>, window_params = [{transform_indices = @transform_0, window_bounds = array<i64: 1, 10, 10, 32>}, {pipeline_mode = #tpu.pipeline_mode<synchronous>, transform_indices = @transform_1, window_bounds = array<i64: 288, 10>}, {pipeline_mode = #tpu.pipeline_mode<synchronous>, transform_indices = @transform_2, window_bounds = array<i64: 1, 10>}, {transform_indices = @transform_3, window_bounds = array<i64: 1, 64, 10>}]} {
    %cst = arith.constant 0.000000e+00 : f32
    %0 = vector.broadcast %cst : f32 to vector<64x10xf32>
    %c0 = arith.constant 0 : index
    %c0_0 = arith.constant 0 : index
    %c0_1 = arith.constant 0 : index
    %c0_2 = arith.constant 0 : index
    %1 = vector.load %arg1[%c0, %c0_0, %c0_1, %c0_2] : memref<1x10x10x32xf32, #tpu.memory_space<vmem>>, vector<1x8x8x32xf32>
    %2 = vector.shape_cast %1 : vector<1x8x8x32xf32> to vector<8x8x32xf32>
    %3 = vector.shape_cast %2 : vector<8x8x32xf32> to vector<64x32xf32>
    %c0_3 = arith.constant 0 : index
    %c0_4 = arith.constant 0 : index
    %4 = vector.load %arg2[%c0_3, %c0_4] : memref<288x10xbf16, #tpu.memory_space<vmem>>, vector<32x10xbf16>
    %5 = arith.truncf %3 : vector<64x32xf32> to vector<64x32xbf16>
    %cst_5 = arith.constant dense<0.000000e+00> : vector<64x10xf32>
    %6 = tpu.matmul %5, %4, %cst_5 {dimension_numbers = #tpu.dot_dimension_numbers<[1], [0], [0], [1], [0, 0, 1, 1], [], []>} : vector<64x32xbf16>, vector<32x10xbf16>, vector<64x10xf32> -> vector<64x10xf32>
    %7 = arith.addf %0, %6 : vector<64x10xf32>
    %c0_6 = arith.constant 0 : index
    %c0_7 = arith.constant 0 : index
    %c1 = arith.constant 1 : index
    %c0_8 = arith.constant 0 : index
    %8 = vector.load %arg1[%c0_6, %c0_7, %c1, %c0_8] : memref<1x10x10x32xf32, #tpu.memory_space<vmem>>, vector<1x8x8x32xf32>
    %9 = vector.shape_cast %8 : vector<1x8x8x32xf32> to vector<8x8x32xf32>
    %10 = vector.shape_cast %9 : vector<8x8x32xf32> to vector<64x32xf32>
    %c32 = arith.constant 32 : index
    %c0_9 = arith.constant 0 : index
    %11 = vector.load %arg2[%c32, %c0_9] : memref<288x10xbf16, #tpu.memory_space<vmem>>, vector<32x10xbf16>
    %12 = arith.truncf %10 : vector<64x32xf32> to vector<64x32xbf16>
    %cst_10 = arith.constant dense<0.000000e+00> : vector<64x10xf32>
    %13 = tpu.matmul %12, %11, %cst_10 {dimension_numbers = #tpu.dot_dimension_numbers<[1], [0], [0], [1], [0, 0, 1, 1], [], []>} : vector<64x32xbf16>, vector<32x10xbf16>, vector<64x10xf32> -> vector<64x10xf32>
    %14 = arith.addf %7, %13 : vector<64x10xf32>
    %c0_11 = arith.constant 0 : index
    %c0_12 = arith.constant 0 : index
    %c2 = arith.constant 2 : index
    %c0_13 = arith.constant 0 : index
    %15 = vector.load %arg1[%c0_11, %c0_12, %c2, %c0_13] : memref<1x10x10x32xf32, #tpu.memory_space<vmem>>, vector<1x8x8x32xf32>
    %16 = vector.shape_cast %15 : vector<1x8x8x32xf32> to vector<8x8x32xf32>
    %17 = vector.shape_cast %16 : vector<8x8x32xf32> to vector<64x32xf32>
    %c64 = arith.constant 64 : index
    %c0_14 = arith.constant 0 : index
    %18 = vector.load %arg2[%c64, %c0_14] : memref<288x10xbf16, #tpu.memory_space<vmem>>, vector<32x10xbf16>
    %19 = arith.truncf %17 : vector<64x32xf32> to vector<64x32xbf16>
    %cst_15 = arith.constant dense<0.000000e+00> : vector<64x10xf32>
    %20 = tpu.matmul %19, %18, %cst_15 {dimension_numbers = #tpu.dot_dimension_numbers<[1], [0], [0], [1], [0, 0, 1, 1], [], []>} : vector<64x32xbf16>, vector<32x10xbf16>, vector<64x10xf32> -> vector<64x10xf32>
    %21 = arith.addf %14, %20 : vector<64x10xf32>
    %c0_16 = arith.constant 0 : index
    %c1_17 = arith.constant 1 : index
    %c0_18 = arith.constant 0 : index
    %c0_19 = arith.constant 0 : index
    %22 = vector.load %arg1[%c0_16, %c1_17, %c0_18, %c0_19] : memref<1x10x10x32xf32, #tpu.memory_space<vmem>>, vector<1x8x8x32xf32>
    %23 = vector.shape_cast %22 : vector<1x8x8x32xf32> to vector<8x8x32xf32>
    %24 = vector.shape_cast %23 : vector<8x8x32xf32> to vector<64x32xf32>
    %c96 = arith.constant 96 : index
    %c0_20 = arith.constant 0 : index
    %25 = vector.load %arg2[%c96, %c0_20] : memref<288x10xbf16, #tpu.memory_space<vmem>>, vector<32x10xbf16>
    %26 = arith.truncf %24 : vector<64x32xf32> to vector<64x32xbf16>
    %cst_21 = arith.constant dense<0.000000e+00> : vector<64x10xf32>
    %27 = tpu.matmul %26, %25, %cst_21 {dimension_numbers = #tpu.dot_dimension_numbers<[1], [0], [0], [1], [0, 0, 1, 1], [], []>} : vector<64x32xbf16>, vector<32x10xbf16>, vector<64x10xf32> -> vector<64x10xf32>
    %28 = arith.addf %21, %27 : vector<64x10xf32>
    %c0_22 = arith.constant 0 : index
    %c1_23 = arith.constant 1 : index
    %c1_24 = arith.constant 1 : index
    %c0_25 = arith.constant 0 : index
    %29 = vector.load %arg1[%c0_22, %c1_23, %c1_24, %c0_25] : memref<1x10x10x32xf32, #tpu.memory_space<vmem>>, vector<1x8x8x32xf32>
    %30 = vector.shape_cast %29 : vector<1x8x8x32xf32> to vector<8x8x32xf32>
    %31 = vector.shape_cast %30 : vector<8x8x32xf32> to vector<64x32xf32>
    %c128 = arith.constant 128 : index
    %c0_26 = arith.constant 0 : index
    %32 = vector.load %arg2[%c128, %c0_26] : memref<288x10xbf16, #tpu.memory_space<vmem>>, vector<32x10xbf16>
    %33 = arith.truncf %31 : vector<64x32xf32> to vector<64x32xbf16>
    %cst_27 = arith.constant dense<0.000000e+00> : vector<64x10xf32>
    %34 = tpu.matmul %33, %32, %cst_27 {dimension_numbers = #tpu.dot_dimension_numbers<[1], [0], [0], [1], [0, 0, 1, 1], [], []>} : vector<64x32xbf16>, vector<32x10xbf16>, vector<64x10xf32> -> vector<64x10xf32>
    %35 = arith.addf %28, %34 : vector<64x10xf32>
    %c0_28 = arith.constant 0 : index
    %c1_29 = arith.constant 1 : index
    %c2_30 = arith.constant 2 : index
    %c0_31 = arith.constant 0 : index
    %36 = vector.load %arg1[%c0_28, %c1_29, %c2_30, %c0_31] : memref<1x10x10x32xf32, #tpu.memory_space<vmem>>, vector<1x8x8x32xf32>
    %37 = vector.shape_cast %36 : vector<1x8x8x32xf32> to vector<8x8x32xf32>
    %38 = vector.shape_cast %37 : vector<8x8x32xf32> to vector<64x32xf32>
    %c160 = arith.constant 160 : index
    %c0_32 = arith.constant 0 : index
    %39 = vector.load %arg2[%c160, %c0_32] : memref<288x10xbf16, #tpu.memory_space<vmem>>, vector<32x10xbf16>
    %40 = arith.truncf %38 : vector<64x32xf32> to vector<64x32xbf16>
    %cst_33 = arith.constant dense<0.000000e+00> : vector<64x10xf32>
    %41 = tpu.matmul %40, %39, %cst_33 {dimension_numbers = #tpu.dot_dimension_numbers<[1], [0], [0], [1], [0, 0, 1, 1], [], []>} : vector<64x32xbf16>, vector<32x10xbf16>, vector<64x10xf32> -> vector<64x10xf32>
    %42 = arith.addf %35, %41 : vector<64x10xf32>
    %c0_34 = arith.constant 0 : index
    %c2_35 = arith.constant 2 : index
    %c0_36 = arith.constant 0 : index
    %c0_37 = arith.constant 0 : index
    %43 = vector.load %arg1[%c0_34, %c2_35, %c0_36, %c0_37] : memref<1x10x10x32xf32, #tpu.memory_space<vmem>>, vector<1x8x8x32xf32>
    %44 = vector.shape_cast %43 : vector<1x8x8x32xf32> to vector<8x8x32xf32>
    %45 = vector.shape_cast %44 : vector<8x8x32xf32> to vector<64x32xf32>
    %c192 = arith.constant 192 : index
    %c0_38 = arith.constant 0 : index
    %46 = vector.load %arg2[%c192, %c0_38] : memref<288x10xbf16, #tpu.memory_space<vmem>>, vector<32x10xbf16>
    %47 = arith.truncf %45 : vector<64x32xf32> to vector<64x32xbf16>
    %cst_39 = arith.constant dense<0.000000e+00> : vector<64x10xf32>
    %48 = tpu.matmul %47, %46, %cst_39 {dimension_numbers = #tpu.dot_dimension_numbers<[1], [0], [0], [1], [0, 0, 1, 1], [], []>} : vector<64x32xbf16>, vector<32x10xbf16>, vector<64x10xf32> -> vector<64x10xf32>
    %49 = arith.addf %42, %48 : vector<64x10xf32>
    %c0_40 = arith.constant 0 : index
    %c2_41 = arith.constant 2 : index
    %c1_42 = arith.constant 1 : index
    %c0_43 = arith.constant 0 : index
    %50 = vector.load %arg1[%c0_40, %c2_41, %c1_42, %c0_43] : memref<1x10x10x32xf32, #tpu.memory_space<vmem>>, vector<1x8x8x32xf32>
    %51 = vector.shape_cast %50 : vector<1x8x8x32xf32> to vector<8x8x32xf32>
    %52 = vector.shape_cast %51 : vector<8x8x32xf32> to vector<64x32xf32>
    %c224 = arith.constant 224 : index
    %c0_44 = arith.constant 0 : index
    %53 = vector.load %arg2[%c224, %c0_44] : memref<288x10xbf16, #tpu.memory_space<vmem>>, vector<32x10xbf16>
    %54 = arith.truncf %52 : vector<64x32xf32> to vector<64x32xbf16>
    %cst_45 = arith.constant dense<0.000000e+00> : vector<64x10xf32>
    %55 = tpu.matmul %54, %53, %cst_45 {dimension_numbers = #tpu.dot_dimension_numbers<[1], [0], [0], [1], [0, 0, 1, 1], [], []>} : vector<64x32xbf16>, vector<32x10xbf16>, vector<64x10xf32> -> vector<64x10xf32>
    %56 = arith.addf %49, %55 : vector<64x10xf32>
    %c0_46 = arith.constant 0 : index
    %c2_47 = arith.constant 2 : index
    %c2_48 = arith.constant 2 : index
    %c0_49 = arith.constant 0 : index
    %57 = vector.load %arg1[%c0_46, %c2_47, %c2_48, %c0_49] : memref<1x10x10x32xf32, #tpu.memory_space<vmem>>, vector<1x8x8x32xf32>
    %58 = vector.shape_cast %57 : vector<1x8x8x32xf32> to vector<8x8x32xf32>
    %59 = vector.shape_cast %58 : vector<8x8x32xf32> to vector<64x32xf32>
    %c256 = arith.constant 256 : index
    %c0_50 = arith.constant 0 : index
    %60 = vector.load %arg2[%c256, %c0_50] : memref<288x10xbf16, #tpu.memory_space<vmem>>, vector<32x10xbf16>
    %61 = arith.truncf %59 : vector<64x32xf32> to vector<64x32xbf16>
    %cst_51 = arith.constant dense<0.000000e+00> : vector<64x10xf32>
    %62 = tpu.matmul %61, %60, %cst_51 {dimension_numbers = #tpu.dot_dimension_numbers<[1], [0], [0], [1], [0, 0, 1, 1], [], []>} : vector<64x32xbf16>, vector<32x10xbf16>, vector<64x10xf32> -> vector<64x10xf32>
    %63 = arith.addf %56, %62 : vector<64x10xf32>
    %c0_52 = arith.constant 0 : index
    %c0_53 = arith.constant 0 : index
    %64 = vector.load %arg3[%c0_52, %c0_53] : memref<1x10xf32, #tpu.memory_space<vmem>>, vector<1x10xf32>
    %65 = vector.broadcast %64 : vector<1x10xf32> to vector<64x10xf32>
    %66 = arith.addf %63, %65 : vector<64x10xf32>
    %c0_54 = arith.constant 0 : index
    %c0_55 = arith.constant 0 : index
    %c0_56 = arith.constant 0 : index
    %67 = vector.load %arg4[%c0_54, %c0_55, %c0_56] : memref<1x64x10xf32, #tpu.memory_space<vmem>>, vector<1x64x10xf32>
    %68 = vector.shape_cast %67 : vector<1x64x10xf32> to vector<64x10xf32>
    %69 = vector.shape_cast %66 : vector<64x10xf32> to vector<1x64x10xf32>
    tpu.vector_store %arg4[%c0_54, %c0_55, %c0_56], %69 {strides = array<i32>} : memref<1x64x10xf32, #tpu.memory_space<vmem>>, vector<1x64x10xf32>,
    return
  }
  func.func @transform_0(%arg0: i32) -> (i32, i32, i32, i32) {
    %c0_i32 = arith.constant 0 : i32
    %c0_i32_0 = arith.constant 0 : i32
    %c0_i32_1 = arith.constant 0 : i32
    %c0_i32_2 = arith.constant 0 : i32
    return %arg0, %c0_i32, %c0_i32_0, %c0_i32_1 : i32, i32, i32, i32
  }
  func.func @transform_1(%arg0: i32) -> (i32, i32) {
    %c0_i32 = arith.constant 0 : i32
    %c0_i32_0 = arith.constant 0 : i32
    %c0_i32_1 = arith.constant 0 : i32
    return %c0_i32, %c0_i32_0 : i32, i32
  }
  func.func @transform_2(%arg0: i32) -> (i32, i32) {
    %c0_i32 = arith.constant 0 : i32
    %c0_i32_0 = arith.constant 0 : i32
    %c0_i32_1 = arith.constant 0 : i32
    return %c0_i32, %c0_i32_0 : i32, i32
  }
  func.func @transform_3(%arg0: i32) -> (i32, i32, i32) {
    %c0_i32 = arith.constant 0 : i32
    %c0_i32_0 = arith.constant 0 : i32
    %c0_i32_1 = arith.constant 0 : i32
    return %arg0, %c0_i32, %c0_i32_0 : i32, i32, i32
  }
}

module attributes {stable_mosaic.version = 11 : i64} {
  func.func @_conv3x3_kernel(%arg0: i32, %arg1: memref<1x10x10x10xf32, #tpu.memory_space<vmem>>, %arg2: memref<90x32xbf16, #tpu.memory_space<vmem>>, %arg3: memref<1x32xf32, #tpu.memory_space<vmem>>, %arg4: memref<1x64x32xf32, #tpu.memory_space<vmem>>) attributes {dimension_semantics = [#tpu.dimension_semantics<parallel>], iteration_bounds = array<i64: 2>, scalar_prefetch = 0 : i64, scratch_operands = 0 : i64, tpu.core_type = #tpu.core_type<tc>, window_params = [{transform_indices = @transform_0, window_bounds = array<i64: 1, 10, 10, 10>}, {pipeline_mode = #tpu.pipeline_mode<synchronous>, transform_indices = @transform_1, window_bounds = array<i64: 90, 32>}, {pipeline_mode = #tpu.pipeline_mode<synchronous>, transform_indices = @transform_2, window_bounds = array<i64: 1, 32>}, {transform_indices = @transform_3, window_bounds = array<i64: 1, 64, 32>}]} {
    %cst = arith.constant 0.000000e+00 : f32
    %0 = vector.broadcast %cst : f32 to vector<64x32xf32>
    %c0 = arith.constant 0 : index
    %c0_0 = arith.constant 0 : index
    %c0_1 = arith.constant 0 : index
    %c0_2 = arith.constant 0 : index
    %1 = vector.load %arg1[%c0, %c0_0, %c0_1, %c0_2] : memref<1x10x10x10xf32, #tpu.memory_space<vmem>>, vector<1x8x8x10xf32>
    %2 = vector.shape_cast %1 : vector<1x8x8x10xf32> to vector<8x8x10xf32>
    %3 = vector.shape_cast %2 : vector<8x8x10xf32> to vector<64x10xf32>
    %c0_3 = arith.constant 0 : index
    %c0_4 = arith.constant 0 : index
    %4 = vector.load %arg2[%c0_3, %c0_4] : memref<90x32xbf16, #tpu.memory_space<vmem>>, vector<10x32xbf16>
    %5 = arith.truncf %3 : vector<64x10xf32> to vector<64x10xbf16>
    %cst_5 = arith.constant dense<0.000000e+00> : vector<64x32xf32>
    %6 = tpu.matmul %5, %4, %cst_5 {dimension_numbers = #tpu.dot_dimension_numbers<[1], [0], [0], [1], [0, 0, 1, 1], [], []>} : vector<64x10xbf16>, vector<10x32xbf16>, vector<64x32xf32> -> vector<64x32xf32>
    %7 = arith.addf %0, %6 : vector<64x32xf32>
    %c0_6 = arith.constant 0 : index
    %c0_7 = arith.constant 0 : index
    %c1 = arith.constant 1 : index
    %c0_8 = arith.constant 0 : index
    %8 = vector.load %arg1[%c0_6, %c0_7, %c1, %c0_8] : memref<1x10x10x10xf32, #tpu.memory_space<vmem>>, vector<1x8x8x10xf32>
    %9 = vector.shape_cast %8 : vector<1x8x8x10xf32> to vector<8x8x10xf32>
    %10 = vector.shape_cast %9 : vector<8x8x10xf32> to vector<64x10xf32>
    %c10 = arith.constant 10 : index
    %c0_9 = arith.constant 0 : index
    %11 = vector.load %arg2[%c10, %c0_9] : memref<90x32xbf16, #tpu.memory_space<vmem>>, vector<10x32xbf16>
    %12 = arith.truncf %10 : vector<64x10xf32> to vector<64x10xbf16>
    %cst_10 = arith.constant dense<0.000000e+00> : vector<64x32xf32>
    %13 = tpu.matmul %12, %11, %cst_10 {dimension_numbers = #tpu.dot_dimension_numbers<[1], [0], [0], [1], [0, 0, 1, 1], [], []>} : vector<64x10xbf16>, vector<10x32xbf16>, vector<64x32xf32> -> vector<64x32xf32>
    %14 = arith.addf %7, %13 : vector<64x32xf32>
    %c0_11 = arith.constant 0 : index
    %c0_12 = arith.constant 0 : index
    %c2 = arith.constant 2 : index
    %c0_13 = arith.constant 0 : index
    %15 = vector.load %arg1[%c0_11, %c0_12, %c2, %c0_13] : memref<1x10x10x10xf32, #tpu.memory_space<vmem>>, vector<1x8x8x10xf32>
    %16 = vector.shape_cast %15 : vector<1x8x8x10xf32> to vector<8x8x10xf32>
    %17 = vector.shape_cast %16 : vector<8x8x10xf32> to vector<64x10xf32>
    %c20 = arith.constant 20 : index
    %c0_14 = arith.constant 0 : index
    %18 = vector.load %arg2[%c20, %c0_14] : memref<90x32xbf16, #tpu.memory_space<vmem>>, vector<10x32xbf16>
    %19 = arith.truncf %17 : vector<64x10xf32> to vector<64x10xbf16>
    %cst_15 = arith.constant dense<0.000000e+00> : vector<64x32xf32>
    %20 = tpu.matmul %19, %18, %cst_15 {dimension_numbers = #tpu.dot_dimension_numbers<[1], [0], [0], [1], [0, 0, 1, 1], [], []>} : vector<64x10xbf16>, vector<10x32xbf16>, vector<64x32xf32> -> vector<64x32xf32>
    %21 = arith.addf %14, %20 : vector<64x32xf32>
    %c0_16 = arith.constant 0 : index
    %c1_17 = arith.constant 1 : index
    %c0_18 = arith.constant 0 : index
    %c0_19 = arith.constant 0 : index
    %22 = vector.load %arg1[%c0_16, %c1_17, %c0_18, %c0_19] : memref<1x10x10x10xf32, #tpu.memory_space<vmem>>, vector<1x8x8x10xf32>
    %23 = vector.shape_cast %22 : vector<1x8x8x10xf32> to vector<8x8x10xf32>
    %24 = vector.shape_cast %23 : vector<8x8x10xf32> to vector<64x10xf32>
    %c30 = arith.constant 30 : index
    %c0_20 = arith.constant 0 : index
    %25 = vector.load %arg2[%c30, %c0_20] : memref<90x32xbf16, #tpu.memory_space<vmem>>, vector<10x32xbf16>
    %26 = arith.truncf %24 : vector<64x10xf32> to vector<64x10xbf16>
    %cst_21 = arith.constant dense<0.000000e+00> : vector<64x32xf32>
    %27 = tpu.matmul %26, %25, %cst_21 {dimension_numbers = #tpu.dot_dimension_numbers<[1], [0], [0], [1], [0, 0, 1, 1], [], []>} : vector<64x10xbf16>, vector<10x32xbf16>, vector<64x32xf32> -> vector<64x32xf32>
    %28 = arith.addf %21, %27 : vector<64x32xf32>
    %c0_22 = arith.constant 0 : index
    %c1_23 = arith.constant 1 : index
    %c1_24 = arith.constant 1 : index
    %c0_25 = arith.constant 0 : index
    %29 = vector.load %arg1[%c0_22, %c1_23, %c1_24, %c0_25] : memref<1x10x10x10xf32, #tpu.memory_space<vmem>>, vector<1x8x8x10xf32>
    %30 = vector.shape_cast %29 : vector<1x8x8x10xf32> to vector<8x8x10xf32>
    %31 = vector.shape_cast %30 : vector<8x8x10xf32> to vector<64x10xf32>
    %c40 = arith.constant 40 : index
    %c0_26 = arith.constant 0 : index
    %32 = vector.load %arg2[%c40, %c0_26] : memref<90x32xbf16, #tpu.memory_space<vmem>>, vector<10x32xbf16>
    %33 = arith.truncf %31 : vector<64x10xf32> to vector<64x10xbf16>
    %cst_27 = arith.constant dense<0.000000e+00> : vector<64x32xf32>
    %34 = tpu.matmul %33, %32, %cst_27 {dimension_numbers = #tpu.dot_dimension_numbers<[1], [0], [0], [1], [0, 0, 1, 1], [], []>} : vector<64x10xbf16>, vector<10x32xbf16>, vector<64x32xf32> -> vector<64x32xf32>
    %35 = arith.addf %28, %34 : vector<64x32xf32>
    %c0_28 = arith.constant 0 : index
    %c1_29 = arith.constant 1 : index
    %c2_30 = arith.constant 2 : index
    %c0_31 = arith.constant 0 : index
    %36 = vector.load %arg1[%c0_28, %c1_29, %c2_30, %c0_31] : memref<1x10x10x10xf32, #tpu.memory_space<vmem>>, vector<1x8x8x10xf32>
    %37 = vector.shape_cast %36 : vector<1x8x8x10xf32> to vector<8x8x10xf32>
    %38 = vector.shape_cast %37 : vector<8x8x10xf32> to vector<64x10xf32>
    %c50 = arith.constant 50 : index
    %c0_32 = arith.constant 0 : index
    %39 = vector.load %arg2[%c50, %c0_32] : memref<90x32xbf16, #tpu.memory_space<vmem>>, vector<10x32xbf16>
    %40 = arith.truncf %38 : vector<64x10xf32> to vector<64x10xbf16>
    %cst_33 = arith.constant dense<0.000000e+00> : vector<64x32xf32>
    %41 = tpu.matmul %40, %39, %cst_33 {dimension_numbers = #tpu.dot_dimension_numbers<[1], [0], [0], [1], [0, 0, 1, 1], [], []>} : vector<64x10xbf16>, vector<10x32xbf16>, vector<64x32xf32> -> vector<64x32xf32>
    %42 = arith.addf %35, %41 : vector<64x32xf32>
    %c0_34 = arith.constant 0 : index
    %c2_35 = arith.constant 2 : index
    %c0_36 = arith.constant 0 : index
    %c0_37 = arith.constant 0 : index
    %43 = vector.load %arg1[%c0_34, %c2_35, %c0_36, %c0_37] : memref<1x10x10x10xf32, #tpu.memory_space<vmem>>, vector<1x8x8x10xf32>
    %44 = vector.shape_cast %43 : vector<1x8x8x10xf32> to vector<8x8x10xf32>
    %45 = vector.shape_cast %44 : vector<8x8x10xf32> to vector<64x10xf32>
    %c60 = arith.constant 60 : index
    %c0_38 = arith.constant 0 : index
    %46 = vector.load %arg2[%c60, %c0_38] : memref<90x32xbf16, #tpu.memory_space<vmem>>, vector<10x32xbf16>
    %47 = arith.truncf %45 : vector<64x10xf32> to vector<64x10xbf16>
    %cst_39 = arith.constant dense<0.000000e+00> : vector<64x32xf32>
    %48 = tpu.matmul %47, %46, %cst_39 {dimension_numbers = #tpu.dot_dimension_numbers<[1], [0], [0], [1], [0, 0, 1, 1], [], []>} : vector<64x10xbf16>, vector<10x32xbf16>, vector<64x32xf32> -> vector<64x32xf32>
    %49 = arith.addf %42, %48 : vector<64x32xf32>
    %c0_40 = arith.constant 0 : index
    %c2_41 = arith.constant 2 : index
    %c1_42 = arith.constant 1 : index
    %c0_43 = arith.constant 0 : index
    %50 = vector.load %arg1[%c0_40, %c2_41, %c1_42, %c0_43] : memref<1x10x10x10xf32, #tpu.memory_space<vmem>>, vector<1x8x8x10xf32>
    %51 = vector.shape_cast %50 : vector<1x8x8x10xf32> to vector<8x8x10xf32>
    %52 = vector.shape_cast %51 : vector<8x8x10xf32> to vector<64x10xf32>
    %c70 = arith.constant 70 : index
    %c0_44 = arith.constant 0 : index
    %53 = vector.load %arg2[%c70, %c0_44] : memref<90x32xbf16, #tpu.memory_space<vmem>>, vector<10x32xbf16>
    %54 = arith.truncf %52 : vector<64x10xf32> to vector<64x10xbf16>
    %cst_45 = arith.constant dense<0.000000e+00> : vector<64x32xf32>
    %55 = tpu.matmul %54, %53, %cst_45 {dimension_numbers = #tpu.dot_dimension_numbers<[1], [0], [0], [1], [0, 0, 1, 1], [], []>} : vector<64x10xbf16>, vector<10x32xbf16>, vector<64x32xf32> -> vector<64x32xf32>
    %56 = arith.addf %49, %55 : vector<64x32xf32>
    %c0_46 = arith.constant 0 : index
    %c2_47 = arith.constant 2 : index
    %c2_48 = arith.constant 2 : index
    %c0_49 = arith.constant 0 : index
    %57 = vector.load %arg1[%c0_46, %c2_47, %c2_48, %c0_49] : memref<1x10x10x10xf32, #tpu.memory_space<vmem>>, vector<1x8x8x10xf32>
    %58 = vector.shape_cast %57 : vector<1x8x8x10xf32> to vector<8x8x10xf32>
    %59 = vector.shape_cast %58 : vector<8x8x10xf32> to vector<64x10xf32>
    %c80 = arith.constant 80 : index
    %c0_50 = arith.constant 0 : index
    %60 = vector.load %arg2[%c80, %c0_50] : memref<90x32xbf16, #tpu.memory_space<vmem>>, vector<10x32xbf16>
    %61 = arith.truncf %59 : vector<64x10xf32> to vector<64x10xbf16>
    %cst_51 = arith.constant dense<0.000000e+00> : vector<64x32xf32>
    %62 = tpu.matmul %61, %60, %cst_51 {dimension_numbers = #tpu.dot_dimension_numbers<[1], [0], [0], [1], [0, 0, 1, 1], [], []>} : vector<64x10xbf16>, vector<10x32xbf16>, vector<64x32xf32> -> vector<64x32xf32>
    %63 = arith.addf %56, %62 : vector<64x32xf32>
    %c0_52 = arith.constant 0 : index
    %c0_53 = arith.constant 0 : index
    %64 = vector.load %arg3[%c0_52, %c0_53] : memref<1x32xf32, #tpu.memory_space<vmem>>, vector<1x32xf32>
    %65 = vector.broadcast %64 : vector<1x32xf32> to vector<64x32xf32>
    %66 = arith.addf %63, %65 : vector<64x32xf32>
    %c0_54 = arith.constant 0 : index
    %c0_55 = arith.constant 0 : index
    %c0_56 = arith.constant 0 : index
    %67 = vector.load %arg4[%c0_54, %c0_55, %c0_56] : memref<1x64x32xf32, #tpu.memory_space<vmem>>, vector<1x64x32xf32>
    %68 = vector.shape_cast %67 : vector<1x64x32xf32> to vector<64x32xf32>
    %69 = vector.shape_cast %66 : vector<64x32xf32> to vector<1x64x32xf32>
    tpu.vector_store %arg4[%c0_54, %c0_55, %c0_56], %69 {strides = array<i32>} : memref<1x64x32xf32, #tpu.memory_space<vmem>>, vector<1x64x32xf32>,
    return
  }
  func.func @transform_0(%arg0: i32) -> (i32, i32, i32, i32) {
    %c0_i32 = arith.constant 0 : i32
    %c0_i32_0 = arith.constant 0 : i32
    %c0_i32_1 = arith.constant 0 : i32
    %c0_i32_2 = arith.constant 0 : i32
    return %arg0, %c0_i32, %c0_i32_0, %c0_i32_1 : i32, i32, i32, i32
  }
  func.func @transform_1(%arg0: i32) -> (i32, i32) {
    %c0_i32 = arith.constant 0 : i32
    %c0_i32_0 = arith.constant 0 : i32
    %c0_i32_1 = arith.constant 0 : i32
    return %c0_i32, %c0_i32_0 : i32, i32
  }
  func.func @transform_2(%arg0: i32) -> (i32, i32) {
    %c0_i32 = arith.constant 0 : i32
    %c0_i32_0 = arith.constant 0 : i32
    %c0_i32_1 = arith.constant 0 : i32
    return %c0_i32, %c0_i32_0 : i32, i32
  }
  func.func @transform_3(%arg0: i32) -> (i32, i32, i32) {
    %c0_i32 = arith.constant 0 : i32
    %c0_i32_0 = arith.constant 0 : i32
    %c0_i32_1 = arith.constant 0 : i32
    return %arg0, %c0_i32, %c0_i32_0 : i32, i32, i32
  }
}

</mosaic_0001>

<bundles_post_ra>
// kernel: vss_block_forward.9
= control target key start
LH: loop header
LB: loop body
LE: loop exit
PB: predicated region body
PF: predicated region fallthrough
CT: control target
= control target key end

     0   :  { %vm34_vm0 = vcmask 261120   ;;  %s864_s0 = inlined_call_operand.vmem [shape: f32[128,32], index: 0, kind: input, shape index: {}]   ;;  %s865_s3 = inlined_call_operand.vmem [shape: bf16[32,128], index: 3, kind: input, shape index: {}]   ;;  %s866_s1 = inlined_call_operand.vmem [shape: f32[1,32], index: 1, kind: input, shape index: {}]   ;;  %s867_s2 = inlined_call_operand.vmem [shape: f32[1,32], index: 2, kind: input, shape index: {}]   ;;  %s868_s4 = inlined_call_operand.vmem [shape: f32[128,128], index: 4, kind: output, shape index: {}]  }
   0x1   :  { %v18_v0 = vld [vmem:[%s864_s0] sm:$0xff]  ;;  %v19_v2 = vld [vmem:[%s864_s0 + $0x8] sm:$0xff]  ;;  %v20_v8 = vld [vmem:[%s864_s0 + $0x10] sm:$0xff] }
   0x2   :  { %v26_v1 = vld [vmem:[%s864_s0 + $0x40] sm:$0xff]  ;;  %v35_v3 = vsel %vm34_vm0, %v18_v0, 0.0  ;;  %v27_v5 = vld [vmem:[%s864_s0 + $0x48] sm:$0xff]  ;;  %v38_v6 = vsel %vm34_vm0, %v19_v2, 0.0  ;;  %v21_v9 = vld [vmem:[%s864_s0 + $0x18] sm:$0xff]  ;;  %v41_v10 = vsel %vm34_vm0, %v20_v8, 0.0 }
   0x3   :  { %v59_v4 = vsel %vm34_vm0, %v26_v1, 0.0  ;;  %36 = vadd.xlane.f32.xlu0 %v35_v3  ;;  %v62_v7 = vsel %vm34_vm0, %v27_v5, 0.0  ;;  %v44_v11 = vsel %vm34_vm0, %v21_v9, 0.0  ;;  %v587_v12 = vld [vmem:[%s864_s0 + $0x50] sm:$0xff]  ;;  %v592_v13 = vld [vmem:[%s864_s0 + $0x58] sm:$0xff]  ;;  %v601_v16 = vld [vmem:[%s864_s0 + $0x20] sm:$0xff] }
   0x4   :  { %60 = vadd.xlane.f32.xlu1 %v59_v4  ;;  %v65_v14 = vsel %vm34_vm0, %v587_v12, 0.0  ;;  %v68_v15 = vsel %vm34_vm0, %v592_v13, 0.0  ;;  %v606_v17 = vld [vmem:[%s864_s0 + $0x28] sm:$0xff]  ;;  %v47_v18 = vsel %vm34_vm0, %v601_v16, 0.0  ;;  %v615_v20 = vld [vmem:[%s864_s0 + $0x60] sm:$0xff]  ;;  %v629_v24 = vld [vmem:[%s864_s0 + $0x30] sm:$0xff] }
   0x5   :  { %v50_v19 = vsel %vm34_vm0, %v606_v17, 0.0  ;;  %v620_v21 = vld [vmem:[%s864_s0 + $0x68] sm:$0xff]  ;;  %v71_v22 = vsel %vm34_vm0, %v615_v20, 0.0  ;;  %v634_v25 = vld [vmem:[%s864_s0 + $0x38] sm:$0xff]  ;;  %v53_v26 = vsel %vm34_vm0, %v629_v24, 0.0  ;;  %v643_v28 = vld [vmem:[%s864_s0 + $0x70] sm:$0xff] }
   0x6   :  { %v74_v23 = vsel %vm34_vm0, %v620_v21, 0.0  ;;  %v56_v27 = vsel %vm34_vm0, %v634_v25, 0.0  ;;  %v648_v29 = vld [vmem:[%s864_s0 + $0x78] sm:$0xff]  ;;  %v77_v30 = vsel %vm34_vm0, %v643_v28, 0.0 }
   0x7   :  { %39 = vadd.xlane.f32.xlu0 %v38_v6  ;;  %v80_v31 = vsel %vm34_vm0, %v648_v29, 0.0 }
   0x8   :  { %63 = vadd.xlane.f32.xlu1 %v62_v7 }
   0xb   :  { %42 = vadd.xlane.f32.xlu0 %v41_v10 }
   0xc   :  { %45 = vadd.xlane.f32.xlu1 %v44_v11 }
   0xf   :  { %66 = vadd.xlane.f32.xlu0 %v65_v14 }
  0x10   :  { %69 = vadd.xlane.f32.xlu1 %v68_v15 }
  0x13   :  { %48 = vadd.xlane.f32.xlu0 %v47_v18 }
  0x14   :  { %51 = vadd.xlane.f32.xlu1 %v50_v19 }
  0x17   :  { %72 = vadd.xlane.f32.xlu0 %v71_v22 }
  0x18   :  { %75 = vadd.xlane.f32.xlu1 %v74_v23 }
  0x1b   :  { %54 = vadd.xlane.f32.xlu0 %v53_v26 }
  0x1c   :  { %57 = vadd.xlane.f32.xlu1 %v56_v27 }
  0x1f   :  { %78 = vadd.xlane.f32.xlu0 %v77_v30 }
  0x20   :  { %81 = vadd.xlane.f32.xlu1 %v80_v31 }
  0x90   :  { %v37_v32 = vpop.xlane.xlu0 %36 }
  0x91   :  { %v61_v33 = vpop.xlane.xlu1 %60  ;;  %v84_v34 = vmul.f32 0.03125, %v37_v32 }
  0x92   :  { %v92_v35 = vmul.f32 0.03125, %v61_v33 }
  0x93   :  { %v654_v36 = vsub.f32 %v18_v0, %v84_v34 }
  0x94   :  { %v656_v37 = vsub.f32 %v26_v1, %v92_v35  ;;  %v40_v38 = vpop.xlane.xlu0 %39 }
  0x95   :  { %v64_v39 = vpop.xlane.xlu1 %63  ;;  %v85_v40 = vmul.f32 0.03125, %v40_v38  ;;  %v116_v42 = vmul.f32 %v654_v36, %v654_v36 }
  0x96   :  { %v93_v41 = vmul.f32 0.03125, %v64_v39  ;;  %v124_v43 = vmul.f32 %v656_v37, %v656_v37 }
  0x97   :  { %v662_v44 = vsub.f32 %v19_v2, %v85_v40  ;;  %v132_v46 = vsel %vm34_vm0, %v116_v42, 0.0 }
  0x98   :  { %v664_v45 = vsub.f32 %v27_v5, %v93_v41  ;;  %133 = vadd.xlane.f32.xlu0 %v132_v46  ;;  %v43_v47 = vpop.xlane.xlu0 %42  ;;  %v156_v49 = vsel %vm34_vm0, %v124_v43, 0.0 }
  0x99   :  { %v46_v48 = vpop.xlane.xlu1 %45  ;;  %v86_v50 = vmul.f32 0.03125, %v43_v47  ;;  %v117_v52 = vmul.f32 %v662_v44, %v662_v44 }
  0x9a   :  { %v87_v51 = vmul.f32 0.03125, %v46_v48  ;;  %v125_v53 = vmul.f32 %v664_v45, %v664_v45 }
  0x9b   :  { %v672_v54 = vsub.f32 %v20_v8, %v86_v50  ;;  %v135_v56 = vsel %vm34_vm0, %v117_v52, 0.0 }
  0x9c   :  { %v674_v55 = vsub.f32 %v21_v9, %v87_v51  ;;  %157 = vadd.xlane.f32.xlu0 %v156_v49  ;;  %136 = vadd.xlane.f32.xlu1 %v135_v56  ;;  %v67_v57 = vpop.xlane.xlu0 %66  ;;  %v159_v59 = vsel %vm34_vm0, %v125_v53, 0.0  ;;  %v502_v53 = vld [vmem:[%s865_s3 + $0x8] sm:$0xff]  }
  0x9d   :  { %v70_v58 = vpop.xlane.xlu1 %69  ;;  %v94_v60 = vmul.f32 0.03125, %v67_v57  ;;  %v118_v62 = vmul.f32 %v672_v54, %v672_v54 }
  0x9e   :  { %v95_v61 = vmul.f32 0.03125, %v70_v58  ;;  %v119_v63 = vmul.f32 %v674_v55, %v674_v55 }
  0x9f   :  { %v683_v0 = vsub.f32 %v587_v12, %v94_v60  ;;  %v138_v2 = vsel %vm34_vm0, %v118_v62, 0.0 }
  0xa0   :  { %v686_v1 = vsub.f32 %v592_v13, %v95_v61  ;;  %160 = vadd.xlane.f32.xlu1 %v159_v59  ;;  %139 = vadd.xlane.f32.xlu0 %v138_v2  ;;  %v49_v3 = vpop.xlane.xlu0 %48  ;;  %v141_v5 = vsel %vm34_vm0, %v119_v63, 0.0 }
  0xa1   :  { %v52_v4 = vpop.xlane.xlu1 %51  ;;  %v88_v6 = vmul.f32 0.03125, %v49_v3  ;;  %v126_v8 = vmul.f32 %v683_v0, %v683_v0 }
  0xa2   :  { %v89_v7 = vmul.f32 0.03125, %v52_v4  ;;  %v127_v9 = vmul.f32 %v686_v1, %v686_v1 }
  0xa3   :  { %v695_v10 = vsub.f32 %v601_v16, %v88_v6  ;;  %v162_v12 = vsel %vm34_vm0, %v126_v8, 0.0 }
  0xa4   :  { %v698_v11 = vsub.f32 %v606_v17, %v89_v7  ;;  %142 = vadd.xlane.f32.xlu1 %v141_v5  ;;  %163 = vadd.xlane.f32.xlu0 %v162_v12  ;;  %v73_v13 = vpop.xlane.xlu0 %72  ;;  %v165_v15 = vsel %vm34_vm0, %v127_v9, 0.0 }
  0xa5   :  { %v76_v14 = vpop.xlane.xlu1 %75  ;;  %v96_v18 = vmul.f32 0.03125, %v73_v13  ;;  %v120_v22 = vmul.f32 %v695_v10, %v695_v10 }
  0xa6   :  { %v97_v19 = vmul.f32 0.03125, %v76_v14  ;;  %v121_v16 = vmul.f32 %v698_v11, %v698_v11 }
  0xa7   :  { %v707_v23 = vsub.f32 %v615_v20, %v96_v18  ;;  %v144_v26 = vsel %vm34_vm0, %v120_v22, 0.0 }
  0xa8   :  { %v710_v17 = vsub.f32 %v620_v21, %v97_v19  ;;  %166 = vadd.xlane.f32.xlu1 %v165_v15  ;;  %145 = vadd.xlane.f32.xlu0 %v144_v26  ;;  %v55_v27 = vpop.xlane.xlu0 %54  ;;  %v147_v31 = vsel %vm34_vm0, %v121_v16, 0.0 }
  0xa9   :  { %v58_v30 = vpop.xlane.xlu1 %57  ;;  %v90_v32 = vmul.f32 0.03125, %v55_v27  ;;  %v128_v34 = vmul.f32 %v707_v23, %v707_v23 }
  0xaa   :  { %v91_v33 = vmul.f32 0.03125, %v58_v30  ;;  %v129_v20 = vmul.f32 %v710_v17, %v710_v17 }
  0xab   :  { %v719_v35 = vsub.f32 %v629_v24, %v90_v32  ;;  %v168_v38 = vsel %vm34_vm0, %v128_v34, 0.0 }
  0xac   :  { %v722_v21 = vsub.f32 %v634_v25, %v91_v33  ;;  %148 = vadd.xlane.f32.xlu1 %v147_v31  ;;  %169 = vadd.xlane.f32.xlu0 %v168_v38  ;;  %v79_v39 = vpop.xlane.xlu0 %78  ;;  %v171_v41 = vsel %vm34_vm0, %v129_v20, 0.0  ;;  %v754_v31 = vld [vmem:[%s866_s1] ss:$0 sm:$0xff] }
  0xad   :  { %v82_v40 = vpop.xlane.xlu1 %81  ;;  %v98_v42 = vmul.f32 0.03125, %v79_v39  ;;  %v122_v46 = vmul.f32 %v719_v35, %v719_v35 }
  0xae   :  { %v99_v43 = vmul.f32 0.03125, %v82_v40  ;;  %v123_v24 = vmul.f32 %v722_v21, %v722_v21 }
  0xaf   :  { %v731_v47 = vsub.f32 %v643_v28, %v98_v42  ;;  %v150_v48 = vsel %vm34_vm0, %v122_v46, 0.0 }
  0xb0   :  { %v734_v25 = vsub.f32 %v648_v29, %v99_v43  ;;  %172 = vadd.xlane.f32.xlu1 %v171_v41  ;;  %151 = vadd.xlane.f32.xlu0 %v150_v48  ;;  %v153_v49 = vsel %vm34_vm0, %v123_v24, 0.0  ;;  %v501_v29 = vld [vmem:[%s865_s3] sm:$0xff]  }
  0xb1   :  { %v130_v50 = vmul.f32 %v731_v47, %v731_v47  ;;  %477 = vmatprep.subr.bf16.mxu0 %v501_v29  ;;  %497 = vmatprep.subr.bf16.mxu1 %v501_v29  ;;  %v761_v43 = vld [vmem:[%s867_s2] ss:$0 sm:$0xff] }
  0xb2   :  { %v131_v51 = vmul.f32 %v734_v25, %v734_v25  ;;  %478 = vmatpush3.bf16.msra.mxu0 %v501_v29  ;;  %499 = vmatpush3.bf16.msra.mxu1 %v501_v29 }
  0xb3   :  { %v174_v52 = vsel %vm34_vm0, %v130_v50, 0.0  ;;  %479 = vmatprep.subr.bf16.mxu0 %v502_v53  ;;  %498 = vmatprep.subr.bf16.mxu1 %v502_v53 }
  0xb4   :  { %154 = vadd.xlane.f32.xlu1 %v153_v49  ;;  %175 = vadd.xlane.f32.xlu0 %v174_v52  ;;  %v177_v28 = vsel %vm34_vm0, %v131_v51, 0.0 }
  0xb6   :  { %480 = vmatpush3.bf16.msra.mxu0 %v502_v53  ;;  %500 = vmatpush3.bf16.msra.mxu1 %v502_v53 }
  0xb8   :  { %178 = vadd.xlane.f32.xlu1 %v177_v28 }
 0x125   :  { %v134_v56 = vpop.xlane.xlu0 %133 }
 0x126   :  { %v180_v57 = vmul.f32 0.03125, %v134_v56 }
 0x128   :  { %v196_v58 = vadd.f32 1e-06, %v180_v57 }
 0x129   :  { %v137_v59 = vpop.xlane.xlu1 %136  ;;  %v158_v60 = vpop.xlane.xlu0 %157 }
 0x12a   :  { %503 = vrsqrt.f32 %v196_v58  ;;  %v181_v61 = vmul.f32 0.03125, %v137_v59  ;;  %v188_v62 = vmul.f32 0.03125, %v158_v60 }
 0x12c   :  { %v197_v63 = vadd.f32 1e-06, %v181_v61  ;;  %v204_v2 = vadd.f32 1e-06, %v188_v62 }
 0x12d   :  { %v161_v3 = vpop.xlane.xlu1 %160  ;;  %v140_v4 = vpop.xlane.xlu0 %139 }
 0x12e   :  { %505 = vrsqrt.f32 %v197_v63  ;;  %v189_v5 = vmul.f32 0.03125, %v161_v3  ;;  %v182_v6 = vmul.f32 0.03125, %v140_v4 }
 0x12f   :  { %507 = vrsqrt.f32 %v204_v2 }
 0x130   :  { %v205_v7 = vadd.f32 1e-06, %v189_v5  ;;  %v198_v8 = vadd.f32 1e-06, %v182_v6 }
 0x131   :  { %v143_v9 = vpop.xlane.xlu1 %142  ;;  %v164_v12 = vpop.xlane.xlu0 %163 }
 0x132   :  { %509 = vrsqrt.f32 %v205_v7  ;;  %v183_v13 = vmul.f32 0.03125, %v143_v9  ;;  %v190_v14 = vmul.f32 0.03125, %v164_v12 }
 0x133   :  { %511 = vrsqrt.f32 %v198_v8 }
 0x134   :  { %v504_v15 = vpop.eup %503  ;;  %v199_v18 = vadd.f32 1e-06, %v183_v13  ;;  %v206_v19 = vadd.f32 1e-06, %v190_v14 }
 0x135   :  { %v167_v22 = vpop.xlane.xlu1 %166  ;;  %v146_v16 = vpop.xlane.xlu0 %145  ;;  %v228_v26 = vmul.f32 %v504_v15, %v654_v36 }
 0x136   :  { %513 = vrsqrt.f32 %v199_v18  ;;  %v191_v27 = vmul.f32 0.03125, %v167_v22  ;;  %v184_v30 = vmul.f32 0.03125, %v146_v16 }
 0x137   :  { %515 = vrsqrt.f32 %v206_v19  ;;  %v251_v41 = vmul.f32 %v754_v31, %v228_v26 }
 0x138   :  { %v506_v32 = vpop.eup %505  ;;  %v207_v33 = vadd.f32 1e-06, %v191_v27  ;;  %v200_v34 = vadd.f32 1e-06, %v184_v30 }
 0x139   :  { %v508_v20 = vpop.eup %507  ;;  %v149_v38 = vpop.xlane.xlu1 %148  ;;  %v229_v40 = vmul.f32 %v506_v32, %v662_v44  ;;  %v274_v28 = vadd.f32 %v761_v43, %v251_v41 }
 0x13a   :  { %v170_v39 = vpop.xlane.xlu0 %169  ;;  %517 = vrsqrt.f32 %v207_v33  ;;  %v185_v36 = vmul.f32 0.03125, %v149_v38  ;;  %v236_v46 = vmul.f32 %v508_v20, %v656_v37 }
 0x13b   :  { %v192_v42 = vmul.f32 0.03125, %v170_v39  ;;  %519 = vrsqrt.f32 %v200_v34  ;;  %v252_v24 = vmul.f32 %v754_v31, %v229_v40 }
 0x13c   :  { %v510_v48 = vpop.eup %509  ;;  %v201_v49 = vadd.f32 1e-06, %v185_v36  ;;  %v259_v56 = vmul.f32 %v754_v31, %v236_v46 }
 0x13d   :  { %v208_v50 = vadd.f32 1e-06, %v192_v42  ;;  %v512_v51 = vpop.eup %511  ;;  %v173_v44 = vpop.xlane.xlu1 %172  ;;  %v275_v29 = vadd.f32 %v761_v43, %v252_v24  ;;  %v237_v53 = vmul.f32 %v510_v48, %v664_v45 }
 0x13e   :  { %v152_v52 = vpop.xlane.xlu0 %151  ;;  %v230_v57 = vmul.f32 %v512_v51, %v672_v54  ;;  %521 = vrsqrt.f32 %v201_v49  ;;  %v193_v37 = vmul.f32 0.03125, %v173_v44  ;;  %v282_v5 = vadd.f32 %v761_v43, %v259_v56 }
 0x13f   :  { %v186_v58 = vmul.f32 0.03125, %v152_v52  ;;  %523 = vrsqrt.f32 %v208_v50  ;;  %v290_v59 = vpack.c.bf16 %v275_v29, %v274_v28  ;;  %v260_v60 = vmul.f32 %v754_v31, %v237_v53 }
 0x140   :  { %v514_v61 = vpop.eup %513  ;;  %v209_v62 = vadd.f32 1e-06, %v193_v37  ;;  %v253_v6 = vmul.f32 %v754_v31, %v230_v57 }
 0x141   :  { %v202_v63 = vadd.f32 1e-06, %v186_v58  ;;  %v516_v2 = vpop.eup %515  ;;  %v231_v3 = vmul.f32 %v514_v61, %v674_v55  ;;  %v155_v4 = vpop.xlane.xlu1 %154  ;;  %481 = vmatprep.mubr.msk.bf16.mxu0 %vm34_vm0, %v290_v59  ;;  %v283_v54 = vadd.f32 %v761_v43, %v260_v60 }
 0x142   :  { %v176_v45 = vpop.xlane.xlu0 %175  ;;  %v238_v7 = vmul.f32 %v516_v2, %v683_v0  ;;  %525 = vrsqrt.f32 %v209_v62  ;;  %v187_v8 = vmul.f32 0.03125, %v155_v4  ;;  %v276_v16 = vadd.f32 %v761_v43, %v253_v6 }
 0x143   :  { %v194_v9 = vmul.f32 0.03125, %v176_v45  ;;  %527 = vrsqrt.f32 %v202_v63  ;;  %v294_v12 = vpack.c.bf16 %v283_v54, %v282_v5  ;;  %v254_v13 = vmul.f32 %v754_v31, %v231_v3 }
 0x144   :  { %v518_v55 = vpop.eup %517  ;;  %v203_v14 = vadd.f32 1e-06, %v187_v8  ;;  %v261_v26 = vmul.f32 %v754_v31, %v238_v7 }
 0x145   :  { %v210_v15 = vadd.f32 1e-06, %v194_v9  ;;  %v520_v18 = vpop.eup %519  ;;  %v239_v19 = vmul.f32 %v518_v55, %v686_v1  ;;  %v179_v22 = vpop.xlane.xlu1 %178  ;;  %489 = vmatprep.mubr.msk.bf16.mxu1 %vm34_vm0, %v294_v12  ;;  %v277_v0 = vadd.f32 %v761_v43, %v254_v13 }
 0x146   :  { %v232_v27 = vmul.f32 %v520_v18, %v695_v10  ;;  %529 = vrsqrt.f32 %v203_v14  ;;  %v195_v30 = vmul.f32 0.03125, %v179_v22  ;;  %v284_v39 = vadd.f32 %v761_v43, %v261_v26 }
 0x147   :  { %531 = vrsqrt.f32 %v210_v15  ;;  %v291_v32 = vpack.c.bf16 %v277_v0, %v276_v16  ;;  %v262_v33 = vmul.f32 %v754_v31, %v239_v19 }
 0x148   :  { %v522_v34 = vpop.eup %521  ;;  %v211_v20 = vadd.f32 1e-06, %v195_v30  ;;  %v255_v41 = vmul.f32 %v754_v31, %v232_v27 }
 0x149   :  { %v524_v1 = vpop.eup %523  ;;  %v233_v38 = vmul.f32 %v522_v34, %v698_v11  ;;  %482 = vmatmul.mubr.msk.bf16.vlgmr.msra.gmra.mrb[0].mxu0 %vm34_vm0, %v291_v32  ;;  %v285_v40 = vadd.f32 %v761_v43, %v262_v33 }
 0x14a   :  { %v240_v10 = vmul.f32 %v524_v1, %v707_v23  ;;  %533 = vrsqrt.f32 %v211_v20  ;;  %v278_v11 = vadd.f32 %v761_v43, %v255_v41 }
 0x14b   :  { %v295_v36 = vpack.c.bf16 %v285_v40, %v284_v39  ;;  %v256_v42 = vmul.f32 %v754_v31, %v233_v38 }
 0x14c   :  { %v526_v46 = vpop.eup %525  ;;  %v263_v50 = vmul.f32 %v754_v31, %v240_v10 }
 0x14d   :  { %v528_v24 = vpop.eup %527  ;;  %v241_v48 = vmul.f32 %v526_v46, %v710_v17  ;;  %490 = vmatmul.mubr.msk.bf16.vlgmr.msra.gmra.mrb[0].mxu1 %vm34_vm0, %v295_v36  ;;  %v279_v49 = vadd.f32 %v761_v43, %v256_v42 }
 0x14e   :  { %v234_v51 = vmul.f32 %v528_v24, %v719_v35  ;;  %v286_v17 = vadd.f32 %v761_v43, %v263_v50 }
 0x14f   :  { %v292_v44 = vpack.c.bf16 %v279_v49, %v278_v11  ;;  %v264_v23 = vmul.f32 %v754_v31, %v241_v48 }
 0x150   :  { %v530_v52 = vpop.eup %529  ;;  %v257_v56 = vmul.f32 %v754_v31, %v234_v51 }
 0x151   :  { %v532_v28 = vpop.eup %531  ;;  %v235_v29 = vmul.f32 %v530_v52, %v722_v21  ;;  %485 = vmatprep.mubr.msk.bf16.mxu0 %vm34_vm0, %v292_v44  ;;  %v287_v53 = vadd.f32 %v761_v43, %v264_v23 }
 0x152   :  { %v242_v57 = vmul.f32 %v532_v28, %v731_v47  ;;  %v280_v21 = vadd.f32 %v761_v43, %v257_v56 }
 0x153   :  { %v296_v37 = vpack.c.bf16 %v287_v53, %v286_v17  ;;  %v258_v35 = vmul.f32 %v754_v31, %v235_v29 }
 0x154   :  { %v534_v58 = vpop.eup %533  ;;  %v265_v61 = vmul.f32 %v754_v31, %v242_v57 }
 0x155   :  { %v243_v59 = vmul.f32 %v534_v58, %v734_v25  ;;  %493 = vmatprep.mubr.msk.bf16.mxu1 %vm34_vm0, %v296_v37  ;;  %v281_v60 = vadd.f32 %v761_v43, %v258_v35 }
 0x156   :  { %v288_v47 = vadd.f32 %v761_v43, %v265_v61 }
 0x157   :  { %v293_v62 = vpack.c.bf16 %v281_v60, %v280_v21  ;;  %v266_v63 = vmul.f32 %v754_v31, %v243_v59 }
 0x159   :  { %486 = vmatmul.mubr.msk.bf16.gmra.mrb[4].mxu0 %vm34_vm0, %v293_v62  ;;  %v289_v2 = vadd.f32 %v761_v43, %v266_v63 }
 0x15b   :  { %v297_v3 = vpack.c.bf16 %v289_v2, %v288_v47 }
 0x15d   :  { %494 = vmatmul.mubr.msk.bf16.gmra.mrb[4].mxu1 %vm34_vm0, %v297_v3 }
 0x21c   :  { %v483_v25 = vpop.f32.mrb[0].mxu0 }
 0x21d   :  { %437 = vst [vmem:[%s868_s4 + $0x10] sm:$0xff] %v483_v25  ;;  %v372_v4 = vpop.f32.mrb[1].mxu0 }
 0x21e   :  { %435 = vst [vmem:[%s868_s4] sm:$0xff] %v372_v4  ;;  %v484_v31 = vpop.f32.mrb[2].mxu0 }
 0x21f   :  { %438 = vst [vmem:[%s868_s4 + $0x18] sm:$0xff] %v484_v31  ;;  %v375_v45 = vpop.f32.mrb[3].mxu0 }
 0x220   :  { %436 = vst [vmem:[%s868_s4 + $0x8] sm:$0xff] %v375_v45  ;;  %v491_v43 = vpop.f32.mrb[0].mxu1 }
 0x221   :  { %445 = vst [vmem:[%s868_s4 + $0x50] sm:$0xff] %v491_v43  ;;  %v404_v5 = vpop.f32.mrb[1].mxu1 }
 0x222   :  { %443 = vst [vmem:[%s868_s4 + $0x40] sm:$0xff] %v404_v5  ;;  %v492_v54 = vpop.f32.mrb[2].mxu1 }
 0x223   :  { %446 = vst [vmem:[%s868_s4 + $0x58] sm:$0xff] %v492_v54  ;;  %v407_v6 = vpop.f32.mrb[3].mxu1 }
 0x224   :  { %444 = vst [vmem:[%s868_s4 + $0x48] sm:$0xff] %v407_v6 }
 0x22c   :  { %v487_v7 = vpop.f32.mrb[4].mxu0 }
 0x22d   :  { %441 = vst [vmem:[%s868_s4 + $0x30] sm:$0xff] %v487_v7  ;;  %v388_v8 = vpop.f32.mrb[5].mxu0 }
 0x22e   :  { %439 = vst [vmem:[%s868_s4 + $0x20] sm:$0xff] %v388_v8  ;;  %v488_v9 = vpop.f32.mrb[6].mxu0 }
 0x22f   :  { %442 = vst [vmem:[%s868_s4 + $0x38] sm:$0xff] %v488_v9  ;;  %v391_v12 = vpop.f32.mrb[7].mxu0 }
 0x230   :  { %440 = vst [vmem:[%s868_s4 + $0x28] sm:$0xff] %v391_v12  ;;  %v495_v13 = vpop.f32.mrb[4].mxu1 }
 0x231   :  { %449 = vst [vmem:[%s868_s4 + $0x70] sm:$0xff] %v495_v13  ;;  %v420_v55 = vpop.f32.mrb[5].mxu1 }
 0x232   :  { %447 = vst [vmem:[%s868_s4 + $0x60] sm:$0xff] %v420_v55  ;;  %v496_v14 = vpop.f32.mrb[6].mxu1 }
 0x233   :  { %450 = vst [vmem:[%s868_s4 + $0x78] sm:$0xff] %v496_v14  ;;  %v423_v15 = vpop.f32.mrb[7].mxu1 }
 0x234   :  { %448 = vst [vmem:[%s868_s4 + $0x68] sm:$0xff] %v423_v15 }

// kernel: vss_block_forward.10
= control target key start
LH: loop header
LB: loop body
LE: loop exit
PB: predicated region body
PF: predicated region fallthrough
CT: control target
= control target key end

     0   :  { %s707_s12 = smov 0   ;;  %s935_s0 = inlined_call_operand.vmem [shape: f32[2,10,10,64], index: 0, kind: input, shape index: {}]   ;;  %s936_s1 = inlined_call_operand.vmem [shape: f32[9,64], index: 1, kind: input, shape index: {}]   ;;  %s937_s2 = inlined_call_operand.vmem [shape: f32[1,64], index: 2, kind: input, shape index: {}]   ;;  %s938_s3 = inlined_call_operand.vmem [shape: f32[2,8,8,64], index: 3, kind: output, shape index: {}]  }
   0x1 LB: > { %s569_s13 = sadd.s32 4294967295, %s685_s12   ;;  %p573_p0 = scmp.ge.s32.totalorder %s685_s12, 1  ;;  %s685_s12 = sphi %s707_s12, %s13_s12  }
   0x2   : > { %p137_p1 = scmp.lt.s32.totalorder %s685_s12, 3 }
   0x4   : > { %p138_p2 = pnand %p573_p0, %p137_p1 }
   0x5   : > { %p161_p3 = scmp.lt.s32.totalorder (!%p138_p2), %s569_s13, 1  ;;  %v720_v0 = vld [vmem:[%s936_s1] ss:$0 sm:$0xff] (!%p138_p2)  ;;  %v726_v1 = vld [vmem:[%s936_s1 + $0x1] ss:$0 sm:$0xff] (!%p138_p2)  ;;  %vm505_vm0 = vcmask (!%p138_p2), 523264  }
   0x6   : > { %141 = sbr.rel (%p138_p2) target bundleno = 103 (0x67), region = 32  ;;  %v731_v2 = vld [vmem:[%s936_s1 + $0x2] ss:$0 sm:$0xff] (!%p138_p2)  ;;  %v736_v3 = vld [vmem:[%s936_s1 + $0x3] ss:$0 sm:$0xff] (!%p138_p2) }
   0x7   : > { %v741_v4 = vld [vmem:[%s936_s1 + $0x4] ss:$0 sm:$0xff] (!%p138_p2)  ;;  %v746_v5 = vld [vmem:[%s936_s1 + $0x5] ss:$0 sm:$0xff] (!%p138_p2)  ;;  %v756_v6 = vld [vmem:[%s936_s1 + $0x6] ss:$0 sm:$0xff] (!%p138_p2) }
   0x8   : > { %v761_v7 = vld [vmem:[%s936_s1 + $0x7] ss:$0 sm:$0xff] (!%p138_p2)  ;;  %v766_v8 = vld [vmem:[%s936_s1 + $0x8] ss:$0 sm:$0xff] (!%p138_p2) }
   0xd   : > { %s940_s13 = smov (!%p161_p3, %s569_s13), 1 }
   0xe   : > { %s638_s16 = smul.u32 160, %s940_s13  ;;  %s637_s11 = sshll.u32 %s940_s13, 6 }
  0x10   : > { %s751_s29 = scalar_lea.vmem %s935_s0, %s638_s16  ;;  %s907_s16 = scalar_lea.vmem %s938_s3, %s637_s11 }
  0x11   : > { %v172_v9 = vld [vmem:[%s751_s29] sm:$0xff]  ;;  %v580_v15 = vld [vmem:[%s751_s29 + $0x10] sm:$0xff] }
  0x12   : > { %v201_v10 = vld [vmem:[%s751_s29 + $0x1] sm:$0xff]  ;;  %v184_v12 = vmul.f32 %v720_v0, %v172_v9  ;;  %v589_v16 = vld [vmem:[%s751_s29 + $0x11] sm:$0xff]  ;;  %v272_v18 = vmul.f32 %v736_v3, %v580_v15  ;;  %v185_v22 = vmul.f32 %v580_v15, %v720_v0 }
  0x13   : > { %v230_v11 = vld [vmem:[%s751_s29 + $0x2] sm:$0xff]  ;;  %v213_v13 = vmul.f32 %v726_v1, %v201_v10  ;;  %v598_v17 = vld [vmem:[%s751_s29 + $0x12] sm:$0xff]  ;;  %v301_v19 = vmul.f32 %v741_v4, %v589_v16  ;;  %v214_v29 = vmul.f32 %v589_v16, %v726_v1 }
  0x14   : > { %v242_v14 = vmul.f32 %v731_v2, %v230_v11  ;;  %v607_v20 = vld [vmem:[%s751_s29 + $0x20] sm:$0xff]  ;;  %v330_v24 = vmul.f32 %v746_v5, %v598_v17  ;;  %v243_v30 = vmul.f32 %v598_v17, %v731_v2  ;;  %v608_v32 = vld [vmem:[%s751_s29 + $0x30] sm:$0xff] }
  0x15   : > { %v616_v21 = vld [vmem:[%s751_s29 + $0x21] sm:$0xff]  ;;  %v221_v23 = vadd.f32 %v213_v13, %v184_v12  ;;  %v360_v25 = vmul.f32 %v756_v6, %v607_v20  ;;  %v273_v31 = vmul.f32 %v607_v20, %v736_v3  ;;  %v361_v36 = vmul.f32 %v756_v6, %v608_v32  ;;  %v617_v37 = vld [vmem:[%s751_s29 + $0x31] sm:$0xff] }
  0x16   : > { %v389_v26 = vmul.f32 %v761_v7, %v616_v21  ;;  %v625_v27 = vld [vmem:[%s751_s29 + $0x22] sm:$0xff]  ;;  %v302_v34 = vmul.f32 %v616_v21, %v741_v4  ;;  %v222_v38 = vadd.f32 %v214_v29, %v185_v22  ;;  %v390_v39 = vmul.f32 %v761_v7, %v617_v37  ;;  %v626_v40 = vld [vmem:[%s751_s29 + $0x32] sm:$0xff] }
  0x17   : > { %v787_v28 = vmul.f32 %v766_v8, %v625_v27  ;;  %v250_v33 = vadd.f32 %v242_v14, %v221_v23  ;;  %v331_v35 = vmul.f32 %v625_v27, %v746_v5  ;;  %v186_v41 = vmul.f32 %v607_v20, %v720_v0  ;;  %v609_v51 = vld [vmem:[%s751_s29 + $0x40] sm:$0xff]  ;;  %v610_v15 = vld [vmem:[%s751_s29 + $0x50] sm:$0xff] }
  0x18   : > { %v215_v42 = vmul.f32 %v616_v21, %v726_v1  ;;  %v419_v44 = vmul.f32 %v766_v8, %v626_v40  ;;  %v244_v45 = vmul.f32 %v625_v27, %v731_v2  ;;  %v274_v46 = vmul.f32 %v608_v32, %v736_v3  ;;  %v618_v52 = vld [vmem:[%s751_s29 + $0x41] sm:$0xff]  ;;  %v619_v16 = vld [vmem:[%s751_s29 + $0x51] sm:$0xff] }
  0x19   : > { %v280_v43 = vadd.f32 %v272_v18, %v250_v33  ;;  %v251_v47 = vadd.f32 %v243_v30, %v222_v38  ;;  %v303_v49 = vmul.f32 %v617_v37, %v741_v4  ;;  %v332_v50 = vmul.f32 %v626_v40, %v746_v5  ;;  %v627_v59 = vld [vmem:[%s751_s29 + $0x42] sm:$0xff] }
  0x1a   : > { %v223_v48 = vadd.f32 %v215_v42, %v186_v41  ;;  %v362_v54 = vmul.f32 %v756_v6, %v609_v51  ;;  %v391_v55 = vmul.f32 %v761_v7, %v618_v52  ;;  %v187_v56 = vmul.f32 %v608_v32, %v720_v0  ;;  %v831_v32 = vld [vmem:[%s937_s2] ss:$0 sm:$0xff] }
  0x1b   : > { %v309_v53 = vadd.f32 %v301_v19, %v280_v43  ;;  %v281_v57 = vadd.f32 %v273_v31, %v251_v47  ;;  %v216_v60 = vmul.f32 %v617_v37, %v726_v1  ;;  %v245_v61 = vmul.f32 %v626_v40, %v731_v2  ;;  %v611_v38 = vld [vmem:[%s751_s29 + $0x60] sm:$0xff] }
  0x1c   : > { %v252_v58 = vadd.f32 %v244_v45, %v223_v48  ;;  %v420_v63 = vmul.f32 %v766_v8, %v627_v59  ;;  %v275_v9 = vmul.f32 %v609_v51, %v736_v3  ;;  %v304_v10 = vmul.f32 %v618_v52, %v741_v4  ;;  %v620_v48 = vld [vmem:[%s751_s29 + $0x61] sm:$0xff] }
  0x1d   : > { %v338_v62 = vadd.f32 %v330_v24, %v309_v53  ;;  %v310_v11 = vadd.f32 %v302_v34, %v281_v57  ;;  %v224_v13 = vadd.f32 %v216_v60, %v187_v56  ;;  %v333_v14 = vmul.f32 %v627_v59, %v746_v5  ;;  %v628_v24 = vld [vmem:[%s751_s29 + $0x52] sm:$0xff] }
  0x1e   : > { %v282_v12 = vadd.f32 %v274_v46, %v252_v58  ;;  %v363_v18 = vmul.f32 %v756_v6, %v610_v15  ;;  %v392_v19 = vmul.f32 %v761_v7, %v619_v16  ;;  %v188_v20 = vmul.f32 %v609_v51, %v720_v0 }
  0x1f   : > { %v368_v17 = vadd.f32 %v360_v25, %v338_v62  ;;  %v339_v21 = vadd.f32 %v331_v35, %v310_v11  ;;  %v253_v23 = vadd.f32 %v245_v61, %v224_v13  ;;  %v217_v27 = vmul.f32 %v618_v52, %v726_v1 }
  0x20   : > { %v311_v22 = vadd.f32 %v303_v49, %v282_v12  ;;  %v421_v30 = vmul.f32 %v766_v8, %v628_v24  ;;  %v246_v31 = vmul.f32 %v627_v59, %v731_v2  ;;  %v276_v25 = vmul.f32 %v610_v15, %v736_v3 }
  0x21   : > { %v397_v29 = vadd.f32 %v389_v26, %v368_v17  ;;  %v369_v33 = vadd.f32 %v361_v36, %v339_v21  ;;  %v283_v35 = vadd.f32 %v275_v9, %v253_v23  ;;  %v225_v37 = vadd.f32 %v217_v27, %v188_v20  ;;  %v629_v9 = vld [vmem:[%s751_s29 + $0x62] sm:$0xff] }
  0x22   : > { %v340_v34 = vadd.f32 %v332_v50, %v311_v22  ;;  %v305_v26 = vmul.f32 %v619_v16, %v741_v4  ;;  %v334_v41 = vmul.f32 %v628_v24, %v746_v5  ;;  %v364_v42 = vmul.f32 %v756_v6, %v611_v38 }
  0x23   : > { %v426_v40 = vadd.f32 %v787_v28, %v397_v29  ;;  %v398_v43 = vadd.f32 %v390_v39, %v369_v33  ;;  %v312_v46 = vadd.f32 %v304_v10, %v283_v35  ;;  %v254_v47 = vadd.f32 %v246_v31, %v225_v37 }
  0x24   : > { %v370_v45 = vadd.f32 %v362_v54, %v340_v34  ;;  %v393_v36 = vmul.f32 %v761_v7, %v620_v48  ;;  %v189_v50 = vmul.f32 %v610_v15, %v720_v0  ;;  %v218_v28 = vmul.f32 %v619_v16, %v726_v1  ;;  %v612_v16 = vld [vmem:[%s751_s29 + $0x70] sm:$0xff] }
  0x25   : > { %v840_v49 = vadd.f32 %v831_v32, %v426_v40  ;;  %v427_v51 = vadd.f32 %v419_v44, %v398_v43  ;;  %v341_v53 = vadd.f32 %v333_v14, %v312_v46  ;;  %v284_v56 = vadd.f32 %v276_v25, %v254_v47 }
  0x26   : > { %v399_v52 = vadd.f32 %v391_v55, %v370_v45  ;;  %v226_v54 = vadd.f32 %v218_v28, %v189_v50  ;;  %v247_v57 = vmul.f32 %v628_v24, %v731_v2  ;;  %v277_v58 = vmul.f32 %v611_v38, %v736_v3  ;;  %v621_v24 = vld [vmem:[%s751_s29 + $0x71] sm:$0xff] }
  0x27   : > { %v449_v39 = vsub.f32 0.0, %v840_v49  ;;  %v849_v59 = vadd.f32 %v831_v32, %v427_v51  ;;  %v371_v61 = vadd.f32 %v363_v18, %v341_v53  ;;  %v313_v62 = vadd.f32 %v305_v26, %v284_v56  ;;  %v613_v51 = vld [vmem:[%s751_s29 + $0x80] sm:$0xff] }
  0x28   : > { %v428_v60 = vadd.f32 %v420_v63, %v399_v52  ;;  %v422_v44 = vmul.f32 %v766_v8, %v629_v9  ;;  %v255_v55 = vadd.f32 %v247_v57, %v226_v54  ;;  %v306_v11 = vmul.f32 %v620_v48, %v741_v4 }
  0x29   : > { %v457_v10 = vmul.f32 1.442695, %v449_v39  ;;  %v450_v12 = vsub.f32 0.0, %v849_v59  ;;  %v400_v14 = vadd.f32 %v392_v19, %v371_v61  ;;  %v342_v15 = vadd.f32 %v334_v41, %v313_v62  ;;  %v622_v61 = vld [vmem:[%s751_s29 + $0x81] sm:$0xff] }
  0x2a   : > { %v856_v13 = vadd.f32 %v831_v32, %v428_v60  ;;  %v285_v63 = vadd.f32 %v277_v58, %v255_v55  ;;  %v335_v17 = vmul.f32 %v629_v9, %v746_v5  ;;  %v365_v18 = vmul.f32 %v756_v6, %v612_v16 }
  0x2b   : > { %647 = vpow2.f32 %v457_v10  ;;  %v459_v20 = vmul.f32 1.442695, %v450_v12  ;;  %v429_v22 = vadd.f32 %v421_v30, %v400_v14  ;;  %v372_v23 = vadd.f32 %v364_v42, %v342_v15 }
  0x2c   : > { %v451_v21 = vsub.f32 0.0, %v856_v13  ;;  %v314_v27 = vadd.f32 %v306_v11, %v285_v63  ;;  %v394_v29 = vmul.f32 %v761_v7, %v621_v24  ;;  %v190_v19 = vmul.f32 %v611_v38, %v720_v0  ;;  %v630_v38 = vld [vmem:[%s751_s29 + $0x72] sm:$0xff]  ;;  %v631_v11 = vld [vmem:[%s751_s29 + $0x82] sm:$0xff] }
  0x2d   : > { %v219_v31 = vmul.f32 %v620_v48, %v726_v1  ;;  %649 = vpow2.f32 %v459_v20  ;;  %v867_v33 = vadd.f32 %v831_v32, %v429_v22  ;;  %v401_v34 = vadd.f32 %v393_v36, %v372_v23 }
  0x2e   : > { %v461_v25 = vmul.f32 1.442695, %v451_v21  ;;  %v343_v35 = vadd.f32 %v335_v17, %v314_v27  ;;  %v248_v30 = vmul.f32 %v629_v9, %v731_v2  ;;  %v278_v40 = vmul.f32 %v612_v16, %v736_v3  ;;  %v614_v17 = vld [vmem:[%s751_s29 + $0x90] sm:$0xff] }
  0x2f   : > { %v227_v37 = vadd.f32 %v219_v31, %v190_v19  ;;  %v452_v26 = vsub.f32 0.0, %v867_v33  ;;  %v430_v41 = vadd.f32 %v422_v44, %v401_v34  ;;  %v423_v43 = vmul.f32 %v766_v8, %v630_v38  ;;  %v623_v27 = vld [vmem:[%s751_s29 + $0x91] sm:$0xff] }
  0x30   : > { %651 = vpow2.f32 %v461_v25  ;;  %v373_v42 = vadd.f32 %v365_v18, %v343_v35  ;;  %v307_v46 = vmul.f32 %v621_v24, %v741_v4  ;;  %v336_v36 = vmul.f32 %v630_v38, %v746_v5  ;;  %v632_v31 = vld [vmem:[%s751_s29 + $0x92] sm:$0xff] }
  0x31   : > { %v256_v45 = vadd.f32 %v248_v30, %v227_v37  ;;  %v463_v47 = vmul.f32 1.442695, %v452_v26  ;;  %v876_v48 = vadd.f32 %v831_v32, %v430_v41  ;;  %v191_v52 = vmul.f32 %v612_v16, %v720_v0 }
  0x32   : > { %v402_v50 = vadd.f32 %v394_v29, %v373_v42  ;;  %v220_v53 = vmul.f32 %v621_v24, %v726_v1  ;;  %v249_v39 = vmul.f32 %v630_v38, %v731_v2  ;;  %v366_v60 = vmul.f32 %v756_v6, %v613_v51 }
  0x33   : > { %v286_v28 = vadd.f32 %v278_v40, %v256_v45  ;;  %653 = vpow2.f32 %v463_v47  ;;  %v453_v56 = vsub.f32 0.0, %v876_v48  ;;  %v279_v0 = vmul.f32 %v613_v51, %v736_v3 }
  0x34   : > { %v431_v57 = vadd.f32 %v423_v43, %v402_v50  ;;  %v228_v62 = vadd.f32 %v220_v53, %v191_v52  ;;  %v395_v55 = vmul.f32 %v761_v7, %v622_v61  ;;  %v424_v14 = vmul.f32 %v766_v8, %v631_v11 }
  0x35   : > { %v648_v54 = vpop.eup %647  ;;  %v315_v58 = vadd.f32 %v307_v46, %v286_v28  ;;  %v465_v10 = vmul.f32 1.442695, %v453_v56  ;;  %v308_v15 = vmul.f32 %v622_v61, %v741_v4  ;;  %v337_v21 = vmul.f32 %v631_v11, %v746_v5 }
  0x36   : > { %v473_v9 = vadd.f32 1.0, %v648_v54  ;;  %v888_v1 = vadd.f32 %v831_v32, %v431_v57  ;;  %v257_v2 = vadd.f32 %v249_v39, %v228_v62  ;;  %v367_v4 = vmul.f32 %v756_v6, %v614_v17 }
  0x37   : > { %v344_v44 = vadd.f32 %v336_v36, %v315_v58  ;;  %v650_v12 = vpop.eup %649  ;;  %v396_v35 = vmul.f32 %v761_v7, %v623_v27  ;;  %v425_v40 = vmul.f32 %v766_v8, %v632_v31 }
  0x38   : > { %655 = vrcp.f32 %v473_v9  ;;  %v474_v16 = vadd.f32 1.0, %v650_v12  ;;  %v454_v3 = vsub.f32 0.0, %v888_v1  ;;  %v287_v20 = vadd.f32 %v279_v0, %v257_v2 }
  0x39   : > { %657 = vpow2.f32 %v465_v10  ;;  %v374_v63 = vadd.f32 %v366_v60, %v344_v44 }
  0x3a   : > { %v652_v18 = vpop.eup %651  ;;  %659 = vrcp.f32 %v474_v16  ;;  %v467_v23 = vmul.f32 1.442695, %v454_v3  ;;  %v316_v29 = vadd.f32 %v308_v15, %v287_v20 }
  0x3b   : > { %v475_v22 = vadd.f32 1.0, %v652_v18  ;;  %v403_v24 = vadd.f32 %v395_v55, %v374_v63 }
  0x3c   : > { %v345_v34 = vadd.f32 %v337_v21, %v316_v29 }
  0x3d   : > { %661 = vrcp.f32 %v475_v22  ;;  %v432_v19 = vadd.f32 %v424_v14, %v403_v24  ;;  %v654_v25 = vpop.eup %653 }
  0x3e   : > { %663 = vpow2.f32 %v467_v23  ;;  %v476_v37 = vadd.f32 1.0, %v654_v25  ;;  %v375_v30 = vadd.f32 %v367_v4, %v345_v34 }
  0x3f   : > { %v447_v5 = vadd.f32 %v831_v32, %v432_v19 }
  0x40   : > { %665 = vrcp.f32 %v476_v37  ;;  %v404_v6 = vadd.f32 %v396_v35, %v375_v30 }
  0x41   : > { %v455_v26 = vsub.f32 0.0, %v447_v5 }
  0x42   : > { %v656_v41 = vpop.eup %655  ;;  %v433_v45 = vadd.f32 %v425_v40, %v404_v6 }
  0x43   : > { %v658_v7 = vpop.eup %657  ;;  %v497_v38 = vmul.f32 %v656_v41, %v840_v49  ;;  %v469_v42 = vmul.f32 1.442695, %v455_v26 }
  0x44   : > { %v477_v43 = vadd.f32 1.0, %v658_v7  ;;  %v660_v8 = vpop.eup %659  ;;  %v448_v47 = vadd.f32 %v831_v32, %v433_v45 }
  0x45   : > { %506 = vst.msk [vmem:[%s907_s16] sm:$0xff] %vm505_vm0, %v497_v38  ;;  %667 = vpow2.f32 %v469_v42  ;;  %v498_v46 = vmul.f32 %v660_v8, %v849_v59 }
  0x46   : > { %669 = vrcp.f32 %v477_v43  ;;  %v456_v28 = vsub.f32 0.0, %v448_v47 }
  0x47   : > { %v662_v36 = vpop.eup %661  ;;  %507 = vst.msk [vmem:[%s907_s16 + $0x8] sm:$0xff] %vm505_vm0, %v498_v46 }
  0x48   : > { %v664_v50 = vpop.eup %663  ;;  %v499_v49 = vmul.f32 %v662_v36, %v856_v13  ;;  %v471_v52 = vmul.f32 1.442695, %v456_v28 }
  0x49   : > { %v478_v51 = vadd.f32 1.0, %v664_v50 }
  0x4a   : > { %508 = vst.msk [vmem:[%s907_s16 + $0x10] sm:$0xff] %vm505_vm0, %v499_v49  ;;  %v666_v53 = vpop.eup %665 }
  0x4b   : > { %671 = vrcp.f32 %v478_v51  ;;  %v500_v59 = vmul.f32 %v666_v53, %v867_v33 }
  0x4c   : > { %673 = vpow2.f32 %v471_v52 }
  0x4d   : > { %509 = vst.msk [vmem:[%s907_s16 + $0x18] sm:$0xff] %vm505_vm0, %v500_v59 }
  0x4f   : > { %v668_v32 = vpop.eup %667 }
  0x50   : > { %v670_v56 = vpop.eup %669  ;;  %v479_v39 = vadd.f32 1.0, %v668_v32 }
  0x51   : > { %v501_v13 = vmul.f32 %v670_v56, %v876_v48 }
  0x52   : > { %675 = vrcp.f32 %v479_v39 }
  0x53   : > { %510 = vst.msk [vmem:[%s907_s16 + $0x20] sm:$0xff] %vm505_vm0, %v501_v13 }
  0x55   : > { %v672_v54 = vpop.eup %671 }
  0x56   : > { %v674_v57 = vpop.eup %673  ;;  %v502_v58 = vmul.f32 %v672_v54, %v888_v1 }
  0x57   : > { %v480_v60 = vadd.f32 1.0, %v674_v57 }
  0x58   : > { %511 = vst.msk [vmem:[%s907_s16 + $0x28] sm:$0xff] %vm505_vm0, %v502_v58 }
  0x59   : > { %677 = vrcp.f32 %v480_v60 }
  0x5c   : > { %v676_v33 = vpop.eup %675 }
  0x5d   : > { %v503_v61 = vmul.f32 %v676_v33, %v447_v5 }
  0x5f   : > { %512 = vst.msk [vmem:[%s907_s16 + $0x30] sm:$0xff] %vm505_vm0, %v503_v61 }
  0x63   : > { %v678_v62 = vpop.eup %677 }
  0x64   : > { %v504_v9 = vmul.f32 %v678_v62, %v448_v47 }
  0x66   : > { %513 = vst.msk [vmem:[%s907_s16 + $0x38] sm:$0xff] %vm505_vm0, %v504_v9 }
  0x67 PF: > { %s13_s12 = sadd.s32 1, %s685_s12  }
  0x68   : > { %p10_p4 = scmp.ge.s32.totalorder %s13_s12, 4  }
  0x6a   :  { %12 = sbr.rel (!%p10_p4) target bundleno = 1 (0x1), region = 64 }

// kernel: vss_block_forward.11
= control target key start
LH: loop header
LB: loop body
LE: loop exit
PB: predicated region body
PF: predicated region fallthrough
CT: control target
= control target key end

     0   :  { %v561_v1 = vmov 0   ;;  %s753_s1 = inlined_call_operand.vmem [shape: bf16[128,256], index: 1, kind: input, shape index: {}]   ;;  %s754_s0 = inlined_call_operand.vmem [shape: bf16[128,128], index: 0, kind: input, shape index: {}]   ;;  %s755_s2 = inlined_call_operand.vmem [shape: f32[128,256], index: 2, kind: output, shape index: {}]  }
   0x1   :  { %v529_v0 = vld [vmem:[%s753_s1 + $0x4] ss:$8 sps:$4 sm:$0xff]   ;;  %272 = vmatprep.mubr.bf16.mxu0 %v561_v1  ;;  %312 = vmatprep.mubr.bf16.mxu1 %v561_v1  ;;  %v531_v2 = vld [vmem:[%s753_s1] ss:$8 sps:$4 sm:$0xff]   ;;  %v532_v3 = vld [vmem:[%s753_s1 + $0x14] ss:$8 sps:$4 sm:$0xff]  }
   0x2   :  { %240 = vmatprep.subr.bf16.mxu0 %v529_v0  ;;  %512 = vmatprep.subr.bf16.mxu1 %v529_v0  ;;  %v534_v4 = vld [vmem:[%s753_s1 + $0x10] ss:$8 sps:$4 sm:$0xff]   ;;  %v535_v5 = vld [vmem:[%s753_s1 + $0x24] ss:$8 sps:$4 sm:$0xff]   ;;  %v537_v6 = vld [vmem:[%s753_s1 + $0x20] ss:$8 sps:$4 sm:$0xff]  }
   0x3   :  { %241 = vmatpush1.bf16.msra.mxu0 %v531_v2  ;;  %520 = vmatpush1.bf16.msra.mxu1 %v531_v2  ;;  %v538_v7 = vld [vmem:[%s753_s1 + $0x34] ss:$8 sps:$4 sm:$0xff]   ;;  %v540_v8 = vld [vmem:[%s753_s1 + $0x30] ss:$8 sps:$4 sm:$0xff]   ;;  %v541_v9 = vld [vmem:[%s753_s1 + $0x44] ss:$8 sps:$4 sm:$0xff]  }
   0x4   :  { %242 = vmatprep.subr.bf16.mxu0 %v532_v3  ;;  %513 = vmatprep.subr.bf16.mxu1 %v532_v3  ;;  %v543_v10 = vld [vmem:[%s753_s1 + $0x40] ss:$8 sps:$4 sm:$0xff]   ;;  %v544_v11 = vld [vmem:[%s753_s1 + $0x54] ss:$8 sps:$4 sm:$0xff]   ;;  %v546_v12 = vld [vmem:[%s753_s1 + $0x50] ss:$8 sps:$4 sm:$0xff]  }
   0x5   :  { %v547_v13 = vld [vmem:[%s753_s1 + $0x64] ss:$8 sps:$4 sm:$0xff]   ;;  %v549_v14 = vld [vmem:[%s753_s1 + $0x60] ss:$8 sps:$4 sm:$0xff]   ;;  %v550_v15 = vld [vmem:[%s753_s1 + $0x74] ss:$8 sps:$4 sm:$0xff]  }
   0x6   :  { %v552_v16 = vld [vmem:[%s753_s1 + $0x70] ss:$8 sps:$4 sm:$0xff]   ;;  %v553_v17 = vld [vmem:[%s754_s0] sm:$0xff]   ;;  %v555_v19 = vld [vmem:[%s754_s0 + $0x8] sm:$0xff]  }
   0x7   :  { %243 = vmatpush1.bf16.msra.mxu0 %v534_v4  ;;  %521 = vmatpush1.bf16.msra.mxu1 %v534_v4  ;;  %v554_v18 = vld [vmem:[%s754_s0 + $0x20] sm:$0xff]   ;;  %v556_v20 = vld [vmem:[%s754_s0 + $0x28] sm:$0xff]   ;;  %v557_v21 = vld [vmem:[%s754_s0 + $0x10] sm:$0xff]  }
   0x8   :  { %244 = vmatprep.subr.bf16.mxu0 %v535_v5  ;;  %514 = vmatprep.subr.bf16.mxu1 %v535_v5  ;;  %v558_v22 = vld [vmem:[%s754_s0 + $0x30] sm:$0xff]   ;;  %v559_v23 = vld [vmem:[%s754_s0 + $0x18] sm:$0xff]  }
   0x9   :  { %v560_v24 = vld [vmem:[%s754_s0 + $0x38] sm:$0xff]  }
   0xb   :  { %245 = vmatpush1.bf16.msra.mxu0 %v537_v6  ;;  %522 = vmatpush1.bf16.msra.mxu1 %v537_v6 }
   0xc   :  { %246 = vmatprep.subr.bf16.mxu0 %v538_v7  ;;  %515 = vmatprep.subr.bf16.mxu1 %v538_v7 }
   0xf   :  { %247 = vmatpush1.bf16.msra.mxu0 %v540_v8  ;;  %523 = vmatpush1.bf16.msra.mxu1 %v540_v8 }
  0x10   :  { %248 = vmatprep.subr.bf16.mxu0 %v541_v9  ;;  %516 = vmatprep.subr.bf16.mxu1 %v541_v9 }
  0x13   :  { %249 = vmatpush1.bf16.msra.mxu0 %v543_v10  ;;  %524 = vmatpush1.bf16.msra.mxu1 %v543_v10 }
  0x14   :  { %250 = vmatprep.subr.bf16.mxu0 %v544_v11  ;;  %517 = vmatprep.subr.bf16.mxu1 %v544_v11 }
  0x17   :  { %251 = vmatpush1.bf16.msra.mxu0 %v546_v12  ;;  %525 = vmatpush1.bf16.msra.mxu1 %v546_v12 }
  0x18   :  { %252 = vmatprep.subr.bf16.mxu0 %v547_v13  ;;  %518 = vmatprep.subr.bf16.mxu1 %v547_v13 }
  0x1b   :  { %253 = vmatpush1.bf16.msra.mxu0 %v549_v14  ;;  %526 = vmatpush1.bf16.msra.mxu1 %v549_v14 }
  0x1c   :  { %254 = vmatprep.subr.bf16.mxu0 %v550_v15  ;;  %519 = vmatprep.subr.bf16.mxu1 %v550_v15 }
  0x1f   :  { %255 = vmatpush1.bf16.msra.mxu0 %v552_v16  ;;  %527 = vmatpush1.bf16.msra.mxu1 %v552_v16 }
  0x22   :  { %273 = vmatmul.mubr.bf16.vlgmr.msra.gmra.mrb[0].mxu0 %v553_v17  ;;  %313 = vmatmul.mubr.bf16.vlgmr.msra.gmra.mrb[0].mxu1 %v554_v18 }
  0x23   :  { %282 = vmatprep.mubr.bf16.mxu0 %v561_v1  ;;  %322 = vmatprep.mubr.bf16.mxu1 %v561_v1 }
  0x2a   :  { %283 = vmatmul.mubr.bf16.gmra.mrb[4].mxu0 %v555_v19  ;;  %323 = vmatmul.mubr.bf16.gmra.mrb[4].mxu1 %v556_v20 }
  0x2b   :  { %292 = vmatprep.mubr.bf16.mxu0 %v561_v1  ;;  %332 = vmatprep.mubr.bf16.mxu1 %v561_v1 }
  0x32   :  { %293 = vmatmul.mubr.bf16.gmra.mrb[8].mxu0 %v557_v21  ;;  %333 = vmatmul.mubr.bf16.gmra.mrb[8].mxu1 %v558_v22 }
  0x33   :  { %302 = vmatprep.mubr.bf16.mxu0 %v561_v1  ;;  %342 = vmatprep.mubr.bf16.mxu1 %v561_v1 }
  0x3a   :  { %303 = vmatmul.mubr.bf16.gmra.mrb[12].mxu0 %v559_v23  ;;  %343 = vmatmul.mubr.bf16.gmra.mrb[12].mxu1 %v560_v24 }
  0xf5   :  { %v274_v25 = vpop.f32.mrb[0].mxu0  ;;  %v314_v26 = vpop.f32.mrb[0].mxu1 }
  0xf6   :  { %452 = vst [vmem:[%s755_s2] sm:$0xff] %v274_v25  ;;  %468 = vst [vmem:[%s755_s2 + $0x80] sm:$0xff] %v314_v26  ;;  %v276_v27 = vpop.f32.mrb[1].mxu0  ;;  %v316_v28 = vpop.f32.mrb[1].mxu1 }
  0xf7   :  { %453 = vst [vmem:[%s755_s2 + $0x8] sm:$0xff] %v276_v27  ;;  %469 = vst [vmem:[%s755_s2 + $0x88] sm:$0xff] %v316_v28  ;;  %v278_v29 = vpop.f32.mrb[2].mxu0  ;;  %v318_v30 = vpop.f32.mrb[2].mxu1 }
  0xf8   :  { %454 = vst [vmem:[%s755_s2 + $0x10] sm:$0xff] %v278_v29  ;;  %470 = vst [vmem:[%s755_s2 + $0x90] sm:$0xff] %v318_v30  ;;  %v280_v31 = vpop.f32.mrb[3].mxu0  ;;  %v320_v32 = vpop.f32.mrb[3].mxu1 }
  0xf9   :  { %455 = vst [vmem:[%s755_s2 + $0x18] sm:$0xff] %v280_v31  ;;  %471 = vst [vmem:[%s755_s2 + $0x98] sm:$0xff] %v320_v32 }
  0xfd   :  { %v284_v33 = vpop.f32.mrb[4].mxu0  ;;  %v324_v34 = vpop.f32.mrb[4].mxu1 }
  0xfe   :  { %456 = vst [vmem:[%s755_s2 + $0x20] sm:$0xff] %v284_v33  ;;  %472 = vst [vmem:[%s755_s2 + $0xa0] sm:$0xff] %v324_v34  ;;  %v286_v35 = vpop.f32.mrb[5].mxu0  ;;  %v326_v36 = vpop.f32.mrb[5].mxu1 }
  0xff   :  { %457 = vst [vmem:[%s755_s2 + $0x28] sm:$0xff] %v286_v35  ;;  %473 = vst [vmem:[%s755_s2 + $0xa8] sm:$0xff] %v326_v36  ;;  %v288_v37 = vpop.f32.mrb[6].mxu0  ;;  %v328_v38 = vpop.f32.mrb[6].mxu1 }
 0x100   :  { %458 = vst [vmem:[%s755_s2 + $0x30] sm:$0xff] %v288_v37  ;;  %474 = vst [vmem:[%s755_s2 + $0xb0] sm:$0xff] %v328_v38  ;;  %v290_v39 = vpop.f32.mrb[7].mxu0  ;;  %v330_v40 = vpop.f32.mrb[7].mxu1 }
 0x101   :  { %459 = vst [vmem:[%s755_s2 + $0x38] sm:$0xff] %v290_v39  ;;  %475 = vst [vmem:[%s755_s2 + $0xb8] sm:$0xff] %v330_v40 }
 0x105   :  { %v294_v41 = vpop.f32.mrb[8].mxu0  ;;  %v334_v42 = vpop.f32.mrb[8].mxu1 }
 0x106   :  { %460 = vst [vmem:[%s755_s2 + $0x40] sm:$0xff] %v294_v41  ;;  %476 = vst [vmem:[%s755_s2 + $0xc0] sm:$0xff] %v334_v42  ;;  %v296_v43 = vpop.f32.mrb[9].mxu0  ;;  %v336_v44 = vpop.f32.mrb[9].mxu1 }
 0x107   :  { %461 = vst [vmem:[%s755_s2 + $0x48] sm:$0xff] %v296_v43  ;;  %477 = vst [vmem:[%s755_s2 + $0xc8] sm:$0xff] %v336_v44  ;;  %v298_v45 = vpop.f32.mrb[10].mxu0  ;;  %v338_v46 = vpop.f32.mrb[10].mxu1 }
 0x108   :  { %462 = vst [vmem:[%s755_s2 + $0x50] sm:$0xff] %v298_v45  ;;  %478 = vst [vmem:[%s755_s2 + $0xd0] sm:$0xff] %v338_v46  ;;  %v300_v47 = vpop.f32.mrb[11].mxu0  ;;  %v340_v48 = vpop.f32.mrb[11].mxu1 }
 0x109   :  { %463 = vst [vmem:[%s755_s2 + $0x58] sm:$0xff] %v300_v47  ;;  %479 = vst [vmem:[%s755_s2 + $0xd8] sm:$0xff] %v340_v48 }
 0x10d   :  { %v304_v49 = vpop.f32.mrb[12].mxu0  ;;  %v344_v50 = vpop.f32.mrb[12].mxu1 }
 0x10e   :  { %464 = vst [vmem:[%s755_s2 + $0x60] sm:$0xff] %v304_v49  ;;  %480 = vst [vmem:[%s755_s2 + $0xe0] sm:$0xff] %v344_v50  ;;  %v306_v51 = vpop.f32.mrb[13].mxu0  ;;  %v346_v52 = vpop.f32.mrb[13].mxu1 }
 0x10f   :  { %465 = vst [vmem:[%s755_s2 + $0x68] sm:$0xff] %v306_v51  ;;  %481 = vst [vmem:[%s755_s2 + $0xe8] sm:$0xff] %v346_v52  ;;  %v308_v53 = vpop.f32.mrb[14].mxu0  ;;  %v348_v54 = vpop.f32.mrb[14].mxu1 }
 0x110   :  { %466 = vst [vmem:[%s755_s2 + $0x70] sm:$0xff] %v308_v53  ;;  %482 = vst [vmem:[%s755_s2 + $0xf0] sm:$0xff] %v348_v54  ;;  %v310_v55 = vpop.f32.mrb[15].mxu0  ;;  %v350_v56 = vpop.f32.mrb[15].mxu1 }
 0x111   :  { %467 = vst [vmem:[%s755_s2 + $0x78] sm:$0xff] %v310_v55  ;;  %483 = vst [vmem:[%s755_s2 + $0xf8] sm:$0xff] %v350_v56 }

// kernel: vss_block_forward.14
= control target key start
LH: loop header
LB: loop body
LE: loop exit
PB: predicated region body
PF: predicated region fallthrough
CT: control target
= control target key end

     0   :  { %vm37_vm0 = vcmask 523264   ;;  %vm598_vm1 = vcmask 261120   ;;  %s1269_s0 = inlined_call_operand.vmem [shape: f32[128,64], index: 0, kind: input, shape index: {}]   ;;  %s1270_s4 = inlined_call_operand.vmem [shape: bf16[64,32], index: 4, kind: input, shape index: {}]   ;;  %s1271_s1 = inlined_call_operand.vmem [shape: f32[128,64], index: 1, kind: input, shape index: {}]   ;;  %s1272_s2 = inlined_call_operand.vmem [shape: f32[1,64], index: 2, kind: input, shape index: {}]   ;;  %s1273_s3 = inlined_call_operand.vmem [shape: f32[1,64], index: 3, kind: input, shape index: {}]   ;;  %s1274_s5 = inlined_call_operand.vmem [shape: f32[128,32], index: 5, kind: output, shape index: {}]  }
   0x1   :  { %v21_v0 = vld [vmem:[%s1269_s0] sm:$0xff]  ;;  %v22_v2 = vld [vmem:[%s1269_s0 + $0x8] sm:$0xff]  ;;  %v23_v8 = vld [vmem:[%s1269_s0 + $0x10] sm:$0xff] }
   0x2   :  { %v29_v1 = vld [vmem:[%s1269_s0 + $0x40] sm:$0xff]  ;;  %v38_v3 = vsel %vm37_vm0, %v21_v0, 0.0  ;;  %v30_v5 = vld [vmem:[%s1269_s0 + $0x48] sm:$0xff]  ;;  %v41_v6 = vsel %vm37_vm0, %v22_v2, 0.0  ;;  %v24_v9 = vld [vmem:[%s1269_s0 + $0x18] sm:$0xff]  ;;  %v44_v10 = vsel %vm37_vm0, %v23_v8, 0.0 }
   0x3   :  { %v62_v4 = vsel %vm37_vm0, %v29_v1, 0.0  ;;  %39 = vadd.xlane.f32.xlu0 %v38_v3  ;;  %v65_v7 = vsel %vm37_vm0, %v30_v5, 0.0  ;;  %v47_v11 = vsel %vm37_vm0, %v24_v9, 0.0  ;;  %v834_v12 = vld [vmem:[%s1269_s0 + $0x50] sm:$0xff]  ;;  %v839_v13 = vld [vmem:[%s1269_s0 + $0x58] sm:$0xff]  ;;  %v848_v16 = vld [vmem:[%s1269_s0 + $0x20] sm:$0xff] }
   0x4   :  { %63 = vadd.xlane.f32.xlu1 %v62_v4  ;;  %v68_v14 = vsel %vm37_vm0, %v834_v12, 0.0  ;;  %v71_v15 = vsel %vm37_vm0, %v839_v13, 0.0  ;;  %v853_v17 = vld [vmem:[%s1269_s0 + $0x28] sm:$0xff]  ;;  %v50_v18 = vsel %vm37_vm0, %v848_v16, 0.0  ;;  %v862_v20 = vld [vmem:[%s1269_s0 + $0x60] sm:$0xff]  ;;  %v876_v24 = vld [vmem:[%s1269_s0 + $0x30] sm:$0xff] }
   0x5   :  { %v53_v19 = vsel %vm37_vm0, %v853_v17, 0.0  ;;  %v867_v21 = vld [vmem:[%s1269_s0 + $0x68] sm:$0xff]  ;;  %v74_v22 = vsel %vm37_vm0, %v862_v20, 0.0  ;;  %v881_v25 = vld [vmem:[%s1269_s0 + $0x38] sm:$0xff]  ;;  %v56_v26 = vsel %vm37_vm0, %v876_v24, 0.0  ;;  %v890_v28 = vld [vmem:[%s1269_s0 + $0x70] sm:$0xff] }
   0x6   :  { %v77_v23 = vsel %vm37_vm0, %v867_v21, 0.0  ;;  %v59_v27 = vsel %vm37_vm0, %v881_v25, 0.0  ;;  %v895_v29 = vld [vmem:[%s1269_s0 + $0x78] sm:$0xff]  ;;  %v80_v30 = vsel %vm37_vm0, %v890_v28, 0.0 }
   0x7   :  { %42 = vadd.xlane.f32.xlu0 %v41_v6  ;;  %v83_v31 = vsel %vm37_vm0, %v895_v29, 0.0 }
   0x8   :  { %66 = vadd.xlane.f32.xlu1 %v65_v7 }
   0xb   :  { %45 = vadd.xlane.f32.xlu0 %v44_v10 }
   0xc   :  { %48 = vadd.xlane.f32.xlu1 %v47_v11 }
   0xf   :  { %69 = vadd.xlane.f32.xlu0 %v68_v14 }
  0x10   :  { %72 = vadd.xlane.f32.xlu1 %v71_v15 }
  0x13   :  { %51 = vadd.xlane.f32.xlu0 %v50_v18 }
  0x14   :  { %54 = vadd.xlane.f32.xlu1 %v53_v19 }
  0x17   :  { %75 = vadd.xlane.f32.xlu0 %v74_v22 }
  0x18   :  { %78 = vadd.xlane.f32.xlu1 %v77_v23 }
  0x1b   :  { %57 = vadd.xlane.f32.xlu0 %v56_v26 }
  0x1c   :  { %60 = vadd.xlane.f32.xlu1 %v59_v27 }
  0x1f   :  { %81 = vadd.xlane.f32.xlu0 %v80_v30 }
  0x20   :  { %84 = vadd.xlane.f32.xlu1 %v83_v31 }
  0x90   :  { %v40_v32 = vpop.xlane.xlu0 %39 }
  0x91   :  { %v64_v33 = vpop.xlane.xlu1 %63  ;;  %v87_v34 = vmul.f32 0.015625, %v40_v32 }
  0x92   :  { %v95_v35 = vmul.f32 0.015625, %v64_v33 }
  0x93   :  { %v901_v36 = vsub.f32 %v21_v0, %v87_v34 }
  0x94   :  { %v903_v37 = vsub.f32 %v29_v1, %v95_v35  ;;  %v43_v38 = vpop.xlane.xlu0 %42 }
  0x95   :  { %v67_v39 = vpop.xlane.xlu1 %66  ;;  %v88_v40 = vmul.f32 0.015625, %v43_v38  ;;  %v119_v42 = vmul.f32 %v901_v36, %v901_v36 }
  0x96   :  { %v96_v41 = vmul.f32 0.015625, %v67_v39  ;;  %v127_v43 = vmul.f32 %v903_v37, %v903_v37 }
  0x97   :  { %v909_v44 = vsub.f32 %v22_v2, %v88_v40  ;;  %v135_v46 = vsel %vm37_vm0, %v119_v42, 0.0 }
  0x98   :  { %v911_v45 = vsub.f32 %v30_v5, %v96_v41  ;;  %136 = vadd.xlane.f32.xlu0 %v135_v46  ;;  %v46_v47 = vpop.xlane.xlu0 %45  ;;  %v159_v49 = vsel %vm37_vm0, %v127_v43, 0.0 }
  0x99   :  { %v49_v48 = vpop.xlane.xlu1 %48  ;;  %v89_v50 = vmul.f32 0.015625, %v46_v47  ;;  %v120_v52 = vmul.f32 %v909_v44, %v909_v44 }
  0x9a   :  { %v90_v51 = vmul.f32 0.015625, %v49_v48  ;;  %v128_v53 = vmul.f32 %v911_v45, %v911_v45 }
  0x9b   :  { %v919_v54 = vsub.f32 %v23_v8, %v89_v50  ;;  %v138_v56 = vsel %vm37_vm0, %v120_v52, 0.0 }
  0x9c   :  { %v921_v55 = vsub.f32 %v24_v9, %v90_v51  ;;  %160 = vadd.xlane.f32.xlu0 %v159_v49  ;;  %139 = vadd.xlane.f32.xlu1 %v138_v56  ;;  %v70_v57 = vpop.xlane.xlu0 %69  ;;  %v162_v59 = vsel %vm37_vm0, %v128_v53, 0.0  ;;  %v678_v53 = vld [vmem:[%s1270_s4 + $0x8] sm:$0xff]   ;;  %v679_v56 = vld [vmem:[%s1270_s4 + $0x10] sm:$0xff]  }
  0x9d   :  { %v73_v58 = vpop.xlane.xlu1 %72  ;;  %v97_v60 = vmul.f32 0.015625, %v70_v57  ;;  %v121_v62 = vmul.f32 %v919_v54, %v919_v54  ;;  %v680_v57 = vld [vmem:[%s1270_s4 + $0x18] sm:$0xff]  }
  0x9e   :  { %v98_v61 = vmul.f32 0.015625, %v73_v58  ;;  %v122_v63 = vmul.f32 %v921_v55, %v921_v55  ;;  %v1006_v58 = vld [vmem:[%s1271_s1] sm:$0xff] }
  0x9f   :  { %v930_v0 = vsub.f32 %v834_v12, %v97_v60  ;;  %v141_v2 = vsel %vm37_vm0, %v121_v62, 0.0  ;;  %v1016_v60 = vld [vmem:[%s1271_s1 + $0x40] sm:$0xff] }
  0xa0   :  { %v933_v1 = vsub.f32 %v839_v13, %v98_v61  ;;  %163 = vadd.xlane.f32.xlu1 %v162_v59  ;;  %142 = vadd.xlane.f32.xlu0 %v141_v2  ;;  %v52_v3 = vpop.xlane.xlu0 %51  ;;  %v144_v5 = vsel %vm37_vm0, %v122_v63, 0.0  ;;  %v1011_v59 = vld [vmem:[%s1271_s1 + $0x8] sm:$0xff]  ;;  %v309_v61 = vsub.f32 0.0, %v1006_v58  ;;  %v317_v2 = vsub.f32 0.0, %v1016_v60 }
  0xa1   :  { %v55_v4 = vpop.xlane.xlu1 %54  ;;  %v91_v6 = vmul.f32 0.015625, %v52_v3  ;;  %v129_v8 = vmul.f32 %v930_v0, %v930_v0  ;;  %v310_v62 = vsub.f32 0.0, %v1011_v59  ;;  %v1023_v63 = vld [vmem:[%s1271_s1 + $0x48] sm:$0xff]  ;;  %v1029_v3 = vld [vmem:[%s1271_s1 + $0x10] sm:$0xff] }
  0xa2   :  { %v92_v7 = vmul.f32 0.015625, %v55_v4  ;;  %v130_v9 = vmul.f32 %v933_v1, %v933_v1  ;;  %v325_v4 = vmul.f32 1.442695, %v309_v61 }
  0xa3   :  { %v942_v10 = vsub.f32 %v848_v16, %v91_v6  ;;  %v165_v12 = vsel %vm37_vm0, %v129_v8, 0.0  ;;  %v1035_v6 = vld [vmem:[%s1271_s1 + $0x18] sm:$0xff]  ;;  %v311_v8 = vsub.f32 0.0, %v1029_v3 }
  0xa4   :  { %v945_v11 = vsub.f32 %v853_v17, %v92_v7  ;;  %145 = vadd.xlane.f32.xlu1 %v144_v5  ;;  %166 = vadd.xlane.f32.xlu0 %v165_v12  ;;  %v76_v13 = vpop.xlane.xlu0 %75  ;;  %v168_v15 = vsel %vm37_vm0, %v130_v9, 0.0  ;;  %v318_v5 = vsub.f32 0.0, %v1023_v63  ;;  %v327_v7 = vmul.f32 1.442695, %v310_v62  ;;  %v1041_v9 = vld [vmem:[%s1271_s1 + $0x50] sm:$0xff] }
  0xa5   :  { %v79_v14 = vpop.xlane.xlu1 %78  ;;  %v99_v18 = vmul.f32 0.015625, %v76_v13  ;;  %v123_v22 = vmul.f32 %v942_v10, %v942_v10  ;;  %v341_v12 = vmul.f32 1.442695, %v317_v2  ;;  %v1046_v13 = vld [vmem:[%s1271_s1 + $0x58] sm:$0xff]  ;;  %681 = vpow2.f32 %v325_v4 }
  0xa6   :  { %v100_v19 = vmul.f32 0.015625, %v79_v14  ;;  %v124_v16 = vmul.f32 %v945_v11, %v945_v11  ;;  %v312_v14 = vsub.f32 0.0, %v1035_v6  ;;  %683 = vpow2.f32 %v327_v7  ;;  %v1083_v2 = vld [vmem:[%s1271_s1 + $0x38] sm:$0xff] }
  0xa7   :  { %v954_v23 = vsub.f32 %v862_v20, %v99_v18  ;;  %v147_v26 = vsel %vm37_vm0, %v123_v22, 0.0  ;;  %v319_v18 = vsub.f32 0.0, %v1041_v9  ;;  %v320_v22 = vsub.f32 0.0, %v1046_v13 }
  0xa8   :  { %v957_v17 = vsub.f32 %v867_v21, %v100_v19  ;;  %169 = vadd.xlane.f32.xlu1 %v168_v15  ;;  %148 = vadd.xlane.f32.xlu0 %v147_v26  ;;  %v58_v27 = vpop.xlane.xlu0 %57  ;;  %v150_v31 = vsel %vm37_vm0, %v124_v16, 0.0  ;;  %v343_v15 = vmul.f32 1.442695, %v318_v5  ;;  %v329_v19 = vmul.f32 1.442695, %v311_v8  ;;  %v1054_v16 = vld [vmem:[%s1271_s1 + $0x20] sm:$0xff] }
  0xa9   :  { %v61_v30 = vpop.xlane.xlu1 %60  ;;  %v93_v32 = vmul.f32 0.015625, %v58_v27  ;;  %v131_v34 = vmul.f32 %v954_v23, %v954_v23  ;;  %685 = vpow2.f32 %v341_v12  ;;  %v331_v26 = vmul.f32 1.442695, %v312_v14 }
  0xaa   :  { %v94_v33 = vmul.f32 0.015625, %v61_v30  ;;  %v132_v20 = vmul.f32 %v957_v17, %v957_v17  ;;  %687 = vpow2.f32 %v343_v15  ;;  %v345_v27 = vmul.f32 1.442695, %v319_v18 }
  0xab   :  { %v966_v35 = vsub.f32 %v876_v24, %v93_v32  ;;  %v171_v38 = vsel %vm37_vm0, %v131_v34, 0.0  ;;  %v313_v30 = vsub.f32 0.0, %v1054_v16  ;;  %689 = vpow2.f32 %v329_v19  ;;  %v1060_v32 = vld [vmem:[%s1271_s1 + $0x28] sm:$0xff]  ;;  %v1090_v19 = vld [vmem:[%s1271_s1 + $0x70] sm:$0xff] }
  0xac   :  { %v969_v21 = vsub.f32 %v881_v25, %v94_v33  ;;  %151 = vadd.xlane.f32.xlu1 %v150_v31  ;;  %172 = vadd.xlane.f32.xlu0 %v171_v38  ;;  %v82_v39 = vpop.xlane.xlu0 %81  ;;  %v174_v41 = vsel %vm37_vm0, %v132_v20, 0.0  ;;  %v347_v31 = vmul.f32 1.442695, %v320_v22  ;;  %691 = vpow2.f32 %v331_v26  ;;  %v1066_v20 = vld [vmem:[%s1271_s1 + $0x60] sm:$0xff] }
  0xad   :  { %v85_v40 = vpop.xlane.xlu1 %84  ;;  %v101_v42 = vmul.f32 0.015625, %v82_v39  ;;  %v125_v46 = vmul.f32 %v966_v35, %v966_v35  ;;  %693 = vpow2.f32 %v345_v27  ;;  %v314_v33 = vsub.f32 0.0, %v1060_v32 }
  0xae   :  { %v102_v43 = vmul.f32 0.015625, %v85_v40  ;;  %v126_v24 = vmul.f32 %v969_v21, %v969_v21  ;;  %v333_v34 = vmul.f32 1.442695, %v313_v30  ;;  %695 = vpow2.f32 %v347_v31 }
  0xaf   :  { %v978_v47 = vsub.f32 %v890_v28, %v101_v42  ;;  %v153_v48 = vsel %vm37_vm0, %v125_v46, 0.0  ;;  %v682_v38 = vpop.eup %681  ;;  %v1071_v42 = vld [vmem:[%s1271_s1 + $0x68] sm:$0xff]  ;;  %v316_v15 = vsub.f32 0.0, %v1083_v2 }
  0xb0   :  { %v981_v25 = vsub.f32 %v895_v29, %v102_v43  ;;  %175 = vadd.xlane.f32.xlu1 %v174_v41  ;;  %154 = vadd.xlane.f32.xlu0 %v153_v48  ;;  %v156_v49 = vsel %vm37_vm0, %v126_v24, 0.0  ;;  %v677_v29 = vld [vmem:[%s1270_s4] sm:$0xff]   ;;  %v684_v39 = vpop.eup %683  ;;  %697 = vpow2.f32 %v333_v34  ;;  %v335_v41 = vmul.f32 1.442695, %v314_v33 }
  0xb1   :  { %v133_v50 = vmul.f32 %v978_v47, %v978_v47  ;;  %645 = vmatprep.subr.bf16.mxu0 %v677_v29  ;;  %669 = vmatprep.subr.bf16.mxu1 %v677_v29  ;;  %v321_v43 = vsub.f32 0.0, %v1066_v20  ;;  %v357_v46 = vadd.f32 1.0, %v682_v38  ;;  %v358_v48 = vadd.f32 1.0, %v684_v39 }
  0xb2   :  { %v134_v51 = vmul.f32 %v981_v25, %v981_v25  ;;  %646 = vmatpush3.bf16.msra.mxu0 %v677_v29  ;;  %673 = vmatpush3.bf16.msra.mxu1 %v677_v29  ;;  %699 = vpow2.f32 %v335_v41  ;;  %v339_v34 = vmul.f32 1.442695, %v316_v15  ;;  %v323_v38 = vsub.f32 0.0, %v1090_v19 }
  0xb3   :  { %v177_v52 = vsel %vm37_vm0, %v133_v50, 0.0  ;;  %647 = vmatprep.subr.bf16.mxu0 %v678_v53  ;;  %670 = vmatprep.subr.bf16.mxu1 %v678_v53  ;;  %v686_v40 = vpop.eup %685  ;;  %701 = vrcp.f32 %v357_v46 }
  0xb4   :  { %157 = vadd.xlane.f32.xlu1 %v156_v49  ;;  %178 = vadd.xlane.f32.xlu0 %v177_v52  ;;  %v180_v28 = vsel %vm37_vm0, %v134_v51, 0.0  ;;  %v688_v24 = vpop.eup %687  ;;  %v365_v50 = vadd.f32 1.0, %v686_v40  ;;  %v322_v51 = vsub.f32 0.0, %v1071_v42  ;;  %v349_v52 = vmul.f32 1.442695, %v321_v43  ;;  %v1096_v43 = vld [vmem:[%s1271_s1 + $0x78] sm:$0xff] }
  0xb5   :  { %v690_v49 = vpop.eup %689  ;;  %v366_v29 = vadd.f32 1.0, %v688_v24  ;;  %703 = vrcp.f32 %v358_v48 }
  0xb6   :  { %648 = vmatpush3.bf16.msra.mxu0 %v678_v53  ;;  %674 = vmatpush3.bf16.msra.mxu1 %v678_v53  ;;  %v1078_v53 = vld [vmem:[%s1271_s1 + $0x30] sm:$0xff]  ;;  %705 = vrcp.f32 %v365_v50  ;;  %v351_v62 = vmul.f32 1.442695, %v322_v51 }
  0xb7   :  { %649 = vmatprep.subr.bf16.mxu0 %v679_v56  ;;  %671 = vmatprep.subr.bf16.mxu1 %v679_v56  ;;  %707 = vpow2.f32 %v349_v52  ;;  %v315_v5 = vsub.f32 0.0, %v1078_v53 }
  0xb8   :  { %181 = vadd.xlane.f32.xlu1 %v180_v28  ;;  %v692_v28 = vpop.eup %691  ;;  %709 = vrcp.f32 %v366_v29  ;;  %v324_v29 = vsub.f32 0.0, %v1096_v43 }
  0xb9   :  { %v360_v4 = vadd.f32 1.0, %v692_v28  ;;  %v337_v22 = vmul.f32 1.442695, %v315_v5 }
  0xba   :  { %650 = vmatpush3.bf16.msra.mxu0 %v679_v56  ;;  %675 = vmatpush3.bf16.msra.mxu1 %v679_v56  ;;  %v694_v56 = vpop.eup %693 }
  0xbb   :  { %651 = vmatprep.subr.bf16.mxu0 %v680_v57  ;;  %672 = vmatprep.subr.bf16.mxu1 %v680_v57  ;;  %v696_v61 = vpop.eup %695  ;;  %v367_v7 = vadd.f32 1.0, %v694_v56  ;;  %v353_v56 = vmul.f32 1.442695, %v323_v38 }
  0xbc   :  { %v698_v8 = vpop.eup %697  ;;  %v368_v14 = vadd.f32 1.0, %v696_v61 }
  0xbd   :  { %v361_v27 = vadd.f32 1.0, %v698_v8  ;;  %v700_v30 = vpop.eup %699 }
  0xbe   :  { %652 = vmatpush3.bf16.msra.mxu0 %v680_v57  ;;  %676 = vmatpush3.bf16.msra.mxu1 %v680_v57  ;;  %v359_v57 = vadd.f32 1.0, %v690_v49  ;;  %v702_v39 = vpop.eup %701  ;;  %v362_v50 = vadd.f32 1.0, %v700_v30 }
  0xbf   :  { %v704_v46 = vpop.eup %703 }
  0xc0   :  { %711 = vrcp.f32 %v359_v57  ;;  %v706_v24 = vpop.eup %705 }
  0xc1   :  { %713 = vpow2.f32 %v351_v62  ;;  %v708_v51 = vpop.eup %707 }
  0xc2   :  { %715 = vrcp.f32 %v360_v4  ;;  %v710_v57 = vpop.eup %709 }
  0xc3   :  { %717 = vrcp.f32 %v367_v7 }
  0xc4   :  { %719 = vrcp.f32 %v368_v14 }
  0xca   :  { %v712_v4 = vpop.eup %711 }
  0xcb   :  { %v714_v5 = vpop.eup %713 }
  0xcc   :  { %v716_v14 = vpop.eup %715 }
 0x125   :  { %v137_v12 = vpop.xlane.xlu0 %136 }
 0x126   :  { %v183_v18 = vmul.f32 0.015625, %v137_v12  ;;  %v369_v12 = vadd.f32 1.0, %v708_v51 }
 0x128   :  { %v199_v26 = vadd.f32 1e-05, %v183_v18 }
 0x129   :  { %v140_v31 = vpop.xlane.xlu1 %139  ;;  %v161_v33 = vpop.xlane.xlu0 %160 }
 0x12a   :  { %721 = vrsqrt.f32 %v199_v26  ;;  %v184_v40 = vmul.f32 0.015625, %v140_v31  ;;  %v191_v41 = vmul.f32 0.015625, %v161_v33  ;;  %v718_v26 = vpop.eup %717  ;;  %v1102_v33 = vld [vmem:[%s1272_s2] ss:$0 sm:$0xff] }
 0x12b   :  { %723 = vpow2.f32 %v337_v22  ;;  %v355_v22 = vmul.f32 1.442695, %v324_v29  ;;  %v720_v31 = vpop.eup %719 }
 0x12c   :  { %v200_v48 = vadd.f32 1e-05, %v184_v40  ;;  %v207_v49 = vadd.f32 1e-05, %v191_v41  ;;  %725 = vrcp.f32 %v361_v27  ;;  %v370_v41 = vadd.f32 1.0, %v714_v5 }
 0x12d   :  { %v164_v52 = vpop.xlane.xlu1 %163  ;;  %v143_v28 = vpop.xlane.xlu0 %142  ;;  %727 = vpow2.f32 %v339_v34 }
 0x12e   :  { %729 = vrsqrt.f32 %v200_v48  ;;  %v192_v61 = vmul.f32 0.015625, %v164_v52  ;;  %v185_v62 = vmul.f32 0.015625, %v143_v28  ;;  %v405_v52 = vmul.f32 %v702_v39, %v1006_v58 }
 0x12f   :  { %731 = vrsqrt.f32 %v207_v49  ;;  %v1117_v58 = vmul.f32 %v710_v57, %v1023_v63 }
 0x130   :  { %v208_v7 = vadd.f32 1e-05, %v192_v61  ;;  %v201_v8 = vadd.f32 1e-05, %v185_v62  ;;  %733 = vrcp.f32 %v362_v50  ;;  %v1111_v61 = vld [vmem:[%s1273_s3] ss:$0 sm:$0xff]  ;;  %v406_v62 = vmul.f32 %v704_v46, %v1011_v59 }
 0x131   :  { %v146_v15 = vpop.xlane.xlu1 %145  ;;  %v167_v18 = vpop.xlane.xlu0 %166  ;;  %735 = vpow2.f32 %v353_v56 }
 0x132   :  { %737 = vrsqrt.f32 %v208_v7  ;;  %v186_v27 = vmul.f32 0.015625, %v146_v15  ;;  %v193_v30 = vmul.f32 0.015625, %v167_v18  ;;  %v1120_v15 = vmul.f32 %v712_v4, %v1029_v3 }
 0x133   :  { %739 = vrsqrt.f32 %v201_v8 }
 0x134   :  { %v722_v34 = vpop.eup %721  ;;  %v202_v38 = vadd.f32 1e-05, %v186_v27  ;;  %v209_v40 = vadd.f32 1e-05, %v193_v30  ;;  %741 = vrcp.f32 %v369_v12  ;;  %v1125_v30 = vmul.f32 %v716_v14, %v1035_v6 }
 0x135   :  { %v724_v48 = vpop.eup %723  ;;  %v170_v49 = vpop.xlane.xlu1 %169  ;;  %v231_v51 = vmul.f32 %v722_v34, %v901_v36  ;;  %743 = vpow2.f32 %v355_v22  ;;  %v413_v36 = vmul.f32 %v706_v24, %v1016_v60 }
 0x136   :  { %v149_v50 = vpop.xlane.xlu0 %148  ;;  %v1106_v28 = vpop.eup %725  ;;  %745 = vrsqrt.f32 %v202_v38  ;;  %v194_v29 = vmul.f32 0.015625, %v170_v49  ;;  %v363_v60 = vadd.f32 1.0, %v724_v48  ;;  %v1132_v38 = vmul.f32 %v718_v26, %v1041_v9 }
 0x137   :  { %v187_v56 = vmul.f32 0.015625, %v149_v50  ;;  %v728_v5 = vpop.eup %727  ;;  %747 = vrsqrt.f32 %v209_v40  ;;  %v254_v7 = vmul.f32 %v1102_v33, %v231_v51 }
 0x138   :  { %v730_v39 = vpop.eup %729  ;;  %v210_v8 = vadd.f32 1e-05, %v194_v29  ;;  %749 = vrcp.f32 %v370_v41  ;;  %v364_v48 = vadd.f32 1.0, %v728_v5 }
 0x139   :  { %v203_v12 = vadd.f32 1e-05, %v187_v56  ;;  %v732_v18 = vpop.eup %731  ;;  %v152_v22 = vpop.xlane.xlu1 %151  ;;  %v232_v59 = vmul.f32 %v730_v39, %v909_v44  ;;  %v277_v46 = vadd.f32 %v1111_v61, %v254_v7  ;;  %v1135_v44 = vmul.f32 %v720_v31, %v1046_v13 }
 0x13a   :  { %v173_v27 = vpop.xlane.xlu0 %172  ;;  %v1127_v63 = vpop.eup %733  ;;  %751 = vrsqrt.f32 %v210_v8  ;;  %v188_v24 = vmul.f32 0.015625, %v152_v22  ;;  %v239_v3 = vmul.f32 %v732_v18, %v903_v37 }
 0x13b   :  { %v195_v57 = vmul.f32 0.015625, %v173_v27  ;;  %v736_v4 = vpop.eup %735  ;;  %753 = vrsqrt.f32 %v203_v12  ;;  %v255_v34 = vmul.f32 %v1102_v33, %v232_v59  ;;  %v421_v29 = vmul.f32 %v405_v52, %v277_v46 }
 0x13c   :  { %v738_v6 = vpop.eup %737  ;;  %v204_v14 = vadd.f32 1e-05, %v188_v24  ;;  %v262_v41 = vmul.f32 %v1102_v33, %v239_v3  ;;  %755 = vrcp.f32 %v363_v60 }
 0x13d   :  { %v211_v40 = vadd.f32 1e-05, %v195_v57  ;;  %v740_v49 = vpop.eup %739  ;;  %v176_v50 = vpop.xlane.xlu1 %175  ;;  %v278_v37 = vadd.f32 %v1111_v61, %v255_v34  ;;  %v240_v56 = vmul.f32 %v738_v6, %v911_v45 }
 0x13e   :  { %v155_v51 = vpop.xlane.xlu0 %154  ;;  %v1140_v9 = vpop.eup %741  ;;  %v233_v13 = vmul.f32 %v740_v49, %v919_v54  ;;  %757 = vrsqrt.f32 %v204_v14  ;;  %v196_v26 = vmul.f32 0.015625, %v176_v50  ;;  %v285_v8 = vadd.f32 %v1111_v61, %v262_v41 }
 0x13f   :  { %v189_v31 = vmul.f32 0.015625, %v155_v51  ;;  %v744_v7 = vpop.eup %743  ;;  %759 = vrsqrt.f32 %v211_v40  ;;  %v422_v39 = vmul.f32 %v406_v62, %v278_v37  ;;  %v263_v5 = vmul.f32 %v1102_v33, %v240_v56 }
 0x140   :  { %v746_v12 = vpop.eup %745  ;;  %v212_v18 = vadd.f32 1e-05, %v196_v26  ;;  %v256_v45 = vmul.f32 %v1102_v33, %v233_v13  ;;  %761 = vrcp.f32 %v364_v48  ;;  %v429_v24 = vmul.f32 %v413_v36, %v285_v8 }
 0x141   :  { %v205_v52 = vadd.f32 1e-05, %v189_v31  ;;  %v748_v22 = vpop.eup %747  ;;  %v234_v27 = vmul.f32 %v746_v12, %v921_v55  ;;  %v158_v54 = vpop.xlane.xlu1 %157  ;;  %v437_v46 = vpack.c.bf16 %v422_v39, %v421_v29  ;;  %v286_v60 = vadd.f32 %v1111_v61, %v263_v5 }
 0x142   :  { %v179_v59 = vpop.xlane.xlu0 %178  ;;  %v750_v62 = vpop.eup %749  ;;  %v241_v57 = vmul.f32 %v748_v22, %v930_v0  ;;  %763 = vrsqrt.f32 %v212_v18  ;;  %v190_v3 = vmul.f32 0.015625, %v158_v54  ;;  %v279_v55 = vadd.f32 %v1111_v61, %v256_v45 }
 0x143   :  { %v197_v34 = vmul.f32 0.015625, %v179_v59  ;;  %765 = vrsqrt.f32 %v205_v52  ;;  %653 = vmatprep.mubr.msk.bf16.mxu0 %vm37_vm0, %v437_v46  ;;  %v430_v6 = vmul.f32 %v1117_v58, %v286_v60  ;;  %v257_v14 = vmul.f32 %v1102_v33, %v234_v27 }
 0x144   :  { %v752_v40 = vpop.eup %751  ;;  %v206_v41 = vadd.f32 1e-05, %v190_v3  ;;  %v264_v36 = vmul.f32 %v1102_v33, %v241_v57  ;;  %v371_v49 = vadd.f32 1.0, %v736_v4  ;;  %v372_v56 = vadd.f32 1.0, %v744_v7 }
 0x145   :  { %v213_v48 = vadd.f32 1e-05, %v197_v34  ;;  %v754_v50 = vpop.eup %753  ;;  %v242_v0 = vmul.f32 %v752_v40, %v933_v1  ;;  %v182_v51 = vpop.xlane.xlu1 %181  ;;  %v441_v37 = vpack.c.bf16 %v430_v6, %v429_v24  ;;  %v280_v29 = vadd.f32 %v1111_v61, %v257_v14 }
 0x146   :  { %v235_v58 = vmul.f32 %v754_v50, %v942_v10  ;;  %767 = vrsqrt.f32 %v206_v41  ;;  %v198_v13 = vmul.f32 0.015625, %v182_v51  ;;  %v423_v26 = vmul.f32 %v1120_v15, %v279_v55  ;;  %v756_v31 = vpop.eup %755 }
 0x147   :  { %769 = vrsqrt.f32 %v213_v48  ;;  %661 = vmatprep.mubr.msk.bf16.mxu1 %vm37_vm0, %v441_v37  ;;  %v424_v4 = vmul.f32 %v1125_v30, %v280_v29  ;;  %v265_v39 = vmul.f32 %v1102_v33, %v242_v0  ;;  %v287_v1 = vadd.f32 %v1111_v61, %v264_v36 }
 0x148   :  { %v758_v5 = vpop.eup %757  ;;  %v214_v8 = vadd.f32 1e-05, %v198_v13  ;;  %v258_v7 = vmul.f32 %v1102_v33, %v235_v58  ;;  %771 = vrcp.f32 %v371_v49  ;;  %v409_v30 = vmul.f32 %v1106_v28, %v1054_v16 }
 0x149   :  { %v760_v10 = vpop.eup %759  ;;  %v236_v12 = vmul.f32 %v758_v5, %v945_v11  ;;  %v438_v18 = vpack.c.bf16 %v424_v4, %v423_v26  ;;  %v288_v15 = vadd.f32 %v1111_v61, %v265_v39  ;;  %773 = vrcp.f32 %v372_v56 }
 0x14a   :  { %v762_v52 = vpop.eup %761  ;;  %v243_v45 = vmul.f32 %v760_v10, %v954_v23  ;;  %775 = vrsqrt.f32 %v214_v8  ;;  %v410_v22 = vmul.f32 %v1127_v63, %v1060_v32  ;;  %v431_v27 = vmul.f32 %v1132_v38, %v287_v1 }
 0x14b   :  { %654 = vmatmul.mubr.msk.bf16.vlgmr.msra.gmra.mrb[0].mxu0 %vm37_vm0, %v438_v18  ;;  %v432_v11 = vmul.f32 %v1135_v44, %v288_v15  ;;  %v259_v54 = vmul.f32 %v1102_v33, %v236_v12  ;;  %v281_v59 = vadd.f32 %v1111_v61, %v258_v7  ;;  %v417_v63 = vmul.f32 %v1140_v9, %v1066_v20 }
 0x14c   :  { %v764_v46 = vpop.eup %763  ;;  %v266_v23 = vmul.f32 %v1102_v33, %v243_v45  ;;  %v418_v38 = vmul.f32 %v750_v62, %v1071_v42  ;;  %v411_v9 = vmul.f32 %v756_v31, %v1078_v53  ;;  %v412_v62 = vmul.f32 %v762_v52, %v1083_v2 }
 0x14d   :  { %v766_v60 = vpop.eup %765  ;;  %v244_v24 = vmul.f32 %v764_v46, %v957_v17  ;;  %v442_v16 = vpack.c.bf16 %v432_v11, %v431_v27  ;;  %v282_v28 = vadd.f32 %v1111_v61, %v259_v54  ;;  %v425_v44 = vmul.f32 %v409_v30, %v281_v59 }
 0x14e   :  { %v237_v32 = vmul.f32 %v766_v60, %v966_v35  ;;  %v289_v34 = vadd.f32 %v1111_v61, %v266_v23 }
 0x14f   :  { %662 = vmatmul.mubr.msk.bf16.vlgmr.msra.gmra.mrb[0].mxu1 %vm37_vm0, %v442_v16  ;;  %v426_v57 = vmul.f32 %v410_v22, %v282_v28  ;;  %v267_v3 = vmul.f32 %v1102_v33, %v244_v24 }
 0x150   :  { %v768_v6 = vpop.eup %767  ;;  %v260_v17 = vmul.f32 %v1102_v33, %v237_v32  ;;  %v433_v48 = vmul.f32 %v417_v63, %v289_v34 }
 0x151   :  { %v770_v14 = vpop.eup %769  ;;  %v238_v55 = vmul.f32 %v768_v6, %v969_v21  ;;  %v439_v35 = vpack.c.bf16 %v426_v57, %v425_v44  ;;  %v290_v40 = vadd.f32 %v1111_v61, %v267_v3 }
 0x152   :  { %v772_v20 = vpop.eup %771  ;;  %v245_v42 = vmul.f32 %v770_v14, %v978_v47  ;;  %v283_v50 = vadd.f32 %v1111_v61, %v260_v17 }
 0x153   :  { %v774_v41 = vpop.eup %773  ;;  %657 = vmatprep.mubr.msk.bf16.mxu0 %vm37_vm0, %v439_v35  ;;  %v434_v36 = vmul.f32 %v418_v38, %v290_v40  ;;  %v261_v49 = vmul.f32 %v1102_v33, %v238_v55  ;;  %v419_v53 = vmul.f32 %v772_v20, %v1090_v19 }
 0x154   :  { %v776_v21 = vpop.eup %775  ;;  %v268_v0 = vmul.f32 %v1102_v33, %v245_v42  ;;  %v420_v2 = vmul.f32 %v774_v41, %v1096_v43  ;;  %v427_v29 = vmul.f32 %v411_v9, %v283_v50 }
 0x155   :  { %v246_v51 = vmul.f32 %v776_v21, %v981_v25  ;;  %v443_v37 = vpack.c.bf16 %v434_v36, %v433_v48  ;;  %v284_v47 = vadd.f32 %v1111_v61, %v261_v49 }
 0x156   :  { %v291_v13 = vadd.f32 %v1111_v61, %v268_v0 }
 0x157   :  { %665 = vmatprep.mubr.msk.bf16.mxu1 %vm37_vm0, %v443_v37  ;;  %v428_v56 = vmul.f32 %v412_v62, %v284_v47  ;;  %v269_v58 = vmul.f32 %v1102_v33, %v246_v51 }
 0x158   :  { %v435_v25 = vmul.f32 %v419_v53, %v291_v13 }
 0x159   :  { %v440_v26 = vpack.c.bf16 %v428_v56, %v427_v29  ;;  %v292_v31 = vadd.f32 %v1111_v61, %v269_v58 }
 0x15b   :  { %658 = vmatmul.mubr.msk.bf16.gmra.mrb[4].mxu0 %vm37_vm0, %v440_v26  ;;  %v436_v4 = vmul.f32 %v420_v2, %v292_v31 }
 0x15d   :  { %v444_v39 = vpack.c.bf16 %v436_v4, %v435_v25 }
 0x15f   :  { %666 = vmatmul.mubr.msk.bf16.gmra.mrb[4].mxu1 %vm37_vm0, %v444_v39 }
 0x21e   :  { %v655_v19 = vpop.f32.mrb[0].mxu0 }
 0x21f   :  { %601 = vst.msk [vmem:[%s1274_s5 + $0x10] sm:$0xff] %vm598_vm1, %v655_v19  ;;  %v535_v43 = vpop.f32.mrb[1].mxu0 }
 0x220   :  { %599 = vst.msk [vmem:[%s1274_s5] sm:$0xff] %vm598_vm1, %v535_v43  ;;  %v656_v33 = vpop.f32.mrb[2].mxu0 }
 0x221   :  { %602 = vst.msk [vmem:[%s1274_s5 + $0x18] sm:$0xff] %vm598_vm1, %v656_v33  ;;  %v538_v61 = vpop.f32.mrb[3].mxu0 }
 0x222   :  { %600 = vst.msk [vmem:[%s1274_s5 + $0x8] sm:$0xff] %vm598_vm1, %v538_v61  ;;  %v663_v1 = vpop.f32.mrb[0].mxu1 }
 0x223   :  { %609 = vst.msk [vmem:[%s1274_s5 + $0x50] sm:$0xff] %vm598_vm1, %v663_v1  ;;  %v567_v5 = vpop.f32.mrb[1].mxu1 }
 0x224   :  { %607 = vst.msk [vmem:[%s1274_s5 + $0x40] sm:$0xff] %vm598_vm1, %v567_v5  ;;  %v664_v8 = vpop.f32.mrb[2].mxu1 }
 0x225   :  { %610 = vst.msk [vmem:[%s1274_s5 + $0x58] sm:$0xff] %vm598_vm1, %v664_v8  ;;  %v570_v7 = vpop.f32.mrb[3].mxu1 }
 0x226   :  { %608 = vst.msk [vmem:[%s1274_s5 + $0x48] sm:$0xff] %vm598_vm1, %v570_v7 }
 0x22e   :  { %v659_v10 = vpop.f32.mrb[4].mxu0 }
 0x22f   :  { %605 = vst.msk [vmem:[%s1274_s5 + $0x30] sm:$0xff] %vm598_vm1, %v659_v10  ;;  %v551_v12 = vpop.f32.mrb[5].mxu0 }
 0x230   :  { %603 = vst.msk [vmem:[%s1274_s5 + $0x20] sm:$0xff] %vm598_vm1, %v551_v12  ;;  %v660_v18 = vpop.f32.mrb[6].mxu0 }
 0x231   :  { %606 = vst.msk [vmem:[%s1274_s5 + $0x38] sm:$0xff] %vm598_vm1, %v660_v18  ;;  %v554_v15 = vpop.f32.mrb[7].mxu0 }
 0x232   :  { %604 = vst.msk [vmem:[%s1274_s5 + $0x28] sm:$0xff] %vm598_vm1, %v554_v15  ;;  %v667_v52 = vpop.f32.mrb[4].mxu1 }
 0x233   :  { %613 = vst.msk [vmem:[%s1274_s5 + $0x70] sm:$0xff] %vm598_vm1, %v667_v52  ;;  %v583_v45 = vpop.f32.mrb[5].mxu1 }
 0x234   :  { %611 = vst.msk [vmem:[%s1274_s5 + $0x60] sm:$0xff] %vm598_vm1, %v583_v45  ;;  %v668_v30 = vpop.f32.mrb[6].mxu1 }
 0x235   :  { %614 = vst.msk [vmem:[%s1274_s5 + $0x78] sm:$0xff] %vm598_vm1, %v668_v30  ;;  %v586_v22 = vpop.f32.mrb[7].mxu1 }
 0x236   :  { %612 = vst.msk [vmem:[%s1274_s5 + $0x68] sm:$0xff] %vm598_vm1, %v586_v22 }

// kernel: vss_block_forward.15
= control target key start
LH: loop header
LB: loop body
LE: loop exit
PB: predicated region body
PF: predicated region fallthrough
CT: control target
= control target key end

     0   :  { %vm30_vm0 = vcmask 261120   ;;  %s666_s0 = inlined_call_operand.vmem [shape: f32[128,32], index: 0, kind: input, shape index: {}]   ;;  %s667_s1 = inlined_call_operand.vmem [shape: f32[1,32], index: 1, kind: input, shape index: {}]   ;;  %s668_s2 = inlined_call_operand.vmem [shape: f32[1,32], index: 2, kind: input, shape index: {}]   ;;  %s669_s3 = inlined_call_operand.vmem [shape: f32[128,32], index: 3, kind: output, shape index: {}]  }
   0x1   :  { %v14_v0 = vld [vmem:[%s666_s0] sm:$0xff]  ;;  %v16_v1 = vld [vmem:[%s666_s0 + $0x10] sm:$0xff]  ;;  %v15_v2 = vld [vmem:[%s666_s0 + $0x8] sm:$0xff] }
   0x2   :  { %v31_v3 = vsel %vm30_vm0, %v14_v0, 0.0  ;;  %v37_v4 = vsel %vm30_vm0, %v16_v1, 0.0  ;;  %v17_v5 = vld [vmem:[%s666_s0 + $0x18] sm:$0xff]  ;;  %v34_v6 = vsel %vm30_vm0, %v15_v2, 0.0  ;;  %v18_v8 = vld [vmem:[%s666_s0 + $0x20] sm:$0xff]  ;;  %v19_v9 = vld [vmem:[%s666_s0 + $0x28] sm:$0xff] }
   0x3   :  { %32 = vadd.xlane.f32.xlu0 %v31_v3  ;;  %38 = vadd.xlane.f32.xlu1 %v37_v4  ;;  %v40_v7 = vsel %vm30_vm0, %v17_v5, 0.0  ;;  %v43_v10 = vsel %vm30_vm0, %v18_v8, 0.0  ;;  %v46_v11 = vsel %vm30_vm0, %v19_v9, 0.0  ;;  %v387_v12 = vld [vmem:[%s666_s0 + $0x30] sm:$0xff]  ;;  %v392_v13 = vld [vmem:[%s666_s0 + $0x38] sm:$0xff]  ;;  %v401_v16 = vld [vmem:[%s666_s0 + $0x40] sm:$0xff] }
   0x4   :  { %v49_v14 = vsel %vm30_vm0, %v387_v12, 0.0  ;;  %v52_v15 = vsel %vm30_vm0, %v392_v13, 0.0  ;;  %v406_v17 = vld [vmem:[%s666_s0 + $0x48] sm:$0xff]  ;;  %v55_v18 = vsel %vm30_vm0, %v401_v16, 0.0  ;;  %v415_v20 = vld [vmem:[%s666_s0 + $0x50] sm:$0xff]  ;;  %v420_v21 = vld [vmem:[%s666_s0 + $0x58] sm:$0xff] }
   0x5   :  { %v58_v19 = vsel %vm30_vm0, %v406_v17, 0.0  ;;  %v61_v22 = vsel %vm30_vm0, %v415_v20, 0.0  ;;  %v64_v23 = vsel %vm30_vm0, %v420_v21, 0.0  ;;  %v429_v24 = vld [vmem:[%s666_s0 + $0x60] sm:$0xff]  ;;  %v434_v25 = vld [vmem:[%s666_s0 + $0x68] sm:$0xff]  ;;  %v443_v28 = vld [vmem:[%s666_s0 + $0x70] sm:$0xff] }
   0x6   :  { %v67_v26 = vsel %vm30_vm0, %v429_v24, 0.0  ;;  %v70_v27 = vsel %vm30_vm0, %v434_v25, 0.0  ;;  %v448_v29 = vld [vmem:[%s666_s0 + $0x78] sm:$0xff]  ;;  %v73_v30 = vsel %vm30_vm0, %v443_v28, 0.0 }
   0x7   :  { %35 = vadd.xlane.f32.xlu0 %v34_v6  ;;  %41 = vadd.xlane.f32.xlu1 %v40_v7  ;;  %v76_v31 = vsel %vm30_vm0, %v448_v29, 0.0 }
   0xb   :  { %44 = vadd.xlane.f32.xlu0 %v43_v10  ;;  %47 = vadd.xlane.f32.xlu1 %v46_v11 }
   0xf   :  { %50 = vadd.xlane.f32.xlu0 %v49_v14  ;;  %53 = vadd.xlane.f32.xlu1 %v52_v15 }
  0x13   :  { %56 = vadd.xlane.f32.xlu0 %v55_v18  ;;  %59 = vadd.xlane.f32.xlu1 %v58_v19 }
  0x17   :  { %62 = vadd.xlane.f32.xlu0 %v61_v22  ;;  %65 = vadd.xlane.f32.xlu1 %v64_v23 }
  0x1b   :  { %68 = vadd.xlane.f32.xlu0 %v67_v26  ;;  %71 = vadd.xlane.f32.xlu1 %v70_v27 }
  0x1f   :  { %74 = vadd.xlane.f32.xlu0 %v73_v30  ;;  %77 = vadd.xlane.f32.xlu1 %v76_v31 }
  0x90   :  { %v33_v32 = vpop.xlane.xlu0 %32  ;;  %v39_v33 = vpop.xlane.xlu1 %38 }
  0x91   :  { %v80_v34 = vmul.f32 0.03125, %v33_v32  ;;  %v82_v35 = vmul.f32 0.03125, %v39_v33 }
  0x93   :  { %v454_v36 = vsub.f32 %v14_v0, %v80_v34  ;;  %v456_v37 = vsub.f32 %v16_v1, %v82_v35 }
  0x94   :  { %v36_v38 = vpop.xlane.xlu0 %35  ;;  %v42_v39 = vpop.xlane.xlu1 %41 }
  0x95   :  { %v81_v40 = vmul.f32 0.03125, %v36_v38  ;;  %v83_v41 = vmul.f32 0.03125, %v42_v39  ;;  %v112_v42 = vmul.f32 %v454_v36, %v454_v36  ;;  %v114_v43 = vmul.f32 %v456_v37, %v456_v37 }
  0x97   :  { %v462_v44 = vsub.f32 %v15_v2, %v81_v40  ;;  %v464_v45 = vsub.f32 %v17_v5, %v83_v41  ;;  %v128_v46 = vsel %vm30_vm0, %v112_v42, 0.0  ;;  %v134_v49 = vsel %vm30_vm0, %v114_v43, 0.0 }
  0x98   :  { %129 = vadd.xlane.f32.xlu0 %v128_v46  ;;  %v45_v47 = vpop.xlane.xlu0 %44  ;;  %v48_v48 = vpop.xlane.xlu1 %47 }
  0x99   :  { %v84_v50 = vmul.f32 0.03125, %v45_v47  ;;  %v85_v51 = vmul.f32 0.03125, %v48_v48  ;;  %v113_v52 = vmul.f32 %v462_v44, %v462_v44  ;;  %v115_v53 = vmul.f32 %v464_v45, %v464_v45 }
  0x9b   :  { %v472_v54 = vsub.f32 %v18_v8, %v84_v50  ;;  %v474_v55 = vsub.f32 %v19_v9, %v85_v51  ;;  %v131_v56 = vsel %vm30_vm0, %v113_v52, 0.0  ;;  %v137_v59 = vsel %vm30_vm0, %v115_v53, 0.0 }
  0x9c   :  { %135 = vadd.xlane.f32.xlu0 %v134_v49  ;;  %132 = vadd.xlane.f32.xlu1 %v131_v56  ;;  %v51_v57 = vpop.xlane.xlu0 %50  ;;  %v54_v58 = vpop.xlane.xlu1 %53 }
  0x9d   :  { %v86_v60 = vmul.f32 0.03125, %v51_v57  ;;  %v87_v61 = vmul.f32 0.03125, %v54_v58  ;;  %v116_v62 = vmul.f32 %v472_v54, %v472_v54  ;;  %v117_v63 = vmul.f32 %v474_v55, %v474_v55 }
  0x9f   :  { %v483_v0 = vsub.f32 %v387_v12, %v86_v60  ;;  %v486_v1 = vsub.f32 %v392_v13, %v87_v61  ;;  %v140_v2 = vsel %vm30_vm0, %v116_v62, 0.0  ;;  %v143_v5 = vsel %vm30_vm0, %v117_v63, 0.0 }
  0xa0   :  { %138 = vadd.xlane.f32.xlu1 %v137_v59  ;;  %141 = vadd.xlane.f32.xlu0 %v140_v2  ;;  %v57_v3 = vpop.xlane.xlu0 %56  ;;  %v60_v4 = vpop.xlane.xlu1 %59 }
  0xa1   :  { %v88_v6 = vmul.f32 0.03125, %v57_v3  ;;  %v89_v7 = vmul.f32 0.03125, %v60_v4  ;;  %v118_v8 = vmul.f32 %v483_v0, %v483_v0  ;;  %v119_v9 = vmul.f32 %v486_v1, %v486_v1 }
  0xa3   :  { %v495_v10 = vsub.f32 %v401_v16, %v88_v6  ;;  %v498_v11 = vsub.f32 %v406_v17, %v89_v7  ;;  %v146_v12 = vsel %vm30_vm0, %v118_v8, 0.0  ;;  %v149_v15 = vsel %vm30_vm0, %v119_v9, 0.0 }
  0xa4   :  { %144 = vadd.xlane.f32.xlu1 %v143_v5  ;;  %147 = vadd.xlane.f32.xlu0 %v146_v12  ;;  %v63_v13 = vpop.xlane.xlu0 %62  ;;  %v66_v14 = vpop.xlane.xlu1 %65 }
  0xa5   :  { %v90_v18 = vmul.f32 0.03125, %v63_v13  ;;  %v91_v19 = vmul.f32 0.03125, %v66_v14  ;;  %v120_v22 = vmul.f32 %v495_v10, %v495_v10  ;;  %v121_v16 = vmul.f32 %v498_v11, %v498_v11  ;;  %v547_v14 = vld [vmem:[%s667_s1] ss:$0 sm:$0xff] }
  0xa7   :  { %v507_v23 = vsub.f32 %v415_v20, %v90_v18  ;;  %v510_v17 = vsub.f32 %v420_v21, %v91_v19  ;;  %v152_v26 = vsel %vm30_vm0, %v120_v22, 0.0  ;;  %v155_v31 = vsel %vm30_vm0, %v121_v16, 0.0 }
  0xa8   :  { %150 = vadd.xlane.f32.xlu1 %v149_v15  ;;  %153 = vadd.xlane.f32.xlu0 %v152_v26  ;;  %v69_v27 = vpop.xlane.xlu0 %68  ;;  %v72_v30 = vpop.xlane.xlu1 %71  ;;  %v553_v26 = vld [vmem:[%s668_s2] ss:$0 sm:$0xff] }
  0xa9   :  { %v92_v32 = vmul.f32 0.03125, %v69_v27  ;;  %v93_v33 = vmul.f32 0.03125, %v72_v30  ;;  %v122_v34 = vmul.f32 %v507_v23, %v507_v23  ;;  %v123_v20 = vmul.f32 %v510_v17, %v510_v17 }
  0xab   :  { %v519_v35 = vsub.f32 %v429_v24, %v92_v32  ;;  %v522_v21 = vsub.f32 %v434_v25, %v93_v33  ;;  %v158_v38 = vsel %vm30_vm0, %v122_v34, 0.0  ;;  %v161_v41 = vsel %vm30_vm0, %v123_v20, 0.0 }
  0xac   :  { %156 = vadd.xlane.f32.xlu1 %v155_v31  ;;  %159 = vadd.xlane.f32.xlu0 %v158_v38  ;;  %v75_v39 = vpop.xlane.xlu0 %74  ;;  %v78_v40 = vpop.xlane.xlu1 %77 }
  0xad   :  { %v94_v42 = vmul.f32 0.03125, %v75_v39  ;;  %v95_v43 = vmul.f32 0.03125, %v78_v40  ;;  %v124_v46 = vmul.f32 %v519_v35, %v519_v35  ;;  %v125_v24 = vmul.f32 %v522_v21, %v522_v21 }
  0xaf   :  { %v531_v47 = vsub.f32 %v443_v28, %v94_v42  ;;  %v534_v25 = vsub.f32 %v448_v29, %v95_v43  ;;  %v164_v48 = vsel %vm30_vm0, %v124_v46, 0.0  ;;  %v167_v49 = vsel %vm30_vm0, %v125_v24, 0.0 }
  0xb0   :  { %162 = vadd.xlane.f32.xlu1 %v161_v41  ;;  %165 = vadd.xlane.f32.xlu0 %v164_v48 }
  0xb1   :  { %v126_v50 = vmul.f32 %v531_v47, %v531_v47  ;;  %v127_v51 = vmul.f32 %v534_v25, %v534_v25 }
  0xb3   :  { %v170_v52 = vsel %vm30_vm0, %v126_v50, 0.0  ;;  %v173_v28 = vsel %vm30_vm0, %v127_v51, 0.0 }
  0xb4   :  { %168 = vadd.xlane.f32.xlu1 %v167_v49  ;;  %171 = vadd.xlane.f32.xlu0 %v170_v52 }
  0xb8   :  { %174 = vadd.xlane.f32.xlu1 %v173_v28 }
 0x125   :  { %v130_v29 = vpop.xlane.xlu0 %129 }
 0x126   :  { %v176_v53 = vmul.f32 0.03125, %v130_v29 }
 0x128   :  { %v192_v56 = vadd.f32 1e-05, %v176_v53 }
 0x129   :  { %v133_v57 = vpop.xlane.xlu1 %132  ;;  %v136_v58 = vpop.xlane.xlu0 %135 }
 0x12a   :  { %308 = vrsqrt.f32 %v192_v56  ;;  %v177_v59 = vmul.f32 0.03125, %v133_v57  ;;  %v178_v60 = vmul.f32 0.03125, %v136_v58 }
 0x12c   :  { %v193_v61 = vadd.f32 1e-05, %v177_v59  ;;  %v194_v62 = vadd.f32 1e-05, %v178_v60 }
 0x12d   :  { %v139_v63 = vpop.xlane.xlu1 %138  ;;  %v142_v2 = vpop.xlane.xlu0 %141 }
 0x12e   :  { %310 = vrsqrt.f32 %v193_v61  ;;  %v179_v3 = vmul.f32 0.03125, %v139_v63  ;;  %v180_v4 = vmul.f32 0.03125, %v142_v2 }
 0x12f   :  { %312 = vrsqrt.f32 %v194_v62 }
 0x130   :  { %v195_v5 = vadd.f32 1e-05, %v179_v3  ;;  %v196_v6 = vadd.f32 1e-05, %v180_v4 }
 0x131   :  { %v145_v7 = vpop.xlane.xlu1 %144  ;;  %v148_v8 = vpop.xlane.xlu0 %147 }
 0x132   :  { %314 = vrsqrt.f32 %v195_v5  ;;  %v181_v9 = vmul.f32 0.03125, %v145_v7  ;;  %v182_v12 = vmul.f32 0.03125, %v148_v8 }
 0x133   :  { %316 = vrsqrt.f32 %v196_v6 }
 0x134   :  { %v309_v13 = vpop.eup %308  ;;  %v197_v15 = vadd.f32 1e-05, %v181_v9  ;;  %v198_v18 = vadd.f32 1e-05, %v182_v12 }
 0x135   :  { %v224_v19 = vmul.f32 %v309_v13, %v454_v36  ;;  %v151_v22 = vpop.xlane.xlu1 %150  ;;  %v154_v16 = vpop.xlane.xlu0 %153 }
 0x136   :  { %318 = vrsqrt.f32 %v197_v15  ;;  %v183_v27 = vmul.f32 0.03125, %v151_v22  ;;  %v184_v30 = vmul.f32 0.03125, %v154_v16 }
 0x137   :  { %v247_v31 = vmul.f32 %v547_v14, %v224_v19  ;;  %320 = vrsqrt.f32 %v198_v18 }
 0x138   :  { %v311_v32 = vpop.eup %310  ;;  %v199_v33 = vadd.f32 1e-05, %v183_v27  ;;  %v200_v34 = vadd.f32 1e-05, %v184_v30 }
 0x139   :  { %v313_v20 = vpop.eup %312  ;;  %v270_v38 = vadd.f32 %v553_v26, %v247_v31  ;;  %v225_v36 = vmul.f32 %v311_v32, %v462_v44  ;;  %v157_v39 = vpop.xlane.xlu1 %156 }
 0x13a   :  { %v160_v40 = vpop.xlane.xlu0 %159  ;;  %v226_v41 = vmul.f32 %v313_v20, %v456_v37  ;;  %322 = vrsqrt.f32 %v199_v33  ;;  %v185_v42 = vmul.f32 0.03125, %v157_v39 }
 0x13b   :  { %v186_v43 = vmul.f32 0.03125, %v160_v40  ;;  %286 = vst.msk [vmem:[%s669_s3] sm:$0xff] %vm30_vm0, %v270_v38  ;;  %v248_v46 = vmul.f32 %v547_v14, %v225_v36  ;;  %324 = vrsqrt.f32 %v200_v34 }
 0x13c   :  { %v315_v24 = vpop.eup %314  ;;  %v249_v48 = vmul.f32 %v547_v14, %v226_v41  ;;  %v201_v49 = vadd.f32 1e-05, %v185_v42 }
 0x13d   :  { %v202_v44 = vadd.f32 1e-05, %v186_v43  ;;  %v317_v50 = vpop.eup %316  ;;  %v271_v51 = vadd.f32 %v553_v26, %v248_v46  ;;  %v227_v37 = vmul.f32 %v315_v24, %v464_v45  ;;  %v163_v52 = vpop.xlane.xlu1 %162 }
 0x13e   :  { %v166_v28 = vpop.xlane.xlu0 %165  ;;  %v272_v29 = vadd.f32 %v553_v26, %v249_v48  ;;  %v228_v53 = vmul.f32 %v317_v50, %v472_v54  ;;  %326 = vrsqrt.f32 %v201_v49  ;;  %v187_v56 = vmul.f32 0.03125, %v163_v52 }
 0x13f   :  { %287 = vst.msk [vmem:[%s669_s3 + $0x8] sm:$0xff] %vm30_vm0, %v271_v51  ;;  %v250_v57 = vmul.f32 %v547_v14, %v227_v37  ;;  %328 = vrsqrt.f32 %v202_v44  ;;  %v188_v58 = vmul.f32 0.03125, %v166_v28 }
 0x140   :  { %v319_v59 = vpop.eup %318  ;;  %288 = vst.msk [vmem:[%s669_s3 + $0x10] sm:$0xff] %vm30_vm0, %v272_v29  ;;  %v251_v45 = vmul.f32 %v547_v14, %v228_v53  ;;  %v203_v54 = vadd.f32 1e-05, %v187_v56 }
 0x141   :  { %v321_v60 = vpop.eup %320  ;;  %v273_v61 = vadd.f32 %v553_v26, %v250_v57  ;;  %v229_v62 = vmul.f32 %v319_v59, %v474_v55  ;;  %v204_v63 = vadd.f32 1e-05, %v188_v58  ;;  %v169_v2 = vpop.xlane.xlu1 %168 }
 0x142   :  { %v172_v3 = vpop.xlane.xlu0 %171  ;;  %v274_v4 = vadd.f32 %v553_v26, %v251_v45  ;;  %v230_v5 = vmul.f32 %v321_v60, %v483_v0  ;;  %330 = vrsqrt.f32 %v203_v54  ;;  %v189_v6 = vmul.f32 0.03125, %v169_v2 }
 0x143   :  { %289 = vst.msk [vmem:[%s669_s3 + $0x18] sm:$0xff] %vm30_vm0, %v273_v61  ;;  %v252_v7 = vmul.f32 %v547_v14, %v229_v62  ;;  %332 = vrsqrt.f32 %v204_v63  ;;  %v190_v8 = vmul.f32 0.03125, %v172_v3 }
 0x144   :  { %v323_v9 = vpop.eup %322  ;;  %290 = vst.msk [vmem:[%s669_s3 + $0x20] sm:$0xff] %vm30_vm0, %v274_v4  ;;  %v253_v55 = vmul.f32 %v547_v14, %v230_v5  ;;  %v205_v0 = vadd.f32 1e-05, %v189_v6 }
 0x145   :  { %v325_v12 = vpop.eup %324  ;;  %v275_v13 = vadd.f32 %v553_v26, %v252_v7  ;;  %v231_v15 = vmul.f32 %v323_v9, %v486_v1  ;;  %v206_v18 = vadd.f32 1e-05, %v190_v8  ;;  %v175_v19 = vpop.xlane.xlu1 %174 }
 0x146   :  { %v276_v22 = vadd.f32 %v553_v26, %v253_v55  ;;  %v232_v16 = vmul.f32 %v325_v12, %v495_v10  ;;  %334 = vrsqrt.f32 %v205_v0  ;;  %v191_v27 = vmul.f32 0.03125, %v175_v19 }
 0x147   :  { %291 = vst.msk [vmem:[%s669_s3 + $0x28] sm:$0xff] %vm30_vm0, %v275_v13  ;;  %v254_v30 = vmul.f32 %v547_v14, %v231_v15  ;;  %336 = vrsqrt.f32 %v206_v18 }
 0x148   :  { %v327_v31 = vpop.eup %326  ;;  %292 = vst.msk [vmem:[%s669_s3 + $0x30] sm:$0xff] %vm30_vm0, %v276_v22  ;;  %v255_v1 = vmul.f32 %v547_v14, %v232_v16  ;;  %v207_v32 = vadd.f32 1e-05, %v191_v27 }
 0x149   :  { %v329_v10 = vpop.eup %328  ;;  %v277_v33 = vadd.f32 %v553_v26, %v254_v30  ;;  %v233_v34 = vmul.f32 %v327_v31, %v498_v11 }
 0x14a   :  { %v278_v20 = vadd.f32 %v553_v26, %v255_v1  ;;  %v234_v38 = vmul.f32 %v329_v10, %v507_v23  ;;  %338 = vrsqrt.f32 %v207_v32 }
 0x14b   :  { %293 = vst.msk [vmem:[%s669_s3 + $0x38] sm:$0xff] %vm30_vm0, %v277_v33  ;;  %v256_v36 = vmul.f32 %v547_v14, %v233_v34 }
 0x14c   :  { %v331_v39 = vpop.eup %330  ;;  %294 = vst.msk [vmem:[%s669_s3 + $0x40] sm:$0xff] %vm30_vm0, %v278_v20  ;;  %v257_v11 = vmul.f32 %v547_v14, %v234_v38 }
 0x14d   :  { %v333_v40 = vpop.eup %332  ;;  %v279_v41 = vadd.f32 %v553_v26, %v256_v36  ;;  %v235_v23 = vmul.f32 %v331_v39, %v510_v17 }
 0x14e   :  { %v280_v42 = vadd.f32 %v553_v26, %v257_v11  ;;  %v236_v43 = vmul.f32 %v333_v40, %v519_v35 }
 0x14f   :  { %295 = vst.msk [vmem:[%s669_s3 + $0x48] sm:$0xff] %vm30_vm0, %v279_v41  ;;  %v258_v46 = vmul.f32 %v547_v14, %v235_v23 }
 0x150   :  { %v335_v24 = vpop.eup %334  ;;  %296 = vst.msk [vmem:[%s669_s3 + $0x50] sm:$0xff] %vm30_vm0, %v280_v42  ;;  %v259_v48 = vmul.f32 %v547_v14, %v236_v43 }
 0x151   :  { %v337_v17 = vpop.eup %336  ;;  %v281_v49 = vadd.f32 %v553_v26, %v258_v46  ;;  %v237_v35 = vmul.f32 %v335_v24, %v522_v21 }
 0x152   :  { %v282_v44 = vadd.f32 %v553_v26, %v259_v48  ;;  %v238_v50 = vmul.f32 %v337_v17, %v531_v47 }
 0x153   :  { %297 = vst.msk [vmem:[%s669_s3 + $0x58] sm:$0xff] %vm30_vm0, %v281_v49  ;;  %v260_v51 = vmul.f32 %v547_v14, %v237_v35 }
 0x154   :  { %v339_v37 = vpop.eup %338  ;;  %298 = vst.msk [vmem:[%s669_s3 + $0x60] sm:$0xff] %vm30_vm0, %v282_v44  ;;  %v261_v52 = vmul.f32 %v547_v14, %v238_v50 }
 0x155   :  { %v283_v21 = vadd.f32 %v553_v26, %v260_v51  ;;  %v239_v28 = vmul.f32 %v339_v37, %v534_v25 }
 0x156   :  { %v284_v47 = vadd.f32 %v553_v26, %v261_v52 }
 0x157   :  { %299 = vst.msk [vmem:[%s669_s3 + $0x68] sm:$0xff] %vm30_vm0, %v283_v21  ;;  %v262_v29 = vmul.f32 %v547_v14, %v239_v28 }
 0x158   :  { %300 = vst.msk [vmem:[%s669_s3 + $0x70] sm:$0xff] %vm30_vm0, %v284_v47 }
 0x159   :  { %v285_v53 = vadd.f32 %v553_v26, %v262_v29 }
 0x15b   :  { %301 = vst.msk [vmem:[%s669_s3 + $0x78] sm:$0xff] %vm30_vm0, %v285_v53 }

// kernel: vss_block_forward.13
= control target key start
LH: loop header
LB: loop body
LE: loop exit
PB: predicated region body
PF: predicated region fallthrough
CT: control target
= control target key end

     0   :  { %s5406_s27 = smov 0   ;;  %s5408_s28 = smov 0   ;;  %s6810_s0 = inlined_call_operand.vmem [shape: f32[2,64,256], index: 0, kind: input, shape index: {}]   ;;  %s6811_s1 = inlined_call_operand.vmem [shape: f32[2,64,256], index: 1, kind: input, shape index: {}]   ;;  %s6812_s2 = inlined_call_operand.vmem [shape: f32[16,256], index: 2, kind: input, shape index: {}]   ;;  %s6813_s3 = inlined_call_operand.vmem [shape: f32[2,1024,4], index: 3, kind: input, shape index: {}]   ;;  %s6814_s4 = inlined_call_operand.vmem [shape: f32[2,1024,4], index: 4, kind: input, shape index: {}]   ;;  %s6815_s5 = inlined_call_operand.vmem [shape: f32[1,256], index: 5, kind: input, shape index: {}]   ;;  %s6816_s6 = inlined_call_operand.vmem [shape: f32[1,256], index: 6, kind: input, shape index: {}]   ;;  %s6817_s7 = inlined_call_operand.vmem [shape: f32[4,256], index: 7, kind: input, shape index: {}]   ;;  %s6818_s8 = inlined_call_operand.vmem [shape: f32[2,64,256], index: 8, kind: output, shape index: {}]  }
   0x1   :  { %s5410_s29 = smov 0  }
   0x2 LB: > { %s30_s30 = sadd.s32 1, %s5333_s28  ;;  %p4824_p0 = scmp.ge.s32.totalorder %s5337_s29, 1  ;;  %s5337_s29 = sphi %s5410_s29, %s18_s29   ;;  %s5333_s28 = sphi %s5408_s28, %s6842_s28   ;;  %s5329_s27 = sphi %s5406_s27, %s6841_s27  }
   0x3   : > { %p32_p1 = scmp.ge.s32.totalorder %s30_s30, 2  ;;  %p336_p2 = scmp.lt.s32.totalorder %s5337_s29, 3 }
   0x5   : > { %s6844_s30 = smov (%p32_p1, %s30_s30), 0  ;;  %p337_p3 = pnand %p4824_p0, %p336_p2 }
   0x7   : > { %340 = sbr.rel (%p337_p3) target bundleno = 903 (0x387), region = 52 }
   0xe   : > { %v5427_v0 = vld [vmem:[%s6812_s2] sm:$0xff]  ;;  %v5432_v1 = vld [vmem:[%s6812_s2 + $0x8] sm:$0xff]  ;;  %v5437_v2 = vld [vmem:[%s6812_s2 + $0x10] sm:$0xff]  ;;  %p409_p4 = scmp.lt.s32.totalorder %s5329_s27, 1  ;;  %v5359_v6 = vmov 0.0   ;;  %vm991_vm0 = vcmask 1043456  }
   0xf   : > { %v5442_v3 = vld [vmem:[%s6812_s2 + $0x18] sm:$0xff]  ;;  %v5447_v4 = vld [vmem:[%s6815_s5] sm:$0x3]  ;;  %465 = vst [vmem:[#allocation2] sm:$0xff] %v5359_v6  ;;  %1060 = vmatprep.mubr.f32.mxu0 %v5359_v6  ;;  %2668 = vmatprep.mubr.f32.mxu1 %v5359_v6  ;;  %vm606_vm1 = vcmask 31744   ;;  %s6264_s21 = smov 0  }
  0x10   : > { %v5452_v5 = vld [vmem:[%s6816_s6] sm:$0x3]  ;;  %s6846_s27 = smov (!%p409_p4, %s5329_s27), 1 }
  0x11   : > { %6821 = vst [vmem:[#allocation5_spill] sm:$0xff] %v5452_v5  ;;  %v603_v7 = vld [vmem:[%s6817_s7] sm:$0xff]  ;;  %s5460_s23 = sshll.u32 %s6846_s27, 7  ;;  %s5129_s24 = sshll.u32 %s6846_s27, 10 }
  0x12   : > { %v605_v8 = vcombine.high %v603_v7, %v603_v7  ;;  %s417_s9 = scalar_lea.vmem %s6810_s0, %s5460_s23  ;;  %s428_s12 = scalar_lea.vmem %s6811_s1, %s5460_s23 }
  0x13   : > { %s5473_s15 = scalar_lea.vmem %s6813_s3, %s5129_s24  ;;  %s459_s17 = scalar_lea.vmem %s6818_s8, %s5460_s23 }
  0x14   : > { %4835 = vmatprep.subr.msk.mxu0 %vm991_vm0, %v605_v8  ;;  %4965 = vmatprep.subr.msk.mxu1 %vm991_vm0, %v605_v8  ;;  %v475_v9 = vld [vmem:[%s5473_s15] sm:$0xff]  ;;  %s5483_s20 = scalar_lea.vmem %s6814_s4, %s5129_s24  ;;  %v476_v11 = vld [vmem:[%s5473_s15 + $0x8] sm:$0xff]  ;;  %v477_v13 = vld [vmem:[%s5473_s15 + $0x10] sm:$0xff] }
  0x15   : > { %4836 = vmatpush1.msk.msra.mxu0 %vm991_vm0, %v603_v7  ;;  %4966 = vmatpush1.msk.msra.mxu1 %vm991_vm0, %v603_v7  ;;  %v2085_v10 = vld [vmem:[%s5483_s20] sm:$0xff]  ;;  %v2086_v12 = vld [vmem:[%s5483_s20 + $0x8] sm:$0xff]  ;;  %v2087_v14 = vld [vmem:[%s5483_s20 + $0x10] sm:$0xff] }
  0x16   : > { %4837 = vmatmul.mubr.msk.f32.vlgmr.msra.gmra.mrb[0].mxu0 %vm606_vm1, %v475_v9  ;;  %4967 = vmatmul.mubr.msk.f32.vlgmr.msra.gmra.mrb[0].mxu1 %vm606_vm1, %v2085_v10  ;;  %v478_v15 = vld [vmem:[%s5473_s15 + $0x18] sm:$0xff]  ;;  %v479_v17 = vld [vmem:[%s5473_s15 + $0x20] sm:$0xff]  ;;  %v480_v19 = vld [vmem:[%s5473_s15 + $0x28] sm:$0xff] }
  0x17   : > { %1066 = vmatprep.mubr.f32.mxu0 %v5359_v6  ;;  %2674 = vmatprep.mubr.f32.mxu1 %v5359_v6  ;;  %v2088_v16 = vld [vmem:[%s5483_s20 + $0x18] sm:$0xff]  ;;  %v2089_v18 = vld [vmem:[%s5483_s20 + $0x20] sm:$0xff]  ;;  %v2090_v20 = vld [vmem:[%s5483_s20 + $0x28] sm:$0xff] }
  0x18   : > { %v481_v21 = vld [vmem:[%s5473_s15 + $0x30] sm:$0xff]  ;;  %v482_v23 = vld [vmem:[%s5473_s15 + $0x38] sm:$0xff]  ;;  %v483_v25 = vld [vmem:[%s5473_s15 + $0x40] sm:$0xff] }
  0x19   : > { %v2091_v22 = vld [vmem:[%s5483_s20 + $0x30] sm:$0xff]  ;;  %v2092_v24 = vld [vmem:[%s5483_s20 + $0x38] sm:$0xff]  ;;  %v2093_v26 = vld [vmem:[%s5483_s20 + $0x40] sm:$0xff] }
  0x1a   : > { %4838 = vmatmul.mubr.msk.f32.gmra.mrb[2].mxu0 %vm606_vm1, %v476_v11  ;;  %4968 = vmatmul.mubr.msk.f32.gmra.mrb[2].mxu1 %vm606_vm1, %v2086_v12  ;;  %v484_v27 = vld [vmem:[%s5473_s15 + $0x48] sm:$0xff]  ;;  %v485_v29 = vld [vmem:[%s5473_s15 + $0x50] sm:$0xff]  ;;  %v486_v31 = vld [vmem:[%s5473_s15 + $0x58] sm:$0xff] }
  0x1b   : > { %1072 = vmatprep.mubr.f32.mxu0 %v5359_v6  ;;  %2680 = vmatprep.mubr.f32.mxu1 %v5359_v6  ;;  %v2094_v28 = vld [vmem:[%s5483_s20 + $0x48] sm:$0xff]  ;;  %v2095_v30 = vld [vmem:[%s5483_s20 + $0x50] sm:$0xff]  ;;  %v2096_v32 = vld [vmem:[%s5483_s20 + $0x58] sm:$0xff] }
  0x1c   : > { %v487_v33 = vld [vmem:[%s5473_s15 + $0x60] sm:$0xff]  ;;  %v488_v35 = vld [vmem:[%s5473_s15 + $0x68] sm:$0xff]  ;;  %v489_v37 = vld [vmem:[%s5473_s15 + $0x70] sm:$0xff] }
  0x1d   : > { %v2097_v34 = vld [vmem:[%s5483_s20 + $0x60] sm:$0xff]  ;;  %v2098_v36 = vld [vmem:[%s5483_s20 + $0x68] sm:$0xff]  ;;  %v2099_v38 = vld [vmem:[%s5483_s20 + $0x70] sm:$0xff] }
  0x1e   : > { %4839 = vmatmul.mubr.msk.f32.gmra.mrb[4].mxu0 %vm606_vm1, %v477_v13  ;;  %4969 = vmatmul.mubr.msk.f32.gmra.mrb[4].mxu1 %vm606_vm1, %v2087_v14  ;;  %v490_v39 = vld [vmem:[%s5473_s15 + $0x78] sm:$0xff]  ;;  %v491_v41 = vld [vmem:[%s5473_s15 + $0x80] sm:$0xff]  ;;  %v492_v43 = vld [vmem:[%s5473_s15 + $0x88] sm:$0xff] }
  0x1f   : > { %1078 = vmatprep.mubr.f32.mxu0 %v5359_v6  ;;  %2686 = vmatprep.mubr.f32.mxu1 %v5359_v6  ;;  %v2100_v40 = vld [vmem:[%s5483_s20 + $0x78] sm:$0xff]  ;;  %v2101_v42 = vld [vmem:[%s5483_s20 + $0x80] sm:$0xff]  ;;  %v2102_v44 = vld [vmem:[%s5483_s20 + $0x88] sm:$0xff] }
  0x20   : > { %v493_v45 = vld [vmem:[%s5473_s15 + $0x90] sm:$0xff]  ;;  %v494_v47 = vld [vmem:[%s5473_s15 + $0x98] sm:$0xff]  ;;  %v495_v49 = vld [vmem:[%s5473_s15 + $0xa0] sm:$0xff] }
  0x21   : > { %v2103_v46 = vld [vmem:[%s5483_s20 + $0x90] sm:$0xff]  ;;  %v2104_v48 = vld [vmem:[%s5483_s20 + $0x98] sm:$0xff]  ;;  %v2105_v50 = vld [vmem:[%s5483_s20 + $0xa0] sm:$0xff] }
  0x22   : > { %4840 = vmatmul.mubr.msk.f32.gmra.mrb[6].mxu0 %vm606_vm1, %v478_v15  ;;  %4970 = vmatmul.mubr.msk.f32.gmra.mrb[6].mxu1 %vm606_vm1, %v2088_v16  ;;  %v496_v51 = vld [vmem:[%s5473_s15 + $0xa8] sm:$0xff]  ;;  %v497_v53 = vld [vmem:[%s5473_s15 + $0xb0] sm:$0xff]  ;;  %v498_v55 = vld [vmem:[%s5473_s15 + $0xb8] sm:$0xff] }
  0x23   : > { %1084 = vmatprep.mubr.f32.mxu0 %v5359_v6  ;;  %2692 = vmatprep.mubr.f32.mxu1 %v5359_v6  ;;  %v2106_v52 = vld [vmem:[%s5483_s20 + $0xa8] sm:$0xff]  ;;  %v2107_v54 = vld [vmem:[%s5483_s20 + $0xb0] sm:$0xff]  ;;  %v2108_v56 = vld [vmem:[%s5483_s20 + $0xb8] sm:$0xff] }
  0x24   : > { %v499_v57 = vld [vmem:[%s5473_s15 + $0xc0] sm:$0xff]  ;;  %v500_v59 = vld [vmem:[%s5473_s15 + $0xc8] sm:$0xff]  ;;  %v501_v61 = vld [vmem:[%s5473_s15 + $0xd0] sm:$0xff] }
  0x25   : > { %v2109_v58 = vld [vmem:[%s5483_s20 + $0xc0] sm:$0xff]  ;;  %v2110_v60 = vld [vmem:[%s5483_s20 + $0xc8] sm:$0xff]  ;;  %v2111_v62 = vld [vmem:[%s5483_s20 + $0xd0] sm:$0xff] }
  0x26   : > { %4841 = vmatmul.mubr.msk.f32.gmra.mrb[8].mxu0 %vm606_vm1, %v479_v17  ;;  %4971 = vmatmul.mubr.msk.f32.gmra.mrb[8].mxu1 %vm606_vm1, %v2089_v18  ;;  %v502_v63 = vld [vmem:[%s5473_s15 + $0xd8] sm:$0xff]  ;;  %v503_v8 = vld [vmem:[%s5473_s15 + $0xe0] sm:$0xff]  ;;  %v504_v10 = vld [vmem:[%s5473_s15 + $0xe8] sm:$0xff] }
  0x27   : > { %1090 = vmatprep.mubr.f32.mxu0 %v5359_v6  ;;  %2698 = vmatprep.mubr.f32.mxu1 %v5359_v6  ;;  %v2112_v7 = vld [vmem:[%s5483_s20 + $0xd8] sm:$0xff]  ;;  %v2113_v9 = vld [vmem:[%s5483_s20 + $0xe0] sm:$0xff]  ;;  %v2114_v11 = vld [vmem:[%s5483_s20 + $0xe8] sm:$0xff] }
  0x28   : > { %v505_v12 = vld [vmem:[%s5473_s15 + $0xf0] sm:$0xff]  ;;  %v506_v14 = vld [vmem:[%s5473_s15 + $0xf8] sm:$0xff]  ;;  %v507_v16 = vld [vmem:[%s5473_s15 + $0x100] sm:$0xff] }
  0x29   : > { %v2115_v13 = vld [vmem:[%s5483_s20 + $0xf0] sm:$0xff]  ;;  %v2116_v15 = vld [vmem:[%s5483_s20 + $0xf8] sm:$0xff]  ;;  %v2117_v17 = vld [vmem:[%s5483_s20 + $0x100] sm:$0xff] }
  0x2a   : > { %4842 = vmatmul.mubr.msk.f32.gmra.mrb[10].mxu0 %vm606_vm1, %v480_v19  ;;  %4972 = vmatmul.mubr.msk.f32.gmra.mrb[10].mxu1 %vm606_vm1, %v2090_v20  ;;  %v508_v18 = vld [vmem:[%s5473_s15 + $0x108] sm:$0xff]  ;;  %v509_v20 = vld [vmem:[%s5473_s15 + $0x110] sm:$0xff] }
  0x2b   : > { %1096 = vmatprep.mubr.f32.mxu0 %v5359_v6  ;;  %2704 = vmatprep.mubr.f32.mxu1 %v5359_v6  ;;  %v2118_v19 = vld [vmem:[%s5483_s20 + $0x108] sm:$0xff] }
  0x2e   : > { %4843 = vmatmul.mubr.msk.f32.gmra.mrb[12].mxu0 %vm606_vm1, %v481_v21  ;;  %4973 = vmatmul.mubr.msk.f32.gmra.mrb[12].mxu1 %vm606_vm1, %v2091_v22  ;;  %v2119_v21 = vld [vmem:[%s5483_s20 + $0x110] sm:$0xff]  ;;  %v510_v22 = vld [vmem:[%s5473_s15 + $0x118] sm:$0xff] }
  0x2f   : > { %1102 = vmatprep.mubr.f32.mxu0 %v5359_v6  ;;  %2710 = vmatprep.mubr.f32.mxu1 %v5359_v6 }
  0x32   : > { %4844 = vmatmul.mubr.msk.f32.gmra.mrb[14].mxu0 %vm606_vm1, %v482_v23  ;;  %4974 = vmatmul.mubr.msk.f32.gmra.mrb[14].mxu1 %vm606_vm1, %v2092_v24  ;;  %v2120_v23 = vld [vmem:[%s5483_s20 + $0x118] sm:$0xff]  ;;  %v511_v24 = vld [vmem:[%s5473_s15 + $0x120] sm:$0xff] }
  0x33   : > { %1108 = vmatprep.mubr.f32.mxu0 %v5359_v6  ;;  %2716 = vmatprep.mubr.f32.mxu1 %v5359_v6 }
  0x36   : > { %4845 = vmatmul.mubr.msk.f32.gmra.mrb[16].mxu0 %vm606_vm1, %v483_v25  ;;  %4975 = vmatmul.mubr.msk.f32.gmra.mrb[16].mxu1 %vm606_vm1, %v2093_v26  ;;  %v2121_v25 = vld [vmem:[%s5483_s20 + $0x120] sm:$0xff]  ;;  %v512_v26 = vld [vmem:[%s5473_s15 + $0x128] sm:$0xff] }
  0x37   : > { %1114 = vmatprep.mubr.f32.mxu0 %v5359_v6  ;;  %2722 = vmatprep.mubr.f32.mxu1 %v5359_v6 }
  0x3a   : > { %4846 = vmatmul.mubr.msk.f32.gmra.mrb[18].mxu0 %vm606_vm1, %v484_v27  ;;  %4976 = vmatmul.mubr.msk.f32.gmra.mrb[18].mxu1 %vm606_vm1, %v2094_v28  ;;  %v2122_v27 = vld [vmem:[%s5483_s20 + $0x128] sm:$0xff]  ;;  %v513_v28 = vld [vmem:[%s5473_s15 + $0x130] sm:$0xff] }
  0x3b   : > { %1120 = vmatprep.mubr.f32.mxu0 %v5359_v6  ;;  %2728 = vmatprep.mubr.f32.mxu1 %v5359_v6 }
  0x3e   : > { %4847 = vmatmul.mubr.msk.f32.gmra.mrb[20].mxu0 %vm606_vm1, %v485_v29  ;;  %4977 = vmatmul.mubr.msk.f32.gmra.mrb[20].mxu1 %vm606_vm1, %v2095_v30  ;;  %v2123_v29 = vld [vmem:[%s5483_s20 + $0x130] sm:$0xff]  ;;  %v514_v30 = vld [vmem:[%s5473_s15 + $0x138] sm:$0xff] }
  0x3f   : > { %1126 = vmatprep.mubr.f32.mxu0 %v5359_v6  ;;  %2734 = vmatprep.mubr.f32.mxu1 %v5359_v6 }
  0x42   : > { %4848 = vmatmul.mubr.msk.f32.gmra.mrb[22].mxu0 %vm606_vm1, %v486_v31  ;;  %4978 = vmatmul.mubr.msk.f32.gmra.mrb[22].mxu1 %vm606_vm1, %v2096_v32  ;;  %v2124_v31 = vld [vmem:[%s5483_s20 + $0x138] sm:$0xff]  ;;  %v515_v32 = vld [vmem:[%s5473_s15 + $0x140] sm:$0xff] }
  0x43   : > { %1132 = vmatprep.mubr.f32.mxu0 %v5359_v6  ;;  %2740 = vmatprep.mubr.f32.mxu1 %v5359_v6 }
  0x46   : > { %4849 = vmatmul.mubr.msk.f32.gmra.mrb[24].mxu0 %vm606_vm1, %v487_v33  ;;  %4979 = vmatmul.mubr.msk.f32.gmra.mrb[24].mxu1 %vm606_vm1, %v2097_v34  ;;  %v2125_v33 = vld [vmem:[%s5483_s20 + $0x140] sm:$0xff]  ;;  %v516_v34 = vld [vmem:[%s5473_s15 + $0x148] sm:$0xff] }
  0x47   : > { %1138 = vmatprep.mubr.f32.mxu0 %v5359_v6  ;;  %2746 = vmatprep.mubr.f32.mxu1 %v5359_v6 }
  0x4a   : > { %4850 = vmatmul.mubr.msk.f32.gmra.mrb[26].mxu0 %vm606_vm1, %v488_v35  ;;  %4980 = vmatmul.mubr.msk.f32.gmra.mrb[26].mxu1 %vm606_vm1, %v2098_v36  ;;  %v2126_v35 = vld [vmem:[%s5483_s20 + $0x148] sm:$0xff]  ;;  %v517_v36 = vld [vmem:[%s5473_s15 + $0x150] sm:$0xff] }
  0x4b   : > { %1144 = vmatprep.mubr.f32.mxu0 %v5359_v6  ;;  %2752 = vmatprep.mubr.f32.mxu1 %v5359_v6 }
  0x4e   : > { %4851 = vmatmul.mubr.msk.f32.gmra.mrb[28].mxu0 %vm606_vm1, %v489_v37  ;;  %4981 = vmatmul.mubr.msk.f32.gmra.mrb[28].mxu1 %vm606_vm1, %v2099_v38  ;;  %v2127_v37 = vld [vmem:[%s5483_s20 + $0x150] sm:$0xff]  ;;  %v518_v38 = vld [vmem:[%s5473_s15 + $0x158] sm:$0xff] }
  0x4f   : > { %1150 = vmatprep.mubr.f32.mxu0 %v5359_v6  ;;  %2758 = vmatprep.mubr.f32.mxu1 %v5359_v6 }
  0x52   : > { %4852 = vmatmul.mubr.msk.f32.gmra.mrb[30].mxu0 %vm606_vm1, %v490_v39  ;;  %4982 = vmatmul.mubr.msk.f32.gmra.mrb[30].mxu1 %vm606_vm1, %v2100_v40  ;;  %v2128_v39 = vld [vmem:[%s5483_s20 + $0x158] sm:$0xff]  ;;  %v519_v40 = vld [vmem:[%s5473_s15 + $0x160] sm:$0xff] }
  0x53   : > { %1156 = vmatprep.mubr.f32.mxu0 %v5359_v6  ;;  %2764 = vmatprep.mubr.f32.mxu1 %v5359_v6 }
  0x56   : > { %4853 = vmatmul.mubr.msk.f32.gmra.mrb[32].mxu0 %vm606_vm1, %v491_v41  ;;  %4983 = vmatmul.mubr.msk.f32.gmra.mrb[32].mxu1 %vm606_vm1, %v2101_v42  ;;  %v2129_v41 = vld [vmem:[%s5483_s20 + $0x160] sm:$0xff]  ;;  %v520_v42 = vld [vmem:[%s5473_s15 + $0x168] sm:$0xff] }
  0x57   : > { %1162 = vmatprep.mubr.f32.mxu0 %v5359_v6  ;;  %2770 = vmatprep.mubr.f32.mxu1 %v5359_v6 }
  0x5a   : > { %4854 = vmatmul.mubr.msk.f32.gmra.mrb[34].mxu0 %vm606_vm1, %v492_v43  ;;  %4984 = vmatmul.mubr.msk.f32.gmra.mrb[34].mxu1 %vm606_vm1, %v2102_v44  ;;  %v2130_v43 = vld [vmem:[%s5483_s20 + $0x168] sm:$0xff]  ;;  %v521_v44 = vld [vmem:[%s5473_s15 + $0x170] sm:$0xff] }
  0x5b   : > { %1168 = vmatprep.mubr.f32.mxu0 %v5359_v6  ;;  %2776 = vmatprep.mubr.f32.mxu1 %v5359_v6 }
  0x5e   : > { %4855 = vmatmul.mubr.msk.f32.gmra.mrb[36].mxu0 %vm606_vm1, %v493_v45  ;;  %4985 = vmatmul.mubr.msk.f32.gmra.mrb[36].mxu1 %vm606_vm1, %v2103_v46  ;;  %v2131_v45 = vld [vmem:[%s5483_s20 + $0x170] sm:$0xff]  ;;  %v522_v46 = vld [vmem:[%s5473_s15 + $0x178] sm:$0xff] }
  0x5f   : > { %1174 = vmatprep.mubr.f32.mxu0 %v5359_v6  ;;  %2782 = vmatprep.mubr.f32.mxu1 %v5359_v6 }
  0x62   : > { %4856 = vmatmul.mubr.msk.f32.gmra.mrb[38].mxu0 %vm606_vm1, %v494_v47  ;;  %4986 = vmatmul.mubr.msk.f32.gmra.mrb[38].mxu1 %vm606_vm1, %v2104_v48  ;;  %v2132_v47 = vld [vmem:[%s5483_s20 + $0x178] sm:$0xff]  ;;  %v523_v48 = vld [vmem:[%s5473_s15 + $0x180] sm:$0xff] }
  0x63   : > { %1180 = vmatprep.mubr.f32.mxu0 %v5359_v6  ;;  %2788 = vmatprep.mubr.f32.mxu1 %v5359_v6 }
  0x66   : > { %4857 = vmatmul.mubr.msk.f32.gmra.mrb[40].mxu0 %vm606_vm1, %v495_v49  ;;  %4987 = vmatmul.mubr.msk.f32.gmra.mrb[40].mxu1 %vm606_vm1, %v2105_v50  ;;  %v2133_v49 = vld [vmem:[%s5483_s20 + $0x180] sm:$0xff]  ;;  %v524_v50 = vld [vmem:[%s5473_s15 + $0x188] sm:$0xff] }
  0x67   : > { %1186 = vmatprep.mubr.f32.mxu0 %v5359_v6  ;;  %2794 = vmatprep.mubr.f32.mxu1 %v5359_v6 }
  0x6a   : > { %4858 = vmatmul.mubr.msk.f32.gmra.mrb[42].mxu0 %vm606_vm1, %v496_v51  ;;  %4988 = vmatmul.mubr.msk.f32.gmra.mrb[42].mxu1 %vm606_vm1, %v2106_v52  ;;  %v2134_v51 = vld [vmem:[%s5483_s20 + $0x188] sm:$0xff]  ;;  %v525_v52 = vld [vmem:[%s5473_s15 + $0x190] sm:$0xff] }
  0x6b   : > { %1192 = vmatprep.mubr.f32.mxu0 %v5359_v6  ;;  %2800 = vmatprep.mubr.f32.mxu1 %v5359_v6 }
  0x6e   : > { %4859 = vmatmul.mubr.msk.f32.gmra.mrb[44].mxu0 %vm606_vm1, %v497_v53  ;;  %4989 = vmatmul.mubr.msk.f32.gmra.mrb[44].mxu1 %vm606_vm1, %v2107_v54  ;;  %v2135_v53 = vld [vmem:[%s5483_s20 + $0x190] sm:$0xff]  ;;  %v526_v54 = vld [vmem:[%s5473_s15 + $0x198] sm:$0xff] }
  0x6f   : > { %1198 = vmatprep.mubr.f32.mxu0 %v5359_v6  ;;  %2806 = vmatprep.mubr.f32.mxu1 %v5359_v6 }
  0x72   : > { %4860 = vmatmul.mubr.msk.f32.gmra.mrb[46].mxu0 %vm606_vm1, %v498_v55  ;;  %4990 = vmatmul.mubr.msk.f32.gmra.mrb[46].mxu1 %vm606_vm1, %v2108_v56  ;;  %v2136_v55 = vld [vmem:[%s5483_s20 + $0x198] sm:$0xff]  ;;  %v527_v56 = vld [vmem:[%s5473_s15 + $0x1a0] sm:$0xff] }
  0x73   : > { %1204 = vmatprep.mubr.f32.mxu0 %v5359_v6  ;;  %2812 = vmatprep.mubr.f32.mxu1 %v5359_v6 }
  0x76   : > { %4861 = vmatmul.mubr.msk.f32.gmra.mrb[48].mxu0 %vm606_vm1, %v499_v57  ;;  %4991 = vmatmul.mubr.msk.f32.gmra.mrb[48].mxu1 %vm606_vm1, %v2109_v58  ;;  %v2137_v57 = vld [vmem:[%s5483_s20 + $0x1a0] sm:$0xff]  ;;  %v528_v58 = vld [vmem:[%s5473_s15 + $0x1a8] sm:$0xff] }
  0x77   : > { %1210 = vmatprep.mubr.f32.mxu0 %v5359_v6  ;;  %2818 = vmatprep.mubr.f32.mxu1 %v5359_v6 }
  0x7a   : > { %4862 = vmatmul.mubr.msk.f32.gmra.mrb[50].mxu0 %vm606_vm1, %v500_v59  ;;  %4992 = vmatmul.mubr.msk.f32.gmra.mrb[50].mxu1 %vm606_vm1, %v2110_v60  ;;  %v2138_v59 = vld [vmem:[%s5483_s20 + $0x1a8] sm:$0xff] }
  0x7b   : > { %1216 = vmatprep.mubr.f32.mxu0 %v5359_v6  ;;  %2824 = vmatprep.mubr.f32.mxu1 %v5359_v6 }
  0x7e   : > { %4863 = vmatmul.mubr.msk.f32.gmra.mrb[52].mxu0 %vm606_vm1, %v501_v61  ;;  %4993 = vmatmul.mubr.msk.f32.gmra.mrb[52].mxu1 %vm606_vm1, %v2111_v62 }
  0x7f   : > { %1222 = vmatprep.mubr.f32.mxu0 %v5359_v6  ;;  %2830 = vmatprep.mubr.f32.mxu1 %v5359_v6 }
  0x82   : > { %4864 = vmatmul.mubr.msk.f32.gmra.mrb[54].mxu0 %vm606_vm1, %v502_v63  ;;  %4994 = vmatmul.mubr.msk.f32.gmra.mrb[54].mxu1 %vm606_vm1, %v2112_v7  ;;  %v529_v7 = vld [vmem:[%s5473_s15 + $0x1b0] sm:$0xff] }
  0x83   : > { %1228 = vmatprep.mubr.f32.mxu0 %v5359_v6  ;;  %2836 = vmatprep.mubr.f32.mxu1 %v5359_v6 }
  0x86   : > { %4865 = vmatmul.mubr.msk.f32.gmra.mrb[56].mxu0 %vm606_vm1, %v503_v8  ;;  %4995 = vmatmul.mubr.msk.f32.gmra.mrb[56].mxu1 %vm606_vm1, %v2113_v9  ;;  %v2139_v8 = vld [vmem:[%s5483_s20 + $0x1b0] sm:$0xff] }
  0x87   : > { %1234 = vmatprep.mubr.f32.mxu0 %v5359_v6  ;;  %2842 = vmatprep.mubr.f32.mxu1 %v5359_v6 }
  0x8a   : > { %4866 = vmatmul.mubr.msk.f32.gmra.mrb[58].mxu0 %vm606_vm1, %v504_v10  ;;  %4996 = vmatmul.mubr.msk.f32.gmra.mrb[58].mxu1 %vm606_vm1, %v2114_v11 }
  0x8b   : > { %1240 = vmatprep.mubr.f32.mxu0 %v5359_v6  ;;  %2848 = vmatprep.mubr.f32.mxu1 %v5359_v6 }
  0x8e   : > { %4867 = vmatmul.mubr.msk.f32.gmra.mrb[60].mxu0 %vm606_vm1, %v505_v12  ;;  %4997 = vmatmul.mubr.msk.f32.gmra.mrb[60].mxu1 %vm606_vm1, %v2115_v13  ;;  %v530_v13 = vld [vmem:[%s5473_s15 + $0x1b8] sm:$0xff] }
  0x8f   : > { %1246 = vmatprep.mubr.f32.mxu0 %v5359_v6  ;;  %2854 = vmatprep.mubr.f32.mxu1 %v5359_v6 }
  0x92   : > { %4868 = vmatmul.mubr.msk.f32.gmra.mrb[62].mxu0 %vm606_vm1, %v506_v14  ;;  %4998 = vmatmul.mubr.msk.f32.gmra.mrb[62].mxu1 %vm606_vm1, %v2116_v15  ;;  %v2140_v14 = vld [vmem:[%s5483_s20 + $0x1b8] sm:$0xff] }
  0x93   : > { %1252 = vmatprep.mubr.f32.mxu0 %v5359_v6  ;;  %2860 = vmatprep.mubr.f32.mxu1 %v5359_v6 }
  0x96   : > { %4869 = vmatmul.mubr.msk.f32.gmra.mrb[64].mxu0 %vm606_vm1, %v507_v16  ;;  %4999 = vmatmul.mubr.msk.f32.gmra.mrb[64].mxu1 %vm606_vm1, %v2117_v17 }
  0x97   : > { %1258 = vmatprep.mubr.f32.mxu0 %v5359_v6  ;;  %2866 = vmatprep.mubr.f32.mxu1 %v5359_v6 }
  0x9a   : > { %4870 = vmatmul.mubr.msk.f32.gmra.mrb[66].mxu0 %vm606_vm1, %v508_v18  ;;  %5000 = vmatmul.mubr.msk.f32.gmra.mrb[66].mxu1 %vm606_vm1, %v2118_v19  ;;  %v531_v19 = vld [vmem:[%s5473_s15 + $0x1c0] sm:$0xff] }
  0x9b   : > { %1264 = vmatprep.mubr.f32.mxu0 %v5359_v6  ;;  %2872 = vmatprep.mubr.f32.mxu1 %v5359_v6 }
  0x9e   : > { %4871 = vmatmul.mubr.msk.f32.gmra.mrb[68].mxu0 %vm606_vm1, %v509_v20  ;;  %5001 = vmatmul.mubr.msk.f32.gmra.mrb[68].mxu1 %vm606_vm1, %v2119_v21  ;;  %v2141_v20 = vld [vmem:[%s5483_s20 + $0x1c0] sm:$0xff] }
  0x9f   : > { %1270 = vmatprep.mubr.f32.mxu0 %v5359_v6  ;;  %2878 = vmatprep.mubr.f32.mxu1 %v5359_v6 }
  0xa2   : > { %4872 = vmatmul.mubr.msk.f32.gmra.mrb[70].mxu0 %vm606_vm1, %v510_v22  ;;  %5002 = vmatmul.mubr.msk.f32.gmra.mrb[70].mxu1 %vm606_vm1, %v2120_v23 }
  0xa3   : > { %1276 = vmatprep.mubr.f32.mxu0 %v5359_v6  ;;  %2884 = vmatprep.mubr.f32.mxu1 %v5359_v6 }
  0xa6   : > { %4873 = vmatmul.mubr.msk.f32.gmra.mrb[72].mxu0 %vm606_vm1, %v511_v24  ;;  %5003 = vmatmul.mubr.msk.f32.gmra.mrb[72].mxu1 %vm606_vm1, %v2121_v25  ;;  %v532_v25 = vld [vmem:[%s5473_s15 + $0x1c8] sm:$0xff] }
  0xa7   : > { %1282 = vmatprep.mubr.f32.mxu0 %v5359_v6  ;;  %2890 = vmatprep.mubr.f32.mxu1 %v5359_v6 }
  0xaa   : > { %4874 = vmatmul.mubr.msk.f32.gmra.mrb[74].mxu0 %vm606_vm1, %v512_v26  ;;  %5004 = vmatmul.mubr.msk.f32.gmra.mrb[74].mxu1 %vm606_vm1, %v2122_v27  ;;  %v2142_v26 = vld [vmem:[%s5483_s20 + $0x1c8] sm:$0xff] }
  0xab   : > { %1288 = vmatprep.mubr.f32.mxu0 %v5359_v6  ;;  %2896 = vmatprep.mubr.f32.mxu1 %v5359_v6 }
  0xae   : > { %4875 = vmatmul.mubr.msk.f32.gmra.mrb[76].mxu0 %vm606_vm1, %v513_v28  ;;  %5005 = vmatmul.mubr.msk.f32.gmra.mrb[76].mxu1 %vm606_vm1, %v2123_v29 }
  0xaf   : > { %1294 = vmatprep.mubr.f32.mxu0 %v5359_v6  ;;  %2902 = vmatprep.mubr.f32.mxu1 %v5359_v6 }
  0xb2   : > { %4876 = vmatmul.mubr.msk.f32.gmra.mrb[78].mxu0 %vm606_vm1, %v514_v30  ;;  %5006 = vmatmul.mubr.msk.f32.gmra.mrb[78].mxu1 %vm606_vm1, %v2124_v31  ;;  %v533_v31 = vld [vmem:[%s5473_s15 + $0x1d0] sm:$0xff] }
  0xb3   : > { %1300 = vmatprep.mubr.f32.mxu0 %v5359_v6  ;;  %2908 = vmatprep.mubr.f32.mxu1 %v5359_v6 }
  0xb6   : > { %4877 = vmatmul.mubr.msk.f32.gmra.mrb[80].mxu0 %vm606_vm1, %v515_v32  ;;  %5007 = vmatmul.mubr.msk.f32.gmra.mrb[80].mxu1 %vm606_vm1, %v2125_v33  ;;  %v2143_v32 = vld [vmem:[%s5483_s20 + $0x1d0] sm:$0xff] }
  0xb7   : > { %1306 = vmatprep.mubr.f32.mxu0 %v5359_v6  ;;  %2914 = vmatprep.mubr.f32.mxu1 %v5359_v6 }
  0xba   : > { %4878 = vmatmul.mubr.msk.f32.gmra.mrb[82].mxu0 %vm606_vm1, %v516_v34  ;;  %5008 = vmatmul.mubr.msk.f32.gmra.mrb[82].mxu1 %vm606_vm1, %v2126_v35 }
  0xbb   : > { %1312 = vmatprep.mubr.f32.mxu0 %v5359_v6  ;;  %2920 = vmatprep.mubr.f32.mxu1 %v5359_v6 }
  0xbe   : > { %4879 = vmatmul.mubr.msk.f32.gmra.mrb[84].mxu0 %vm606_vm1, %v517_v36  ;;  %5009 = vmatmul.mubr.msk.f32.gmra.mrb[84].mxu1 %vm606_vm1, %v2127_v37  ;;  %v534_v37 = vld [vmem:[%s5473_s15 + $0x1d8] sm:$0xff] }
  0xbf   : > { %1318 = vmatprep.mubr.f32.mxu0 %v5359_v6  ;;  %2926 = vmatprep.mubr.f32.mxu1 %v5359_v6 }
  0xc2   : > { %4880 = vmatmul.mubr.msk.f32.gmra.mrb[86].mxu0 %vm606_vm1, %v518_v38  ;;  %5010 = vmatmul.mubr.msk.f32.gmra.mrb[86].mxu1 %vm606_vm1, %v2128_v39  ;;  %v2144_v38 = vld [vmem:[%s5483_s20 + $0x1d8] sm:$0xff] }
  0xc3   : > { %1324 = vmatprep.mubr.f32.mxu0 %v5359_v6  ;;  %2932 = vmatprep.mubr.f32.mxu1 %v5359_v6 }
  0xc6   : > { %4881 = vmatmul.mubr.msk.f32.gmra.mrb[88].mxu0 %vm606_vm1, %v519_v40  ;;  %5011 = vmatmul.mubr.msk.f32.gmra.mrb[88].mxu1 %vm606_vm1, %v2129_v41 }
  0xc7   : > { %1330 = vmatprep.mubr.f32.mxu0 %v5359_v6  ;;  %2938 = vmatprep.mubr.f32.mxu1 %v5359_v6 }
  0xca   : > { %4882 = vmatmul.mubr.msk.f32.gmra.mrb[90].mxu0 %vm606_vm1, %v520_v42  ;;  %5012 = vmatmul.mubr.msk.f32.gmra.mrb[90].mxu1 %vm606_vm1, %v2130_v43  ;;  %v535_v43 = vld [vmem:[%s5473_s15 + $0x1e0] sm:$0xff] }
  0xcb   : > { %1336 = vmatprep.mubr.f32.mxu0 %v5359_v6  ;;  %2944 = vmatprep.mubr.f32.mxu1 %v5359_v6 }
  0xce   : > { %4883 = vmatmul.mubr.msk.f32.gmra.mrb[92].mxu0 %vm606_vm1, %v521_v44  ;;  %5013 = vmatmul.mubr.msk.f32.gmra.mrb[92].mxu1 %vm606_vm1, %v2131_v45  ;;  %v2145_v44 = vld [vmem:[%s5483_s20 + $0x1e0] sm:$0xff] }
  0xcf   : > { %1342 = vmatprep.mubr.f32.mxu0 %v5359_v6  ;;  %2950 = vmatprep.mubr.f32.mxu1 %v5359_v6 }
  0xd2   : > { %4884 = vmatmul.mubr.msk.f32.gmra.mrb[94].mxu0 %vm606_vm1, %v522_v46  ;;  %5014 = vmatmul.mubr.msk.f32.gmra.mrb[94].mxu1 %vm606_vm1, %v2132_v47 }
  0xd3   : > { %1348 = vmatprep.mubr.f32.mxu0 %v5359_v6  ;;  %2956 = vmatprep.mubr.f32.mxu1 %v5359_v6 }
  0xd6   : > { %4885 = vmatmul.mubr.msk.f32.gmra.mrb[96].mxu0 %vm606_vm1, %v523_v48  ;;  %5015 = vmatmul.mubr.msk.f32.gmra.mrb[96].mxu1 %vm606_vm1, %v2133_v49  ;;  %v536_v49 = vld [vmem:[%s5473_s15 + $0x1e8] sm:$0xff] }
  0xd7   : > { %1354 = vmatprep.mubr.f32.mxu0 %v5359_v6  ;;  %2962 = vmatprep.mubr.f32.mxu1 %v5359_v6 }
  0xda   : > { %4886 = vmatmul.mubr.msk.f32.gmra.mrb[98].mxu0 %vm606_vm1, %v524_v50  ;;  %5016 = vmatmul.mubr.msk.f32.gmra.mrb[98].mxu1 %vm606_vm1, %v2134_v51  ;;  %v2146_v50 = vld [vmem:[%s5483_s20 + $0x1e8] sm:$0xff] }
  0xdb   : > { %1360 = vmatprep.mubr.f32.mxu0 %v5359_v6  ;;  %2968 = vmatprep.mubr.f32.mxu1 %v5359_v6 }
  0xde   : > { %4887 = vmatmul.mubr.msk.f32.gmra.mrb[100].mxu0 %vm606_vm1, %v525_v52  ;;  %5017 = vmatmul.mubr.msk.f32.gmra.mrb[100].mxu1 %vm606_vm1, %v2135_v53 }
  0xdf   : > { %1366 = vmatprep.mubr.f32.mxu0 %v5359_v6  ;;  %2974 = vmatprep.mubr.f32.mxu1 %v5359_v6 }
  0xe2   : > { %4888 = vmatmul.mubr.msk.f32.gmra.mrb[102].mxu0 %vm606_vm1, %v526_v54  ;;  %5018 = vmatmul.mubr.msk.f32.gmra.mrb[102].mxu1 %vm606_vm1, %v2136_v55  ;;  %v537_v55 = vld [vmem:[%s5473_s15 + $0x1f0] sm:$0xff] }
  0xe3   : > { %1372 = vmatprep.mubr.f32.mxu0 %v5359_v6  ;;  %2980 = vmatprep.mubr.f32.mxu1 %v5359_v6 }
  0xe6   : > { %4889 = vmatmul.mubr.msk.f32.gmra.mrb[104].mxu0 %vm606_vm1, %v527_v56  ;;  %5019 = vmatmul.mubr.msk.f32.gmra.mrb[104].mxu1 %vm606_vm1, %v2137_v57  ;;  %v2147_v56 = vld [vmem:[%s5483_s20 + $0x1f0] sm:$0xff] }
  0xe7   : > { %1378 = vmatprep.mubr.f32.mxu0 %v5359_v6  ;;  %2986 = vmatprep.mubr.f32.mxu1 %v5359_v6 }
  0xe9   : > { %v1062_v60 = vpop.f32.mrb[0].mxu0  ;;  %v2670_v61 = vpop.f32.mrb[0].mxu1 }
  0xea   : > { %1829 = vst [vmem:[#allocation3] sm:$0xff] %v1062_v60  ;;  %v1064_v62 = vpop.f32.mrb[1].mxu0  ;;  %4890 = vmatmul.mubr.msk.f32.gmra.mrb[106].mxu0 %vm606_vm1, %v528_v58  ;;  %3437 = vst [vmem:[#allocation4] sm:$0xff] %v2670_v61  ;;  %v2672_v63 = vpop.f32.mrb[1].mxu1  ;;  %5020 = vmatmul.mubr.msk.f32.gmra.mrb[106].mxu1 %vm606_vm1, %v2138_v59  ;;  %v538_v61 = vld [vmem:[%s5473_s15 + $0x1f8] sm:$0xff] }
  0xeb   : > { %1830 = vst [vmem:[#allocation3 + $0x8] sm:$0xff] %v1064_v62  ;;  %1384 = vmatprep.mubr.f32.mxu0 %v5359_v6  ;;  %3438 = vst [vmem:[#allocation4 + $0x8] sm:$0xff] %v2672_v63  ;;  %2992 = vmatprep.mubr.f32.mxu1 %v5359_v6  ;;  %v2148_v62 = vld [vmem:[%s5483_s20 + $0x1f8] sm:$0xff] }
  0xed   : > { %v1068_v9 = vpop.f32.mrb[2].mxu0  ;;  %v2676_v10 = vpop.f32.mrb[2].mxu1 }
  0xee   : > { %1831 = vst [vmem:[#allocation3 + $0x10] sm:$0xff] %v1068_v9  ;;  %v1070_v11 = vpop.f32.mrb[3].mxu0  ;;  %4891 = vmatmul.mubr.msk.f32.gmra.mrb[108].mxu0 %vm606_vm1, %v529_v7  ;;  %3439 = vst [vmem:[#allocation4 + $0x10] sm:$0xff] %v2676_v10  ;;  %v2678_v12 = vpop.f32.mrb[3].mxu1  ;;  %5021 = vmatmul.mubr.msk.f32.gmra.mrb[108].mxu1 %vm606_vm1, %v2139_v8  ;;  %v539_v10 = vld [vmem:[%s5473_s15 + $0x200] sm:$0xff] }
  0xef   : > { %1832 = vst [vmem:[#allocation3 + $0x18] sm:$0xff] %v1070_v11  ;;  %1390 = vmatprep.mubr.f32.mxu0 %v5359_v6  ;;  %3440 = vst [vmem:[#allocation4 + $0x18] sm:$0xff] %v2678_v12  ;;  %2998 = vmatprep.mubr.f32.mxu1 %v5359_v6  ;;  %v2149_v11 = vld [vmem:[%s5483_s20 + $0x200] sm:$0xff] }
  0xf1   : > { %v1074_v15 = vpop.f32.mrb[4].mxu0  ;;  %v2682_v16 = vpop.f32.mrb[4].mxu1 }
  0xf2   : > { %1833 = vst [vmem:[#allocation3 + $0x20] sm:$0xff] %v1074_v15  ;;  %v1076_v17 = vpop.f32.mrb[5].mxu0  ;;  %4892 = vmatmul.mubr.msk.f32.gmra.mrb[110].mxu0 %vm606_vm1, %v530_v13  ;;  %3441 = vst [vmem:[#allocation4 + $0x20] sm:$0xff] %v2682_v16  ;;  %v2684_v18 = vpop.f32.mrb[5].mxu1  ;;  %5022 = vmatmul.mubr.msk.f32.gmra.mrb[110].mxu1 %vm606_vm1, %v2140_v14  ;;  %v540_v16 = vld [vmem:[%s5473_s15 + $0x208] sm:$0xff] }
  0xf3   : > { %1834 = vst [vmem:[#allocation3 + $0x28] sm:$0xff] %v1076_v17  ;;  %1396 = vmatprep.mubr.f32.mxu0 %v5359_v6  ;;  %3442 = vst [vmem:[#allocation4 + $0x28] sm:$0xff] %v2684_v18  ;;  %3004 = vmatprep.mubr.f32.mxu1 %v5359_v6  ;;  %v2150_v17 = vld [vmem:[%s5483_s20 + $0x208] sm:$0xff] }
  0xf5   : > { %v1080_v21 = vpop.f32.mrb[6].mxu0  ;;  %v2688_v22 = vpop.f32.mrb[6].mxu1 }
  0xf6   : > { %1835 = vst [vmem:[#allocation3 + $0x30] sm:$0xff] %v1080_v21  ;;  %v1082_v23 = vpop.f32.mrb[7].mxu0  ;;  %4893 = vmatmul.mubr.msk.f32.gmra.mrb[112].mxu0 %vm606_vm1, %v531_v19  ;;  %3443 = vst [vmem:[#allocation4 + $0x30] sm:$0xff] %v2688_v22  ;;  %v2690_v24 = vpop.f32.mrb[7].mxu1  ;;  %5023 = vmatmul.mubr.msk.f32.gmra.mrb[112].mxu1 %vm606_vm1, %v2141_v20  ;;  %v5878_v22 = vld [vmem:[#allocation2] sm:$0xff] }
  0xf7   : > { %1836 = vst [vmem:[#allocation3 + $0x38] sm:$0xff] %v1082_v23  ;;  %1402 = vmatprep.mubr.f32.mxu0 %v5359_v6  ;;  %3444 = vst [vmem:[#allocation4 + $0x38] sm:$0xff] %v2690_v24  ;;  %3010 = vmatprep.mubr.f32.mxu1 %v5359_v6  ;;  %v541_v23 = vld [vmem:[%s5473_s15 + $0x210] sm:$0xff] }
  0xf9   : > { %v1086_v27 = vpop.f32.mrb[8].mxu0  ;;  %v2694_v28 = vpop.f32.mrb[8].mxu1 }
  0xfa   : > { %1837 = vst [vmem:[#allocation3 + $0x40] sm:$0xff] %v1086_v27  ;;  %v1088_v29 = vpop.f32.mrb[9].mxu0  ;;  %4894 = vmatmul.mubr.msk.f32.gmra.mrb[114].mxu0 %vm606_vm1, %v532_v25  ;;  %3445 = vst [vmem:[#allocation4 + $0x40] sm:$0xff] %v2694_v28  ;;  %v2696_v30 = vpop.f32.mrb[9].mxu1  ;;  %5024 = vmatmul.mubr.msk.f32.gmra.mrb[114].mxu1 %vm606_vm1, %v2142_v26  ;;  %v542_v28 = vld [vmem:[%s5473_s15 + $0x218] sm:$0xff] }
  0xfb   : > { %1838 = vst [vmem:[#allocation3 + $0x48] sm:$0xff] %v1088_v29  ;;  %1408 = vmatprep.mubr.f32.mxu0 %v5359_v6  ;;  %3446 = vst [vmem:[#allocation4 + $0x48] sm:$0xff] %v2696_v30  ;;  %3016 = vmatprep.mubr.f32.mxu1 %v5359_v6  ;;  %v2152_v29 = vld [vmem:[%s5483_s20 + $0x218] sm:$0xff] }
  0xfd   : > { %v1092_v33 = vpop.f32.mrb[10].mxu0  ;;  %v2700_v34 = vpop.f32.mrb[10].mxu1 }
  0xfe   : > { %1839 = vst [vmem:[#allocation3 + $0x50] sm:$0xff] %v1092_v33  ;;  %v1094_v35 = vpop.f32.mrb[11].mxu0  ;;  %4895 = vmatmul.mubr.msk.f32.gmra.mrb[116].mxu0 %vm606_vm1, %v533_v31  ;;  %3447 = vst [vmem:[#allocation4 + $0x50] sm:$0xff] %v2700_v34  ;;  %v2702_v36 = vpop.f32.mrb[11].mxu1  ;;  %5025 = vmatmul.mubr.msk.f32.gmra.mrb[116].mxu1 %vm606_vm1, %v2143_v32  ;;  %v543_v34 = vld [vmem:[%s5473_s15 + $0x220] sm:$0xff] }
  0xff   : > { %1840 = vst [vmem:[#allocation3 + $0x58] sm:$0xff] %v1094_v35  ;;  %1414 = vmatprep.mubr.f32.mxu0 %v5359_v6  ;;  %3448 = vst [vmem:[#allocation4 + $0x58] sm:$0xff] %v2702_v36  ;;  %3022 = vmatprep.mubr.f32.mxu1 %v5359_v6  ;;  %v2153_v35 = vld [vmem:[%s5483_s20 + $0x220] sm:$0xff] }
 0x101   : > { %v1098_v39 = vpop.f32.mrb[12].mxu0  ;;  %v2706_v40 = vpop.f32.mrb[12].mxu1 }
 0x102   : > { %1841 = vst [vmem:[#allocation3 + $0x60] sm:$0xff] %v1098_v39  ;;  %v1100_v41 = vpop.f32.mrb[13].mxu0  ;;  %4896 = vmatmul.mubr.msk.f32.gmra.mrb[118].mxu0 %vm606_vm1, %v534_v37  ;;  %3449 = vst [vmem:[#allocation4 + $0x60] sm:$0xff] %v2706_v40  ;;  %v2708_v42 = vpop.f32.mrb[13].mxu1  ;;  %5026 = vmatmul.mubr.msk.f32.gmra.mrb[118].mxu1 %vm606_vm1, %v2144_v38  ;;  %v544_v40 = vld [vmem:[%s5473_s15 + $0x228] sm:$0xff] }
 0x103   : > { %1842 = vst [vmem:[#allocation3 + $0x68] sm:$0xff] %v1100_v41  ;;  %1420 = vmatprep.mubr.f32.mxu0 %v5359_v6  ;;  %3450 = vst [vmem:[#allocation4 + $0x68] sm:$0xff] %v2708_v42  ;;  %3028 = vmatprep.mubr.f32.mxu1 %v5359_v6  ;;  %v2154_v41 = vld [vmem:[%s5483_s20 + $0x228] sm:$0xff] }
 0x105   : > { %v1104_v45 = vpop.f32.mrb[14].mxu0  ;;  %v2712_v46 = vpop.f32.mrb[14].mxu1 }
 0x106   : > { %1843 = vst [vmem:[#allocation3 + $0x70] sm:$0xff] %v1104_v45  ;;  %v1106_v47 = vpop.f32.mrb[15].mxu0  ;;  %4897 = vmatmul.mubr.msk.f32.gmra.mrb[120].mxu0 %vm606_vm1, %v535_v43  ;;  %3451 = vst [vmem:[#allocation4 + $0x70] sm:$0xff] %v2712_v46  ;;  %v2714_v48 = vpop.f32.mrb[15].mxu1  ;;  %5027 = vmatmul.mubr.msk.f32.gmra.mrb[120].mxu1 %vm606_vm1, %v2145_v44  ;;  %v545_v46 = vld [vmem:[%s5473_s15 + $0x230] sm:$0xff] }
 0x107   : > { %1844 = vst [vmem:[#allocation3 + $0x78] sm:$0xff] %v1106_v47  ;;  %1426 = vmatprep.mubr.f32.mxu0 %v5359_v6  ;;  %3452 = vst [vmem:[#allocation4 + $0x78] sm:$0xff] %v2714_v48  ;;  %3034 = vmatprep.mubr.f32.mxu1 %v5359_v6  ;;  %v2155_v47 = vld [vmem:[%s5483_s20 + $0x230] sm:$0xff] }
 0x109   : > { %v1110_v51 = vpop.f32.mrb[16].mxu0  ;;  %v2718_v52 = vpop.f32.mrb[16].mxu1 }
 0x10a   : > { %1845 = vst [vmem:[#allocation3 + $0x80] sm:$0xff] %v1110_v51  ;;  %v1112_v53 = vpop.f32.mrb[17].mxu0  ;;  %4898 = vmatmul.mubr.msk.f32.gmra.mrb[122].mxu0 %vm606_vm1, %v536_v49  ;;  %3453 = vst [vmem:[#allocation4 + $0x80] sm:$0xff] %v2718_v52  ;;  %v2720_v54 = vpop.f32.mrb[17].mxu1  ;;  %5028 = vmatmul.mubr.msk.f32.gmra.mrb[122].mxu1 %vm606_vm1, %v2146_v50  ;;  %v546_v52 = vld [vmem:[%s5473_s15 + $0x238] sm:$0xff] }
 0x10b   : > { %1846 = vst [vmem:[#allocation3 + $0x88] sm:$0xff] %v1112_v53  ;;  %1432 = vmatprep.mubr.f32.mxu0 %v5359_v6  ;;  %3454 = vst [vmem:[#allocation4 + $0x88] sm:$0xff] %v2720_v54  ;;  %3040 = vmatprep.mubr.f32.mxu1 %v5359_v6  ;;  %v2156_v53 = vld [vmem:[%s5483_s20 + $0x238] sm:$0xff] }
 0x10d   : > { %v1116_v57 = vpop.f32.mrb[18].mxu0  ;;  %v2724_v58 = vpop.f32.mrb[18].mxu1 }
 0x10e   : > { %1847 = vst [vmem:[#allocation3 + $0x90] sm:$0xff] %v1116_v57  ;;  %v1118_v59 = vpop.f32.mrb[19].mxu0  ;;  %4899 = vmatmul.mubr.msk.f32.gmra.mrb[124].mxu0 %vm606_vm1, %v537_v55  ;;  %3455 = vst [vmem:[#allocation4 + $0x90] sm:$0xff] %v2724_v58  ;;  %v2726_v60 = vpop.f32.mrb[19].mxu1  ;;  %5029 = vmatmul.mubr.msk.f32.gmra.mrb[124].mxu1 %vm606_vm1, %v2147_v56  ;;  %v547_v58 = vld [vmem:[%s5473_s15 + $0x240] sm:$0xff] }
 0x10f   : > { %1848 = vst [vmem:[#allocation3 + $0x98] sm:$0xff] %v1118_v59  ;;  %1438 = vmatprep.mubr.f32.mxu0 %v5359_v6  ;;  %3456 = vst [vmem:[#allocation4 + $0x98] sm:$0xff] %v2726_v60  ;;  %3046 = vmatprep.mubr.f32.mxu1 %v5359_v6  ;;  %v2157_v59 = vld [vmem:[%s5483_s20 + $0x240] sm:$0xff] }
 0x111   : > { %v1122_v63 = vpop.f32.mrb[20].mxu0  ;;  %v2730_v7 = vpop.f32.mrb[20].mxu1 }
 0x112   : > { %1849 = vst [vmem:[#allocation3 + $0xa0] sm:$0xff] %v1122_v63  ;;  %v1124_v8 = vpop.f32.mrb[21].mxu0  ;;  %4900 = vmatmul.mubr.msk.f32.gmra.mrb[126].mxu0 %vm606_vm1, %v538_v61  ;;  %3457 = vst [vmem:[#allocation4 + $0xa0] sm:$0xff] %v2730_v7  ;;  %v2732_v9 = vpop.f32.mrb[21].mxu1  ;;  %5030 = vmatmul.mubr.msk.f32.gmra.mrb[126].mxu1 %vm606_vm1, %v2148_v62  ;;  %v548_v7 = vld [vmem:[%s5473_s15 + $0x248] sm:$0xff] }
 0x113   : > { %1850 = vst [vmem:[#allocation3 + $0xa8] sm:$0xff] %v1124_v8  ;;  %1444 = vmatprep.mubr.f32.mxu0 %v5359_v6  ;;  %3458 = vst [vmem:[#allocation4 + $0xa8] sm:$0xff] %v2732_v9  ;;  %3052 = vmatprep.mubr.f32.mxu1 %v5359_v6  ;;  %v2158_v8 = vld [vmem:[%s5483_s20 + $0x248] sm:$0xff] }
 0x115   : > { %v1128_v12 = vpop.f32.mrb[22].mxu0  ;;  %v2736_v13 = vpop.f32.mrb[22].mxu1 }
 0x116   : > { %1851 = vst [vmem:[#allocation3 + $0xb0] sm:$0xff] %v1128_v12  ;;  %v1130_v14 = vpop.f32.mrb[23].mxu0  ;;  %4901 = vmatmul.mubr.msk.f32.gmra.mrb[128].mxu0 %vm606_vm1, %v539_v10  ;;  %3459 = vst [vmem:[#allocation4 + $0xb0] sm:$0xff] %v2736_v13  ;;  %v2738_v15 = vpop.f32.mrb[23].mxu1  ;;  %5031 = vmatmul.mubr.msk.f32.gmra.mrb[128].mxu1 %vm606_vm1, %v2149_v11  ;;  %v549_v13 = vld [vmem:[%s5473_s15 + $0x250] sm:$0xff] }
 0x117   : > { %1852 = vst [vmem:[#allocation3 + $0xb8] sm:$0xff] %v1130_v14  ;;  %1450 = vmatprep.mubr.f32.mxu0 %v5359_v6  ;;  %3460 = vst [vmem:[#allocation4 + $0xb8] sm:$0xff] %v2738_v15  ;;  %3058 = vmatprep.mubr.f32.mxu1 %v5359_v6  ;;  %v2151_v6 = vld [vmem:[%s5483_s20 + $0x210] sm:$0xff] }
 0x118   : > { %v2159_v14 = vld [vmem:[%s5483_s20 + $0x250] sm:$0xff] }
 0x119   : > { %v1134_v18 = vpop.f32.mrb[24].mxu0  ;;  %v2742_v19 = vpop.f32.mrb[24].mxu1 }
 0x11a   : > { %1853 = vst [vmem:[#allocation3 + $0xc0] sm:$0xff] %v1134_v18  ;;  %v1136_v20 = vpop.f32.mrb[25].mxu0  ;;  %4902 = vmatmul.mubr.msk.f32.gmra.mrb[130].mxu0 %vm606_vm1, %v540_v16  ;;  %3461 = vst [vmem:[#allocation4 + $0xc0] sm:$0xff] %v2742_v19  ;;  %v2744_v21 = vpop.f32.mrb[25].mxu1  ;;  %5032 = vmatmul.mubr.msk.f32.gmra.mrb[130].mxu1 %vm606_vm1, %v2150_v17  ;;  %v550_v19 = vld [vmem:[%s5473_s15 + $0x258] sm:$0xff] }
 0x11b   : > { %1854 = vst [vmem:[#allocation3 + $0xc8] sm:$0xff] %v1136_v20  ;;  %1456 = vmatprep.mubr.f32.mxu0 %v5878_v22  ;;  %3462 = vst [vmem:[#allocation4 + $0xc8] sm:$0xff] %v2744_v21  ;;  %3064 = vmatprep.mubr.f32.mxu1 %v5878_v22  ;;  %v2160_v20 = vld [vmem:[%s5483_s20 + $0x258] sm:$0xff] }
 0x11d   : > { %v1140_v24 = vpop.f32.mrb[26].mxu0  ;;  %v2748_v25 = vpop.f32.mrb[26].mxu1 }
 0x11e   : > { %1855 = vst [vmem:[#allocation3 + $0xd0] sm:$0xff] %v1140_v24  ;;  %v1142_v26 = vpop.f32.mrb[27].mxu0  ;;  %4903 = vmatmul.mubr.msk.f32.gmra.mrb[132].mxu0 %vm606_vm1, %v541_v23  ;;  %3463 = vst [vmem:[#allocation4 + $0xd0] sm:$0xff] %v2748_v25  ;;  %v2750_v27 = vpop.f32.mrb[27].mxu1  ;;  %5033 = vmatmul.mubr.msk.f32.gmra.mrb[132].mxu1 %vm606_vm1, %v2151_v6  ;;  %v551_v25 = vld [vmem:[%s5473_s15 + $0x260] sm:$0xff] }
 0x11f   : > { %1856 = vst [vmem:[#allocation3 + $0xd8] sm:$0xff] %v1142_v26  ;;  %1462 = vmatprep.mubr.f32.mxu0 %v5878_v22  ;;  %3464 = vst [vmem:[#allocation4 + $0xd8] sm:$0xff] %v2750_v27  ;;  %3070 = vmatprep.mubr.f32.mxu1 %v5878_v22  ;;  %v2161_v26 = vld [vmem:[%s5483_s20 + $0x260] sm:$0xff] }
 0x121   : > { %v1146_v30 = vpop.f32.mrb[28].mxu0  ;;  %v2754_v31 = vpop.f32.mrb[28].mxu1 }
 0x122   : > { %1857 = vst [vmem:[#allocation3 + $0xe0] sm:$0xff] %v1146_v30  ;;  %v1148_v32 = vpop.f32.mrb[29].mxu0  ;;  %4904 = vmatmul.mubr.msk.f32.gmra.mrb[134].mxu0 %vm606_vm1, %v542_v28  ;;  %3465 = vst [vmem:[#allocation4 + $0xe0] sm:$0xff] %v2754_v31  ;;  %v2756_v33 = vpop.f32.mrb[29].mxu1  ;;  %5034 = vmatmul.mubr.msk.f32.gmra.mrb[134].mxu1 %vm606_vm1, %v2152_v29  ;;  %v552_v31 = vld [vmem:[%s5473_s15 + $0x268] sm:$0xff] }
 0x123   : > { %1858 = vst [vmem:[#allocation3 + $0xe8] sm:$0xff] %v1148_v32  ;;  %1468 = vmatprep.mubr.f32.mxu0 %v5878_v22  ;;  %3466 = vst [vmem:[#allocation4 + $0xe8] sm:$0xff] %v2756_v33  ;;  %3076 = vmatprep.mubr.f32.mxu1 %v5878_v22  ;;  %v2162_v32 = vld [vmem:[%s5483_s20 + $0x268] sm:$0xff] }
 0x125   : > { %v1152_v36 = vpop.f32.mrb[30].mxu0  ;;  %v2760_v37 = vpop.f32.mrb[30].mxu1 }
 0x126   : > { %1859 = vst [vmem:[#allocation3 + $0xf0] sm:$0xff] %v1152_v36  ;;  %v1154_v38 = vpop.f32.mrb[31].mxu0  ;;  %4905 = vmatmul.mubr.msk.f32.gmra.mrb[136].mxu0 %vm606_vm1, %v543_v34  ;;  %3467 = vst [vmem:[#allocation4 + $0xf0] sm:$0xff] %v2760_v37  ;;  %v2762_v39 = vpop.f32.mrb[31].mxu1  ;;  %5035 = vmatmul.mubr.msk.f32.gmra.mrb[136].mxu1 %vm606_vm1, %v2153_v35  ;;  %v553_v37 = vld [vmem:[%s5473_s15 + $0x270] sm:$0xff] }
 0x127   : > { %1860 = vst [vmem:[#allocation3 + $0xf8] sm:$0xff] %v1154_v38  ;;  %1474 = vmatprep.mubr.f32.mxu0 %v5878_v22  ;;  %3468 = vst [vmem:[#allocation4 + $0xf8] sm:$0xff] %v2762_v39  ;;  %3082 = vmatprep.mubr.f32.mxu1 %v5878_v22  ;;  %v2163_v38 = vld [vmem:[%s5483_s20 + $0x270] sm:$0xff] }
 0x129   : > { %v1158_v42 = vpop.f32.mrb[32].mxu0  ;;  %v2766_v43 = vpop.f32.mrb[32].mxu1 }
 0x12a   : > { %1861 = vst [vmem:[#allocation3 + $0x100] sm:$0xff] %v1158_v42  ;;  %v1160_v44 = vpop.f32.mrb[33].mxu0  ;;  %4906 = vmatmul.mubr.msk.f32.gmra.mrb[138].mxu0 %vm606_vm1, %v544_v40  ;;  %3469 = vst [vmem:[#allocation4 + $0x100] sm:$0xff] %v2766_v43  ;;  %v2768_v45 = vpop.f32.mrb[33].mxu1  ;;  %5036 = vmatmul.mubr.msk.f32.gmra.mrb[138].mxu1 %vm606_vm1, %v2154_v41  ;;  %v554_v43 = vld [vmem:[%s5473_s15 + $0x278] sm:$0xff] }
 0x12b   : > { %1862 = vst [vmem:[#allocation3 + $0x108] sm:$0xff] %v1160_v44  ;;  %1480 = vmatprep.mubr.f32.mxu0 %v5878_v22  ;;  %3470 = vst [vmem:[#allocation4 + $0x108] sm:$0xff] %v2768_v45  ;;  %3088 = vmatprep.mubr.f32.mxu1 %v5878_v22  ;;  %v2164_v44 = vld [vmem:[%s5483_s20 + $0x278] sm:$0xff] }
 0x12d   : > { %v1164_v48 = vpop.f32.mrb[34].mxu0  ;;  %v2772_v49 = vpop.f32.mrb[34].mxu1 }
 0x12e   : > { %1863 = vst [vmem:[#allocation3 + $0x110] sm:$0xff] %v1164_v48  ;;  %v1166_v50 = vpop.f32.mrb[35].mxu0  ;;  %4907 = vmatmul.mubr.msk.f32.gmra.mrb[140].mxu0 %vm606_vm1, %v545_v46  ;;  %3471 = vst [vmem:[#allocation4 + $0x110] sm:$0xff] %v2772_v49  ;;  %v2774_v51 = vpop.f32.mrb[35].mxu1  ;;  %5037 = vmatmul.mubr.msk.f32.gmra.mrb[140].mxu1 %vm606_vm1, %v2155_v47  ;;  %v555_v49 = vld [vmem:[%s5473_s15 + $0x280] sm:$0xff] }
 0x12f   : > { %1864 = vst [vmem:[#allocation3 + $0x118] sm:$0xff] %v1166_v50  ;;  %1486 = vmatprep.mubr.f32.mxu0 %v5878_v22  ;;  %3472 = vst [vmem:[#allocation4 + $0x118] sm:$0xff] %v2774_v51  ;;  %3094 = vmatprep.mubr.f32.mxu1 %v5878_v22  ;;  %v2165_v50 = vld [vmem:[%s5483_s20 + $0x280] sm:$0xff] }
 0x131   : > { %v1170_v54 = vpop.f32.mrb[36].mxu0  ;;  %v2778_v55 = vpop.f32.mrb[36].mxu1 }
 0x132   : > { %1865 = vst [vmem:[#allocation3 + $0x120] sm:$0xff] %v1170_v54  ;;  %v1172_v56 = vpop.f32.mrb[37].mxu0  ;;  %4908 = vmatmul.mubr.msk.f32.gmra.mrb[142].mxu0 %vm606_vm1, %v546_v52  ;;  %3473 = vst [vmem:[#allocation4 + $0x120] sm:$0xff] %v2778_v55  ;;  %v2780_v57 = vpop.f32.mrb[37].mxu1  ;;  %5038 = vmatmul.mubr.msk.f32.gmra.mrb[142].mxu1 %vm606_vm1, %v2156_v53  ;;  %v556_v55 = vld [vmem:[%s5473_s15 + $0x288] sm:$0xff] }
 0x133   : > { %1866 = vst [vmem:[#allocation3 + $0x128] sm:$0xff] %v1172_v56  ;;  %1492 = vmatprep.mubr.f32.mxu0 %v5878_v22  ;;  %3474 = vst [vmem:[#allocation4 + $0x128] sm:$0xff] %v2780_v57  ;;  %3100 = vmatprep.mubr.f32.mxu1 %v5878_v22  ;;  %v2166_v56 = vld [vmem:[%s5483_s20 + $0x288] sm:$0xff] }
 0x135   : > { %v1176_v60 = vpop.f32.mrb[38].mxu0  ;;  %v2784_v61 = vpop.f32.mrb[38].mxu1 }
 0x136   : > { %1867 = vst [vmem:[#allocation3 + $0x130] sm:$0xff] %v1176_v60  ;;  %v1178_v62 = vpop.f32.mrb[39].mxu0  ;;  %4909 = vmatmul.mubr.msk.f32.gmra.mrb[144].mxu0 %vm606_vm1, %v547_v58  ;;  %3475 = vst [vmem:[#allocation4 + $0x130] sm:$0xff] %v2784_v61  ;;  %v2786_v63 = vpop.f32.mrb[39].mxu1  ;;  %5039 = vmatmul.mubr.msk.f32.gmra.mrb[144].mxu1 %vm606_vm1, %v2157_v59  ;;  %v557_v61 = vld [vmem:[%s5473_s15 + $0x290] sm:$0xff] }
 0x137   : > { %1868 = vst [vmem:[#allocation3 + $0x138] sm:$0xff] %v1178_v62  ;;  %1498 = vmatprep.mubr.f32.mxu0 %v5878_v22  ;;  %3476 = vst [vmem:[#allocation4 + $0x138] sm:$0xff] %v2786_v63  ;;  %3106 = vmatprep.mubr.f32.mxu1 %v5878_v22  ;;  %v2167_v62 = vld [vmem:[%s5483_s20 + $0x290] sm:$0xff] }
 0x139   : > { %v1182_v9 = vpop.f32.mrb[40].mxu0  ;;  %v2790_v10 = vpop.f32.mrb[40].mxu1 }
 0x13a   : > { %1869 = vst [vmem:[#allocation3 + $0x140] sm:$0xff] %v1182_v9  ;;  %v1184_v11 = vpop.f32.mrb[41].mxu0  ;;  %4910 = vmatmul.mubr.msk.f32.gmra.mrb[146].mxu0 %vm606_vm1, %v548_v7  ;;  %3477 = vst [vmem:[#allocation4 + $0x140] sm:$0xff] %v2790_v10  ;;  %v2792_v12 = vpop.f32.mrb[41].mxu1  ;;  %5040 = vmatmul.mubr.msk.f32.gmra.mrb[146].mxu1 %vm606_vm1, %v2158_v8  ;;  %v558_v10 = vld [vmem:[%s5473_s15 + $0x298] sm:$0xff] }
 0x13b   : > { %1870 = vst [vmem:[#allocation3 + $0x148] sm:$0xff] %v1184_v11  ;;  %1504 = vmatprep.mubr.f32.mxu0 %v5878_v22  ;;  %3478 = vst [vmem:[#allocation4 + $0x148] sm:$0xff] %v2792_v12  ;;  %3112 = vmatprep.mubr.f32.mxu1 %v5878_v22  ;;  %v2168_v11 = vld [vmem:[%s5483_s20 + $0x298] sm:$0xff] }
 0x13d   : > { %v1188_v15 = vpop.f32.mrb[42].mxu0  ;;  %v2796_v16 = vpop.f32.mrb[42].mxu1 }
 0x13e   : > { %1871 = vst [vmem:[#allocation3 + $0x150] sm:$0xff] %v1188_v15  ;;  %v1190_v17 = vpop.f32.mrb[43].mxu0  ;;  %4911 = vmatmul.mubr.msk.f32.gmra.mrb[148].mxu0 %vm606_vm1, %v549_v13  ;;  %3479 = vst [vmem:[#allocation4 + $0x150] sm:$0xff] %v2796_v16  ;;  %v2798_v18 = vpop.f32.mrb[43].mxu1  ;;  %5041 = vmatmul.mubr.msk.f32.gmra.mrb[148].mxu1 %vm606_vm1, %v2159_v14  ;;  %v559_v16 = vld [vmem:[%s5473_s15 + $0x2a0] sm:$0xff] }
 0x13f   : > { %1872 = vst [vmem:[#allocation3 + $0x158] sm:$0xff] %v1190_v17  ;;  %1510 = vmatprep.mubr.f32.mxu0 %v5878_v22  ;;  %3480 = vst [vmem:[#allocation4 + $0x158] sm:$0xff] %v2798_v18  ;;  %3118 = vmatprep.mubr.f32.mxu1 %v5878_v22  ;;  %v2169_v17 = vld [vmem:[%s5483_s20 + $0x2a0] sm:$0xff] }
 0x141   : > { %v1194_v21 = vpop.f32.mrb[44].mxu0  ;;  %v2802_v23 = vpop.f32.mrb[44].mxu1 }
 0x142   : > { %1873 = vst [vmem:[#allocation3 + $0x160] sm:$0xff] %v1194_v21  ;;  %v1196_v6 = vpop.f32.mrb[45].mxu0  ;;  %4912 = vmatmul.mubr.msk.f32.gmra.mrb[150].mxu0 %vm606_vm1, %v550_v19  ;;  %3481 = vst [vmem:[#allocation4 + $0x160] sm:$0xff] %v2802_v23  ;;  %v2804_v24 = vpop.f32.mrb[45].mxu1  ;;  %5042 = vmatmul.mubr.msk.f32.gmra.mrb[150].mxu1 %vm606_vm1, %v2160_v20  ;;  %v560_v23 = vld [vmem:[%s5473_s15 + $0x2a8] sm:$0xff] }
 0x143   : > { %1874 = vst [vmem:[#allocation3 + $0x168] sm:$0xff] %v1196_v6  ;;  %1516 = vmatprep.mubr.f32.mxu0 %v5878_v22  ;;  %3482 = vst [vmem:[#allocation4 + $0x168] sm:$0xff] %v2804_v24  ;;  %3124 = vmatprep.mubr.f32.mxu1 %v5878_v22  ;;  %v2170_v6 = vld [vmem:[%s5483_s20 + $0x2a8] sm:$0xff] }
 0x145   : > { %v1200_v27 = vpop.f32.mrb[46].mxu0  ;;  %v2808_v28 = vpop.f32.mrb[46].mxu1 }
 0x146   : > { %1875 = vst [vmem:[#allocation3 + $0x170] sm:$0xff] %v1200_v27  ;;  %v1202_v29 = vpop.f32.mrb[47].mxu0  ;;  %4913 = vmatmul.mubr.msk.f32.gmra.mrb[152].mxu0 %vm606_vm1, %v551_v25  ;;  %3483 = vst [vmem:[#allocation4 + $0x170] sm:$0xff] %v2808_v28  ;;  %v2810_v30 = vpop.f32.mrb[47].mxu1  ;;  %5043 = vmatmul.mubr.msk.f32.gmra.mrb[152].mxu1 %vm606_vm1, %v2161_v26  ;;  %v561_v28 = vld [vmem:[%s5473_s15 + $0x2b0] sm:$0xff] }
 0x147   : > { %1876 = vst [vmem:[#allocation3 + $0x178] sm:$0xff] %v1202_v29  ;;  %1522 = vmatprep.mubr.f32.mxu0 %v5878_v22  ;;  %3484 = vst [vmem:[#allocation4 + $0x178] sm:$0xff] %v2810_v30  ;;  %3130 = vmatprep.mubr.f32.mxu1 %v5878_v22  ;;  %v2171_v29 = vld [vmem:[%s5483_s20 + $0x2b0] sm:$0xff] }
 0x149   : > { %v1206_v33 = vpop.f32.mrb[48].mxu0  ;;  %v2814_v34 = vpop.f32.mrb[48].mxu1 }
 0x14a   : > { %1877 = vst [vmem:[#allocation3 + $0x180] sm:$0xff] %v1206_v33  ;;  %v1208_v35 = vpop.f32.mrb[49].mxu0  ;;  %4914 = vmatmul.mubr.msk.f32.gmra.mrb[154].mxu0 %vm606_vm1, %v552_v31  ;;  %3485 = vst [vmem:[#allocation4 + $0x180] sm:$0xff] %v2814_v34  ;;  %v2816_v36 = vpop.f32.mrb[49].mxu1  ;;  %5044 = vmatmul.mubr.msk.f32.gmra.mrb[154].mxu1 %vm606_vm1, %v2162_v32  ;;  %v562_v34 = vld [vmem:[%s5473_s15 + $0x2b8] sm:$0xff] }
 0x14b   : > { %1878 = vst [vmem:[#allocation3 + $0x188] sm:$0xff] %v1208_v35  ;;  %1528 = vmatprep.mubr.f32.mxu0 %v5878_v22  ;;  %3486 = vst [vmem:[#allocation4 + $0x188] sm:$0xff] %v2816_v36  ;;  %3136 = vmatprep.mubr.f32.mxu1 %v5878_v22  ;;  %v2172_v35 = vld [vmem:[%s5483_s20 + $0x2b8] sm:$0xff] }
 0x14d   : > { %v1212_v39 = vpop.f32.mrb[50].mxu0  ;;  %v2820_v40 = vpop.f32.mrb[50].mxu1 }
 0x14e   : > { %1879 = vst [vmem:[#allocation3 + $0x190] sm:$0xff] %v1212_v39  ;;  %v1214_v41 = vpop.f32.mrb[51].mxu0  ;;  %4915 = vmatmul.mubr.msk.f32.gmra.mrb[156].mxu0 %vm606_vm1, %v553_v37  ;;  %3487 = vst [vmem:[#allocation4 + $0x190] sm:$0xff] %v2820_v40  ;;  %v2822_v42 = vpop.f32.mrb[51].mxu1  ;;  %5045 = vmatmul.mubr.msk.f32.gmra.mrb[156].mxu1 %vm606_vm1, %v2163_v38  ;;  %v563_v40 = vld [vmem:[%s5473_s15 + $0x2c0] sm:$0xff] }
 0x14f   : > { %1880 = vst [vmem:[#allocation3 + $0x198] sm:$0xff] %v1214_v41  ;;  %1534 = vmatprep.mubr.f32.mxu0 %v5878_v22  ;;  %3488 = vst [vmem:[#allocation4 + $0x198] sm:$0xff] %v2822_v42  ;;  %3142 = vmatprep.mubr.f32.mxu1 %v5878_v22  ;;  %v2173_v41 = vld [vmem:[%s5483_s20 + $0x2c0] sm:$0xff] }
 0x151   : > { %v1218_v45 = vpop.f32.mrb[52].mxu0  ;;  %v2826_v46 = vpop.f32.mrb[52].mxu1 }
 0x152   : > { %1881 = vst [vmem:[#allocation3 + $0x1a0] sm:$0xff] %v1218_v45  ;;  %v1220_v47 = vpop.f32.mrb[53].mxu0  ;;  %4916 = vmatmul.mubr.msk.f32.gmra.mrb[158].mxu0 %vm606_vm1, %v554_v43  ;;  %3489 = vst [vmem:[#allocation4 + $0x1a0] sm:$0xff] %v2826_v46  ;;  %v2828_v48 = vpop.f32.mrb[53].mxu1  ;;  %5046 = vmatmul.mubr.msk.f32.gmra.mrb[158].mxu1 %vm606_vm1, %v2164_v44  ;;  %v564_v46 = vld [vmem:[%s5473_s15 + $0x2c8] sm:$0xff] }
 0x153   : > { %1882 = vst [vmem:[#allocation3 + $0x1a8] sm:$0xff] %v1220_v47  ;;  %1540 = vmatprep.mubr.f32.mxu0 %v5878_v22  ;;  %3490 = vst [vmem:[#allocation4 + $0x1a8] sm:$0xff] %v2828_v48  ;;  %3148 = vmatprep.mubr.f32.mxu1 %v5878_v22  ;;  %v2174_v47 = vld [vmem:[%s5483_s20 + $0x2c8] sm:$0xff] }
 0x155   : > { %v1224_v51 = vpop.f32.mrb[54].mxu0  ;;  %v2832_v52 = vpop.f32.mrb[54].mxu1 }
 0x156   : > { %1883 = vst [vmem:[#allocation3 + $0x1b0] sm:$0xff] %v1224_v51  ;;  %v1226_v53 = vpop.f32.mrb[55].mxu0  ;;  %4917 = vmatmul.mubr.msk.f32.gmra.mrb[160].mxu0 %vm606_vm1, %v555_v49  ;;  %3491 = vst [vmem:[#allocation4 + $0x1b0] sm:$0xff] %v2832_v52  ;;  %v2834_v54 = vpop.f32.mrb[55].mxu1  ;;  %5047 = vmatmul.mubr.msk.f32.gmra.mrb[160].mxu1 %vm606_vm1, %v2165_v50  ;;  %v565_v52 = vld [vmem:[%s5473_s15 + $0x2d0] sm:$0xff] }
 0x157   : > { %1884 = vst [vmem:[#allocation3 + $0x1b8] sm:$0xff] %v1226_v53  ;;  %1546 = vmatprep.mubr.f32.mxu0 %v5878_v22  ;;  %3492 = vst [vmem:[#allocation4 + $0x1b8] sm:$0xff] %v2834_v54  ;;  %3154 = vmatprep.mubr.f32.mxu1 %v5878_v22  ;;  %v2175_v53 = vld [vmem:[%s5483_s20 + $0x2d0] sm:$0xff] }
 0x159   : > { %v1230_v57 = vpop.f32.mrb[56].mxu0  ;;  %v2838_v58 = vpop.f32.mrb[56].mxu1 }
 0x15a   : > { %1885 = vst [vmem:[#allocation3 + $0x1c0] sm:$0xff] %v1230_v57  ;;  %v1232_v59 = vpop.f32.mrb[57].mxu0  ;;  %4918 = vmatmul.mubr.msk.f32.gmra.mrb[162].mxu0 %vm606_vm1, %v556_v55  ;;  %3493 = vst [vmem:[#allocation4 + $0x1c0] sm:$0xff] %v2838_v58  ;;  %v2840_v60 = vpop.f32.mrb[57].mxu1  ;;  %5048 = vmatmul.mubr.msk.f32.gmra.mrb[162].mxu1 %vm606_vm1, %v2166_v56  ;;  %v566_v58 = vld [vmem:[%s5473_s15 + $0x2d8] sm:$0xff] }
 0x15b   : > { %1886 = vst [vmem:[#allocation3 + $0x1c8] sm:$0xff] %v1232_v59  ;;  %1552 = vmatprep.mubr.f32.mxu0 %v5878_v22  ;;  %3494 = vst [vmem:[#allocation4 + $0x1c8] sm:$0xff] %v2840_v60  ;;  %3160 = vmatprep.mubr.f32.mxu1 %v5878_v22  ;;  %v2176_v59 = vld [vmem:[%s5483_s20 + $0x2d8] sm:$0xff] }
 0x15d   : > { %v1236_v63 = vpop.f32.mrb[58].mxu0  ;;  %v2844_v7 = vpop.f32.mrb[58].mxu1 }
 0x15e   : > { %1887 = vst [vmem:[#allocation3 + $0x1d0] sm:$0xff] %v1236_v63  ;;  %v1238_v8 = vpop.f32.mrb[59].mxu0  ;;  %4919 = vmatmul.mubr.msk.f32.gmra.mrb[164].mxu0 %vm606_vm1, %v557_v61  ;;  %3495 = vst [vmem:[#allocation4 + $0x1d0] sm:$0xff] %v2844_v7  ;;  %v2846_v9 = vpop.f32.mrb[59].mxu1  ;;  %5049 = vmatmul.mubr.msk.f32.gmra.mrb[164].mxu1 %vm606_vm1, %v2167_v62  ;;  %v567_v7 = vld [vmem:[%s5473_s15 + $0x2e0] sm:$0xff] }
 0x15f   : > { %1888 = vst [vmem:[#allocation3 + $0x1d8] sm:$0xff] %v1238_v8  ;;  %1558 = vmatprep.mubr.f32.mxu0 %v5878_v22  ;;  %3496 = vst [vmem:[#allocation4 + $0x1d8] sm:$0xff] %v2846_v9  ;;  %3166 = vmatprep.mubr.f32.mxu1 %v5878_v22  ;;  %v2177_v8 = vld [vmem:[%s5483_s20 + $0x2e0] sm:$0xff] }
 0x161   : > { %v1242_v12 = vpop.f32.mrb[60].mxu0  ;;  %v2850_v13 = vpop.f32.mrb[60].mxu1 }
 0x162   : > { %1889 = vst [vmem:[#allocation3 + $0x1e0] sm:$0xff] %v1242_v12  ;;  %v1244_v14 = vpop.f32.mrb[61].mxu0  ;;  %4920 = vmatmul.mubr.msk.f32.gmra.mrb[166].mxu0 %vm606_vm1, %v558_v10  ;;  %3497 = vst [vmem:[#allocation4 + $0x1e0] sm:$0xff] %v2850_v13  ;;  %v2852_v15 = vpop.f32.mrb[61].mxu1  ;;  %5050 = vmatmul.mubr.msk.f32.gmra.mrb[166].mxu1 %vm606_vm1, %v2168_v11  ;;  %v568_v13 = vld [vmem:[%s5473_s15 + $0x2e8] sm:$0xff] }
 0x163   : > { %1890 = vst [vmem:[#allocation3 + $0x1e8] sm:$0xff] %v1244_v14  ;;  %1564 = vmatprep.mubr.f32.mxu0 %v5878_v22  ;;  %3498 = vst [vmem:[#allocation4 + $0x1e8] sm:$0xff] %v2852_v15  ;;  %3172 = vmatprep.mubr.f32.mxu1 %v5878_v22  ;;  %v2178_v14 = vld [vmem:[%s5483_s20 + $0x2e8] sm:$0xff] }
 0x165   : > { %v1248_v18 = vpop.f32.mrb[62].mxu0  ;;  %v2856_v19 = vpop.f32.mrb[62].mxu1 }
 0x166   : > { %1891 = vst [vmem:[#allocation3 + $0x1f0] sm:$0xff] %v1248_v18  ;;  %v1250_v20 = vpop.f32.mrb[63].mxu0  ;;  %4921 = vmatmul.mubr.msk.f32.gmra.mrb[168].mxu0 %vm606_vm1, %v559_v16  ;;  %3499 = vst [vmem:[#allocation4 + $0x1f0] sm:$0xff] %v2856_v19  ;;  %v2858_v21 = vpop.f32.mrb[63].mxu1  ;;  %5051 = vmatmul.mubr.msk.f32.gmra.mrb[168].mxu1 %vm606_vm1, %v2169_v17  ;;  %v569_v19 = vld [vmem:[%s5473_s15 + $0x2f0] sm:$0xff] }
 0x167   : > { %1892 = vst [vmem:[#allocation3 + $0x1f8] sm:$0xff] %v1250_v20  ;;  %1570 = vmatprep.mubr.f32.mxu0 %v5878_v22  ;;  %3500 = vst [vmem:[#allocation4 + $0x1f8] sm:$0xff] %v2858_v21  ;;  %3178 = vmatprep.mubr.f32.mxu1 %v5878_v22  ;;  %v2179_v20 = vld [vmem:[%s5483_s20 + $0x2f0] sm:$0xff] }
 0x169   : > { %v1254_v24 = vpop.f32.mrb[64].mxu0  ;;  %v2862_v25 = vpop.f32.mrb[64].mxu1 }
 0x16a   : > { %1893 = vst [vmem:[#allocation3 + $0x200] sm:$0xff] %v1254_v24  ;;  %v1256_v26 = vpop.f32.mrb[65].mxu0  ;;  %4922 = vmatmul.mubr.msk.f32.gmra.mrb[170].mxu0 %vm606_vm1, %v560_v23  ;;  %3501 = vst [vmem:[#allocation4 + $0x200] sm:$0xff] %v2862_v25  ;;  %v2864_v27 = vpop.f32.mrb[65].mxu1  ;;  %5052 = vmatmul.mubr.msk.f32.gmra.mrb[170].mxu1 %vm606_vm1, %v2170_v6  ;;  %v570_v25 = vld [vmem:[%s5473_s15 + $0x2f8] sm:$0xff] }
 0x16b   : > { %1894 = vst [vmem:[#allocation3 + $0x208] sm:$0xff] %v1256_v26  ;;  %1576 = vmatprep.mubr.f32.mxu0 %v5878_v22  ;;  %3502 = vst [vmem:[#allocation4 + $0x208] sm:$0xff] %v2864_v27  ;;  %3184 = vmatprep.mubr.f32.mxu1 %v5878_v22  ;;  %v2180_v26 = vld [vmem:[%s5483_s20 + $0x2f8] sm:$0xff] }
 0x16d   : > { %v1260_v30 = vpop.f32.mrb[66].mxu0  ;;  %v2868_v31 = vpop.f32.mrb[66].mxu1 }
 0x16e   : > { %1895 = vst [vmem:[#allocation3 + $0x210] sm:$0xff] %v1260_v30  ;;  %v1262_v32 = vpop.f32.mrb[67].mxu0  ;;  %4923 = vmatmul.mubr.msk.f32.gmra.mrb[172].mxu0 %vm606_vm1, %v561_v28  ;;  %3503 = vst [vmem:[#allocation4 + $0x210] sm:$0xff] %v2868_v31  ;;  %v2870_v33 = vpop.f32.mrb[67].mxu1  ;;  %5053 = vmatmul.mubr.msk.f32.gmra.mrb[172].mxu1 %vm606_vm1, %v2171_v29  ;;  %v571_v31 = vld [vmem:[%s5473_s15 + $0x300] sm:$0xff] }
 0x16f   : > { %1896 = vst [vmem:[#allocation3 + $0x218] sm:$0xff] %v1262_v32  ;;  %1582 = vmatprep.mubr.f32.mxu0 %v5878_v22  ;;  %3504 = vst [vmem:[#allocation4 + $0x218] sm:$0xff] %v2870_v33  ;;  %3190 = vmatprep.mubr.f32.mxu1 %v5878_v22  ;;  %v2181_v32 = vld [vmem:[%s5483_s20 + $0x300] sm:$0xff] }
 0x171   : > { %v1266_v36 = vpop.f32.mrb[68].mxu0  ;;  %v2874_v37 = vpop.f32.mrb[68].mxu1 }
 0x172   : > { %1897 = vst [vmem:[#allocation3 + $0x220] sm:$0xff] %v1266_v36  ;;  %v1268_v38 = vpop.f32.mrb[69].mxu0  ;;  %4924 = vmatmul.mubr.msk.f32.gmra.mrb[174].mxu0 %vm606_vm1, %v562_v34  ;;  %3505 = vst [vmem:[#allocation4 + $0x220] sm:$0xff] %v2874_v37  ;;  %v2876_v39 = vpop.f32.mrb[69].mxu1  ;;  %5054 = vmatmul.mubr.msk.f32.gmra.mrb[174].mxu1 %vm606_vm1, %v2172_v35  ;;  %v572_v37 = vld [vmem:[%s5473_s15 + $0x308] sm:$0xff] }
 0x173   : > { %1898 = vst [vmem:[#allocation3 + $0x228] sm:$0xff] %v1268_v38  ;;  %1588 = vmatprep.mubr.f32.mxu0 %v5878_v22  ;;  %3506 = vst [vmem:[#allocation4 + $0x228] sm:$0xff] %v2876_v39  ;;  %3196 = vmatprep.mubr.f32.mxu1 %v5878_v22  ;;  %v2182_v38 = vld [vmem:[%s5483_s20 + $0x308] sm:$0xff] }
 0x175   : > { %v1272_v42 = vpop.f32.mrb[70].mxu0  ;;  %v2880_v43 = vpop.f32.mrb[70].mxu1 }
 0x176   : > { %1899 = vst [vmem:[#allocation3 + $0x230] sm:$0xff] %v1272_v42  ;;  %v1274_v44 = vpop.f32.mrb[71].mxu0  ;;  %4925 = vmatmul.mubr.msk.f32.gmra.mrb[176].mxu0 %vm606_vm1, %v563_v40  ;;  %3507 = vst [vmem:[#allocation4 + $0x230] sm:$0xff] %v2880_v43  ;;  %v2882_v45 = vpop.f32.mrb[71].mxu1  ;;  %5055 = vmatmul.mubr.msk.f32.gmra.mrb[176].mxu1 %vm606_vm1, %v2173_v41  ;;  %v573_v43 = vld [vmem:[%s5473_s15 + $0x310] sm:$0xff] }
 0x177   : > { %1900 = vst [vmem:[#allocation3 + $0x238] sm:$0xff] %v1274_v44  ;;  %1594 = vmatprep.mubr.f32.mxu0 %v5878_v22  ;;  %3508 = vst [vmem:[#allocation4 + $0x238] sm:$0xff] %v2882_v45  ;;  %3202 = vmatprep.mubr.f32.mxu1 %v5878_v22  ;;  %v2183_v44 = vld [vmem:[%s5483_s20 + $0x310] sm:$0xff] }
 0x179   : > { %v1278_v48 = vpop.f32.mrb[72].mxu0  ;;  %v2886_v49 = vpop.f32.mrb[72].mxu1 }
 0x17a   : > { %1901 = vst [vmem:[#allocation3 + $0x240] sm:$0xff] %v1278_v48  ;;  %v1280_v50 = vpop.f32.mrb[73].mxu0  ;;  %4926 = vmatmul.mubr.msk.f32.gmra.mrb[178].mxu0 %vm606_vm1, %v564_v46  ;;  %3509 = vst [vmem:[#allocation4 + $0x240] sm:$0xff] %v2886_v49  ;;  %v2888_v51 = vpop.f32.mrb[73].mxu1  ;;  %5056 = vmatmul.mubr.msk.f32.gmra.mrb[178].mxu1 %vm606_vm1, %v2174_v47  ;;  %v574_v49 = vld [vmem:[%s5473_s15 + $0x318] sm:$0xff] }
 0x17b   : > { %1902 = vst [vmem:[#allocation3 + $0x248] sm:$0xff] %v1280_v50  ;;  %1600 = vmatprep.mubr.f32.mxu0 %v5878_v22  ;;  %3510 = vst [vmem:[#allocation4 + $0x248] sm:$0xff] %v2888_v51  ;;  %3208 = vmatprep.mubr.f32.mxu1 %v5878_v22  ;;  %v2184_v50 = vld [vmem:[%s5483_s20 + $0x318] sm:$0xff] }
 0x17d   : > { %v1284_v54 = vpop.f32.mrb[74].mxu0  ;;  %v2892_v55 = vpop.f32.mrb[74].mxu1 }
 0x17e   : > { %1903 = vst [vmem:[#allocation3 + $0x250] sm:$0xff] %v1284_v54  ;;  %v1286_v56 = vpop.f32.mrb[75].mxu0  ;;  %4927 = vmatmul.mubr.msk.f32.gmra.mrb[180].mxu0 %vm606_vm1, %v565_v52  ;;  %3511 = vst [vmem:[#allocation4 + $0x250] sm:$0xff] %v2892_v55  ;;  %v2894_v57 = vpop.f32.mrb[75].mxu1  ;;  %5057 = vmatmul.mubr.msk.f32.gmra.mrb[180].mxu1 %vm606_vm1, %v2175_v53  ;;  %v575_v55 = vld [vmem:[%s5473_s15 + $0x320] sm:$0xff] }
 0x17f   : > { %1904 = vst [vmem:[#allocation3 + $0x258] sm:$0xff] %v1286_v56  ;;  %1606 = vmatprep.mubr.f32.mxu0 %v5878_v22  ;;  %3512 = vst [vmem:[#allocation4 + $0x258] sm:$0xff] %v2894_v57  ;;  %3214 = vmatprep.mubr.f32.mxu1 %v5878_v22  ;;  %v2185_v56 = vld [vmem:[%s5483_s20 + $0x320] sm:$0xff] }
 0x181   : > { %v1290_v60 = vpop.f32.mrb[76].mxu0  ;;  %v2898_v61 = vpop.f32.mrb[76].mxu1 }
 0x182   : > { %1905 = vst [vmem:[#allocation3 + $0x260] sm:$0xff] %v1290_v60  ;;  %v1292_v62 = vpop.f32.mrb[77].mxu0  ;;  %4928 = vmatmul.mubr.msk.f32.gmra.mrb[182].mxu0 %vm606_vm1, %v566_v58  ;;  %3513 = vst [vmem:[#allocation4 + $0x260] sm:$0xff] %v2898_v61  ;;  %v2900_v63 = vpop.f32.mrb[77].mxu1  ;;  %5058 = vmatmul.mubr.msk.f32.gmra.mrb[182].mxu1 %vm606_vm1, %v2176_v59  ;;  %v576_v61 = vld [vmem:[%s5473_s15 + $0x328] sm:$0xff] }
 0x183   : > { %1906 = vst [vmem:[#allocation3 + $0x268] sm:$0xff] %v1292_v62  ;;  %1612 = vmatprep.mubr.f32.mxu0 %v5878_v22  ;;  %3514 = vst [vmem:[#allocation4 + $0x268] sm:$0xff] %v2900_v63  ;;  %3220 = vmatprep.mubr.f32.mxu1 %v5878_v22  ;;  %v2186_v62 = vld [vmem:[%s5483_s20 + $0x328] sm:$0xff] }
 0x185   : > { %v1296_v9 = vpop.f32.mrb[78].mxu0  ;;  %v2904_v10 = vpop.f32.mrb[78].mxu1 }
 0x186   : > { %1907 = vst [vmem:[#allocation3 + $0x270] sm:$0xff] %v1296_v9  ;;  %v1298_v11 = vpop.f32.mrb[79].mxu0  ;;  %4929 = vmatmul.mubr.msk.f32.gmra.mrb[184].mxu0 %vm606_vm1, %v567_v7  ;;  %3515 = vst [vmem:[#allocation4 + $0x270] sm:$0xff] %v2904_v10  ;;  %v2906_v12 = vpop.f32.mrb[79].mxu1  ;;  %5059 = vmatmul.mubr.msk.f32.gmra.mrb[184].mxu1 %vm606_vm1, %v2177_v8  ;;  %v577_v10 = vld [vmem:[%s5473_s15 + $0x330] sm:$0xff] }
 0x187   : > { %1908 = vst [vmem:[#allocation3 + $0x278] sm:$0xff] %v1298_v11  ;;  %1618 = vmatprep.mubr.f32.mxu0 %v5878_v22  ;;  %3516 = vst [vmem:[#allocation4 + $0x278] sm:$0xff] %v2906_v12  ;;  %3226 = vmatprep.mubr.f32.mxu1 %v5878_v22  ;;  %v2187_v11 = vld [vmem:[%s5483_s20 + $0x330] sm:$0xff] }
 0x189   : > { %v1302_v15 = vpop.f32.mrb[80].mxu0  ;;  %v2910_v16 = vpop.f32.mrb[80].mxu1 }
 0x18a   : > { %1909 = vst [vmem:[#allocation3 + $0x280] sm:$0xff] %v1302_v15  ;;  %v1304_v17 = vpop.f32.mrb[81].mxu0  ;;  %4930 = vmatmul.mubr.msk.f32.gmra.mrb[186].mxu0 %vm606_vm1, %v568_v13  ;;  %3517 = vst [vmem:[#allocation4 + $0x280] sm:$0xff] %v2910_v16  ;;  %v2912_v18 = vpop.f32.mrb[81].mxu1  ;;  %5060 = vmatmul.mubr.msk.f32.gmra.mrb[186].mxu1 %vm606_vm1, %v2178_v14  ;;  %v6102_v16 = vld [vmem:[#allocation2] sm:$0xff] }
 0x18b   : > { %1910 = vst [vmem:[#allocation3 + $0x288] sm:$0xff] %v1304_v17  ;;  %1624 = vmatprep.mubr.f32.mxu0 %v5878_v22  ;;  %3518 = vst [vmem:[#allocation4 + $0x288] sm:$0xff] %v2912_v18  ;;  %3232 = vmatprep.mubr.f32.mxu1 %v5878_v22  ;;  %v578_v17 = vld [vmem:[%s5473_s15 + $0x338] sm:$0xff] }
 0x18d   : > { %v1308_v21 = vpop.f32.mrb[82].mxu0  ;;  %v2916_v23 = vpop.f32.mrb[82].mxu1 }
 0x18e   : > { %1911 = vst [vmem:[#allocation3 + $0x290] sm:$0xff] %v1308_v21  ;;  %v1310_v6 = vpop.f32.mrb[83].mxu0  ;;  %4931 = vmatmul.mubr.msk.f32.gmra.mrb[188].mxu0 %vm606_vm1, %v569_v19  ;;  %3519 = vst [vmem:[#allocation4 + $0x290] sm:$0xff] %v2916_v23  ;;  %v2918_v24 = vpop.f32.mrb[83].mxu1  ;;  %5061 = vmatmul.mubr.msk.f32.gmra.mrb[188].mxu1 %vm606_vm1, %v2179_v20  ;;  %v579_v23 = vld [vmem:[%s5473_s15 + $0x340] sm:$0xff] }
 0x18f   : > { %1912 = vst [vmem:[#allocation3 + $0x298] sm:$0xff] %v1310_v6  ;;  %1630 = vmatprep.mubr.f32.mxu0 %v5878_v22  ;;  %3520 = vst [vmem:[#allocation4 + $0x298] sm:$0xff] %v2918_v24  ;;  %3238 = vmatprep.mubr.f32.mxu1 %v5878_v22  ;;  %v2189_v6 = vld [vmem:[%s5483_s20 + $0x340] sm:$0xff] }
 0x191   : > { %v1314_v27 = vpop.f32.mrb[84].mxu0  ;;  %v2922_v28 = vpop.f32.mrb[84].mxu1 }
 0x192   : > { %1913 = vst [vmem:[#allocation3 + $0x2a0] sm:$0xff] %v1314_v27  ;;  %v1316_v29 = vpop.f32.mrb[85].mxu0  ;;  %4932 = vmatmul.mubr.msk.f32.gmra.mrb[190].mxu0 %vm606_vm1, %v570_v25  ;;  %3521 = vst [vmem:[#allocation4 + $0x2a0] sm:$0xff] %v2922_v28  ;;  %v2924_v30 = vpop.f32.mrb[85].mxu1  ;;  %5062 = vmatmul.mubr.msk.f32.gmra.mrb[190].mxu1 %vm606_vm1, %v2180_v26  ;;  %v580_v28 = vld [vmem:[%s5473_s15 + $0x348] sm:$0xff] }
 0x193   : > { %1914 = vst [vmem:[#allocation3 + $0x2a8] sm:$0xff] %v1316_v29  ;;  %1636 = vmatprep.mubr.f32.mxu0 %v5878_v22  ;;  %3522 = vst [vmem:[#allocation4 + $0x2a8] sm:$0xff] %v2924_v30  ;;  %3244 = vmatprep.mubr.f32.mxu1 %v5878_v22  ;;  %v2190_v29 = vld [vmem:[%s5483_s20 + $0x348] sm:$0xff] }
 0x195   : > { %v1320_v33 = vpop.f32.mrb[86].mxu0  ;;  %v2928_v34 = vpop.f32.mrb[86].mxu1 }
 0x196   : > { %1915 = vst [vmem:[#allocation3 + $0x2b0] sm:$0xff] %v1320_v33  ;;  %v1322_v35 = vpop.f32.mrb[87].mxu0  ;;  %4933 = vmatmul.mubr.msk.f32.gmra.mrb[192].mxu0 %vm606_vm1, %v571_v31  ;;  %3523 = vst [vmem:[#allocation4 + $0x2b0] sm:$0xff] %v2928_v34  ;;  %v2930_v36 = vpop.f32.mrb[87].mxu1  ;;  %5063 = vmatmul.mubr.msk.f32.gmra.mrb[192].mxu1 %vm606_vm1, %v2181_v32  ;;  %v581_v34 = vld [vmem:[%s5473_s15 + $0x350] sm:$0xff] }
 0x197   : > { %1916 = vst [vmem:[#allocation3 + $0x2b8] sm:$0xff] %v1322_v35  ;;  %1642 = vmatprep.mubr.f32.mxu0 %v5878_v22  ;;  %3524 = vst [vmem:[#allocation4 + $0x2b8] sm:$0xff] %v2930_v36  ;;  %3250 = vmatprep.mubr.f32.mxu1 %v5878_v22  ;;  %v2191_v35 = vld [vmem:[%s5483_s20 + $0x350] sm:$0xff] }
 0x199   : > { %v1326_v39 = vpop.f32.mrb[88].mxu0  ;;  %v2934_v40 = vpop.f32.mrb[88].mxu1 }
 0x19a   : > { %1917 = vst [vmem:[#allocation3 + $0x2c0] sm:$0xff] %v1326_v39  ;;  %v1328_v41 = vpop.f32.mrb[89].mxu0  ;;  %4934 = vmatmul.mubr.msk.f32.gmra.mrb[194].mxu0 %vm606_vm1, %v572_v37  ;;  %3525 = vst [vmem:[#allocation4 + $0x2c0] sm:$0xff] %v2934_v40  ;;  %v2936_v42 = vpop.f32.mrb[89].mxu1  ;;  %5064 = vmatmul.mubr.msk.f32.gmra.mrb[194].mxu1 %vm606_vm1, %v2182_v38  ;;  %v582_v40 = vld [vmem:[%s5473_s15 + $0x358] sm:$0xff] }
 0x19b   : > { %1918 = vst [vmem:[#allocation3 + $0x2c8] sm:$0xff] %v1328_v41  ;;  %1648 = vmatprep.mubr.f32.mxu0 %v5878_v22  ;;  %3526 = vst [vmem:[#allocation4 + $0x2c8] sm:$0xff] %v2936_v42  ;;  %3256 = vmatprep.mubr.f32.mxu1 %v5878_v22  ;;  %v2192_v41 = vld [vmem:[%s5483_s20 + $0x358] sm:$0xff] }
 0x19d   : > { %v1332_v45 = vpop.f32.mrb[90].mxu0  ;;  %v2940_v46 = vpop.f32.mrb[90].mxu1 }
 0x19e   : > { %1919 = vst [vmem:[#allocation3 + $0x2d0] sm:$0xff] %v1332_v45  ;;  %v1334_v47 = vpop.f32.mrb[91].mxu0  ;;  %4935 = vmatmul.mubr.msk.f32.gmra.mrb[196].mxu0 %vm606_vm1, %v573_v43  ;;  %3527 = vst [vmem:[#allocation4 + $0x2d0] sm:$0xff] %v2940_v46  ;;  %v2942_v48 = vpop.f32.mrb[91].mxu1  ;;  %5065 = vmatmul.mubr.msk.f32.gmra.mrb[196].mxu1 %vm606_vm1, %v2183_v44  ;;  %v583_v46 = vld [vmem:[%s5473_s15 + $0x360] sm:$0xff] }
 0x19f   : > { %1920 = vst [vmem:[#allocation3 + $0x2d8] sm:$0xff] %v1334_v47  ;;  %1654 = vmatprep.mubr.f32.mxu0 %v5878_v22  ;;  %3528 = vst [vmem:[#allocation4 + $0x2d8] sm:$0xff] %v2942_v48  ;;  %3262 = vmatprep.mubr.f32.mxu1 %v5878_v22  ;;  %v2193_v47 = vld [vmem:[%s5483_s20 + $0x360] sm:$0xff] }
 0x1a1   : > { %v1338_v51 = vpop.f32.mrb[92].mxu0  ;;  %v2946_v52 = vpop.f32.mrb[92].mxu1 }
 0x1a2   : > { %1921 = vst [vmem:[#allocation3 + $0x2e0] sm:$0xff] %v1338_v51  ;;  %v1340_v53 = vpop.f32.mrb[93].mxu0  ;;  %4936 = vmatmul.mubr.msk.f32.gmra.mrb[198].mxu0 %vm606_vm1, %v574_v49  ;;  %3529 = vst [vmem:[#allocation4 + $0x2e0] sm:$0xff] %v2946_v52  ;;  %v2948_v54 = vpop.f32.mrb[93].mxu1  ;;  %5066 = vmatmul.mubr.msk.f32.gmra.mrb[198].mxu1 %vm606_vm1, %v2184_v50  ;;  %v584_v52 = vld [vmem:[%s5473_s15 + $0x368] sm:$0xff] }
 0x1a3   : > { %1922 = vst [vmem:[#allocation3 + $0x2e8] sm:$0xff] %v1340_v53  ;;  %1660 = vmatprep.mubr.f32.mxu0 %v5878_v22  ;;  %3530 = vst [vmem:[#allocation4 + $0x2e8] sm:$0xff] %v2948_v54  ;;  %3268 = vmatprep.mubr.f32.mxu1 %v5878_v22  ;;  %v2194_v53 = vld [vmem:[%s5483_s20 + $0x368] sm:$0xff] }
 0x1a5   : > { %v1344_v57 = vpop.f32.mrb[94].mxu0  ;;  %v2952_v58 = vpop.f32.mrb[94].mxu1 }
 0x1a6   : > { %1923 = vst [vmem:[#allocation3 + $0x2f0] sm:$0xff] %v1344_v57  ;;  %v1346_v59 = vpop.f32.mrb[95].mxu0  ;;  %4937 = vmatmul.mubr.msk.f32.gmra.mrb[200].mxu0 %vm606_vm1, %v575_v55  ;;  %3531 = vst [vmem:[#allocation4 + $0x2f0] sm:$0xff] %v2952_v58  ;;  %v2954_v60 = vpop.f32.mrb[95].mxu1  ;;  %5067 = vmatmul.mubr.msk.f32.gmra.mrb[200].mxu1 %vm606_vm1, %v2185_v56  ;;  %v585_v58 = vld [vmem:[%s5473_s15 + $0x370] sm:$0xff] }
 0x1a7   : > { %1924 = vst [vmem:[#allocation3 + $0x2f8] sm:$0xff] %v1346_v59  ;;  %1666 = vmatprep.mubr.f32.mxu0 %v5878_v22  ;;  %3532 = vst [vmem:[#allocation4 + $0x2f8] sm:$0xff] %v2954_v60  ;;  %3274 = vmatprep.mubr.f32.mxu1 %v5878_v22  ;;  %v2195_v59 = vld [vmem:[%s5483_s20 + $0x370] sm:$0xff] }
 0x1a9   : > { %v1350_v63 = vpop.f32.mrb[96].mxu0  ;;  %v2958_v7 = vpop.f32.mrb[96].mxu1 }
 0x1aa   : > { %1925 = vst [vmem:[#allocation3 + $0x300] sm:$0xff] %v1350_v63  ;;  %v1352_v8 = vpop.f32.mrb[97].mxu0  ;;  %4938 = vmatmul.mubr.msk.f32.gmra.mrb[202].mxu0 %vm606_vm1, %v576_v61  ;;  %3533 = vst [vmem:[#allocation4 + $0x300] sm:$0xff] %v2958_v7  ;;  %v2960_v9 = vpop.f32.mrb[97].mxu1  ;;  %5068 = vmatmul.mubr.msk.f32.gmra.mrb[202].mxu1 %vm606_vm1, %v2186_v62  ;;  %v586_v7 = vld [vmem:[%s5473_s15 + $0x378] sm:$0xff] }
 0x1ab   : > { %1926 = vst [vmem:[#allocation3 + $0x308] sm:$0xff] %v1352_v8  ;;  %1672 = vmatprep.mubr.f32.mxu0 %v5878_v22  ;;  %3534 = vst [vmem:[#allocation4 + $0x308] sm:$0xff] %v2960_v9  ;;  %3280 = vmatprep.mubr.f32.mxu1 %v5878_v22  ;;  %v2188_v22 = vld [vmem:[%s5483_s20 + $0x338] sm:$0xff] }
 0x1ac   : > { %v2196_v8 = vld [vmem:[%s5483_s20 + $0x378] sm:$0xff] }
 0x1ad   : > { %v1356_v12 = vpop.f32.mrb[98].mxu0  ;;  %v2964_v13 = vpop.f32.mrb[98].mxu1 }
 0x1ae   : > { %1927 = vst [vmem:[#allocation3 + $0x310] sm:$0xff] %v1356_v12  ;;  %v1358_v14 = vpop.f32.mrb[99].mxu0  ;;  %4939 = vmatmul.mubr.msk.f32.gmra.mrb[204].mxu0 %vm606_vm1, %v577_v10  ;;  %3535 = vst [vmem:[#allocation4 + $0x310] sm:$0xff] %v2964_v13  ;;  %v2966_v15 = vpop.f32.mrb[99].mxu1  ;;  %5069 = vmatmul.mubr.msk.f32.gmra.mrb[204].mxu1 %vm606_vm1, %v2187_v11  ;;  %v587_v13 = vld [vmem:[%s5473_s15 + $0x380] sm:$0xff] }
 0x1af   : > { %1928 = vst [vmem:[#allocation3 + $0x318] sm:$0xff] %v1358_v14  ;;  %1678 = vmatprep.mubr.f32.mxu0 %v6102_v16  ;;  %3536 = vst [vmem:[#allocation4 + $0x318] sm:$0xff] %v2966_v15  ;;  %3286 = vmatprep.mubr.f32.mxu1 %v6102_v16  ;;  %v2197_v14 = vld [vmem:[%s5483_s20 + $0x380] sm:$0xff] }
 0x1b1   : > { %v1362_v18 = vpop.f32.mrb[100].mxu0  ;;  %v2970_v19 = vpop.f32.mrb[100].mxu1 }
 0x1b2   : > { %1929 = vst [vmem:[#allocation3 + $0x320] sm:$0xff] %v1362_v18  ;;  %v1364_v20 = vpop.f32.mrb[101].mxu0  ;;  %4940 = vmatmul.mubr.msk.f32.gmra.mrb[206].mxu0 %vm606_vm1, %v578_v17  ;;  %3537 = vst [vmem:[#allocation4 + $0x320] sm:$0xff] %v2970_v19  ;;  %v2972_v21 = vpop.f32.mrb[101].mxu1  ;;  %5070 = vmatmul.mubr.msk.f32.gmra.mrb[206].mxu1 %vm606_vm1, %v2188_v22  ;;  %v588_v19 = vld [vmem:[%s5473_s15 + $0x388] sm:$0xff] }
 0x1b3   : > { %1930 = vst [vmem:[#allocation3 + $0x328] sm:$0xff] %v1364_v20  ;;  %1684 = vmatprep.mubr.f32.mxu0 %v6102_v16  ;;  %3538 = vst [vmem:[#allocation4 + $0x328] sm:$0xff] %v2972_v21  ;;  %3292 = vmatprep.mubr.f32.mxu1 %v6102_v16  ;;  %v2198_v20 = vld [vmem:[%s5483_s20 + $0x388] sm:$0xff] }
 0x1b5   : > { %v1368_v24 = vpop.f32.mrb[102].mxu0  ;;  %v2976_v25 = vpop.f32.mrb[102].mxu1 }
 0x1b6   : > { %1931 = vst [vmem:[#allocation3 + $0x330] sm:$0xff] %v1368_v24  ;;  %v1370_v26 = vpop.f32.mrb[103].mxu0  ;;  %4941 = vmatmul.mubr.msk.f32.gmra.mrb[208].mxu0 %vm606_vm1, %v579_v23  ;;  %3539 = vst [vmem:[#allocation4 + $0x330] sm:$0xff] %v2976_v25  ;;  %v2978_v27 = vpop.f32.mrb[103].mxu1  ;;  %5071 = vmatmul.mubr.msk.f32.gmra.mrb[208].mxu1 %vm606_vm1, %v2189_v6  ;;  %v589_v25 = vld [vmem:[%s5473_s15 + $0x390] sm:$0xff] }
 0x1b7   : > { %1932 = vst [vmem:[#allocation3 + $0x338] sm:$0xff] %v1370_v26  ;;  %1690 = vmatprep.mubr.f32.mxu0 %v6102_v16  ;;  %3540 = vst [vmem:[#allocation4 + $0x338] sm:$0xff] %v2978_v27  ;;  %3298 = vmatprep.mubr.f32.mxu1 %v6102_v16  ;;  %v2199_v26 = vld [vmem:[%s5483_s20 + $0x390] sm:$0xff] }
 0x1b9   : > { %v1374_v30 = vpop.f32.mrb[104].mxu0  ;;  %v2982_v31 = vpop.f32.mrb[104].mxu1 }
 0x1ba   : > { %1933 = vst [vmem:[#allocation3 + $0x340] sm:$0xff] %v1374_v30  ;;  %v1376_v32 = vpop.f32.mrb[105].mxu0  ;;  %4942 = vmatmul.mubr.msk.f32.gmra.mrb[210].mxu0 %vm606_vm1, %v580_v28  ;;  %3541 = vst [vmem:[#allocation4 + $0x340] sm:$0xff] %v2982_v31  ;;  %v2984_v33 = vpop.f32.mrb[105].mxu1  ;;  %5072 = vmatmul.mubr.msk.f32.gmra.mrb[210].mxu1 %vm606_vm1, %v2190_v29  ;;  %v590_v31 = vld [vmem:[%s5473_s15 + $0x398] sm:$0xff] }
 0x1bb   : > { %1934 = vst [vmem:[#allocation3 + $0x348] sm:$0xff] %v1376_v32  ;;  %1696 = vmatprep.mubr.f32.mxu0 %v6102_v16  ;;  %3542 = vst [vmem:[#allocation4 + $0x348] sm:$0xff] %v2984_v33  ;;  %3304 = vmatprep.mubr.f32.mxu1 %v6102_v16  ;;  %v2200_v32 = vld [vmem:[%s5483_s20 + $0x398] sm:$0xff] }
 0x1bd   : > { %v1380_v36 = vpop.f32.mrb[106].mxu0  ;;  %v2988_v37 = vpop.f32.mrb[106].mxu1 }
 0x1be   : > { %1935 = vst [vmem:[#allocation3 + $0x350] sm:$0xff] %v1380_v36  ;;  %v1382_v38 = vpop.f32.mrb[107].mxu0  ;;  %4943 = vmatmul.mubr.msk.f32.gmra.mrb[212].mxu0 %vm606_vm1, %v581_v34  ;;  %3543 = vst [vmem:[#allocation4 + $0x350] sm:$0xff] %v2988_v37  ;;  %v2990_v39 = vpop.f32.mrb[107].mxu1  ;;  %5073 = vmatmul.mubr.msk.f32.gmra.mrb[212].mxu1 %vm606_vm1, %v2191_v35  ;;  %v591_v37 = vld [vmem:[%s5473_s15 + $0x3a0] sm:$0xff] }
 0x1bf   : > { %1936 = vst [vmem:[#allocation3 + $0x358] sm:$0xff] %v1382_v38  ;;  %1702 = vmatprep.mubr.f32.mxu0 %v6102_v16  ;;  %3544 = vst [vmem:[#allocation4 + $0x358] sm:$0xff] %v2990_v39  ;;  %3310 = vmatprep.mubr.f32.mxu1 %v6102_v16  ;;  %v2201_v38 = vld [vmem:[%s5483_s20 + $0x3a0] sm:$0xff] }
 0x1c1   : > { %v1386_v42 = vpop.f32.mrb[108].mxu0  ;;  %v2994_v43 = vpop.f32.mrb[108].mxu1 }
 0x1c2   : > { %1937 = vst [vmem:[#allocation3 + $0x360] sm:$0xff] %v1386_v42  ;;  %v1388_v44 = vpop.f32.mrb[109].mxu0  ;;  %4944 = vmatmul.mubr.msk.f32.gmra.mrb[214].mxu0 %vm606_vm1, %v582_v40  ;;  %3545 = vst [vmem:[#allocation4 + $0x360] sm:$0xff] %v2994_v43  ;;  %v2996_v45 = vpop.f32.mrb[109].mxu1  ;;  %5074 = vmatmul.mubr.msk.f32.gmra.mrb[214].mxu1 %vm606_vm1, %v2192_v41  ;;  %v592_v43 = vld [vmem:[%s5473_s15 + $0x3a8] sm:$0xff] }
 0x1c3   : > { %1938 = vst [vmem:[#allocation3 + $0x368] sm:$0xff] %v1388_v44  ;;  %1708 = vmatprep.mubr.f32.mxu0 %v6102_v16  ;;  %3546 = vst [vmem:[#allocation4 + $0x368] sm:$0xff] %v2996_v45  ;;  %3316 = vmatprep.mubr.f32.mxu1 %v6102_v16  ;;  %v2202_v44 = vld [vmem:[%s5483_s20 + $0x3a8] sm:$0xff] }
 0x1c5   : > { %v1392_v48 = vpop.f32.mrb[110].mxu0  ;;  %v3000_v49 = vpop.f32.mrb[110].mxu1 }
 0x1c6   : > { %1939 = vst [vmem:[#allocation3 + $0x370] sm:$0xff] %v1392_v48  ;;  %v1394_v50 = vpop.f32.mrb[111].mxu0  ;;  %4945 = vmatmul.mubr.msk.f32.gmra.mrb[216].mxu0 %vm606_vm1, %v583_v46  ;;  %3547 = vst [vmem:[#allocation4 + $0x370] sm:$0xff] %v3000_v49  ;;  %v3002_v51 = vpop.f32.mrb[111].mxu1  ;;  %5075 = vmatmul.mubr.msk.f32.gmra.mrb[216].mxu1 %vm606_vm1, %v2193_v47  ;;  %v593_v49 = vld [vmem:[%s5473_s15 + $0x3b0] sm:$0xff] }
 0x1c7   : > { %1940 = vst [vmem:[#allocation3 + $0x378] sm:$0xff] %v1394_v50  ;;  %1714 = vmatprep.mubr.f32.mxu0 %v6102_v16  ;;  %3548 = vst [vmem:[#allocation4 + $0x378] sm:$0xff] %v3002_v51  ;;  %3322 = vmatprep.mubr.f32.mxu1 %v6102_v16  ;;  %v2203_v50 = vld [vmem:[%s5483_s20 + $0x3b0] sm:$0xff] }
 0x1c9   : > { %v1398_v54 = vpop.f32.mrb[112].mxu0  ;;  %v3006_v55 = vpop.f32.mrb[112].mxu1 }
 0x1ca   : > { %1941 = vst [vmem:[#allocation3 + $0x380] sm:$0xff] %v1398_v54  ;;  %v1400_v56 = vpop.f32.mrb[113].mxu0  ;;  %4946 = vmatmul.mubr.msk.f32.gmra.mrb[218].mxu0 %vm606_vm1, %v584_v52  ;;  %3549 = vst [vmem:[#allocation4 + $0x380] sm:$0xff] %v3006_v55  ;;  %v3008_v57 = vpop.f32.mrb[113].mxu1  ;;  %5076 = vmatmul.mubr.msk.f32.gmra.mrb[218].mxu1 %vm606_vm1, %v2194_v53  ;;  %v594_v55 = vld [vmem:[%s5473_s15 + $0x3b8] sm:$0xff] }
 0x1cb   : > { %1942 = vst [vmem:[#allocation3 + $0x388] sm:$0xff] %v1400_v56  ;;  %1720 = vmatprep.mubr.f32.mxu0 %v6102_v16  ;;  %3550 = vst [vmem:[#allocation4 + $0x388] sm:$0xff] %v3008_v57  ;;  %3328 = vmatprep.mubr.f32.mxu1 %v6102_v16  ;;  %v2204_v56 = vld [vmem:[%s5483_s20 + $0x3b8] sm:$0xff] }
 0x1cd   : > { %v1404_v60 = vpop.f32.mrb[114].mxu0  ;;  %v3012_v61 = vpop.f32.mrb[114].mxu1 }
 0x1ce   : > { %1943 = vst [vmem:[#allocation3 + $0x390] sm:$0xff] %v1404_v60  ;;  %v1406_v62 = vpop.f32.mrb[115].mxu0  ;;  %4947 = vmatmul.mubr.msk.f32.gmra.mrb[220].mxu0 %vm606_vm1, %v585_v58  ;;  %3551 = vst [vmem:[#allocation4 + $0x390] sm:$0xff] %v3012_v61  ;;  %v3014_v63 = vpop.f32.mrb[115].mxu1  ;;  %5077 = vmatmul.mubr.msk.f32.gmra.mrb[220].mxu1 %vm606_vm1, %v2195_v59  ;;  %v595_v61 = vld [vmem:[%s5473_s15 + $0x3c0] sm:$0xff] }
 0x1cf   : > { %1944 = vst [vmem:[#allocation3 + $0x398] sm:$0xff] %v1406_v62  ;;  %1726 = vmatprep.mubr.f32.mxu0 %v6102_v16  ;;  %3552 = vst [vmem:[#allocation4 + $0x398] sm:$0xff] %v3014_v63  ;;  %3334 = vmatprep.mubr.f32.mxu1 %v6102_v16  ;;  %v2205_v62 = vld [vmem:[%s5483_s20 + $0x3c0] sm:$0xff] }
 0x1d1   : > { %v1410_v9 = vpop.f32.mrb[116].mxu0  ;;  %v3018_v10 = vpop.f32.mrb[116].mxu1 }
 0x1d2   : > { %1945 = vst [vmem:[#allocation3 + $0x3a0] sm:$0xff] %v1410_v9  ;;  %v1412_v11 = vpop.f32.mrb[117].mxu0  ;;  %4948 = vmatmul.mubr.msk.f32.gmra.mrb[222].mxu0 %vm606_vm1, %v586_v7  ;;  %3553 = vst [vmem:[#allocation4 + $0x3a0] sm:$0xff] %v3018_v10  ;;  %v3020_v12 = vpop.f32.mrb[117].mxu1  ;;  %5078 = vmatmul.mubr.msk.f32.gmra.mrb[222].mxu1 %vm606_vm1, %v2196_v8  ;;  %v596_v10 = vld [vmem:[%s5473_s15 + $0x3c8] sm:$0xff] }
 0x1d3   : > { %1946 = vst [vmem:[#allocation3 + $0x3a8] sm:$0xff] %v1412_v11  ;;  %1732 = vmatprep.mubr.f32.mxu0 %v6102_v16  ;;  %3554 = vst [vmem:[#allocation4 + $0x3a8] sm:$0xff] %v3020_v12  ;;  %3340 = vmatprep.mubr.f32.mxu1 %v6102_v16  ;;  %v2206_v11 = vld [vmem:[%s5483_s20 + $0x3c8] sm:$0xff] }
 0x1d5   : > { %v1416_v15 = vpop.f32.mrb[118].mxu0  ;;  %v3024_v17 = vpop.f32.mrb[118].mxu1 }
 0x1d6   : > { %1947 = vst [vmem:[#allocation3 + $0x3b0] sm:$0xff] %v1416_v15  ;;  %v1418_v22 = vpop.f32.mrb[119].mxu0  ;;  %4949 = vmatmul.mubr.msk.f32.gmra.mrb[224].mxu0 %vm606_vm1, %v587_v13  ;;  %3555 = vst [vmem:[#allocation4 + $0x3b0] sm:$0xff] %v3024_v17  ;;  %v3026_v18 = vpop.f32.mrb[119].mxu1  ;;  %5079 = vmatmul.mubr.msk.f32.gmra.mrb[224].mxu1 %vm606_vm1, %v2197_v14  ;;  %v597_v17 = vld [vmem:[%s5473_s15 + $0x3d0] sm:$0xff] }
 0x1d7   : > { %1948 = vst [vmem:[#allocation3 + $0x3b8] sm:$0xff] %v1418_v22  ;;  %1738 = vmatprep.mubr.f32.mxu0 %v6102_v16  ;;  %3556 = vst [vmem:[#allocation4 + $0x3b8] sm:$0xff] %v3026_v18  ;;  %3346 = vmatprep.mubr.f32.mxu1 %v6102_v16  ;;  %v2207_v22 = vld [vmem:[%s5483_s20 + $0x3d0] sm:$0xff] }
 0x1d9   : > { %v1422_v21 = vpop.f32.mrb[120].mxu0  ;;  %v3030_v23 = vpop.f32.mrb[120].mxu1 }
 0x1da   : > { %1949 = vst [vmem:[#allocation3 + $0x3c0] sm:$0xff] %v1422_v21  ;;  %v1424_v6 = vpop.f32.mrb[121].mxu0  ;;  %4950 = vmatmul.mubr.msk.f32.gmra.mrb[226].mxu0 %vm606_vm1, %v588_v19  ;;  %3557 = vst [vmem:[#allocation4 + $0x3c0] sm:$0xff] %v3030_v23  ;;  %v3032_v24 = vpop.f32.mrb[121].mxu1  ;;  %5080 = vmatmul.mubr.msk.f32.gmra.mrb[226].mxu1 %vm606_vm1, %v2198_v20  ;;  %v598_v23 = vld [vmem:[%s5473_s15 + $0x3d8] sm:$0xff] }
 0x1db   : > { %1950 = vst [vmem:[#allocation3 + $0x3c8] sm:$0xff] %v1424_v6  ;;  %1744 = vmatprep.mubr.f32.mxu0 %v6102_v16  ;;  %3558 = vst [vmem:[#allocation4 + $0x3c8] sm:$0xff] %v3032_v24  ;;  %3352 = vmatprep.mubr.f32.mxu1 %v6102_v16  ;;  %v2208_v6 = vld [vmem:[%s5483_s20 + $0x3d8] sm:$0xff] }
 0x1dd   : > { %v1428_v27 = vpop.f32.mrb[122].mxu0  ;;  %v3036_v28 = vpop.f32.mrb[122].mxu1 }
 0x1de   : > { %1951 = vst [vmem:[#allocation3 + $0x3d0] sm:$0xff] %v1428_v27  ;;  %v1430_v29 = vpop.f32.mrb[123].mxu0  ;;  %4951 = vmatmul.mubr.msk.f32.gmra.mrb[228].mxu0 %vm606_vm1, %v589_v25  ;;  %3559 = vst [vmem:[#allocation4 + $0x3d0] sm:$0xff] %v3036_v28  ;;  %v3038_v30 = vpop.f32.mrb[123].mxu1  ;;  %5081 = vmatmul.mubr.msk.f32.gmra.mrb[228].mxu1 %vm606_vm1, %v2199_v26  ;;  %v599_v28 = vld [vmem:[%s5473_s15 + $0x3e0] sm:$0xff] }
 0x1df   : > { %1952 = vst [vmem:[#allocation3 + $0x3d8] sm:$0xff] %v1430_v29  ;;  %1750 = vmatprep.mubr.f32.mxu0 %v6102_v16  ;;  %3560 = vst [vmem:[#allocation4 + $0x3d8] sm:$0xff] %v3038_v30  ;;  %3358 = vmatprep.mubr.f32.mxu1 %v6102_v16  ;;  %v2209_v29 = vld [vmem:[%s5483_s20 + $0x3e0] sm:$0xff] }
 0x1e1   : > { %v1434_v33 = vpop.f32.mrb[124].mxu0  ;;  %v3042_v34 = vpop.f32.mrb[124].mxu1 }
 0x1e2   : > { %1953 = vst [vmem:[#allocation3 + $0x3e0] sm:$0xff] %v1434_v33  ;;  %v1436_v35 = vpop.f32.mrb[125].mxu0  ;;  %4952 = vmatmul.mubr.msk.f32.gmra.mrb[230].mxu0 %vm606_vm1, %v590_v31  ;;  %3561 = vst [vmem:[#allocation4 + $0x3e0] sm:$0xff] %v3042_v34  ;;  %v3044_v36 = vpop.f32.mrb[125].mxu1  ;;  %5082 = vmatmul.mubr.msk.f32.gmra.mrb[230].mxu1 %vm606_vm1, %v2200_v32  ;;  %v600_v34 = vld [vmem:[%s5473_s15 + $0x3e8] sm:$0xff] }
 0x1e3   : > { %1954 = vst [vmem:[#allocation3 + $0x3e8] sm:$0xff] %v1436_v35  ;;  %1756 = vmatprep.mubr.f32.mxu0 %v6102_v16  ;;  %3562 = vst [vmem:[#allocation4 + $0x3e8] sm:$0xff] %v3044_v36  ;;  %3364 = vmatprep.mubr.f32.mxu1 %v6102_v16  ;;  %v2210_v35 = vld [vmem:[%s5483_s20 + $0x3e8] sm:$0xff] }
 0x1e5   : > { %v1440_v39 = vpop.f32.mrb[126].mxu0  ;;  %v3048_v40 = vpop.f32.mrb[126].mxu1 }
 0x1e6   : > { %1955 = vst [vmem:[#allocation3 + $0x3f0] sm:$0xff] %v1440_v39  ;;  %v1442_v41 = vpop.f32.mrb[127].mxu0  ;;  %4953 = vmatmul.mubr.msk.f32.gmra.mrb[232].mxu0 %vm606_vm1, %v591_v37  ;;  %3563 = vst [vmem:[#allocation4 + $0x3f0] sm:$0xff] %v3048_v40  ;;  %v3050_v42 = vpop.f32.mrb[127].mxu1  ;;  %5083 = vmatmul.mubr.msk.f32.gmra.mrb[232].mxu1 %vm606_vm1, %v2201_v38  ;;  %v601_v40 = vld [vmem:[%s5473_s15 + $0x3f0] sm:$0xff] }
 0x1e7   : > { %1956 = vst [vmem:[#allocation3 + $0x3f8] sm:$0xff] %v1442_v41  ;;  %1762 = vmatprep.mubr.f32.mxu0 %v6102_v16  ;;  %3564 = vst [vmem:[#allocation4 + $0x3f8] sm:$0xff] %v3050_v42  ;;  %3370 = vmatprep.mubr.f32.mxu1 %v6102_v16  ;;  %v2211_v41 = vld [vmem:[%s5483_s20 + $0x3f0] sm:$0xff] }
 0x1e9   : > { %v1446_v45 = vpop.f32.mrb[128].mxu0  ;;  %v3054_v46 = vpop.f32.mrb[128].mxu1 }
 0x1ea   : > { %1957 = vst [vmem:[#allocation3 + $0x400] sm:$0xff] %v1446_v45  ;;  %v1448_v47 = vpop.f32.mrb[129].mxu0  ;;  %4954 = vmatmul.mubr.msk.f32.gmra.mrb[234].mxu0 %vm606_vm1, %v592_v43  ;;  %3565 = vst [vmem:[#allocation4 + $0x400] sm:$0xff] %v3054_v46  ;;  %v3056_v48 = vpop.f32.mrb[129].mxu1  ;;  %5084 = vmatmul.mubr.msk.f32.gmra.mrb[234].mxu1 %vm606_vm1, %v2202_v44  ;;  %v602_v46 = vld [vmem:[%s5473_s15 + $0x3f8] sm:$0xff] }
 0x1eb   : > { %1958 = vst [vmem:[#allocation3 + $0x408] sm:$0xff] %v1448_v47  ;;  %1768 = vmatprep.mubr.f32.mxu0 %v6102_v16  ;;  %3566 = vst [vmem:[#allocation4 + $0x408] sm:$0xff] %v3056_v48  ;;  %3376 = vmatprep.mubr.f32.mxu1 %v6102_v16  ;;  %v2212_v47 = vld [vmem:[%s5483_s20 + $0x3f8] sm:$0xff] }
 0x1ed   : > { %v1452_v51 = vpop.f32.mrb[130].mxu0  ;;  %v3060_v52 = vpop.f32.mrb[130].mxu1 }
 0x1ee   : > { %1959 = vst [vmem:[#allocation3 + $0x410] sm:$0xff] %v1452_v51  ;;  %v1454_v53 = vpop.f32.mrb[131].mxu0  ;;  %4955 = vmatmul.mubr.msk.f32.gmra.mrb[236].mxu0 %vm606_vm1, %v593_v49  ;;  %3567 = vst [vmem:[#allocation4 + $0x410] sm:$0xff] %v3060_v52  ;;  %v3062_v54 = vpop.f32.mrb[131].mxu1  ;;  %5085 = vmatmul.mubr.msk.f32.gmra.mrb[236].mxu1 %vm606_vm1, %v2203_v50 }
 0x1ef   : > { %1960 = vst [vmem:[#allocation3 + $0x418] sm:$0xff] %v1454_v53  ;;  %1774 = vmatprep.mubr.f32.mxu0 %v6102_v16  ;;  %3568 = vst [vmem:[#allocation4 + $0x418] sm:$0xff] %v3062_v54  ;;  %3382 = vmatprep.mubr.f32.mxu1 %v6102_v16 }
 0x1f1   : > { %v1458_v57 = vpop.f32.mrb[132].mxu0  ;;  %v3066_v58 = vpop.f32.mrb[132].mxu1 }
 0x1f2   : > { %1961 = vst [vmem:[#allocation3 + $0x420] sm:$0xff] %v1458_v57  ;;  %v1460_v59 = vpop.f32.mrb[133].mxu0  ;;  %4956 = vmatmul.mubr.msk.f32.gmra.mrb[238].mxu0 %vm606_vm1, %v594_v55  ;;  %3569 = vst [vmem:[#allocation4 + $0x420] sm:$0xff] %v3066_v58  ;;  %v3068_v60 = vpop.f32.mrb[133].mxu1  ;;  %5086 = vmatmul.mubr.msk.f32.gmra.mrb[238].mxu1 %vm606_vm1, %v2204_v56 }
 0x1f3   : > { %1962 = vst [vmem:[#allocation3 + $0x428] sm:$0xff] %v1460_v59  ;;  %1780 = vmatprep.mubr.f32.mxu0 %v6102_v16  ;;  %3570 = vst [vmem:[#allocation4 + $0x428] sm:$0xff] %v3068_v60  ;;  %3388 = vmatprep.mubr.f32.mxu1 %v6102_v16 }
 0x1f5   : > { %v1464_v63 = vpop.f32.mrb[134].mxu0  ;;  %v3072_v7 = vpop.f32.mrb[134].mxu1 }
 0x1f6   : > { %1963 = vst [vmem:[#allocation3 + $0x430] sm:$0xff] %v1464_v63  ;;  %v1466_v8 = vpop.f32.mrb[135].mxu0  ;;  %4957 = vmatmul.mubr.msk.f32.gmra.mrb[240].mxu0 %vm606_vm1, %v595_v61  ;;  %3571 = vst [vmem:[#allocation4 + $0x430] sm:$0xff] %v3072_v7  ;;  %v3074_v9 = vpop.f32.mrb[135].mxu1  ;;  %5087 = vmatmul.mubr.msk.f32.gmra.mrb[240].mxu1 %vm606_vm1, %v2205_v62 }
 0x1f7   : > { %1964 = vst [vmem:[#allocation3 + $0x438] sm:$0xff] %v1466_v8  ;;  %1786 = vmatprep.mubr.f32.mxu0 %v6102_v16  ;;  %3572 = vst [vmem:[#allocation4 + $0x438] sm:$0xff] %v3074_v9  ;;  %3394 = vmatprep.mubr.f32.mxu1 %v6102_v16 }
 0x1f9   : > { %v1470_v12 = vpop.f32.mrb[136].mxu0  ;;  %v3078_v13 = vpop.f32.mrb[136].mxu1 }
 0x1fa   : > { %1965 = vst [vmem:[#allocation3 + $0x440] sm:$0xff] %v1470_v12  ;;  %v1472_v14 = vpop.f32.mrb[137].mxu0  ;;  %4958 = vmatmul.mubr.msk.f32.gmra.mrb[242].mxu0 %vm606_vm1, %v596_v10  ;;  %3573 = vst [vmem:[#allocation4 + $0x440] sm:$0xff] %v3078_v13  ;;  %v3080_v15 = vpop.f32.mrb[137].mxu1  ;;  %5088 = vmatmul.mubr.msk.f32.gmra.mrb[242].mxu1 %vm606_vm1, %v2206_v11 }
 0x1fb   : > { %1966 = vst [vmem:[#allocation3 + $0x448] sm:$0xff] %v1472_v14  ;;  %1792 = vmatprep.mubr.f32.mxu0 %v6102_v16  ;;  %3574 = vst [vmem:[#allocation4 + $0x448] sm:$0xff] %v3080_v15  ;;  %3400 = vmatprep.mubr.f32.mxu1 %v6102_v16 }
 0x1fd   : > { %v1476_v18 = vpop.f32.mrb[138].mxu0  ;;  %v3084_v19 = vpop.f32.mrb[138].mxu1 }
 0x1fe   : > { %1967 = vst [vmem:[#allocation3 + $0x450] sm:$0xff] %v1476_v18  ;;  %v1478_v20 = vpop.f32.mrb[139].mxu0  ;;  %4959 = vmatmul.mubr.msk.f32.gmra.mrb[244].mxu0 %vm606_vm1, %v597_v17  ;;  %3575 = vst [vmem:[#allocation4 + $0x450] sm:$0xff] %v3084_v19  ;;  %v3086_v21 = vpop.f32.mrb[139].mxu1  ;;  %5089 = vmatmul.mubr.msk.f32.gmra.mrb[244].mxu1 %vm606_vm1, %v2207_v22 }
 0x1ff   : > { %1968 = vst [vmem:[#allocation3 + $0x458] sm:$0xff] %v1478_v20  ;;  %1798 = vmatprep.mubr.f32.mxu0 %v6102_v16  ;;  %3576 = vst [vmem:[#allocation4 + $0x458] sm:$0xff] %v3086_v21  ;;  %3406 = vmatprep.mubr.f32.mxu1 %v6102_v16 }
 0x201   : > { %v1482_v24 = vpop.f32.mrb[140].mxu0  ;;  %v3090_v25 = vpop.f32.mrb[140].mxu1 }
 0x202   : > { %1969 = vst [vmem:[#allocation3 + $0x460] sm:$0xff] %v1482_v24  ;;  %v1484_v26 = vpop.f32.mrb[141].mxu0  ;;  %4960 = vmatmul.mubr.msk.f32.gmra.mrb[246].mxu0 %vm606_vm1, %v598_v23  ;;  %3577 = vst [vmem:[#allocation4 + $0x460] sm:$0xff] %v3090_v25  ;;  %v3092_v27 = vpop.f32.mrb[141].mxu1  ;;  %5090 = vmatmul.mubr.msk.f32.gmra.mrb[246].mxu1 %vm606_vm1, %v2208_v6 }
 0x203   : > { %1970 = vst [vmem:[#allocation3 + $0x468] sm:$0xff] %v1484_v26  ;;  %1804 = vmatprep.mubr.f32.mxu0 %v6102_v16  ;;  %3578 = vst [vmem:[#allocation4 + $0x468] sm:$0xff] %v3092_v27  ;;  %3412 = vmatprep.mubr.f32.mxu1 %v6102_v16 }
 0x205   : > { %v1488_v30 = vpop.f32.mrb[142].mxu0  ;;  %v3096_v31 = vpop.f32.mrb[142].mxu1 }
 0x206   : > { %1971 = vst [vmem:[#allocation3 + $0x470] sm:$0xff] %v1488_v30  ;;  %v1490_v32 = vpop.f32.mrb[143].mxu0  ;;  %4961 = vmatmul.mubr.msk.f32.gmra.mrb[248].mxu0 %vm606_vm1, %v599_v28  ;;  %3579 = vst [vmem:[#allocation4 + $0x470] sm:$0xff] %v3096_v31  ;;  %v3098_v33 = vpop.f32.mrb[143].mxu1  ;;  %5091 = vmatmul.mubr.msk.f32.gmra.mrb[248].mxu1 %vm606_vm1, %v2209_v29 }
 0x207   : > { %1972 = vst [vmem:[#allocation3 + $0x478] sm:$0xff] %v1490_v32  ;;  %1810 = vmatprep.mubr.f32.mxu0 %v6102_v16  ;;  %3580 = vst [vmem:[#allocation4 + $0x478] sm:$0xff] %v3098_v33  ;;  %3418 = vmatprep.mubr.f32.mxu1 %v6102_v16 }
 0x209   : > { %v1494_v36 = vpop.f32.mrb[144].mxu0  ;;  %v3102_v37 = vpop.f32.mrb[144].mxu1 }
 0x20a   : > { %1973 = vst [vmem:[#allocation3 + $0x480] sm:$0xff] %v1494_v36  ;;  %v1496_v38 = vpop.f32.mrb[145].mxu0  ;;  %4962 = vmatmul.mubr.msk.f32.gmra.mrb[250].mxu0 %vm606_vm1, %v600_v34  ;;  %3581 = vst [vmem:[#allocation4 + $0x480] sm:$0xff] %v3102_v37  ;;  %v3104_v39 = vpop.f32.mrb[145].mxu1  ;;  %5092 = vmatmul.mubr.msk.f32.gmra.mrb[250].mxu1 %vm606_vm1, %v2210_v35 }
 0x20b   : > { %1974 = vst [vmem:[#allocation3 + $0x488] sm:$0xff] %v1496_v38  ;;  %1816 = vmatprep.mubr.f32.mxu0 %v6102_v16  ;;  %3582 = vst [vmem:[#allocation4 + $0x488] sm:$0xff] %v3104_v39  ;;  %3424 = vmatprep.mubr.f32.mxu1 %v6102_v16 }
 0x20d   : > { %v1500_v42 = vpop.f32.mrb[146].mxu0  ;;  %v3108_v43 = vpop.f32.mrb[146].mxu1 }
 0x20e   : > { %1975 = vst [vmem:[#allocation3 + $0x490] sm:$0xff] %v1500_v42  ;;  %v1502_v44 = vpop.f32.mrb[147].mxu0  ;;  %4963 = vmatmul.mubr.msk.f32.gmra.mrb[252].mxu0 %vm606_vm1, %v601_v40  ;;  %3583 = vst [vmem:[#allocation4 + $0x490] sm:$0xff] %v3108_v43  ;;  %v3110_v45 = vpop.f32.mrb[147].mxu1  ;;  %5093 = vmatmul.mubr.msk.f32.gmra.mrb[252].mxu1 %vm606_vm1, %v2211_v41 }
 0x20f   : > { %1976 = vst [vmem:[#allocation3 + $0x498] sm:$0xff] %v1502_v44  ;;  %1822 = vmatprep.mubr.f32.mxu0 %v6102_v16  ;;  %3584 = vst [vmem:[#allocation4 + $0x498] sm:$0xff] %v3110_v45  ;;  %3430 = vmatprep.mubr.f32.mxu1 %v6102_v16 }
 0x211   : > { %v1506_v48 = vpop.f32.mrb[148].mxu0  ;;  %v3114_v49 = vpop.f32.mrb[148].mxu1 }
 0x212   : > { %1977 = vst [vmem:[#allocation3 + $0x4a0] sm:$0xff] %v1506_v48  ;;  %v1508_v50 = vpop.f32.mrb[149].mxu0  ;;  %4964 = vmatmul.mubr.msk.f32.gmra.mrb[254].mxu0 %vm606_vm1, %v602_v46  ;;  %3585 = vst [vmem:[#allocation4 + $0x4a0] sm:$0xff] %v3114_v49  ;;  %v3116_v51 = vpop.f32.mrb[149].mxu1  ;;  %5094 = vmatmul.mubr.msk.f32.gmra.mrb[254].mxu1 %vm606_vm1, %v2212_v47 }
 0x213   : > { %1978 = vst [vmem:[#allocation3 + $0x4a8] sm:$0xff] %v1508_v50  ;;  %3586 = vst [vmem:[#allocation4 + $0x4a8] sm:$0xff] %v3116_v51 }
 0x215   : > { %v1512_v52 = vpop.f32.mrb[150].mxu0  ;;  %v3120_v53 = vpop.f32.mrb[150].mxu1 }
 0x216   : > { %1979 = vst [vmem:[#allocation3 + $0x4b0] sm:$0xff] %v1512_v52  ;;  %v1514_v54 = vpop.f32.mrb[151].mxu0  ;;  %3587 = vst [vmem:[#allocation4 + $0x4b0] sm:$0xff] %v3120_v53  ;;  %v3122_v16 = vpop.f32.mrb[151].mxu1 }
 0x217   : > { %1980 = vst [vmem:[#allocation3 + $0x4b8] sm:$0xff] %v1514_v54  ;;  %3588 = vst [vmem:[#allocation4 + $0x4b8] sm:$0xff] %v3122_v16 }
 0x219   : > { %v1518_v55 = vpop.f32.mrb[152].mxu0  ;;  %v3126_v56 = vpop.f32.mrb[152].mxu1 }
 0x21a   : > { %1981 = vst [vmem:[#allocation3 + $0x4c0] sm:$0xff] %v1518_v55  ;;  %v1520_v57 = vpop.f32.mrb[153].mxu0  ;;  %3589 = vst [vmem:[#allocation4 + $0x4c0] sm:$0xff] %v3126_v56  ;;  %v3128_v58 = vpop.f32.mrb[153].mxu1 }
 0x21b   : > { %1982 = vst [vmem:[#allocation3 + $0x4c8] sm:$0xff] %v1520_v57  ;;  %3590 = vst [vmem:[#allocation4 + $0x4c8] sm:$0xff] %v3128_v58 }
 0x21d   : > { %v1524_v59 = vpop.f32.mrb[154].mxu0  ;;  %v3132_v60 = vpop.f32.mrb[154].mxu1 }
 0x21e   : > { %1983 = vst [vmem:[#allocation3 + $0x4d0] sm:$0xff] %v1524_v59  ;;  %v1526_v61 = vpop.f32.mrb[155].mxu0  ;;  %3591 = vst [vmem:[#allocation4 + $0x4d0] sm:$0xff] %v3132_v60  ;;  %v3134_v62 = vpop.f32.mrb[155].mxu1 }
 0x21f   : > { %1984 = vst [vmem:[#allocation3 + $0x4d8] sm:$0xff] %v1526_v61  ;;  %3592 = vst [vmem:[#allocation4 + $0x4d8] sm:$0xff] %v3134_v62 }
 0x221   : > { %v1530_v63 = vpop.f32.mrb[156].mxu0  ;;  %v3138_v7 = vpop.f32.mrb[156].mxu1 }
 0x222   : > { %1985 = vst [vmem:[#allocation3 + $0x4e0] sm:$0xff] %v1530_v63  ;;  %v1532_v8 = vpop.f32.mrb[157].mxu0  ;;  %3593 = vst [vmem:[#allocation4 + $0x4e0] sm:$0xff] %v3138_v7  ;;  %v3140_v9 = vpop.f32.mrb[157].mxu1 }
 0x223   : > { %1986 = vst [vmem:[#allocation3 + $0x4e8] sm:$0xff] %v1532_v8  ;;  %3594 = vst [vmem:[#allocation4 + $0x4e8] sm:$0xff] %v3140_v9 }
 0x225   : > { %v1536_v10 = vpop.f32.mrb[158].mxu0  ;;  %v3144_v11 = vpop.f32.mrb[158].mxu1 }
 0x226   : > { %1987 = vst [vmem:[#allocation3 + $0x4f0] sm:$0xff] %v1536_v10  ;;  %v1538_v12 = vpop.f32.mrb[159].mxu0  ;;  %3595 = vst [vmem:[#allocation4 + $0x4f0] sm:$0xff] %v3144_v11  ;;  %v3146_v13 = vpop.f32.mrb[159].mxu1 }
 0x227   : > { %1988 = vst [vmem:[#allocation3 + $0x4f8] sm:$0xff] %v1538_v12  ;;  %3596 = vst [vmem:[#allocation4 + $0x4f8] sm:$0xff] %v3146_v13 }
 0x229   : > { %v1542_v14 = vpop.f32.mrb[160].mxu0  ;;  %v3150_v15 = vpop.f32.mrb[160].mxu1 }
 0x22a   : > { %1989 = vst [vmem:[#allocation3 + $0x500] sm:$0xff] %v1542_v14  ;;  %v1544_v17 = vpop.f32.mrb[161].mxu0  ;;  %3597 = vst [vmem:[#allocation4 + $0x500] sm:$0xff] %v3150_v15  ;;  %v3152_v22 = vpop.f32.mrb[161].mxu1 }
 0x22b   : > { %1990 = vst [vmem:[#allocation3 + $0x508] sm:$0xff] %v1544_v17  ;;  %3598 = vst [vmem:[#allocation4 + $0x508] sm:$0xff] %v3152_v22 }
 0x22d   : > { %v1548_v18 = vpop.f32.mrb[162].mxu0  ;;  %v3156_v19 = vpop.f32.mrb[162].mxu1 }
 0x22e   : > { %1991 = vst [vmem:[#allocation3 + $0x510] sm:$0xff] %v1548_v18  ;;  %v1550_v20 = vpop.f32.mrb[163].mxu0  ;;  %3599 = vst [vmem:[#allocation4 + $0x510] sm:$0xff] %v3156_v19  ;;  %v3158_v21 = vpop.f32.mrb[163].mxu1  ;;  %v3693_v19 = vlaneseq }
 0x22f   : > { %1992 = vst [vmem:[#allocation3 + $0x518] sm:$0xff] %v1550_v20  ;;  %3600 = vst [vmem:[#allocation4 + $0x518] sm:$0xff] %v3158_v21 }
 0x230   : > { %v6254_v21 = vshrl.u32 %v3693_v19, 7 }
 0x231   : > { %v1554_v23 = vpop.f32.mrb[164].mxu0  ;;  %v3162_v6 = vpop.f32.mrb[164].mxu1 }
 0x232   : > { %1993 = vst [vmem:[#allocation3 + $0x520] sm:$0xff] %v1554_v23  ;;  %v1556_v24 = vpop.f32.mrb[165].mxu0  ;;  %3601 = vst [vmem:[#allocation4 + $0x520] sm:$0xff] %v3162_v6  ;;  %v3164_v25 = vpop.f32.mrb[165].mxu1 }
 0x233   : > { %1994 = vst [vmem:[#allocation3 + $0x528] sm:$0xff] %v1556_v24  ;;  %3602 = vst [vmem:[#allocation4 + $0x528] sm:$0xff] %v3164_v25 }
 0x235   : > { %v1560_v26 = vpop.f32.mrb[166].mxu0  ;;  %v3168_v27 = vpop.f32.mrb[166].mxu1 }
 0x236   : > { %1995 = vst [vmem:[#allocation3 + $0x530] sm:$0xff] %v1560_v26  ;;  %v1562_v28 = vpop.f32.mrb[167].mxu0  ;;  %3603 = vst [vmem:[#allocation4 + $0x530] sm:$0xff] %v3168_v27  ;;  %v3170_v29 = vpop.f32.mrb[167].mxu1 }
 0x237   : > { %1996 = vst [vmem:[#allocation3 + $0x538] sm:$0xff] %v1562_v28  ;;  %3604 = vst [vmem:[#allocation4 + $0x538] sm:$0xff] %v3170_v29 }
 0x239   : > { %v1566_v30 = vpop.f32.mrb[168].mxu0  ;;  %v3174_v31 = vpop.f32.mrb[168].mxu1 }
 0x23a   : > { %1997 = vst [vmem:[#allocation3 + $0x540] sm:$0xff] %v1566_v30  ;;  %v1568_v32 = vpop.f32.mrb[169].mxu0  ;;  %3605 = vst [vmem:[#allocation4 + $0x540] sm:$0xff] %v3174_v31  ;;  %v3176_v33 = vpop.f32.mrb[169].mxu1 }
 0x23b   : > { %1998 = vst [vmem:[#allocation3 + $0x548] sm:$0xff] %v1568_v32  ;;  %3606 = vst [vmem:[#allocation4 + $0x548] sm:$0xff] %v3176_v33 }
 0x23d   : > { %v1572_v34 = vpop.f32.mrb[170].mxu0  ;;  %v3180_v35 = vpop.f32.mrb[170].mxu1 }
 0x23e   : > { %1999 = vst [vmem:[#allocation3 + $0x550] sm:$0xff] %v1572_v34  ;;  %v1574_v36 = vpop.f32.mrb[171].mxu0  ;;  %3607 = vst [vmem:[#allocation4 + $0x550] sm:$0xff] %v3180_v35  ;;  %v3182_v37 = vpop.f32.mrb[171].mxu1 }
 0x23f   : > { %2000 = vst [vmem:[#allocation3 + $0x558] sm:$0xff] %v1574_v36  ;;  %3608 = vst [vmem:[#allocation4 + $0x558] sm:$0xff] %v3182_v37 }
 0x241   : > { %v1578_v38 = vpop.f32.mrb[172].mxu0  ;;  %v3186_v39 = vpop.f32.mrb[172].mxu1 }
 0x242   : > { %2001 = vst [vmem:[#allocation3 + $0x560] sm:$0xff] %v1578_v38  ;;  %v1580_v40 = vpop.f32.mrb[173].mxu0  ;;  %3609 = vst [vmem:[#allocation4 + $0x560] sm:$0xff] %v3186_v39  ;;  %v3188_v41 = vpop.f32.mrb[173].mxu1 }
 0x243   : > { %2002 = vst [vmem:[#allocation3 + $0x568] sm:$0xff] %v1580_v40  ;;  %3610 = vst [vmem:[#allocation4 + $0x568] sm:$0xff] %v3188_v41 }
 0x245   : > { %v1584_v42 = vpop.f32.mrb[174].mxu0  ;;  %v3192_v43 = vpop.f32.mrb[174].mxu1 }
 0x246   : > { %2003 = vst [vmem:[#allocation3 + $0x570] sm:$0xff] %v1584_v42  ;;  %v1586_v44 = vpop.f32.mrb[175].mxu0  ;;  %3611 = vst [vmem:[#allocation4 + $0x570] sm:$0xff] %v3192_v43  ;;  %v3194_v45 = vpop.f32.mrb[175].mxu1 }
 0x247   : > { %2004 = vst [vmem:[#allocation3 + $0x578] sm:$0xff] %v1586_v44  ;;  %3612 = vst [vmem:[#allocation4 + $0x578] sm:$0xff] %v3194_v45 }
 0x249   : > { %v1590_v46 = vpop.f32.mrb[176].mxu0  ;;  %v3198_v47 = vpop.f32.mrb[176].mxu1 }
 0x24a   : > { %2005 = vst [vmem:[#allocation3 + $0x580] sm:$0xff] %v1590_v46  ;;  %v1592_v48 = vpop.f32.mrb[177].mxu0  ;;  %3613 = vst [vmem:[#allocation4 + $0x580] sm:$0xff] %v3198_v47  ;;  %v3200_v49 = vpop.f32.mrb[177].mxu1 }
 0x24b   : > { %2006 = vst [vmem:[#allocation3 + $0x588] sm:$0xff] %v1592_v48  ;;  %3614 = vst [vmem:[#allocation4 + $0x588] sm:$0xff] %v3200_v49 }
 0x24d   : > { %v1596_v50 = vpop.f32.mrb[178].mxu0  ;;  %v3204_v51 = vpop.f32.mrb[178].mxu1 }
 0x24e   : > { %2007 = vst [vmem:[#allocation3 + $0x590] sm:$0xff] %v1596_v50  ;;  %v1598_v52 = vpop.f32.mrb[179].mxu0  ;;  %3615 = vst [vmem:[#allocation4 + $0x590] sm:$0xff] %v3204_v51  ;;  %v3206_v53 = vpop.f32.mrb[179].mxu1 }
 0x24f   : > { %2008 = vst [vmem:[#allocation3 + $0x598] sm:$0xff] %v1598_v52  ;;  %3616 = vst [vmem:[#allocation4 + $0x598] sm:$0xff] %v3206_v53 }
 0x251   : > { %v1602_v54 = vpop.f32.mrb[180].mxu0  ;;  %v3210_v16 = vpop.f32.mrb[180].mxu1 }
 0x252   : > { %2009 = vst [vmem:[#allocation3 + $0x5a0] sm:$0xff] %v1602_v54  ;;  %v1604_v55 = vpop.f32.mrb[181].mxu0  ;;  %3617 = vst [vmem:[#allocation4 + $0x5a0] sm:$0xff] %v3210_v16  ;;  %v3212_v56 = vpop.f32.mrb[181].mxu1 }
 0x253   : > { %2010 = vst [vmem:[#allocation3 + $0x5a8] sm:$0xff] %v1604_v55  ;;  %3618 = vst [vmem:[#allocation4 + $0x5a8] sm:$0xff] %v3212_v56 }
 0x255   : > { %v1608_v57 = vpop.f32.mrb[182].mxu0  ;;  %v3216_v58 = vpop.f32.mrb[182].mxu1 }
 0x256   : > { %2011 = vst [vmem:[#allocation3 + $0x5b0] sm:$0xff] %v1608_v57  ;;  %v1610_v59 = vpop.f32.mrb[183].mxu0  ;;  %3619 = vst [vmem:[#allocation4 + $0x5b0] sm:$0xff] %v3216_v58  ;;  %v3218_v60 = vpop.f32.mrb[183].mxu1 }
 0x257   : > { %2012 = vst [vmem:[#allocation3 + $0x5b8] sm:$0xff] %v1610_v59  ;;  %3620 = vst [vmem:[#allocation4 + $0x5b8] sm:$0xff] %v3218_v60 }
 0x259   : > { %v1614_v61 = vpop.f32.mrb[184].mxu0  ;;  %v3222_v62 = vpop.f32.mrb[184].mxu1 }
 0x25a   : > { %2013 = vst [vmem:[#allocation3 + $0x5c0] sm:$0xff] %v1614_v61  ;;  %v1616_v63 = vpop.f32.mrb[185].mxu0  ;;  %3621 = vst [vmem:[#allocation4 + $0x5c0] sm:$0xff] %v3222_v62  ;;  %v3224_v7 = vpop.f32.mrb[185].mxu1 }
 0x25b   : > { %2014 = vst [vmem:[#allocation3 + $0x5c8] sm:$0xff] %v1616_v63  ;;  %3622 = vst [vmem:[#allocation4 + $0x5c8] sm:$0xff] %v3224_v7 }
 0x25d   : > { %v1620_v8 = vpop.f32.mrb[186].mxu0  ;;  %v3228_v9 = vpop.f32.mrb[186].mxu1 }
 0x25e   : > { %2015 = vst [vmem:[#allocation3 + $0x5d0] sm:$0xff] %v1620_v8  ;;  %v1622_v10 = vpop.f32.mrb[187].mxu0  ;;  %3623 = vst [vmem:[#allocation4 + $0x5d0] sm:$0xff] %v3228_v9  ;;  %v3230_v11 = vpop.f32.mrb[187].mxu1 }
 0x25f   : > { %2016 = vst [vmem:[#allocation3 + $0x5d8] sm:$0xff] %v1622_v10  ;;  %3624 = vst [vmem:[#allocation4 + $0x5d8] sm:$0xff] %v3230_v11 }
 0x261   : > { %v1626_v12 = vpop.f32.mrb[188].mxu0  ;;  %v3234_v13 = vpop.f32.mrb[188].mxu1 }
 0x262   : > { %2017 = vst [vmem:[#allocation3 + $0x5e0] sm:$0xff] %v1626_v12  ;;  %v1628_v14 = vpop.f32.mrb[189].mxu0  ;;  %3625 = vst [vmem:[#allocation4 + $0x5e0] sm:$0xff] %v3234_v13  ;;  %v3236_v15 = vpop.f32.mrb[189].mxu1 }
 0x263   : > { %2018 = vst [vmem:[#allocation3 + $0x5e8] sm:$0xff] %v1628_v14  ;;  %3626 = vst [vmem:[#allocation4 + $0x5e8] sm:$0xff] %v3236_v15 }
 0x265   : > { %v1632_v17 = vpop.f32.mrb[190].mxu0  ;;  %v3240_v22 = vpop.f32.mrb[190].mxu1 }
 0x266   : > { %2019 = vst [vmem:[#allocation3 + $0x5f0] sm:$0xff] %v1632_v17  ;;  %v1634_v18 = vpop.f32.mrb[191].mxu0  ;;  %3627 = vst [vmem:[#allocation4 + $0x5f0] sm:$0xff] %v3240_v22  ;;  %v3242_v20 = vpop.f32.mrb[191].mxu1 }
 0x267   : > { %2020 = vst [vmem:[#allocation3 + $0x5f8] sm:$0xff] %v1634_v18  ;;  %3628 = vst [vmem:[#allocation4 + $0x5f8] sm:$0xff] %v3242_v20 }
 0x269   : > { %v1638_v23 = vpop.f32.mrb[192].mxu0  ;;  %v3246_v6 = vpop.f32.mrb[192].mxu1 }
 0x26a   : > { %2021 = vst [vmem:[#allocation3 + $0x600] sm:$0xff] %v1638_v23  ;;  %v1640_v24 = vpop.f32.mrb[193].mxu0  ;;  %3629 = vst [vmem:[#allocation4 + $0x600] sm:$0xff] %v3246_v6  ;;  %v3248_v25 = vpop.f32.mrb[193].mxu1 }
 0x26b   : > { %2022 = vst [vmem:[#allocation3 + $0x608] sm:$0xff] %v1640_v24  ;;  %3630 = vst [vmem:[#allocation4 + $0x608] sm:$0xff] %v3248_v25 }
 0x26d   : > { %v1644_v26 = vpop.f32.mrb[194].mxu0  ;;  %v3252_v27 = vpop.f32.mrb[194].mxu1 }
 0x26e   : > { %2023 = vst [vmem:[#allocation3 + $0x610] sm:$0xff] %v1644_v26  ;;  %v1646_v28 = vpop.f32.mrb[195].mxu0  ;;  %3631 = vst [vmem:[#allocation4 + $0x610] sm:$0xff] %v3252_v27  ;;  %v3254_v29 = vpop.f32.mrb[195].mxu1 }
 0x26f   : > { %2024 = vst [vmem:[#allocation3 + $0x618] sm:$0xff] %v1646_v28  ;;  %3632 = vst [vmem:[#allocation4 + $0x618] sm:$0xff] %v3254_v29 }
 0x271   : > { %v1650_v30 = vpop.f32.mrb[196].mxu0  ;;  %v3258_v31 = vpop.f32.mrb[196].mxu1 }
 0x272   : > { %2025 = vst [vmem:[#allocation3 + $0x620] sm:$0xff] %v1650_v30  ;;  %v1652_v32 = vpop.f32.mrb[197].mxu0  ;;  %3633 = vst [vmem:[#allocation4 + $0x620] sm:$0xff] %v3258_v31  ;;  %v3260_v33 = vpop.f32.mrb[197].mxu1 }
 0x273   : > { %2026 = vst [vmem:[#allocation3 + $0x628] sm:$0xff] %v1652_v32  ;;  %3634 = vst [vmem:[#allocation4 + $0x628] sm:$0xff] %v3260_v33 }
 0x275   : > { %v1656_v34 = vpop.f32.mrb[198].mxu0  ;;  %v3264_v35 = vpop.f32.mrb[198].mxu1 }
 0x276   : > { %2027 = vst [vmem:[#allocation3 + $0x630] sm:$0xff] %v1656_v34  ;;  %v1658_v36 = vpop.f32.mrb[199].mxu0  ;;  %3635 = vst [vmem:[#allocation4 + $0x630] sm:$0xff] %v3264_v35  ;;  %v3266_v37 = vpop.f32.mrb[199].mxu1 }
 0x277   : > { %2028 = vst [vmem:[#allocation3 + $0x638] sm:$0xff] %v1658_v36  ;;  %3636 = vst [vmem:[#allocation4 + $0x638] sm:$0xff] %v3266_v37 }
 0x279   : > { %v1662_v38 = vpop.f32.mrb[200].mxu0  ;;  %v3270_v39 = vpop.f32.mrb[200].mxu1 }
 0x27a   : > { %2029 = vst [vmem:[#allocation3 + $0x640] sm:$0xff] %v1662_v38  ;;  %v1664_v40 = vpop.f32.mrb[201].mxu0  ;;  %3637 = vst [vmem:[#allocation4 + $0x640] sm:$0xff] %v3270_v39  ;;  %v3272_v41 = vpop.f32.mrb[201].mxu1 }
 0x27b   : > { %2030 = vst [vmem:[#allocation3 + $0x648] sm:$0xff] %v1664_v40  ;;  %3638 = vst [vmem:[#allocation4 + $0x648] sm:$0xff] %v3272_v41 }
 0x27d   : > { %v1668_v42 = vpop.f32.mrb[202].mxu0  ;;  %v3276_v43 = vpop.f32.mrb[202].mxu1 }
 0x27e   : > { %2031 = vst [vmem:[#allocation3 + $0x650] sm:$0xff] %v1668_v42  ;;  %v1670_v44 = vpop.f32.mrb[203].mxu0  ;;  %3639 = vst [vmem:[#allocation4 + $0x650] sm:$0xff] %v3276_v43  ;;  %v3278_v45 = vpop.f32.mrb[203].mxu1 }
 0x27f   : > { %2032 = vst [vmem:[#allocation3 + $0x658] sm:$0xff] %v1670_v44  ;;  %3640 = vst [vmem:[#allocation4 + $0x658] sm:$0xff] %v3278_v45 }
 0x281   : > { %v1674_v46 = vpop.f32.mrb[204].mxu0  ;;  %v3282_v47 = vpop.f32.mrb[204].mxu1 }
 0x282   : > { %2033 = vst [vmem:[#allocation3 + $0x660] sm:$0xff] %v1674_v46  ;;  %v1676_v48 = vpop.f32.mrb[205].mxu0  ;;  %3641 = vst [vmem:[#allocation4 + $0x660] sm:$0xff] %v3282_v47  ;;  %v3284_v49 = vpop.f32.mrb[205].mxu1 }
 0x283   : > { %2034 = vst [vmem:[#allocation3 + $0x668] sm:$0xff] %v1676_v48  ;;  %3642 = vst [vmem:[#allocation4 + $0x668] sm:$0xff] %v3284_v49 }
 0x285   : > { %v1680_v50 = vpop.f32.mrb[206].mxu0  ;;  %v3288_v51 = vpop.f32.mrb[206].mxu1 }
 0x286   : > { %2035 = vst [vmem:[#allocation3 + $0x670] sm:$0xff] %v1680_v50  ;;  %v1682_v52 = vpop.f32.mrb[207].mxu0  ;;  %3643 = vst [vmem:[#allocation4 + $0x670] sm:$0xff] %v3288_v51  ;;  %v3290_v53 = vpop.f32.mrb[207].mxu1 }
 0x287   : > { %2036 = vst [vmem:[#allocation3 + $0x678] sm:$0xff] %v1682_v52  ;;  %3644 = vst [vmem:[#allocation4 + $0x678] sm:$0xff] %v3290_v53 }
 0x289   : > { %v1686_v54 = vpop.f32.mrb[208].mxu0  ;;  %v3294_v16 = vpop.f32.mrb[208].mxu1 }
 0x28a   : > { %2037 = vst [vmem:[#allocation3 + $0x680] sm:$0xff] %v1686_v54  ;;  %v1688_v55 = vpop.f32.mrb[209].mxu0  ;;  %3645 = vst [vmem:[#allocation4 + $0x680] sm:$0xff] %v3294_v16  ;;  %v3296_v56 = vpop.f32.mrb[209].mxu1 }
 0x28b   : > { %2038 = vst [vmem:[#allocation3 + $0x688] sm:$0xff] %v1688_v55  ;;  %3646 = vst [vmem:[#allocation4 + $0x688] sm:$0xff] %v3296_v56 }
 0x28d   : > { %v1692_v57 = vpop.f32.mrb[210].mxu0  ;;  %v3300_v58 = vpop.f32.mrb[210].mxu1 }
 0x28e   : > { %2039 = vst [vmem:[#allocation3 + $0x690] sm:$0xff] %v1692_v57  ;;  %v1694_v59 = vpop.f32.mrb[211].mxu0  ;;  %3647 = vst [vmem:[#allocation4 + $0x690] sm:$0xff] %v3300_v58  ;;  %v3302_v60 = vpop.f32.mrb[211].mxu1 }
 0x28f   : > { %2040 = vst [vmem:[#allocation3 + $0x698] sm:$0xff] %v1694_v59  ;;  %3648 = vst [vmem:[#allocation4 + $0x698] sm:$0xff] %v3302_v60 }
 0x291   : > { %v1698_v61 = vpop.f32.mrb[212].mxu0  ;;  %v3306_v62 = vpop.f32.mrb[212].mxu1 }
 0x292   : > { %2041 = vst [vmem:[#allocation3 + $0x6a0] sm:$0xff] %v1698_v61  ;;  %v1700_v63 = vpop.f32.mrb[213].mxu0  ;;  %3649 = vst [vmem:[#allocation4 + $0x6a0] sm:$0xff] %v3306_v62  ;;  %v3308_v7 = vpop.f32.mrb[213].mxu1 }
 0x293   : > { %2042 = vst [vmem:[#allocation3 + $0x6a8] sm:$0xff] %v1700_v63  ;;  %3650 = vst [vmem:[#allocation4 + $0x6a8] sm:$0xff] %v3308_v7 }
 0x295   : > { %v1704_v8 = vpop.f32.mrb[214].mxu0  ;;  %v3312_v9 = vpop.f32.mrb[214].mxu1 }
 0x296   : > { %2043 = vst [vmem:[#allocation3 + $0x6b0] sm:$0xff] %v1704_v8  ;;  %v1706_v10 = vpop.f32.mrb[215].mxu0  ;;  %3651 = vst [vmem:[#allocation4 + $0x6b0] sm:$0xff] %v3312_v9  ;;  %v3314_v11 = vpop.f32.mrb[215].mxu1 }
 0x297   : > { %2044 = vst [vmem:[#allocation3 + $0x6b8] sm:$0xff] %v1706_v10  ;;  %3652 = vst [vmem:[#allocation4 + $0x6b8] sm:$0xff] %v3314_v11 }
 0x299   : > { %v1710_v12 = vpop.f32.mrb[216].mxu0  ;;  %v3318_v13 = vpop.f32.mrb[216].mxu1 }
 0x29a   : > { %2045 = vst [vmem:[#allocation3 + $0x6c0] sm:$0xff] %v1710_v12  ;;  %v1712_v14 = vpop.f32.mrb[217].mxu0  ;;  %3653 = vst [vmem:[#allocation4 + $0x6c0] sm:$0xff] %v3318_v13  ;;  %v3320_v15 = vpop.f32.mrb[217].mxu1 }
 0x29b   : > { %2046 = vst [vmem:[#allocation3 + $0x6c8] sm:$0xff] %v1712_v14  ;;  %3654 = vst [vmem:[#allocation4 + $0x6c8] sm:$0xff] %v3320_v15 }
 0x29d   : > { %v1716_v17 = vpop.f32.mrb[218].mxu0  ;;  %v3324_v22 = vpop.f32.mrb[218].mxu1 }
 0x29e   : > { %2047 = vst [vmem:[#allocation3 + $0x6d0] sm:$0xff] %v1716_v17  ;;  %v1718_v18 = vpop.f32.mrb[219].mxu0  ;;  %3655 = vst [vmem:[#allocation4 + $0x6d0] sm:$0xff] %v3324_v22  ;;  %v3326_v19 = vpop.f32.mrb[219].mxu1 }
 0x29f   : > { %2048 = vst [vmem:[#allocation3 + $0x6d8] sm:$0xff] %v1718_v18  ;;  %3656 = vst [vmem:[#allocation4 + $0x6d8] sm:$0xff] %v3326_v19 }
 0x2a1   : > { %v1722_v20 = vpop.f32.mrb[220].mxu0  ;;  %v3330_v23 = vpop.f32.mrb[220].mxu1 }
 0x2a2   : > { %2049 = vst [vmem:[#allocation3 + $0x6e0] sm:$0xff] %v1722_v20  ;;  %v1724_v6 = vpop.f32.mrb[221].mxu0  ;;  %3657 = vst [vmem:[#allocation4 + $0x6e0] sm:$0xff] %v3330_v23  ;;  %v3332_v24 = vpop.f32.mrb[221].mxu1 }
 0x2a3   : > { %2050 = vst [vmem:[#allocation3 + $0x6e8] sm:$0xff] %v1724_v6  ;;  %3658 = vst [vmem:[#allocation4 + $0x6e8] sm:$0xff] %v3332_v24 }
 0x2a5   : > { %v1728_v25 = vpop.f32.mrb[222].mxu0  ;;  %v3336_v26 = vpop.f32.mrb[222].mxu1 }
 0x2a6   : > { %2051 = vst [vmem:[#allocation3 + $0x6f0] sm:$0xff] %v1728_v25  ;;  %v1730_v27 = vpop.f32.mrb[223].mxu0  ;;  %3659 = vst [vmem:[#allocation4 + $0x6f0] sm:$0xff] %v3336_v26  ;;  %v3338_v28 = vpop.f32.mrb[223].mxu1 }
 0x2a7   : > { %2052 = vst [vmem:[#allocation3 + $0x6f8] sm:$0xff] %v1730_v27  ;;  %3660 = vst [vmem:[#allocation4 + $0x6f8] sm:$0xff] %v3338_v28 }
 0x2a9   : > { %v1734_v29 = vpop.f32.mrb[224].mxu0  ;;  %v3342_v30 = vpop.f32.mrb[224].mxu1 }
 0x2aa   : > { %2053 = vst [vmem:[#allocation3 + $0x700] sm:$0xff] %v1734_v29  ;;  %v1736_v31 = vpop.f32.mrb[225].mxu0  ;;  %3661 = vst [vmem:[#allocation4 + $0x700] sm:$0xff] %v3342_v30  ;;  %v3344_v32 = vpop.f32.mrb[225].mxu1 }
 0x2ab   : > { %2054 = vst [vmem:[#allocation3 + $0x708] sm:$0xff] %v1736_v31  ;;  %3662 = vst [vmem:[#allocation4 + $0x708] sm:$0xff] %v3344_v32 }
 0x2ad   : > { %v1740_v33 = vpop.f32.mrb[226].mxu0  ;;  %v3348_v34 = vpop.f32.mrb[226].mxu1 }
 0x2ae   : > { %2055 = vst [vmem:[#allocation3 + $0x710] sm:$0xff] %v1740_v33  ;;  %v1742_v35 = vpop.f32.mrb[227].mxu0  ;;  %3663 = vst [vmem:[#allocation4 + $0x710] sm:$0xff] %v3348_v34  ;;  %v3350_v36 = vpop.f32.mrb[227].mxu1 }
 0x2af   : > { %2056 = vst [vmem:[#allocation3 + $0x718] sm:$0xff] %v1742_v35  ;;  %3664 = vst [vmem:[#allocation4 + $0x718] sm:$0xff] %v3350_v36  ;;  %v6256_v36 = vmov 0.0  }
 0x2b1   : > { %v1746_v37 = vpop.f32.mrb[228].mxu0  ;;  %v3354_v38 = vpop.f32.mrb[228].mxu1 }
 0x2b2   : > { %2057 = vst [vmem:[#allocation3 + $0x720] sm:$0xff] %v1746_v37  ;;  %v1748_v39 = vpop.f32.mrb[229].mxu0  ;;  %3665 = vst [vmem:[#allocation4 + $0x720] sm:$0xff] %v3354_v38  ;;  %v3356_v40 = vpop.f32.mrb[229].mxu1  ;;  %v6258_v37 = vmov 0.0   ;;  %v6260_v38 = vmov 0.0  }
 0x2b3   : > { %2058 = vst [vmem:[#allocation3 + $0x728] sm:$0xff] %v1748_v39  ;;  %3666 = vst [vmem:[#allocation4 + $0x728] sm:$0xff] %v3356_v40  ;;  %v6262_v39 = vmov 0.0  }
 0x2b5   : > { %v1752_v41 = vpop.f32.mrb[230].mxu0  ;;  %v3360_v42 = vpop.f32.mrb[230].mxu1 }
 0x2b6   : > { %2059 = vst [vmem:[#allocation3 + $0x730] sm:$0xff] %v1752_v41  ;;  %v1754_v43 = vpop.f32.mrb[231].mxu0  ;;  %3667 = vst [vmem:[#allocation4 + $0x730] sm:$0xff] %v3360_v42  ;;  %v3362_v44 = vpop.f32.mrb[231].mxu1 }
 0x2b7   : > { %2060 = vst [vmem:[#allocation3 + $0x738] sm:$0xff] %v1754_v43  ;;  %3668 = vst [vmem:[#allocation4 + $0x738] sm:$0xff] %v3362_v44 }
 0x2b9   : > { %v1758_v45 = vpop.f32.mrb[232].mxu0  ;;  %v3366_v46 = vpop.f32.mrb[232].mxu1 }
 0x2ba   : > { %2061 = vst [vmem:[#allocation3 + $0x740] sm:$0xff] %v1758_v45  ;;  %v1760_v47 = vpop.f32.mrb[233].mxu0  ;;  %3669 = vst [vmem:[#allocation4 + $0x740] sm:$0xff] %v3366_v46  ;;  %v3368_v48 = vpop.f32.mrb[233].mxu1 }
 0x2bb   : > { %2062 = vst [vmem:[#allocation3 + $0x748] sm:$0xff] %v1760_v47  ;;  %3670 = vst [vmem:[#allocation4 + $0x748] sm:$0xff] %v3368_v48 }
 0x2bd   : > { %v1764_v49 = vpop.f32.mrb[234].mxu0  ;;  %v3372_v50 = vpop.f32.mrb[234].mxu1 }
 0x2be   : > { %2063 = vst [vmem:[#allocation3 + $0x750] sm:$0xff] %v1764_v49  ;;  %v1766_v51 = vpop.f32.mrb[235].mxu0  ;;  %3671 = vst [vmem:[#allocation4 + $0x750] sm:$0xff] %v3372_v50  ;;  %v3374_v52 = vpop.f32.mrb[235].mxu1 }
 0x2bf   : > { %2064 = vst [vmem:[#allocation3 + $0x758] sm:$0xff] %v1766_v51  ;;  %3672 = vst [vmem:[#allocation4 + $0x758] sm:$0xff] %v3374_v52 }
 0x2c1   : > { %v1770_v53 = vpop.f32.mrb[236].mxu0  ;;  %v3378_v54 = vpop.f32.mrb[236].mxu1 }
 0x2c2   : > { %2065 = vst [vmem:[#allocation3 + $0x760] sm:$0xff] %v1770_v53  ;;  %v1772_v16 = vpop.f32.mrb[237].mxu0  ;;  %3673 = vst [vmem:[#allocation4 + $0x760] sm:$0xff] %v3378_v54  ;;  %v3380_v55 = vpop.f32.mrb[237].mxu1 }
 0x2c3   : > { %2066 = vst [vmem:[#allocation3 + $0x768] sm:$0xff] %v1772_v16  ;;  %3674 = vst [vmem:[#allocation4 + $0x768] sm:$0xff] %v3380_v55 }
 0x2c5   : > { %v1776_v56 = vpop.f32.mrb[238].mxu0  ;;  %v3384_v57 = vpop.f32.mrb[238].mxu1 }
 0x2c6   : > { %2067 = vst [vmem:[#allocation3 + $0x770] sm:$0xff] %v1776_v56  ;;  %v1778_v58 = vpop.f32.mrb[239].mxu0  ;;  %3675 = vst [vmem:[#allocation4 + $0x770] sm:$0xff] %v3384_v57  ;;  %v3386_v59 = vpop.f32.mrb[239].mxu1 }
 0x2c7   : > { %2068 = vst [vmem:[#allocation3 + $0x778] sm:$0xff] %v1778_v58  ;;  %3676 = vst [vmem:[#allocation4 + $0x778] sm:$0xff] %v3386_v59 }
 0x2c9   : > { %v1782_v60 = vpop.f32.mrb[240].mxu0  ;;  %v3390_v61 = vpop.f32.mrb[240].mxu1 }
 0x2ca   : > { %2069 = vst [vmem:[#allocation3 + $0x780] sm:$0xff] %v1782_v60  ;;  %v1784_v62 = vpop.f32.mrb[241].mxu0  ;;  %3677 = vst [vmem:[#allocation4 + $0x780] sm:$0xff] %v3390_v61  ;;  %v3392_v63 = vpop.f32.mrb[241].mxu1 }
 0x2cb   : > { %2070 = vst [vmem:[#allocation3 + $0x788] sm:$0xff] %v1784_v62  ;;  %3678 = vst [vmem:[#allocation4 + $0x788] sm:$0xff] %v3392_v63 }
 0x2cd   : > { %v1788_v7 = vpop.f32.mrb[242].mxu0  ;;  %v3396_v8 = vpop.f32.mrb[242].mxu1 }
 0x2ce   : > { %2071 = vst [vmem:[#allocation3 + $0x790] sm:$0xff] %v1788_v7  ;;  %v1790_v9 = vpop.f32.mrb[243].mxu0  ;;  %3679 = vst [vmem:[#allocation4 + $0x790] sm:$0xff] %v3396_v8  ;;  %v3398_v10 = vpop.f32.mrb[243].mxu1 }
 0x2cf   : > { %2072 = vst [vmem:[#allocation3 + $0x798] sm:$0xff] %v1790_v9  ;;  %3680 = vst [vmem:[#allocation4 + $0x798] sm:$0xff] %v3398_v10 }
 0x2d1   : > { %v1794_v11 = vpop.f32.mrb[244].mxu0  ;;  %v3402_v12 = vpop.f32.mrb[244].mxu1 }
 0x2d2   : > { %2073 = vst [vmem:[#allocation3 + $0x7a0] sm:$0xff] %v1794_v11  ;;  %v1796_v13 = vpop.f32.mrb[245].mxu0  ;;  %3681 = vst [vmem:[#allocation4 + $0x7a0] sm:$0xff] %v3402_v12  ;;  %v3404_v14 = vpop.f32.mrb[245].mxu1 }
 0x2d3   : > { %2074 = vst [vmem:[#allocation3 + $0x7a8] sm:$0xff] %v1796_v13  ;;  %3682 = vst [vmem:[#allocation4 + $0x7a8] sm:$0xff] %v3404_v14 }
 0x2d5   : > { %v1800_v15 = vpop.f32.mrb[246].mxu0  ;;  %v3408_v17 = vpop.f32.mrb[246].mxu1 }
 0x2d6   : > { %2075 = vst [vmem:[#allocation3 + $0x7b0] sm:$0xff] %v1800_v15  ;;  %v1802_v22 = vpop.f32.mrb[247].mxu0  ;;  %3683 = vst [vmem:[#allocation4 + $0x7b0] sm:$0xff] %v3408_v17  ;;  %v3410_v18 = vpop.f32.mrb[247].mxu1 }
 0x2d7   : > { %2076 = vst [vmem:[#allocation3 + $0x7b8] sm:$0xff] %v1802_v22  ;;  %3684 = vst [vmem:[#allocation4 + $0x7b8] sm:$0xff] %v3410_v18 }
 0x2d9   : > { %v1806_v19 = vpop.f32.mrb[248].mxu0  ;;  %v3414_v20 = vpop.f32.mrb[248].mxu1 }
 0x2da   : > { %2077 = vst [vmem:[#allocation3 + $0x7c0] sm:$0xff] %v1806_v19  ;;  %v1808_v23 = vpop.f32.mrb[249].mxu0  ;;  %3685 = vst [vmem:[#allocation4 + $0x7c0] sm:$0xff] %v3414_v20  ;;  %v3416_v6 = vpop.f32.mrb[249].mxu1 }
 0x2db   : > { %2078 = vst [vmem:[#allocation3 + $0x7c8] sm:$0xff] %v1808_v23  ;;  %3686 = vst [vmem:[#allocation4 + $0x7c8] sm:$0xff] %v3416_v6 }
 0x2dd   : > { %v1812_v24 = vpop.f32.mrb[250].mxu0  ;;  %v3420_v25 = vpop.f32.mrb[250].mxu1 }
 0x2de   : > { %2079 = vst [vmem:[#allocation3 + $0x7d0] sm:$0xff] %v1812_v24  ;;  %v1814_v26 = vpop.f32.mrb[251].mxu0  ;;  %3687 = vst [vmem:[#allocation4 + $0x7d0] sm:$0xff] %v3420_v25  ;;  %v3422_v27 = vpop.f32.mrb[251].mxu1 }
 0x2df   : > { %2080 = vst [vmem:[#allocation3 + $0x7d8] sm:$0xff] %v1814_v26  ;;  %3688 = vst [vmem:[#allocation4 + $0x7d8] sm:$0xff] %v3422_v27 }
 0x2e1   : > { %v1818_v28 = vpop.f32.mrb[252].mxu0  ;;  %v3426_v29 = vpop.f32.mrb[252].mxu1 }
 0x2e2   : > { %2081 = vst [vmem:[#allocation3 + $0x7e0] sm:$0xff] %v1818_v28  ;;  %v1820_v30 = vpop.f32.mrb[253].mxu0  ;;  %3689 = vst [vmem:[#allocation4 + $0x7e0] sm:$0xff] %v3426_v29  ;;  %v3428_v31 = vpop.f32.mrb[253].mxu1 }
 0x2e3   : > { %2082 = vst [vmem:[#allocation3 + $0x7e8] sm:$0xff] %v1820_v30  ;;  %3690 = vst [vmem:[#allocation4 + $0x7e8] sm:$0xff] %v3428_v31 }
 0x2e5   : > { %v1824_v32 = vpop.f32.mrb[254].mxu0  ;;  %v3432_v33 = vpop.f32.mrb[254].mxu1 }
 0x2e6   : > { %2083 = vst [vmem:[#allocation3 + $0x7f0] sm:$0xff] %v1824_v32  ;;  %v1826_v34 = vpop.f32.mrb[255].mxu0  ;;  %3691 = vst [vmem:[#allocation4 + $0x7f0] sm:$0xff] %v3432_v33  ;;  %v3434_v35 = vpop.f32.mrb[255].mxu1 }
 0x2e7   : > { %2084 = vst [vmem:[#allocation3 + $0x7f8] sm:$0xff] %v1826_v34  ;;  %3692 = vst [vmem:[#allocation4 + $0x7f8] sm:$0xff] %v3434_v35 }
 0x2e8 LB: >> { %v6822_v5 = vld [vmem:[#allocation5_spill] sm:$0xff]  ;;  %s5095_s22 = sshll.u32 %s5357_s21, 3  ;;  %v6283_v40 = vsub.s32 0, %v6254_v21  ;;  %v6286_v41 = vsub.s32 1, %v6254_v21  ;;  %v5360_v52 = vmov 1966171168   ;;  %v5341_v36 = vphi %v6256_v36, %v6839_v36   ;;  %s5357_s21 = sphi %s6264_s21, %s3704_s21   ;;  %v5353_v39 = vphi %v6262_v39, %v6840_v39   ;;  %v5349_v38 = vphi %v6260_v38, %v6695_v38   ;;  %v5345_v37 = vphi %v6258_v37, %v6697_v37  }
 0x2e9   : >> { %s3710_s24 = sshra.s32 %s5095_s22, 3  ;;  %v3830_v53 = vunpack.c.l.s4 %v5360_v52  ;;  %s6310_s16 = sshll.u32 %s5357_s21, 7  ;;  %v6316_v9 = vsub.s32 2, %v6254_v21  ;;  %v6319_v10 = vsub.s32 3, %v6254_v21  ;;  %v6325_v14 = vsub.s32 4, %v6254_v21 }
 0x2ea   : >> { %s6288_s25 = sshll.u32 %s3710_s24, 4  ;;  %v3725_v42 = vrot.slane %v6822_v5, %v6283_v40  ;;  %v3729_v43 = vrot.slane %v6822_v5, %v6286_v41  ;;  %s3751_s27 = sshra.s32 %s6310_s16, 3  ;;  %v6330_v22 = vsub.s32 5, %v6254_v21  ;;  %v6333_v18 = vsub.s32 6, %v6254_v21 }
 0x2eb   : >> { %s3718_s11 = scalar_lea.vmem %s428_s12, %s6288_s25  ;;  %s3714_s15 = scalar_lea.vmem %s417_s9, %s6288_s25  ;;  %v3831_v57 = vunpack.c.0.s8 %v3830_v53  ;;  %v6342_v6 = vsub.s32 7, %v6254_v21  ;;  %vm3858_vm4 = vcmp.eq.s32.totalorder %v6254_v21, 0  ;;  %vm3966_vm5 = vcmp.eq.s32.totalorder %v6254_v21, 1 }
 0x2ec   : >> { %v3719_v44 = vld [vmem:[%s3718_s11] sm:$0xff]  ;;  %v3720_v45 = vld [vmem:[%s3718_s11 + $0x8] sm:$0xff]  ;;  %s6327_s18 = sshll.u32 %s3751_s27, 4  ;;  %s3869_s19 = sadd.s32 16, %s6310_s16  ;;  %vm4067_vm6 = vcmp.eq.s32.totalorder %v6254_v21, 2  ;;  %vm4168_vm7 = vcmp.eq.s32.totalorder %v6254_v21, 3 }
 0x2ed   : >> { %v3732_v46 = vadd.f32 %v3725_v42, %v3719_v44  ;;  %v3733_v47 = vadd.f32 %v3729_v43, %v3720_v45  ;;  %v3715_v58 = vld [vmem:[%s3714_s15] sm:$0xff]  ;;  %v3716_v59 = vld [vmem:[%s3714_s15 + $0x8] sm:$0xff]  ;;  %v6307_v61 = vsub.s32 %v3831_v57, %v6254_v21  ;;  %s3977_s20 = sadd.s32 32, %s6310_s16  ;;  %s6367_s22 = sshra.s32 %s3869_s19, 3  ;;  %vm4283_vm8 = vcmp.eq.s32.totalorder %v6254_v21, 4 }
 0x2ee   : >> { %v3828_v60 = vcombine.low %v3715_v58, %v3716_v59  ;;  %v4253_v62 = vcombine.high %v3715_v58, %v3716_v59  ;;  %s6378_s24 = sshra.s32 %s3977_s20, 3  ;;  %s3755_s26 = scalar_lea.vmem [#allocation3], %s6327_s18  ;;  %vm4391_vm9 = vcmp.eq.s32.totalorder %v6254_v21, 5  ;;  %vm4492_vm10 = vcmp.eq.s32.totalorder %v6254_v21, 6 }
 0x2ef   : >> { %v3736_v48 = vmin.f32 %v3732_v46, 20.0  ;;  %v3737_v49 = vmin.f32 %v3733_v47, 20.0  ;;  %vm3734_vm2 = vcmp.gt.f32.partialorder %v3732_v46, 20.0  ;;  %vm3735_vm3 = vcmp.gt.f32.partialorder %v3733_v47, 20.0  ;;  %s5137_s10 = sshll.u32 %s6367_s22, 4  ;;  %s5139_s11 = sshll.u32 %s6378_s24, 4 }
 0x2f0   : >> { %v3835_v63 = vrot.slane %v3828_v60, %v6307_v61  ;;  %v4260_v7 = vrot.slane %v4253_v62, %v6307_v61  ;;  %s3874_s13 = scalar_lea.vmem [#allocation3], %s5137_s10  ;;  %s3982_s14 = scalar_lea.vmem [#allocation3], %s5139_s11  ;;  %vm4593_vm11 = vcmp.eq.s32.totalorder %v6254_v21, 7 }
 0x2f1   : >> { %v3738_v50 = vmul.f32 1.442695, %v3736_v48  ;;  %v3740_v51 = vmul.f32 1.442695, %v3737_v49  ;;  %s3761_s15 = scalar_lea.vmem [#allocation4], %s6327_s18  ;;  %s3880_s27 = scalar_lea.vmem [#allocation4], %s5137_s10 }
 0x2f2   : >> { %v6322_v13 = vrot.slane %v3835_v63, %v6307_v61  ;;  %v3943_v17 = vcombine.high %v3835_v63, %v3835_v63  ;;  %v6339_v20 = vrot.slane %v4260_v7, %v6307_v61  ;;  %v4368_v23 = vcombine.high %v4260_v7, %v4260_v7  ;;  %s4078_s18 = sadd.s32 48, %s6310_s16  ;;  %s3988_s19 = scalar_lea.vmem [#allocation4], %s5139_s11 }
 0x2f3   : >> { %5223 = vpow2.f32 %v3738_v50  ;;  %s6463_s20 = sshra.s32 %s4078_s18, 3  ;;  %s4179_s10 = sadd.s32 64, %s6310_s16 }
 0x2f4   : >> { %5225 = vpow2.f32 %v3740_v51  ;;  %v6361_v30 = vmul.f32 %v6322_v13, %v5447_v4  ;;  %v6371_v35 = vrot.slane %v3943_v17, %v6307_v61  ;;  %v4051_v49 = vcombine.high %v6322_v13, %v6322_v13  ;;  %v3758_v51 = vld [vmem:[%s3755_s26 + $0x10] sm:$0xff]  ;;  %v3759_v17 = vld [vmem:[%s3755_s26 + $0x18] sm:$0xff]  ;;  %s5141_s22 = sshll.u32 %s6463_s20, 4  ;;  %s6547_s11 = sshra.s32 %s4179_s10, 3 }
 0x2f5   : >> { %v6385_v50 = vmul.f32 %v6339_v20, %v5447_v4  ;;  %v6398_v62 = vrot.slane %v4368_v23, %v6307_v61  ;;  %s4083_s24 = scalar_lea.vmem [#allocation3], %s5141_s22  ;;  %s3704_s21 = sadd.s32 1, %s5357_s21  }
 0x2f6   : >> { %p3701_p5 = scmp.ge.s32.totalorder %s3704_s21, 8  }
 0x2f7   : >> { %6823 = vst [vmem:[#allocation6_spill] sm:$0xff] %v6398_v62 }
 0x2fd   : >> { %v5224_v54 = vpop.eup %5223 }
 0x2fe   : >> { %v5226_v16 = vpop.eup %5225  ;;  %v3742_v55 = vadd.f32 1.0, %v5224_v54 }
 0x2ff   : >> { %v3743_v56 = vadd.f32 1.0, %v5226_v16 }
 0x300   : >> { %5227 = vlog2.f32 %v3742_v55  ;;  %v3757_v55 = vld [vmem:[%s3755_s26 + $0x8] sm:$0xff] }
 0x301   : >> { %5229 = vlog2.f32 %v3743_v56 }
 0x30a   : >> { %v5228_v8 = vpop.eup %5227 }
 0x30b   : >> { %v5230_v11 = vpop.eup %5229  ;;  %v3745_v12 = vmul.f32 0.6931472, %v5228_v8 }
 0x30c   : >> { %v3747_v15 = vmul.f32 0.6931472, %v5230_v11 }
 0x30d   : >> { %v6335_v19 = vsel %vm3734_vm2, %v3732_v46, %v3745_v12  ;;  %v3756_v46 = vld [vmem:[%s3755_s26] sm:$0xff]  ;;  %s4089_s26 = scalar_lea.vmem [#allocation4], %s5141_s22 }
 0x30e   : >> { %v6344_v24 = vsel %vm3735_vm3, %v3733_v47, %v3747_v15  ;;  %v3769_v25 = vrot.slane %v6335_v19, %v6283_v40  ;;  %v6349_v26 = vmul.f32 %v6335_v19, %v3715_v58  ;;  %v3888_v27 = vrot.slane %v6335_v19, %v6286_v41 }
 0x30f   : >> { %v3773_v28 = vrot.slane %v6344_v24, %v6283_v40  ;;  %v6357_v29 = vmul.f32 %v6344_v24, %v3716_v59  ;;  %v3892_v31 = vrot.slane %v6344_v24, %v6286_v41  ;;  %v3996_v16 = vrot.slane %v6335_v19, %v6316_v9 }
 0x310   : >> { %v3774_v32 = vmul.f32 %v3769_v25, %v5427_v0  ;;  %v3776_v33 = vmul.f32 %v3769_v25, %v5437_v2  ;;  %v3893_v34 = vmul.f32 %v3888_v27, %v5427_v0  ;;  %v3795_v44 = vrot.slane %v6349_v26, %v6283_v40 }
 0x311   : >> { %v3775_v42 = vmul.f32 %v3773_v28, %v5432_v1  ;;  %v3777_v43 = vmul.f32 %v3773_v28, %v5442_v3  ;;  %v3894_v45 = vmul.f32 %v3892_v31, %v5432_v1  ;;  %v3799_v54 = vrot.slane %v6357_v29, %v6283_v40  ;;  %v3876_v28 = vld [vmem:[%s3874_s13 + $0x8] sm:$0xff] }
 0x312   : >> { %v3778_v47 = vmul.f32 1.442695, %v3774_v32  ;;  %v3782_v48 = vmul.f32 1.442695, %v3776_v33  ;;  %v3895_v56 = vmul.f32 %v3888_v27, %v5437_v2  ;;  %v3896_v57 = vmul.f32 %v3892_v31, %v5442_v3  ;;  %v3875_v27 = vld [vmem:[%s3874_s13] sm:$0xff]  ;;  %v3877_v31 = vld [vmem:[%s3874_s13 + $0x10] sm:$0xff] }
 0x313   : >> { %v3780_v52 = vmul.f32 1.442695, %v3775_v42  ;;  %v3784_v53 = vmul.f32 1.442695, %v3777_v43  ;;  %v3897_v58 = vmul.f32 1.442695, %v3893_v34  ;;  %v6395_v59 = vmul.f32 %v3795_v44, %v3756_v46 }
 0x314   : >> { %5231 = vpow2.f32 %v3778_v47  ;;  %v3899_v60 = vmul.f32 1.442695, %v3894_v45  ;;  %v6400_v63 = vmul.f32 %v3795_v44, %v3758_v51  ;;  %v3901_v7 = vmul.f32 1.442695, %v3895_v56  ;;  %v3878_v42 = vld [vmem:[%s3874_s13 + $0x18] sm:$0xff]  ;;  %v3983_v43 = vld [vmem:[%s3982_s14] sm:$0xff] }
 0x315   : >> { %5233 = vpow2.f32 %v3780_v52  ;;  %v4000_v8 = vrot.slane %v6344_v24, %v6316_v9  ;;  %v6404_v11 = vmul.f32 %v3799_v54, %v3757_v55  ;;  %v3903_v12 = vmul.f32 1.442695, %v3896_v57  ;;  %v3985_v51 = vld [vmem:[%s3982_s14 + $0x10] sm:$0xff]  ;;  %s5143_s13 = sshll.u32 %s6547_s11, 4 }
 0x316   : >> { %5235 = vpow2.f32 %v3782_v48  ;;  %v3912_v15 = vrot.slane %v6349_v26, %v6286_v41  ;;  %v3916_v61 = vrot.slane %v6357_v29, %v6286_v41  ;;  %v4001_v23 = vmul.f32 %v3996_v16, %v5427_v0  ;;  %v3984_v48 = vld [vmem:[%s3982_s14 + $0x8] sm:$0xff]  ;;  %s4190_s22 = scalar_lea.vmem [#allocation4], %s5143_s13 }
 0x317   : >> { %5237 = vpow2.f32 %v3784_v53  ;;  %v4002_v25 = vmul.f32 %v4000_v8, %v5432_v1  ;;  %v4003_v32 = vmul.f32 %v3996_v16, %v5437_v2  ;;  %v4004_v33 = vmul.f32 %v4000_v8, %v5442_v3 }
 0x318   : >> { %5239 = vpow2.f32 %v3897_v58  ;;  %v4020_v34 = vrot.slane %v6349_v26, %v6316_v9  ;;  %v4005_v44 = vmul.f32 1.442695, %v4001_v23  ;;  %v4024_v46 = vrot.slane %v6357_v29, %v6316_v9  ;;  %v3986_v58 = vld [vmem:[%s3982_s14 + $0x18] sm:$0xff]  ;;  %s4294_s14 = sadd.s32 80, %s6310_s16 }
 0x319   : >> { %5241 = vpow2.f32 %v3899_v60  ;;  %v4007_v45 = vmul.f32 1.442695, %v4002_v25  ;;  %v3803_v47 = vmul.f32 %v3799_v54, %v3759_v17  ;;  %v4009_v52 = vmul.f32 1.442695, %v4003_v32  ;;  %s6599_s18 = sshra.s32 %s4294_s14, 3 }
 0x31a   : >> { %5243 = vpow2.f32 %v3901_v7  ;;  %v4011_v53 = vmul.f32 1.442695, %v4004_v33  ;;  %v3917_v16 = vmul.f32 %v3912_v15, %v3875_v27  ;;  %v3918_v55 = vmul.f32 %v3916_v61, %v3876_v28  ;;  %v3762_v27 = vld [vmem:[%s3761_s15] sm:$0xff]  ;;  %s5145_s20 = sshll.u32 %s6599_s18, 4 }
 0x31b   : >> { %5245 = vpow2.f32 %v3903_v12  ;;  %v6422_v56 = vmul.f32 %v3912_v15, %v3877_v31  ;;  %v6424_v57 = vmul.f32 %v3916_v61, %v3878_v42  ;;  %v4097_v60 = vrot.slane %v6335_v19, %v6319_v10  ;;  %v3763_v42 = vld [vmem:[%s3761_s15 + $0x8] sm:$0xff]  ;;  %s4305_s11 = scalar_lea.vmem [#allocation4], %s5145_s20 }
 0x31c   : >> { %5247 = vpow2.f32 %v4005_v44  ;;  %v4101_v9 = vrot.slane %v6344_v24, %v6319_v10  ;;  %v6430_v7 = vmul.f32 %v4020_v34, %v3983_v43  ;;  %v6432_v8 = vmul.f32 %v4024_v46, %v3984_v48 }
 0x31d   : >> { %5249 = vpow2.f32 %v4007_v45  ;;  %v6434_v12 = vmul.f32 %v4020_v34, %v3985_v51  ;;  %v4102_v61 = vmul.f32 %v4097_v60, %v5427_v0  ;;  %v6441_v31 = vmul.f32 %v4024_v46, %v3986_v58  ;;  %v3764_v51 = vld [vmem:[%s3761_s15 + $0x10] sm:$0xff] }
 0x31e   : >> { %v5232_v54 = vpop.eup %5231  ;;  %5251 = vpow2.f32 %v4009_v52  ;;  %v4103_v23 = vmul.f32 %v4101_v9, %v5432_v1  ;;  %v4104_v32 = vmul.f32 %v4097_v60, %v5437_v2  ;;  %v4105_v33 = vmul.f32 %v4101_v9, %v5442_v3  ;;  %v3765_v60 = vld [vmem:[%s3761_s15 + $0x18] sm:$0xff]  ;;  %s4184_s15 = scalar_lea.vmem [#allocation3], %s5143_s13  ;;  %s4503_s13 = sadd.s32 112, %s6310_s16 }
 0x31f   : >> { %v5234_v15 = vpop.eup %5233  ;;  %v3786_v17 = vmul.f32 %v5353_v39, %v5232_v54  ;;  %5253 = vpow2.f32 %v4011_v53  ;;  %v4106_v44 = vmul.f32 1.442695, %v4102_v61  ;;  %v3881_v61 = vld [vmem:[%s3880_s27] sm:$0xff] }
 0x320   : >> { %v5236_v25 = vpop.eup %5235  ;;  %v3787_v28 = vmul.f32 %v5349_v38, %v5234_v15  ;;  %v4108_v45 = vmul.f32 1.442695, %v4103_v23  ;;  %v4110_v46 = vmul.f32 1.442695, %v4104_v32  ;;  %v4112_v53 = vmul.f32 1.442695, %v4105_v33 }
 0x321   : >> { %v5238_v34 = vpop.eup %5237  ;;  %v3788_v39 = vmul.f32 %v5345_v37, %v5236_v25  ;;  %v3804_v43 = vadd.f32 %v6395_v59, %v3786_v17  ;;  %5255 = vpow2.f32 %v4106_v44 }
 0x322   : >> { %v5240_v48 = vpop.eup %5239  ;;  %v3789_v52 = vmul.f32 %v5341_v36, %v5238_v34  ;;  %v3805_v38 = vadd.f32 %v6404_v11, %v3787_v28  ;;  %5257 = vpow2.f32 %v4108_v45  ;;  %v3882_v11 = vld [vmem:[%s3880_s27 + $0x8] sm:$0xff] }
 0x323   : >> { %v5242_v58 = vpop.eup %5241  ;;  %v3806_v9 = vadd.f32 %v6400_v63, %v3788_v39  ;;  %v3808_v54 = vmul.f32 %v3804_v43, %v3762_v27  ;;  %v3905_v15 = vmul.f32 %v5240_v48, %v3804_v43  ;;  %5259 = vpow2.f32 %v4110_v46  ;;  %v3883_v27 = vld [vmem:[%s3880_s27 + $0x10] sm:$0xff]  ;;  %v3884_v43 = vld [vmem:[%s3880_s27 + $0x18] sm:$0xff]  ;;  %v3989_v46 = vld [vmem:[%s3988_s19] sm:$0xff]  ;;  %s4402_s27 = sadd.s32 96, %s6310_s16  ;;  %s6657_s16 = sshra.s32 %s4503_s13, 3 }
 0x324   : >> { %v5244_v37 = vpop.eup %5243  ;;  %v3807_v59 = vadd.f32 %v3803_v47, %v3789_v52  ;;  %v3809_v17 = vmul.f32 %v3805_v38, %v3763_v42  ;;  %v3906_v23 = vmul.f32 %v5242_v58, %v3805_v38  ;;  %5261 = vpow2.f32 %v4112_v53 }
 0x325   : >> { %v5246_v36 = vpop.eup %5245  ;;  %v3810_v25 = vmul.f32 %v3806_v9, %v3764_v51  ;;  %v3907_v28 = vmul.f32 %v5244_v37, %v3806_v9  ;;  %v3921_v32 = vadd.f32 %v3917_v16, %v3905_v15  ;;  %v3990_v9 = vld [vmem:[%s3988_s19 + $0x8] sm:$0xff] }
 0x326   : >> { %v5248_v33 = vpop.eup %5247  ;;  %v3811_v63 = vmul.f32 %v3807_v59, %v3765_v60  ;;  %v3908_v34 = vmul.f32 %v5246_v36, %v3807_v59  ;;  %v3922_v39 = vadd.f32 %v3918_v55, %v3906_v23  ;;  %v3991_v59 = vld [vmem:[%s3988_s19 + $0x10] sm:$0xff]  ;;  %v3992_v36 = vld [vmem:[%s3988_s19 + $0x18] sm:$0xff]  ;;  %s6612_s19 = sshra.s32 %s4402_s27, 3 }
 0x327   : >> { %v5250_v47 = vpop.eup %5249  ;;  %v3812_v42 = vadd.f32 %v3810_v25, %v3808_v54  ;;  %v3923_v44 = vadd.f32 %v6422_v56, %v3907_v28  ;;  %v3925_v45 = vmul.f32 %v3921_v32, %v3881_v61  ;;  %v4013_v48 = vmul.f32 %v5248_v33, %v3921_v32 }
 0x328   : >> { %v5252_v51 = vpop.eup %5251  ;;  %v3819_v52 = vadd.f32 %v3811_v63, %v3809_v17  ;;  %v3924_v16 = vadd.f32 %v6424_v57, %v3908_v34  ;;  %v3926_v38 = vmul.f32 %v3922_v39, %v3882_v11  ;;  %v4014_v58 = vmul.f32 %v5250_v47, %v3922_v39 }
 0x329   : >> { %v5254_v60 = vpop.eup %5253  ;;  %v3813_v55 = vrot.slane %v3812_v42, 4  ;;  %v3927_v53 = vmul.f32 %v3923_v44, %v3883_v27  ;;  %v4015_v54 = vmul.f32 %v5252_v51, %v3923_v44  ;;  %v6458_v15 = vadd.f32 %v6430_v7, %v4013_v48 }
 0x32a   : >> { %v3820_v56 = vrot.slane %v3819_v52, 4  ;;  %v3928_v37 = vmul.f32 %v3924_v16, %v3884_v43  ;;  %v4016_v61 = vmul.f32 %v5254_v60, %v3924_v16  ;;  %v6461_v17 = vadd.f32 %v6432_v8, %v4014_v58 }
 0x32b   : >> { %v3814_v57 = vadd.f32 %v3813_v55, %v3812_v42  ;;  %v3929_v23 = vadd.f32 %v3927_v53, %v3925_v45  ;;  %v4031_v25 = vadd.f32 %v6434_v12, %v4015_v54  ;;  %v4033_v11 = vmul.f32 %v6458_v15, %v3989_v46  ;;  %v5256_v63 = vpop.eup %5255 }
 0x32c   : >> { %v3821_v28 = vadd.f32 %v3820_v56, %v3819_v52  ;;  %v3936_v7 = vadd.f32 %v3928_v37, %v3926_v38  ;;  %v4032_v32 = vadd.f32 %v6441_v31, %v4016_v61  ;;  %v4034_v33 = vmul.f32 %v6461_v17, %v3990_v9  ;;  %v5258_v47 = vpop.eup %5257 }
 0x32d   : >> { %v3815_v27 = vrot.slane %v3814_v57, 2  ;;  %v3930_v8 = vrot.slane %v3929_v23, 4  ;;  %v4035_v34 = vmul.f32 %v4031_v25, %v3991_v59  ;;  %v3849_v12 = vrot.slane %v6361_v30, %v6283_v40  ;;  %v5260_v45 = vpop.eup %5259 }
 0x32e   : >> { %v3822_v42 = vrot.slane %v3821_v28, 2  ;;  %v3937_v43 = vrot.slane %v3936_v7, 4  ;;  %v4036_v44 = vmul.f32 %v4032_v32, %v3992_v36  ;;  %v6476_v51 = vmul.f32 %v6371_v35, %v5447_v4  ;;  %v5262_v16 = vpop.eup %5261 }
 0x32f   : >> { %v3816_v48 = vadd.f32 %v3815_v27, %v3814_v57  ;;  %v3931_v31 = vadd.f32 %v3930_v8, %v3929_v23  ;;  %v4037_v52 = vadd.f32 %v4035_v34, %v4033_v11  ;;  %v6482_v60 = vmul.f32 %v4051_v49, %v5447_v4  ;;  %v4085_v57 = vld [vmem:[%s4083_s24 + $0x8] sm:$0xff]  ;;  %v4086_v27 = vld [vmem:[%s4083_s24 + $0x10] sm:$0xff]  ;;  %v4087_v8 = vld [vmem:[%s4083_s24 + $0x18] sm:$0xff] }
 0x330   : >> { %v3823_v38 = vadd.f32 %v3822_v42, %v3821_v28  ;;  %v3938_v46 = vadd.f32 %v3937_v43, %v3936_v7  ;;  %v4044_v58 = vadd.f32 %v4036_v44, %v4034_v33  ;;  %v3853_v55 = vrot.slane %v6361_v30, %v6286_v41  ;;  %v4084_v30 = vld [vmem:[%s4083_s24] sm:$0xff]  ;;  %s5147_s24 = sshll.u32 %s6612_s19, 4 }
 0x331   : >> { %v3932_v53 = vrot.slane %v3931_v31, 2  ;;  %v4038_v9 = vrot.slane %v4037_v52, 4  ;;  %v4152_v54 = vcombine.high %v6371_v35, %v6371_v35  ;;  %v3817_v56 = vrot.slane %v3816_v48, 1  ;;  %s6637_s10 = scalar_lea.vmem [#allocation3], %s5147_s24  ;;  %s4413_s14 = scalar_lea.vmem [#allocation4], %s5147_s24 }
 0x332   : >> { %v4121_v37 = vrot.slane %v6349_v26, %v6319_v10  ;;  %v4125_v59 = vrot.slane %v6357_v29, %v6319_v10  ;;  %v3824_v49 = vrot.slane %v3823_v38, 1  ;;  %v3939_v61 = vrot.slane %v3938_v46, 2 }
 0x333   : >> { %v6500_v35 = vmul.f32 %v6398_v62, %v5447_v4  ;;  %v4045_v11 = vrot.slane %v4044_v58, 4  ;;  %v3933_v7 = vadd.f32 %v3932_v53, %v3931_v31  ;;  %v4039_v33 = vadd.f32 %v4038_v9, %v4037_v52 }
 0x334   : >> { %v4198_v34 = vrot.slane %v6335_v19, %v6325_v14  ;;  %v4202_v42 = vrot.slane %v6344_v24, %v6325_v14  ;;  %v3818_v43 = vadd.f32 %v3817_v56, %v3816_v48  ;;  %v4114_v44 = vmul.f32 %v5256_v63, %v6458_v15 }
 0x335   : >> { %v4126_v23 = vmul.f32 %v4121_v37, %v4084_v30  ;;  %v4127_v13 = vmul.f32 %v4125_v59, %v4085_v57  ;;  %v3825_v10 = vadd.f32 %v3824_v49, %v3823_v38  ;;  %v3940_v36 = vadd.f32 %v3939_v61, %v3938_v46  ;;  %v4091_v46 = vld [vmem:[%s4089_s26 + $0x8] sm:$0xff] }
 0x336   : >> { %v4115_v28 = vmul.f32 %v5258_v47, %v6461_v17  ;;  %v4116_v31 = vmul.f32 %v5260_v45, %v4031_v25  ;;  %v4046_v52 = vadd.f32 %v4045_v11, %v4044_v58  ;;  %v4117_v53 = vmul.f32 %v5262_v16, %v4032_v32  ;;  %v4090_v17 = vld [vmem:[%s4089_s26] sm:$0xff]  ;;  %v4092_v58 = vld [vmem:[%s4089_s26 + $0x10] sm:$0xff] }
 0x337   : >> { %v4128_v9 = vmul.f32 %v4121_v37, %v4086_v27  ;;  %v4129_v39 = vmul.f32 %v4125_v59, %v4087_v8  ;;  %v3934_v5 = vrot.slane %v3933_v7, 1  ;;  %v4040_v62 = vrot.slane %v4039_v33, 2 }
 0x338   : >> { %v4062_v15 = vrot.slane %v6482_v60, %v6286_v41  ;;  %v6518_v63 = vmul.f32 %v4152_v54, %v5447_v4  ;;  %v3856_v48 = vadd.f32 %v3849_v12, %v3818_v43  ;;  %v6522_v25 = vadd.f32 %v4126_v23, %v4114_v44  ;;  %v4093_v54 = vld [vmem:[%s4089_s26 + $0x18] sm:$0xff]  ;;  %s4299_s26 = scalar_lea.vmem [#allocation3], %s5145_s20 }
 0x339   : >> { %v6824_v47 = vcombine.high %v6339_v20, %v6339_v20  ;;  %v3857_v16 = vadd.f32 %v3853_v55, %v3825_v10  ;;  %v3941_v38 = vrot.slane %v3940_v36, 1  ;;  %v6532_v12 = vadd.f32 %v4127_v13, %v4115_v28 }
 0x33a   : >> { %v4203_v56 = vmul.f32 %v4198_v34, %v5427_v0  ;;  %v4047_v37 = vrot.slane %v4046_v52, 2  ;;  %v6536_v59 = vadd.f32 %v4128_v9, %v4116_v31  ;;  %v6538_v49 = vadd.f32 %v4129_v39, %v4117_v53 }
 0x33b   : >> { %v6530_v45 = vmul.f32 %v6824_v47, %v5447_v4  ;;  %v4204_v61 = vmul.f32 %v4202_v42, %v5432_v1  ;;  %v3935_v20 = vadd.f32 %v3934_v5, %v3933_v7  ;;  %v4041_v30 = vadd.f32 %v4040_v62, %v4039_v33 }
 0x33c   : >> { %v4134_v55 = vmul.f32 %v6522_v25, %v4090_v17  ;;  %v4205_v57 = vmul.f32 %v4198_v34, %v5437_v2  ;;  %v4135_v13 = vmul.f32 %v6532_v12, %v4091_v46  ;;  %v4136_v23 = vmul.f32 %v6536_v59, %v4092_v58 }
 0x33d   : >> { %v4137_v10 = vmul.f32 %v6538_v49, %v4093_v54  ;;  %v4206_v39 = vmul.f32 %v4202_v42, %v5442_v3  ;;  %v3862_v5 = vrot.slane %v3856_v48, %v6283_v40  ;;  %v3866_v62 = vrot.slane %v3857_v16, %v6283_v40 }
 0x33e   : >> { %v4207_v11 = vmul.f32 1.442695, %v4203_v56  ;;  %v4209_v28 = vmul.f32 1.442695, %v4204_v61  ;;  %v3942_v7 = vadd.f32 %v3941_v38, %v3940_v36  ;;  %v4048_v33 = vadd.f32 %v4047_v37, %v4046_v52  ;;  %v4309_v52 = vld [vmem:[%s4305_s11 + $0x18] sm:$0xff] }
 0x33f   : >> { %v4211_v27 = vmul.f32 1.442695, %v4205_v57  ;;  %v4213_v8 = vmul.f32 1.442695, %v4206_v39  ;;  %v6825_v34 = vrot.slane %v6476_v51, %v6283_v40  ;;  %v4042_v44 = vrot.slane %v4041_v30, 1 }
 0x340   : >> { %5263 = vpow2.f32 %v4207_v11  ;;  %v4138_v31 = vadd.f32 %v4136_v23, %v4134_v55  ;;  %v4145_v53 = vadd.f32 %v4137_v10, %v4135_v13  ;;  %v3867_v36 = vsel %vm3858_vm4, %v3862_v5, 0.0  ;;  %v4185_v55 = vld [vmem:[%s4184_s15] sm:$0xff]  ;;  %v4186_v5 = vld [vmem:[%s4184_s15 + $0x8] sm:$0xff] }
 0x341   : >> { %v3964_v43 = vadd.f32 %v6825_v34, %v3935_v20  ;;  %5265 = vpow2.f32 %v4209_v28  ;;  %v6568_v17 = vsel %vm3858_vm4, %v3866_v62, 0.0  ;;  %v6826_v47 = vrot.slane %v6476_v51, %v6286_v41 }
 0x342   : >> { %5267 = vpow2.f32 %v4211_v27  ;;  %v4049_v38 = vrot.slane %v4048_v33, 1  ;;  %v6576_v58 = vadd.f32 %v4042_v44, %v4041_v30  ;;  %v4313_v54 = vrot.slane %v6335_v19, %v6330_v22 }
 0x343   : >> { %v6573_v16 = vadd.f32 %v6826_v47, %v3942_v7  ;;  %5269 = vpow2.f32 %v4213_v8  ;;  %v3970_v46 = vrot.slane %v3964_v43, %v6283_v40  ;;  %v4317_v56 = vrot.slane %v6344_v24, %v6330_v22  ;;  %v4188_v43 = vld [vmem:[%s4184_s15 + $0x18] sm:$0xff] }
 0x344   : >> { %v4139_v37 = vrot.slane %v4138_v31, 4  ;;  %v4146_v61 = vrot.slane %v4145_v53, 4  ;;  %v4222_v51 = vrot.slane %v6349_v26, %v6325_v14  ;;  %v4226_v20 = vrot.slane %v6357_v29, %v6325_v14  ;;  %v4187_v14 = vld [vmem:[%s4184_s15 + $0x10] sm:$0xff]  ;;  %s5149_s15 = sshll.u32 %s6657_s16, 4 }
 0x345   : >> { %v4318_v30 = vmul.f32 %v4313_v54, %v5427_v0  ;;  %v4319_v57 = vmul.f32 %v4317_v56, %v5432_v1  ;;  %v4320_v13 = vmul.f32 %v4313_v54, %v5437_v2  ;;  %v4421_v23 = vrot.slane %v6335_v19, %v6333_v18  ;;  %s4508_s27 = scalar_lea.vmem [#allocation3], %s5149_s15  ;;  %s4514_s18 = scalar_lea.vmem [#allocation4], %s5149_s15 }
 0x346   : >> { %v6597_v39 = vadd.f32 %v4049_v38, %v4048_v33  ;;  %v4321_v62 = vmul.f32 %v4317_v56, %v5442_v3  ;;  %v4425_v11 = vrot.slane %v6344_v24, %v6333_v18  ;;  %v6606_v28 = vsel %vm3966_vm5, %v3970_v46, %v3867_v36 }
 0x347   : >> { %v4322_v7 = vmul.f32 1.442695, %v4318_v30  ;;  %v4324_v27 = vmul.f32 1.442695, %v4319_v57  ;;  %v4326_v8 = vmul.f32 1.442695, %v4320_v13  ;;  %v6608_v34 = vadd.f32 %v4139_v37, %v4138_v31 }
 0x348   : >> { %v6610_v33 = vadd.f32 %v4146_v61, %v4145_v53  ;;  %v4227_v44 = vmul.f32 %v4222_v51, %v4185_v55  ;;  %v4328_v47 = vmul.f32 1.442695, %v4321_v62  ;;  %v4228_v54 = vmul.f32 %v4226_v20, %v4186_v5  ;;  %v4191_v55 = vld [vmem:[%s4190_s22] sm:$0xff]  ;;  %v4193_v62 = vld [vmem:[%s4190_s22 + $0x10] sm:$0xff] }
 0x349   : >> { %v4229_v56 = vmul.f32 %v4222_v51, %v4187_v14  ;;  %5271 = vpow2.f32 %v4322_v7  ;;  %v4426_v36 = vmul.f32 %v4421_v23, %v5427_v0  ;;  %v4427_v53 = vmul.f32 %v4425_v11, %v5432_v1 }
 0x34a   : >> { %v5264_v38 = vpop.eup %5263  ;;  %5273 = vpow2.f32 %v4324_v27  ;;  %v4428_v37 = vmul.f32 %v4421_v23, %v5437_v2  ;;  %v4230_v57 = vmul.f32 %v4226_v20, %v4188_v43  ;;  %v4429_v51 = vmul.f32 %v4425_v11, %v5442_v3  ;;  %v4192_v23 = vld [vmem:[%s4190_s22 + $0x8] sm:$0xff] }
 0x34b   : >> { %v5266_v46 = vpop.eup %5265  ;;  %v4215_v31 = vmul.f32 %v5264_v38, %v6522_v25  ;;  %5275 = vpow2.f32 %v4326_v8  ;;  %v4141_v5 = vrot.slane %v6608_v34, 2  ;;  %v4430_v20 = vmul.f32 1.442695, %v4426_v36  ;;  %v4194_v8 = vld [vmem:[%s4190_s22 + $0x18] sm:$0xff]  ;;  %s4605_s22 = scalar_lea.vmem %s459_s17, %s6288_s25 }
 0x34c   : >> { %v5268_v61 = vpop.eup %5267  ;;  %v4216_v30 = vmul.f32 %v5266_v46, %v6532_v12  ;;  %5277 = vpow2.f32 %v4328_v47  ;;  %v4337_v12 = vrot.slane %v6349_v26, %v6330_v22  ;;  %v4432_v38 = vmul.f32 1.442695, %v4427_v53  ;;  %v4303_v53 = vld [vmem:[%s4299_s26 + $0x18] sm:$0xff] }
 0x34d   : >> { %v5270_v13 = vpop.eup %5269  ;;  %v4217_v25 = vmul.f32 %v5268_v61, %v6536_v59  ;;  %v4231_v14 = vadd.f32 %v4227_v44, %v4215_v31  ;;  %v4434_v46 = vmul.f32 1.442695, %v4428_v37  ;;  %v4300_v59 = vld [vmem:[%s4299_s26] sm:$0xff]  ;;  %v4341_v44 = vrot.slane %v6357_v29, %v6330_v22  ;;  %v4301_v31 = vld [vmem:[%s4299_s26 + $0x8] sm:$0xff]  ;;  %v4302_v61 = vld [vmem:[%s4299_s26 + $0x10] sm:$0xff] }
 0x34e   : >> { %v4218_v7 = vmul.f32 %v5270_v13, %v6538_v49  ;;  %v4232_v27 = vadd.f32 %v4228_v54, %v4216_v30  ;;  %5279 = vpow2.f32 %v4430_v20  ;;  %v4436_v49 = vmul.f32 1.442695, %v4429_v51  ;;  %v4408_v37 = vld [vmem:[%s6637_s10] sm:$0xff] }
 0x34f   : >> { %v4233_v43 = vadd.f32 %v4229_v56, %v4217_v25  ;;  %v4235_v11 = vmul.f32 %v4231_v14, %v4191_v55  ;;  %5281 = vpow2.f32 %v4432_v38  ;;  %v4445_v56 = vrot.slane %v6349_v26, %v6333_v18  ;;  %v4409_v38 = vld [vmem:[%s6637_s10 + $0x8] sm:$0xff] }
 0x350   : >> { %v4234_v42 = vadd.f32 %v4230_v57, %v4218_v7  ;;  %v4236_v47 = vmul.f32 %v4232_v27, %v4192_v23  ;;  %5283 = vpow2.f32 %v4434_v46  ;;  %v4522_v22 = vrot.slane %v6335_v19, %v6342_v6 }
 0x351   : >> { %v4237_v54 = vmul.f32 %v4233_v43, %v4193_v62  ;;  %v4526_v55 = vrot.slane %v6344_v24, %v6342_v6  ;;  %v4342_v51 = vmul.f32 %v4337_v12, %v4300_v59  ;;  %5285 = vpow2.f32 %v4436_v49  ;;  %v4306_v59 = vld [vmem:[%s4305_s11] sm:$0xff] }
 0x352   : >> { %v4238_v36 = vmul.f32 %v4234_v42, %v4194_v8  ;;  %v4343_v25 = vmul.f32 %v4341_v44, %v4301_v31  ;;  %v4344_v23 = vmul.f32 %v4337_v12, %v4302_v61  ;;  %v4449_v62 = vrot.slane %v6357_v29, %v6333_v18 }
 0x353   : >> { %v4239_v57 = vadd.f32 %v4237_v54, %v4235_v11  ;;  %v5272_v13 = vpop.eup %5271  ;;  %v4527_v7 = vmul.f32 %v4522_v22, %v5427_v0  ;;  %v4345_v19 = vmul.f32 %v4341_v44, %v4303_v53  ;;  %v4450_v24 = vmul.f32 %v4445_v56, %v4408_v37 }
 0x354   : >> { %v5274_v20 = vpop.eup %5273  ;;  %v4330_v8 = vmul.f32 %v5272_v13, %v4231_v14  ;;  %v4528_v46 = vmul.f32 %v4526_v55, %v5432_v1  ;;  %v4246_v54 = vadd.f32 %v4238_v36, %v4236_v47  ;;  %v4529_v49 = vmul.f32 %v4522_v22, %v5437_v2  ;;  %v4307_v14 = vld [vmem:[%s4305_s11 + $0x8] sm:$0xff]  ;;  %v4308_v13 = vld [vmem:[%s4305_s11 + $0x10] sm:$0xff] }
 0x355   : >> { %v5276_v11 = vpop.eup %5275  ;;  %v4331_v12 = vmul.f32 %v5274_v20, %v4232_v27  ;;  %v4531_v18 = vmul.f32 1.442695, %v4527_v7  ;;  %v4240_v61 = vrot.slane %v4239_v57, 4  ;;  %v4410_v47 = vld [vmem:[%s6637_s10 + $0x10] sm:$0xff]  ;;  %v4451_v36 = vmul.f32 %v4449_v62, %v4409_v38  ;;  %v4411_v20 = vld [vmem:[%s6637_s10 + $0x18] sm:$0xff] }
 0x356   : >> { %v5278_v31 = vpop.eup %5277  ;;  %v4332_v44 = vmul.f32 %v5276_v11, %v4233_v43  ;;  %v4346_v53 = vadd.f32 %v4342_v51, %v4330_v8  ;;  %v4533_v37 = vmul.f32 1.442695, %v4528_v46  ;;  %v4530_v22 = vmul.f32 %v4526_v55, %v5442_v3 }
 0x357   : >> { %v4333_v48 = vmul.f32 %v5278_v31, %v4234_v42  ;;  %v4347_v32 = vadd.f32 %v4343_v25, %v4331_v12  ;;  %5287 = vpow2.f32 %v4531_v18  ;;  %v4247_v9 = vrot.slane %v4246_v54, 4  ;;  %v4414_v12 = vld [vmem:[%s4413_s14] sm:$0xff] }
 0x358   : >> { %v4348_v10 = vadd.f32 %v4344_v23, %v4332_v44  ;;  %v4350_v27 = vmul.f32 %v4346_v53, %v4306_v59  ;;  %5289 = vpow2.f32 %v4533_v37  ;;  %v5280_v7 = vpop.eup %5279  ;;  %v4535_v8 = vmul.f32 1.442695, %v4529_v49  ;;  %v4416_v37 = vld [vmem:[%s4413_s14 + $0x10] sm:$0xff] }
 0x359   : >> { %v4349_v43 = vadd.f32 %v4345_v19, %v4333_v48  ;;  %v4351_v51 = vmul.f32 %v4347_v32, %v4307_v14  ;;  %v5282_v42 = vpop.eup %5281  ;;  %v4241_v25 = vadd.f32 %v4240_v61, %v4239_v57  ;;  %v4438_v46 = vmul.f32 %v5280_v7, %v4346_v53  ;;  %v4415_v19 = vld [vmem:[%s4413_s14 + $0x8] sm:$0xff] }
 0x35a   : >> { %v4352_v38 = vmul.f32 %v4348_v10, %v4308_v13  ;;  %v4452_v11 = vmul.f32 %v4445_v56, %v4410_v47  ;;  %v5284_v23 = vpop.eup %5283  ;;  %v4439_v55 = vmul.f32 %v5282_v42, %v4347_v32  ;;  %v4453_v18 = vmul.f32 %v4449_v62, %v4411_v20  ;;  %v4417_v47 = vld [vmem:[%s4413_s14 + $0x18] sm:$0xff] }
 0x35b   : >> { %v4353_v59 = vmul.f32 %v4349_v43, %v4309_v52  ;;  %5291 = vpow2.f32 %v4535_v8  ;;  %v5286_v31 = vpop.eup %5285  ;;  %v4440_v14 = vmul.f32 %v5284_v23, %v4348_v10  ;;  %v4454_v44 = vadd.f32 %v4450_v24, %v4438_v46  ;;  %v4509_v46 = vld [vmem:[%s4508_s27] sm:$0xff] }
 0x35c   : >> { %v4354_v48 = vadd.f32 %v4352_v38, %v4350_v27  ;;  %v4537_v49 = vmul.f32 1.442695, %v4530_v22  ;;  %v4248_v57 = vadd.f32 %v4247_v9, %v4246_v54  ;;  %v4441_v53 = vmul.f32 %v5286_v31, %v4349_v43 }
 0x35d   : >> { %v4361_v61 = vadd.f32 %v4353_v59, %v4351_v51  ;;  %v4455_v56 = vadd.f32 %v4451_v36, %v4439_v55  ;;  %v4242_v13 = vrot.slane %v4241_v25, 2  ;;  %v4456_v7 = vadd.f32 %v4452_v11, %v4440_v14 }
 0x35e   : >> { %v4355_v52 = vrot.slane %v4354_v48, 4  ;;  %v4458_v30 = vmul.f32 %v4454_v44, %v4414_v12  ;;  %v4142_v32 = vadd.f32 %v4141_v5, %v6608_v34  ;;  %v6665_v27 = vadd.f32 %v4453_v18, %v4441_v53 }
 0x35f   : >> { %v4362_v62 = vrot.slane %v4361_v61, 4  ;;  %v4459_v10 = vmul.f32 %v4455_v56, %v4415_v19  ;;  %v6827_v9 = vrot.slane %v6482_v60, %v6283_v40  ;;  %v4460_v36 = vmul.f32 %v4456_v7, %v4416_v37  ;;  %v4511_v60 = vld [vmem:[%s4508_s27 + $0x10] sm:$0xff] }
 0x360   : >> { %v4356_v54 = vadd.f32 %v4355_v52, %v4354_v48  ;;  %5293 = vpow2.f32 %v4537_v49  ;;  %v4249_v22 = vrot.slane %v4248_v57, 2  ;;  %v4461_v51 = vmul.f32 %v6665_v27, %v4417_v47  ;;  %v4515_v47 = vld [vmem:[%s4514_s18] sm:$0xff] }
 0x361   : >> { %v6671_v24 = vadd.f32 %v6827_v9, %v6576_v58  ;;  %v5288_v20 = vpop.eup %5287  ;;  %v4363_v43 = vadd.f32 %v4362_v62, %v4361_v61  ;;  %v4546_v34 = vrot.slane %v6349_v26, %v6342_v6  ;;  %v6680_v8 = vadd.f32 %v4062_v15, %v6597_v39  ;;  %v4510_v26 = vld [vmem:[%s4508_s27 + $0x8] sm:$0xff]  ;;  %v4512_v61 = vld [vmem:[%s4508_s27 + $0x18] sm:$0xff] }
 0x362   : >> { %v5290_v5 = vpop.eup %5289  ;;  %v4243_v58 = vadd.f32 %v4242_v13, %v4241_v25  ;;  %v4357_v42 = vrot.slane %v4356_v54, 2  ;;  %v4462_v38 = vadd.f32 %v4460_v36, %v4458_v30  ;;  %v4143_v11 = vrot.slane %v4142_v32, 1 }
 0x363   : >> { %v6828_v23 = vrot.slane %v6610_v33, 2  ;;  %v4469_v12 = vadd.f32 %v4461_v51, %v4459_v10  ;;  %v4539_v55 = vmul.f32 %v5288_v20, %v4454_v44  ;;  %v4364_v31 = vrot.slane %v4363_v43, 2  ;;  %v4517_v10 = vld [vmem:[%s4514_s18 + $0x10] sm:$0xff] }
 0x364   : >> { %v4358_v18 = vadd.f32 %v4357_v42, %v4356_v54  ;;  %v4463_v48 = vrot.slane %v4462_v38, 4  ;;  %v4550_v15 = vrot.slane %v6357_v29, %v6342_v6  ;;  %v4250_v30 = vadd.f32 %v4249_v22, %v4248_v57  ;;  %v4516_v22 = vld [vmem:[%s4514_s18 + $0x8] sm:$0xff] }
 0x365   : >> { %v4149_v59 = vadd.f32 %v6828_v23, %v6610_v33  ;;  %v5292_v39 = vpop.eup %5291  ;;  %v4470_v25 = vrot.slane %v4469_v12, 4  ;;  %v4540_v19 = vmul.f32 %v5290_v5, %v4455_v56  ;;  %v4551_v14 = vmul.f32 %v4546_v34, %v4509_v46 }
 0x366   : >> { %v4244_v49 = vrot.slane %v4243_v58, 1  ;;  %v4464_v33 = vadd.f32 %v4463_v48, %v4462_v38  ;;  %v4541_v37 = vmul.f32 %v5292_v39, %v4456_v7  ;;  %v4552_v44 = vmul.f32 %v4550_v15, %v4510_v26  ;;  %v4518_v26 = vld [vmem:[%s4514_s18 + $0x18] sm:$0xff] }
 0x367   : >> { %v4144_v53 = vadd.f32 %v4143_v11, %v4142_v32  ;;  %v4150_v13 = vrot.slane %v4149_v59, 1  ;;  %v4471_v52 = vadd.f32 %v4470_v25, %v4469_v12  ;;  %v4553_v62 = vmul.f32 %v4546_v34, %v4511_v60  ;;  %v6833_v25 = vld [vmem:[#allocation6_spill] sm:$0xff] }
 0x368   : >> { %v4359_v6 = vrot.slane %v4358_v18, 1  ;;  %v4365_v29 = vadd.f32 %v4364_v31, %v4363_v43  ;;  %v4465_v57 = vrot.slane %v4464_v33, 2  ;;  %v6693_v39 = vadd.f32 %v4551_v14, %v4539_v55  }
 0x369   : >> { %v4472_v9 = vrot.slane %v4471_v52, 2  ;;  %v4554_v54 = vmul.f32 %v4550_v15, %v4512_v61  ;;  %v6695_v38 = vadd.f32 %v4552_v44, %v4540_v19   ;;  %v6697_v37 = vadd.f32 %v4553_v62, %v4541_v37  }
 0x36a   : >> { %v6829_v56 = vmov %v6693_v39  ;;  %v5294_v7 = vpop.eup %5293  ;;  %v4245_v32 = vadd.f32 %v4244_v49, %v4243_v58  ;;  %v4251_v36 = vrot.slane %v4250_v30, 1  ;;  %v4466_v20 = vadd.f32 %v4465_v57, %v4464_v33 }
 0x36b   : >> { %v4559_v51 = vmul.f32 %v6829_v56, %v4515_v47  ;;  %v4151_v34 = vadd.f32 %v4150_v13, %v4149_v59  ;;  %v6830_v43 = vrot.slane %v6518_v63, %v6283_v40  ;;  %v4542_v42 = vmul.f32 %v5294_v7, %v6665_v27  ;;  %4608 = vst [vmem:[#allocation2] sm:$0xff] (%p3701_p5), %v6829_v56 }
 0x36c   : >> { %v4561_v46 = vmul.f32 %v6697_v37, %v4517_v10  ;;  %v4071_v11 = vrot.slane %v6671_v24, %v6283_v40  ;;  %v4366_v23 = vrot.slane %v4365_v29, 1  ;;  %v4467_v12 = vrot.slane %v4466_v20, 1 }
 0x36d   : >> { %v4166_v5 = vadd.f32 %v6830_v43, %v4144_v53  ;;  %v4473_v58 = vadd.f32 %v4472_v9, %v4471_v52  ;;  %v4360_v55 = vadd.f32 %v4359_v6, %v4358_v18  ;;  %v6707_v31 = vadd.f32 %v4554_v54, %v4542_v42  }
 0x36e   : >> { %v4560_v59 = vmul.f32 %v6695_v38, %v4516_v22  ;;  %v4563_v48 = vadd.f32 %v4561_v46, %v4559_v51  ;;  %v6831_v60 = vrot.slane %v6573_v16, %v6283_v40  ;;  %v4252_v15 = vadd.f32 %v4251_v36, %v4250_v30 }
 0x36f   : >> { %v6832_v24 = vrot.slane %v6385_v50, %v6283_v40  ;;  %v4577_v18 = vcombine.high %v6833_v25, %v6833_v25  ;;  %v6834_v19 = vrot.slane %v6518_v63, %v6286_v41  ;;  %v4172_v49 = vrot.slane %v4166_v5, %v6283_v40 }
 0x370   : >> { %v3976_v27 = vsel %vm3966_vm5, %v6831_v60, %v6568_v17  ;;  %v4562_v33 = vmul.f32 %v6707_v31, %v4518_v26  ;;  %v4564_v16 = vrot.slane %v4563_v48, 4  ;;  %v4075_v17 = vrot.slane %v6680_v8, %v6283_v40 }
 0x371   : >> { %v4281_v39 = vadd.f32 %v6832_v24, %v4245_v32  ;;  %v4167_v14 = vadd.f32 %v6834_v19, %v4151_v34  ;;  %v4076_v30 = vsel %vm4067_vm6, %v4071_v11, %v6606_v28  ;;  %v4468_v61 = vadd.f32 %v4467_v12, %v4466_v20 }
 0x372   : >> { %v4474_v44 = vrot.slane %v4473_v58, 1  ;;  %v4367_v53 = vadd.f32 %v4366_v23, %v4365_v29  ;;  %v6835_v13 = vrot.slane %v6500_v35, %v6283_v40  ;;  %v4565_v52 = vadd.f32 %v4564_v16, %v4563_v48 }
 0x373   : >> { %v4570_v47 = vadd.f32 %v4562_v33, %v4560_v59  ;;  %v6836_v62 = vrot.slane %v6385_v50, %v6286_v41  ;;  %v4287_v8 = vrot.slane %v4281_v39, %v6283_v40  ;;  %v4579_v57 = vmul.f32 %v4577_v18, %v5447_v4 }
 0x374   : >> { %v4389_v63 = vadd.f32 %v6835_v13, %v4360_v55  ;;  %v4176_v28 = vrot.slane %v4167_v14, %v6283_v40  ;;  %v4177_v29 = vsel %vm4168_vm7, %v4172_v49, %v4076_v30  ;;  %v4566_v10 = vrot.slane %v4565_v52, 2 }
 0x375   : >> { %v4282_v6 = vadd.f32 %v6836_v62, %v4252_v15  ;;  %v4571_v9 = vrot.slane %v4570_v47, 4  ;;  %v4077_v54 = vsel %vm4067_vm6, %v4075_v17, %v3976_v27  ;;  %v4475_v7 = vadd.f32 %v4474_v44, %v4473_v58 }
 0x376   : >> { %v4487_v50 = vrot.slane %v6530_v45, %v6286_v41  ;;  %v6837_v32 = vrot.slane %v6530_v45, %v6283_v40  ;;  %v6838_v20 = vrot.slane %v6500_v35, %v6286_v41  ;;  %v4395_v51 = vrot.slane %v4389_v63, %v6283_v40 }
 0x377   : >> { %v4567_v34 = vadd.f32 %v4566_v10, %v4565_v52  ;;  %v4572_v43 = vadd.f32 %v4571_v9, %v4570_v47  ;;  %v4291_v5 = vrot.slane %v4282_v6, %v6283_v40  ;;  %v4292_v42 = vsel %vm4283_vm8, %v4287_v8, %v4177_v29 }
 0x378   : >> { %v4490_v36 = vadd.f32 %v6837_v32, %v4468_v61  ;;  %v4390_v22 = vadd.f32 %v6838_v20, %v4367_v53  ;;  %v4178_v46 = vsel %vm4168_vm7, %v4176_v28, %v4077_v54  ;;  %v4584_v23 = vrot.slane %v4579_v57, %v6283_v40 }
 0x379   : >> { %v4568_v45 = vrot.slane %v4567_v34, 1  ;;  %v4573_v11 = vrot.slane %v4572_v43, 2  ;;  %v4491_v35 = vadd.f32 %v4487_v50, %v4475_v7  ;;  %v4400_v26 = vsel %vm4391_vm9, %v4395_v51, %v4292_v42 }
 0x37a   : >> { %v4496_v12 = vrot.slane %v4490_v36, %v6283_v40  ;;  %v4399_v58 = vrot.slane %v4390_v22, %v6283_v40  ;;  %v4293_v48 = vsel %vm4283_vm8, %v4291_v5, %v4178_v46  ;;  %v4588_v27 = vrot.slane %v4579_v57, %v6286_v41 }
 0x37b   : >> { %v4569_v55 = vadd.f32 %v4568_v45, %v4567_v34  ;;  %v4574_v59 = vadd.f32 %v4573_v11, %v4572_v43  ;;  %v4500_v24 = vrot.slane %v4491_v35, %v6283_v40  ;;  %v6839_v36 = vmov %v6707_v31 }
 0x37c   : >> { %v4501_v39 = vsel %vm4492_vm10, %v4496_v12, %v4400_v26  ;;  %v4401_v25 = vsel %vm4391_vm9, %v4399_v58, %v4293_v48 }
 0x37d   : >> { %v4575_v60 = vrot.slane %v4574_v59, 1  ;;  %v4591_v15 = vadd.f32 %v4584_v23, %v4569_v55  ;;  %v4502_v49 = vsel %vm4492_vm10, %v4500_v24, %v4401_v25 }
 0x37f   : >> { %v4576_v18 = vadd.f32 %v4575_v60, %v4574_v59  ;;  %v4597_v19 = vrot.slane %v4591_v15, %v6283_v40 }
 0x380   : > { %3703 = sbr.rel (!%p3701_p5) target bundleno = 744 (0x2e8), region = 121 }
 0x381   : >> { %v4592_v41 = vadd.f32 %v4588_v27, %v4576_v18  ;;  %v4602_v14 = vsel %vm4593_vm11, %v4597_v19, %v4501_v39  ;;  %v6840_v39 = vmov %v6829_v56 }
 0x382   : >> { %4606 = vst [vmem:[%s4605_s22] sm:$0xff] %v4602_v14 }
 0x383   : >> { %v4601_v33 = vrot.slane %v4592_v41, %v6283_v40 }
 0x385   : >> { %v4603_v16 = vsel %vm4593_vm11, %v4601_v33, %v4502_v49 }
 0x386   : >> { %4607 = vst [vmem:[%s4605_s22 + $0x8] sm:$0xff] %v4603_v16 }
 0x387 PF: > { %s18_s29 = sadd.s32 1, %s5337_s29   ;;  %s6841_s27 = smov %s5333_s28 }
 0x388   : > { %p15_p6 = scmp.ge.s32.totalorder %s18_s29, 4   ;;  %s6842_s28 = smov %s6844_s30 }
 0x38a   :  { %17 = sbr.rel (!%p15_p6) target bundleno = 2 (0x2), region = 132 }

// kernel: vss_block_forward.16
= control target key start
LH: loop header
LB: loop body
LE: loop exit
PB: predicated region body
PF: predicated region fallthrough
CT: control target
= control target key end

     0   :  { %s1654_s12 = smov 0   ;;  %s1882_s0 = inlined_call_operand.vmem [shape: f32[2,10,10,32], index: 0, kind: input, shape index: {}]   ;;  %s1883_s1 = inlined_call_operand.vmem [shape: bf16[288,10], index: 1, kind: input, shape index: {}]   ;;  %s1884_s2 = inlined_call_operand.vmem [shape: f32[1,10], index: 2, kind: input, shape index: {}]   ;;  %s1885_s3 = inlined_call_operand.vmem [shape: f32[2,64,10], index: 3, kind: output, shape index: {}]  }
   0x1 LB: > { %s1255_s13 = sadd.s32 4294967295, %s1632_s12   ;;  %p1259_p0 = scmp.ge.s32.totalorder %s1632_s12, 1  ;;  %s1632_s12 = sphi %s1654_s12, %s13_s12  }
   0x2   : > { %p137_p1 = scmp.lt.s32.totalorder %s1632_s12, 3 }
   0x4   : > { %p138_p2 = pnand %p1259_p0, %p137_p1 }
   0x5   : > { %v1608_v0 = vld [vmem:[%s1883_s1 + $0x10] sm:$0xff] (!%p138_p2)   ;;  %p161_p3 = scmp.lt.s32.totalorder (!%p138_p2), %s1255_s13, 1  ;;  %v1668_v1 = vld [vmem:[%s1883_s1 + $0x40] sm:$0xff] (!%p138_p2)   ;;  %v1610_v2 = vld [vmem:[%s1883_s1 + $0x18] sm:$0xff] (!%p138_p2)   ;;  %vm216_vm0 = vcmask (!%p138_p2), 261120   ;;  %vm1191_vm1 = vcmask (!%p138_p2), 80896  }
   0x6   : > { %141 = sbr.rel (%p138_p2) target bundleno = 310 (0x136), region = 32  ;;  %1423 = vmatprep.subr.bf16.mxu1 (!%p138_p2), %v1608_v0  ;;  %1471 = vmatprep.subr.bf16.mxu0 (!%p138_p2), %v1668_v1  ;;  %v1679_v3 = vld [vmem:[%s1883_s1 + $0x48] sm:$0xff] (!%p138_p2)   ;;  %v1612_v4 = vld [vmem:[%s1883_s1] sm:$0xff] (!%p138_p2)   ;;  %v1613_v5 = vld [vmem:[%s1883_s1 + $0x50] sm:$0xff] (!%p138_p2)  }
   0x7   : > { %1424 = vmatpush3.bf16.msra.mxu1 (!%p138_p2), %v1608_v0  ;;  %1472 = vmatpush3.bf16.msra.mxu0 (!%p138_p2), %v1668_v1  ;;  %v1614_v16 = vld [vmem:[%s1883_s1 + $0x58] sm:$0xff] (!%p138_p2)   ;;  %v1615_v18 = vld [vmem:[%s1883_s1 + $0x8] sm:$0xff] (!%p138_p2)   ;;  %v1616_v24 = vld [vmem:[%s1883_s1 + $0x60] sm:$0xff] (!%p138_p2)  }
   0x8   : > { %1425 = vmatprep.subr.bf16.mxu1 (!%p138_p2), %v1610_v2  ;;  %1473 = vmatprep.subr.bf16.mxu0 (!%p138_p2), %v1679_v3  ;;  %v1617_v28 = vld [vmem:[%s1883_s1 + $0x20] sm:$0xff] (!%p138_p2)   ;;  %v1618_v38 = vld [vmem:[%s1883_s1 + $0x68] sm:$0xff] (!%p138_p2)   ;;  %v1620_v46 = vld [vmem:[%s1883_s1 + $0x70] sm:$0xff] (!%p138_p2)  }
   0x9   : > { %v1619_v45 = vld [vmem:[%s1883_s1 + $0x28] sm:$0xff] (!%p138_p2)   ;;  %v1621_v51 = vld [vmem:[%s1883_s1 + $0x30] sm:$0xff] (!%p138_p2)   ;;  %v1622_v54 = vld [vmem:[%s1883_s1 + $0x78] sm:$0xff] (!%p138_p2)  }
   0xa   : > { %v1623_v59 = vld [vmem:[%s1883_s1 + $0x38] sm:$0xff] (!%p138_p2)   ;;  %v1624_v60 = vld [vmem:[%s1883_s1 + $0x80] sm:$0xff] (!%p138_p2)   ;;  %v1625_v0 = vld [vmem:[%s1883_s1 + $0x88] sm:$0xff] (!%p138_p2)  }
   0xb   : > { %1426 = vmatpush3.bf16.msra.mxu1 (!%p138_p2), %v1610_v2  ;;  %1474 = vmatpush3.bf16.msra.mxu0 (!%p138_p2), %v1679_v3 }
   0xc   : > { %1435 = vmatprep.subr.bf16.mxu1 (!%p138_p2), %v1612_v4  ;;  %1483 = vmatprep.subr.bf16.mxu0 (!%p138_p2), %v1613_v5 }
   0xd   : > { %s1887_s13 = smov (!%p161_p3, %s1255_s13), 1 }
   0xe   : > { %s1599_s22 = smul.u32 160, %s1887_s13  ;;  %s1368_s30 = sshll.u32 %s1887_s13, 6 }
   0xf   : > { %s1861_s7 = scalar_lea.vmem %s1885_s3, %s1368_s30 }
  0x10   : > { %s1693_s29 = scalar_lea.vmem %s1882_s0, %s1599_s22 }
  0x11   : > { %v188_v6 = vld [vmem:[%s1693_s29 + $0x1] sm:$0xff]  ;;  %v189_v7 = vld [vmem:[%s1693_s29 + $0x11] sm:$0xff] }
  0x12   : > { %v1296_v8 = vld [vmem:[%s1693_s29 + $0x21] sm:$0xff]  ;;  %v200_v9 = vpack.c.bf16 %v189_v7, %v188_v6  ;;  %v191_v11 = vld [vmem:[%s1693_s29 + $0x31] sm:$0xff] }
  0x13   : > { %v622_v10 = vpack.c.bf16 %v1296_v8, %v189_v7  ;;  %v1298_v12 = vld [vmem:[%s1693_s29 + $0x41] sm:$0xff]  ;;  %v1702_v13 = vld [vmem:[%s1693_s29 + $0x51] sm:$0xff]  ;;  %v1704_v14 = vpack.c.bf16 %v191_v11, %v1296_v8 }
  0x14   : > { %v623_v15 = vpack.c.bf16 %v1298_v12, %v191_v11  ;;  %v1710_v17 = vpack.c.bf16 %v1702_v13, %v1298_v12  ;;  %1427 = vmatprep.mubr.msk.bf16.mxu1 %vm216_vm0, %v200_v9  ;;  %v1718_v19 = vld [vmem:[%s1693_s29 + $0x12] sm:$0xff]  ;;  %v1724_v20 = vld [vmem:[%s1693_s29 + $0x61] sm:$0xff] }
  0x15   : > { %1475 = vmatprep.mubr.msk.bf16.mxu0 %vm216_vm0, %v622_v10  ;;  %1428 = vmatmul.mubr.msk.bf16.vlgmr.msra.gmra.mrb[0].mxu1 %vm216_vm0, %v1704_v14  ;;  %v1727_v21 = vld [vmem:[%s1693_s29 + $0x22] sm:$0xff]  ;;  %v1730_v22 = vld [vmem:[%s1693_s29 + $0x71] sm:$0xff]  ;;  %v624_v9 = vpack.c.bf16 %v1724_v20, %v1702_v13 }
  0x16   : > { %1476 = vmatmul.mubr.msk.bf16.vlgmr.msra.gmra.mrb[0].mxu0 %vm216_vm0, %v623_v15  ;;  %1436 = vmatpush3.bf16.msra.mxu1 %v1612_v4  ;;  %v735_v23 = vpack.c.bf16 %v1727_v21, %v1718_v19  ;;  %v172_v25 = vld [vmem:[%s1693_s29] sm:$0xff]  ;;  %v1741_v26 = vld [vmem:[%s1693_s29 + $0x10] sm:$0xff]  ;;  %v1746_v27 = vpack.c.bf16 %v1730_v22, %v1724_v20 }
  0x17   : > { %1484 = vmatpush3.bf16.msra.mxu0 %v1613_v5  ;;  %1431 = vmatprep.mubr.msk.bf16.mxu1 %vm216_vm0, %v1710_v17  ;;  %v1311_v29 = vld [vmem:[%s1693_s29 + $0x32] sm:$0xff]  ;;  %v1312_v30 = vld [vmem:[%s1693_s29 + $0x42] sm:$0xff]  ;;  %v184_v31 = vpack.c.bf16 %v1741_v26, %v172_v25 }
  0x18   : > { %1485 = vmatprep.subr.bf16.mxu0 %v1614_v16  ;;  %1437 = vmatprep.subr.bf16.mxu1 %v1615_v18  ;;  %v1313_v32 = vld [vmem:[%s1693_s29 + $0x52] sm:$0xff]  ;;  %v1314_v33 = vld [vmem:[%s1693_s29 + $0x62] sm:$0xff]  ;;  %v736_v34 = vpack.c.bf16 %v1312_v30, %v1311_v29  ;;  %v396_v55 = vpack.c.bf16 %v1311_v29, %v1727_v21 }
  0x19   : > { %1487 = vmatprep.mubr.msk.bf16.mxu0 %vm216_vm0, %v735_v23  ;;  %v174_v35 = vld [vmem:[%s1693_s29 + $0x20] sm:$0xff]  ;;  %v1761_v36 = vld [vmem:[%s1693_s29 + $0x30] sm:$0xff]  ;;  %v737_v37 = vpack.c.bf16 %v1314_v33, %v1313_v32  ;;  %v397_v58 = vpack.c.bf16 %v1313_v32, %v1312_v30 }
  0x1a   : > { %1438 = vmatpush3.bf16.msra.mxu1 %v1615_v18  ;;  %v1767_v39 = vld [vmem:[%s1693_s29 + $0x40] sm:$0xff]  ;;  %v1770_v40 = vld [vmem:[%s1693_s29 + $0x50] sm:$0xff]  ;;  %v185_v41 = vpack.c.bf16 %v1761_v36, %v174_v35  ;;  %v509_v63 = vpack.c.bf16 %v174_v35, %v1741_v26 }
  0x1b   : > { %1486 = vmatpush3.bf16.msra.mxu0 %v1614_v16  ;;  %1447 = vmatprep.subr.bf16.mxu1 %v1617_v28  ;;  %v1315_v42 = vld [vmem:[%s1693_s29 + $0x72] sm:$0xff]  ;;  %v1777_v43 = vld [vmem:[%s1693_s29 + $0x82] sm:$0xff]  ;;  %v186_v44 = vpack.c.bf16 %v1770_v40, %v1767_v39  ;;  %v510_v2 = vpack.c.bf16 %v1767_v39, %v1761_v36  ;;  %v1365_v16 = vld [vmem:[%s1884_s2] ss:$0 sm:$0xff] }
  0x1c   : > { %1495 = vmatprep.subr.bf16.mxu0 %v1616_v24  ;;  %v738_v47 = vpack.c.bf16 %v1777_v43, %v1315_v42  ;;  %v178_v48 = vld [vmem:[%s1693_s29 + $0x60] sm:$0xff]  ;;  %v179_v49 = vld [vmem:[%s1693_s29 + $0x70] sm:$0xff]  ;;  %v398_v62 = vpack.c.bf16 %v1315_v42, %v1314_v33 }
  0x1d   : > { %1432 = vmatmul.mubr.msk.bf16.gmra.mrb[4].mxu1 %vm216_vm0, %v1746_v27  ;;  %v383_v50 = vld [vmem:[%s1693_s29 + $0x2] sm:$0xff]  ;;  %v187_v52 = vpack.c.bf16 %v179_v49, %v178_v48  ;;  %v1330_v57 = vld [vmem:[%s1693_s29 + $0x90] sm:$0xff]  ;;  %v511_v6 = vpack.c.bf16 %v178_v48, %v1770_v40 }
  0x1e   : > { %1439 = vmatprep.mubr.msk.bf16.mxu1 %vm216_vm0, %v184_v31  ;;  %v395_v53 = vpack.c.bf16 %v1718_v19, %v383_v50  ;;  %v1329_v56 = vld [vmem:[%s1693_s29 + $0x80] sm:$0xff]  ;;  %v1344_v5 = vld [vmem:[%s1693_s29 + $0x91] sm:$0xff] }
  0x1f   : > { %v852_v61 = vpack.c.bf16 %v1330_v57, %v1329_v56  ;;  %v1343_v4 = vld [vmem:[%s1693_s29 + $0x81] sm:$0xff]  ;;  %v512_v8 = vpack.c.bf16 %v1329_v56, %v179_v49 }
  0x20   : > { %v965_v7 = vpack.c.bf16 %v1344_v5, %v1343_v4  ;;  %v625_v10 = vpack.c.bf16 %v1343_v4, %v1730_v22 }
  0x22   : > { %1488 = vmatmul.mubr.msk.bf16.vlgmr.msra.gmra.mrb[0].mxu0 %vm216_vm0, %v736_v34 }
  0x23   : > { %1496 = vmatpush3.bf16.msra.mxu0 %v1616_v24  ;;  %1491 = vmatprep.mubr.msk.bf16.mxu0 %vm216_vm0, %v737_v37 }
  0x24   : > { %1497 = vmatprep.subr.bf16.mxu0 %v1618_v38 }
  0x25   : > { %1440 = vmatmul.mubr.msk.bf16.vlgmr.msra.gmra.mrb[0].mxu1 %vm216_vm0, %v185_v41 }
  0x26   : > { %1448 = vmatpush3.bf16.msra.mxu1 %v1617_v28  ;;  %1443 = vmatprep.mubr.msk.bf16.mxu1 %vm216_vm0, %v186_v44 }
  0x27   : > { %1498 = vmatpush3.bf16.msra.mxu0 %v1618_v38  ;;  %1449 = vmatprep.subr.bf16.mxu1 %v1619_v45 }
  0x28   : > { %1507 = vmatprep.subr.bf16.mxu0 %v1620_v46 }
  0x2a   : > { %1492 = vmatmul.mubr.msk.bf16.gmra.mrb[4].mxu0 %vm216_vm0, %v738_v47  ;;  %1450 = vmatpush3.bf16.msra.mxu1 %v1619_v45 }
  0x2b   : > { %1499 = vmatprep.mubr.msk.bf16.mxu0 %vm216_vm0, %v185_v41  ;;  %1459 = vmatprep.subr.bf16.mxu1 %v1621_v51 }
  0x2d   : > { %1444 = vmatmul.mubr.msk.bf16.gmra.mrb[4].mxu1 %vm216_vm0, %v187_v52 }
  0x2e   : > { %1451 = vmatprep.mubr.msk.bf16.mxu1 %vm216_vm0, %v395_v53 }
  0x32   : > { %1500 = vmatmul.mubr.msk.bf16.vlgmr.msra.gmra.mrb[0].mxu0 %vm216_vm0, %v186_v44 }
  0x33   : > { %1508 = vmatpush3.bf16.msra.mxu0 %v1620_v46  ;;  %1503 = vmatprep.mubr.msk.bf16.mxu0 %vm216_vm0, %v187_v52 }
  0x34   : > { %1509 = vmatprep.subr.bf16.mxu0 %v1622_v54 }
  0x35   : > { %1452 = vmatmul.mubr.msk.bf16.vlgmr.msra.gmra.mrb[0].mxu1 %vm216_vm0, %v396_v55 }
  0x36   : > { %1460 = vmatpush3.bf16.msra.mxu1 %v1621_v51  ;;  %1455 = vmatprep.mubr.msk.bf16.mxu1 %vm216_vm0, %v397_v58 }
  0x37   : > { %1510 = vmatpush3.bf16.msra.mxu0 %v1622_v54  ;;  %1461 = vmatprep.subr.bf16.mxu1 %v1623_v59 }
  0x38   : > { %1519 = vmatprep.subr.bf16.mxu0 %v1624_v60 }
  0x3a   : > { %1504 = vmatmul.mubr.msk.bf16.gmra.mrb[4].mxu0 %vm216_vm0, %v852_v61  ;;  %1462 = vmatpush3.bf16.msra.mxu1 %v1623_v59 }
  0x3b   : > { %1511 = vmatprep.mubr.msk.bf16.mxu0 %vm216_vm0, %v1704_v14  ;;  %1531 = vmatprep.subr.bf16.mxu1 %v1668_v1 }
  0x3d   : > { %1456 = vmatmul.mubr.msk.bf16.gmra.mrb[4].mxu1 %vm216_vm0, %v398_v62 }
  0x3e   : > { %1463 = vmatprep.mubr.msk.bf16.mxu1 %vm216_vm0, %v509_v63 }
  0x42   : > { %1512 = vmatmul.mubr.msk.bf16.vlgmr.msra.gmra.mrb[0].mxu0 %vm216_vm0, %v1710_v17 }
  0x43   : > { %1520 = vmatpush3.bf16.msra.mxu0 %v1624_v60  ;;  %1515 = vmatprep.mubr.msk.bf16.mxu0 %vm216_vm0, %v1746_v27 }
  0x44   : > { %1521 = vmatprep.subr.bf16.mxu0 %v1625_v0 }
  0x45   : > { %1464 = vmatmul.mubr.msk.bf16.vlgmr.msra.gmra.mrb[0].mxu1 %vm216_vm0, %v510_v2 }
  0x46   : > { %1533 = vmatpush3.bf16.msra.mxu1 %v1668_v1  ;;  %1467 = vmatprep.mubr.msk.bf16.mxu1 %vm216_vm0, %v511_v6  ;;  %v1358_v1 = vld [vmem:[%s1693_s29 + $0x92] sm:$0xff] }
  0x47   : > { %1522 = vmatpush3.bf16.msra.mxu0 %v1625_v0  ;;  %1532 = vmatprep.subr.bf16.mxu1 %v1679_v3  ;;  %v1078_v11 = vpack.c.bf16 %v1358_v1, %v1777_v43 }
  0x4a   : > { %1516 = vmatmul.mubr.msk.bf16.gmra.mrb[4].mxu0 %vm216_vm0, %v965_v7  ;;  %1534 = vmatpush3.bf16.msra.mxu1 %v1679_v3 }
  0x4b   : > { %1523 = vmatprep.mubr.msk.bf16.mxu0 %vm216_vm0, %v396_v55 }
  0x4d   : > { %1468 = vmatmul.mubr.msk.bf16.gmra.mrb[4].mxu1 %vm216_vm0, %v512_v8 }
  0x4e   : > { %1479 = vmatprep.mubr.msk.bf16.mxu1 %vm216_vm0, %v624_v9 }
  0x52   : > { %1524 = vmatmul.mubr.msk.bf16.vlgmr.msra.gmra.mrb[0].mxu0 %vm216_vm0, %v397_v58 }
  0x53   : > { %1527 = vmatprep.mubr.msk.bf16.mxu0 %vm216_vm0, %v398_v62 }
  0x59   : > { %1480 = vmatmul.mubr.msk.bf16.vlgmr.msra.gmra.mrb[4].mxu1 %vm216_vm0, %v625_v10 }
  0x5a   : > { %1528 = vmatmul.mubr.msk.bf16.gmra.mrb[4].mxu0 %vm216_vm0, %v1078_v11 }
 0x118   : > { %v1465_v3 = vpop.f32.mrb[0].mxu1 }
 0x119   : > { %v571_v12 = vpop.f32.mrb[1].mxu1 }
 0x11a   : > { %v1466_v13 = vpop.f32.mrb[2].mxu1 }
 0x11b   : > { %v574_v14 = vpop.f32.mrb[3].mxu1 }
 0x125   : > { %v1525_v15 = vpop.f32.mrb[0].mxu0 }
 0x126   : > { %v1535_v17 = vadd.f32 %v1525_v15, %v1465_v3  ;;  %v1137_v18 = vpop.f32.mrb[1].mxu0 }
 0x127   : > { %v1536_v19 = vadd.f32 %v1137_v18, %v571_v12  ;;  %v1526_v20 = vpop.f32.mrb[2].mxu0 }
 0x128   : > { %v1185_v21 = vadd.f32 %v1535_v17, %v1365_v16  ;;  %v1537_v22 = vadd.f32 %v1526_v20, %v1466_v13  ;;  %v1140_v23 = vpop.f32.mrb[3].mxu0 }
 0x129   : > { %v1183_v24 = vadd.f32 %v1536_v19, %v1365_v16  ;;  %v1538_v25 = vadd.f32 %v1140_v23, %v574_v14 }
 0x12a   : > { %1194 = vst.msk [vmem:[%s1861_s7 + $0x10] sm:$0xff] %vm1191_vm1, %v1185_v21  ;;  %v1186_v26 = vadd.f32 %v1537_v22, %v1365_v16 }
 0x12b   : > { %1192 = vst.msk [vmem:[%s1861_s7] sm:$0xff] %vm1191_vm1, %v1183_v24  ;;  %v1184_v27 = vadd.f32 %v1538_v25, %v1365_v16 }
 0x12c   : > { %1195 = vst.msk [vmem:[%s1861_s7 + $0x18] sm:$0xff] %vm1191_vm1, %v1186_v26  ;;  %v1481_v28 = vpop.f32.mrb[4].mxu1 }
 0x12d   : > { %1193 = vst.msk [vmem:[%s1861_s7 + $0x8] sm:$0xff] %vm1191_vm1, %v1184_v27  ;;  %v1529_v29 = vpop.f32.mrb[4].mxu0  ;;  %v700_v31 = vpop.f32.mrb[5].mxu1 }
 0x12e   : > { %v1539_v30 = vadd.f32 %v1529_v29, %v1481_v28  ;;  %v1153_v32 = vpop.f32.mrb[5].mxu0  ;;  %v1482_v34 = vpop.f32.mrb[6].mxu1 }
 0x12f   : > { %v1540_v33 = vadd.f32 %v1153_v32, %v700_v31  ;;  %v1530_v35 = vpop.f32.mrb[6].mxu0  ;;  %v703_v38 = vpop.f32.mrb[7].mxu1 }
 0x130   : > { %v1189_v36 = vadd.f32 %v1539_v30, %v1365_v16  ;;  %v1541_v37 = vadd.f32 %v1530_v35, %v1482_v34  ;;  %v1156_v39 = vpop.f32.mrb[7].mxu0 }
 0x131   : > { %v1187_v40 = vadd.f32 %v1540_v33, %v1365_v16  ;;  %v1542_v41 = vadd.f32 %v1156_v39, %v703_v38 }
 0x132   : > { %1198 = vst.msk [vmem:[%s1861_s7 + $0x30] sm:$0xff] %vm1191_vm1, %v1189_v36  ;;  %v1190_v42 = vadd.f32 %v1541_v37, %v1365_v16 }
 0x133   : > { %1196 = vst.msk [vmem:[%s1861_s7 + $0x20] sm:$0xff] %vm1191_vm1, %v1187_v40  ;;  %v1188_v43 = vadd.f32 %v1542_v41, %v1365_v16 }
 0x134   : > { %1199 = vst.msk [vmem:[%s1861_s7 + $0x38] sm:$0xff] %vm1191_vm1, %v1190_v42 }
 0x135   : > { %1197 = vst.msk [vmem:[%s1861_s7 + $0x28] sm:$0xff] %vm1191_vm1, %v1188_v43 }
 0x136 PF: > { %s13_s12 = sadd.s32 1, %s1632_s12  }
 0x137   : > { %p10_p4 = scmp.ge.s32.totalorder %s13_s12, 4  }
 0x139   :  { %12 = sbr.rel (!%p10_p4) target bundleno = 1 (0x1), region = 64 }

// kernel: vss_block_forward.17
= control target key start
LH: loop header
LB: loop body
LE: loop exit
PB: predicated region body
PF: predicated region fallthrough
CT: control target
= control target key end

     0   :  { %s1570_s12 = smov 0   ;;  %s1767_s0 = inlined_call_operand.vmem [shape: f32[2,10,10,10], index: 0, kind: input, shape index: {}]   ;;  %s1768_s1 = inlined_call_operand.vmem [shape: bf16[90,32], index: 1, kind: input, shape index: {}]   ;;  %s1769_s2 = inlined_call_operand.vmem [shape: f32[1,32], index: 2, kind: input, shape index: {}]   ;;  %s1770_s3 = inlined_call_operand.vmem [shape: f32[2,64,32], index: 3, kind: output, shape index: {}]  }
   0x1 LB: > { %s1208_s13 = sadd.s32 4294967295, %s1548_s12   ;;  %p1212_p0 = scmp.ge.s32.totalorder %s1548_s12, 1  ;;  %s1548_s12 = sphi %s1570_s12, %s13_s12  }
   0x2   : > { %p137_p1 = scmp.lt.s32.totalorder %s1548_s12, 3 }
   0x4   : > { %p138_p2 = pnand %p1212_p0, %p137_p1 }
   0x5   : > { %v1533_v0 = vld [vmem:[%s1768_s1 + $0x4] sm:$0x3e] (!%p138_p2)   ;;  %vm219_vm0 = vcmask (!%p138_p2), 1044480   ;;  %p161_p3 = scmp.lt.s32.totalorder (!%p138_p2), %s1208_s13, 1  ;;  %v1584_v2 = vld [vmem:[%s1768_s1 + $0x14] sm:$0x1f] (!%p138_p2)  }
   0x6   : > { %141 = sbr.rel (%p138_p2) target bundleno = 310 (0x136), region = 32  ;;  %v205_v1 = vrot.slane (!%p138_p2), %v1533_v0, 1  ;;  %v1535_v3 = vld [vmem:[%s1768_s1] sm:$0x1f] (!%p138_p2)   ;;  %1518 = vmatprep.subr.msk.bf16.mxu0 (!%p138_p2), %vm219_vm0, %v1584_v2  ;;  %v1597_v5 = vsel (!%p138_p2), %vm219_vm0, %v1584_v2, 0  ;;  %vm206_vm1 = vcmask (!%p138_p2), 80896  }
   0x7   : > { %1399 = vmatpush3.bf16.msra.mxu0 (!%p138_p2), %v1597_v5  ;;  %v1536_v6 = vld [vmem:[%s1768_s1 + $0x18] sm:$0x3e] (!%p138_p2)   ;;  %v1537_v7 = vld [vmem:[%s1768_s1 + $0x1c] sm:$0x7c] (!%p138_p2)   ;;  %v1538_v9 = vld [vmem:[%s1768_s1 + $0x8] sm:$0x7c] (!%p138_p2)  }
   0x8   : > { %1514 = vmatprep.subr.msk.bf16.mxu1 (!%p138_p2), %vm219_vm0, %v205_v1  ;;  %v221_v4 = vsel (!%p138_p2), %vm219_vm0, %v205_v1, 0  ;;  %v716_v8 = vrot.slane (!%p138_p2), %v1536_v6, 1  ;;  %v306_v16 = vsel (!%p138_p2), %vm219_vm0, %v1535_v3, 0  ;;  %v825_v25 = vrot.slane (!%p138_p2), %v1537_v7, 2  ;;  %v1539_v38 = vld [vmem:[%s1768_s1 + $0x20] sm:$0xf8] (!%p138_p2)  }
   0x9   : > { %1359 = vmatpush3.bf16.msra.mxu1 (!%p138_p2), %v221_v4  ;;  %v392_v26 = vrot.slane (!%p138_p2), %v1538_v9, 2  ;;  %v933_v46 = vrot.slane (!%p138_p2), %v1539_v38, 3  ;;  %v1540_v47 = vld [vmem:[%s1768_s1 + $0xc] sm:$0xf8] (!%p138_p2)   ;;  %v1541_v61 = vld [vmem:[%s1768_s1 + $0x28] sm:$0x1f] (!%p138_p2)  }
   0xa   : > { %1515 = vmatprep.subr.msk.bf16.mxu1 (!%p138_p2), %vm219_vm0, %v1535_v3  ;;  %1520 = vmatprep.subr.msk.bf16.mxu0 (!%p138_p2), %vm219_vm0, %v716_v8  ;;  %v730_v21 = vsel (!%p138_p2), %vm219_vm0, %v716_v8, 0  ;;  %v839_v43 = vsel (!%p138_p2), %vm219_vm0, %v825_v25, 0  ;;  %v501_v53 = vrot.slane (!%p138_p2), %v1540_v47, 3  ;;  %v1054_v8 = vsel (!%p138_p2), %vm219_vm0, %v1541_v61, 0 }
   0xb   : > { %v406_v52 = vsel (!%p138_p2), %vm219_vm0, %v392_v26, 0  ;;  %v947_v60 = vsel (!%p138_p2), %vm219_vm0, %v933_v46, 0  ;;  %vm1144_vm2 = vcmask (!%p138_p2), 261120  }
   0xc   : > { %v515_v3 = vsel (!%p138_p2), %vm219_vm0, %v501_v53, 0 }
   0xd   : > { %s1772_s13 = smov (!%p161_p3, %s1208_s13), 1 }
   0xe   : > { %s1524_s20 = smul.u32 160, %s1772_s13  ;;  %s1312_s9 = sshll.u32 %s1772_s13, 6 }
   0xf   : > { %s1746_s16 = scalar_lea.vmem %s1770_s3, %s1312_s9 }
  0x10   : > { %s1611_s27 = scalar_lea.vmem %s1767_s0, %s1524_s20 }
  0x11   : > { %v186_v10 = vld [vmem:[%s1611_s27 + $0x1] sm:$0xff]  ;;  %v187_v11 = vld [vmem:[%s1611_s27 + $0x11] sm:$0xff] }
  0x12   : > { %v1245_v12 = vld [vmem:[%s1611_s27 + $0x21] sm:$0xff]  ;;  %v196_v13 = vpack.c.bf16 %v187_v11, %v186_v10  ;;  %v189_v15 = vld [vmem:[%s1611_s27 + $0x31] sm:$0xff] }
  0x13   : > { %v600_v14 = vpack.c.bf16 %v1245_v12, %v187_v11  ;;  %v1247_v17 = vld [vmem:[%s1611_s27 + $0x41] sm:$0xff]  ;;  %v1624_v18 = vld [vmem:[%s1611_s27 + $0x51] sm:$0xff]  ;;  %v1626_v19 = vpack.c.bf16 %v189_v15, %v1245_v12 }
  0x14   : > { %v601_v20 = vpack.c.bf16 %v1247_v17, %v189_v15  ;;  %v1630_v22 = vpack.c.bf16 %v1624_v18, %v1247_v17  ;;  %v1257_v23 = vld [vmem:[%s1611_s27 + $0x12] sm:$0xff]  ;;  %1360 = vmatprep.mubr.msk.bf16.mxu1 %vm206_vm1, %v196_v13  ;;  %v1258_v24 = vld [vmem:[%s1611_s27 + $0x22] sm:$0xff] }
  0x15   : > { %1400 = vmatprep.mubr.msk.bf16.mxu0 %vm206_vm1, %v600_v14  ;;  %1361 = vmatmul.mubr.msk.bf16.vlgmr.msra.gmra.mrb[0].mxu1 %vm206_vm1, %v1626_v19  ;;  %v707_v27 = vpack.c.bf16 %v1258_v24, %v1257_v23  ;;  %v1640_v28 = vld [vmem:[%s1611_s27 + $0x61] sm:$0xff]  ;;  %v1643_v29 = vld [vmem:[%s1611_s27 + $0x71] sm:$0xff] }
  0x16   : > { %1401 = vmatmul.mubr.msk.bf16.vlgmr.msra.gmra.mrb[0].mxu0 %vm206_vm1, %v601_v20  ;;  %1369 = vmatpush3.bf16.msra.mxu1 %v306_v16  ;;  %v172_v30 = vld [vmem:[%s1611_s27] sm:$0xff]  ;;  %v1650_v31 = vld [vmem:[%s1611_s27 + $0x10] sm:$0xff]  ;;  %v1656_v32 = vpack.c.bf16 %v1643_v29, %v1640_v28  ;;  %v602_v14 = vpack.c.bf16 %v1640_v28, %v1624_v18 }
  0x17   : > { %1409 = vmatpush3.bf16.msra.mxu0 %v730_v21  ;;  %1364 = vmatprep.mubr.msk.bf16.mxu1 %vm206_vm1, %v1630_v22  ;;  %v1259_v33 = vld [vmem:[%s1611_s27 + $0x32] sm:$0xff]  ;;  %v1260_v34 = vld [vmem:[%s1611_s27 + $0x42] sm:$0xff]  ;;  %v182_v35 = vpack.c.bf16 %v1650_v31, %v172_v30 }
  0x18   : > { %1410 = vmatprep.mubr.msk.bf16.mxu0 %vm206_vm1, %v707_v27  ;;  %1521 = vmatprep.subr.msk.bf16.mxu0 %vm219_vm0, %v825_v25  ;;  %v1261_v36 = vld [vmem:[%s1611_s27 + $0x52] sm:$0xff]  ;;  %v1262_v37 = vld [vmem:[%s1611_s27 + $0x62] sm:$0xff]  ;;  %v708_v39 = vpack.c.bf16 %v1260_v34, %v1259_v33  ;;  %v384_v62 = vpack.c.bf16 %v1259_v33, %v1258_v24 }
  0x19   : > { %1516 = vmatprep.subr.msk.bf16.mxu1 %vm219_vm0, %v392_v26  ;;  %v174_v40 = vld [vmem:[%s1611_s27 + $0x20] sm:$0xff]  ;;  %v175_v41 = vld [vmem:[%s1611_s27 + $0x30] sm:$0xff]  ;;  %v709_v42 = vpack.c.bf16 %v1262_v37, %v1261_v36  ;;  %v385_v1 = vpack.c.bf16 %v1261_v36, %v1260_v34 }
  0x1a   : > { %v176_v44 = vld [vmem:[%s1611_s27 + $0x40] sm:$0xff]  ;;  %v177_v45 = vld [vmem:[%s1611_s27 + $0x50] sm:$0xff]  ;;  %v183_v48 = vpack.c.bf16 %v175_v41, %v174_v40  ;;  %v492_v7 = vpack.c.bf16 %v174_v40, %v1650_v31 }
  0x1b   : > { %v1263_v49 = vld [vmem:[%s1611_s27 + $0x72] sm:$0xff]  ;;  %v1681_v50 = vld [vmem:[%s1611_s27 + $0x82] sm:$0xff]  ;;  %v184_v51 = vpack.c.bf16 %v177_v45, %v176_v44  ;;  %v493_v9 = vpack.c.bf16 %v176_v44, %v175_v41 }
  0x1c   : > { %v710_v54 = vpack.c.bf16 %v1681_v50, %v1263_v49  ;;  %v178_v55 = vld [vmem:[%s1611_s27 + $0x60] sm:$0xff]  ;;  %v179_v56 = vld [vmem:[%s1611_s27 + $0x70] sm:$0xff]  ;;  %v386_v6 = vpack.c.bf16 %v1263_v49, %v1262_v37 }
  0x1d   : > { %1365 = vmatmul.mubr.msk.bf16.gmra.mrb[4].mxu1 %vm206_vm1, %v1656_v32  ;;  %v373_v57 = vld [vmem:[%s1611_s27 + $0x2] sm:$0xff]  ;;  %v185_v58 = vpack.c.bf16 %v179_v56, %v178_v55  ;;  %v1277_v0 = vld [vmem:[%s1611_s27 + $0x90] sm:$0xff]  ;;  %v494_v11 = vpack.c.bf16 %v178_v55, %v177_v45 }
  0x1e   : > { %1370 = vmatprep.mubr.msk.bf16.mxu1 %vm206_vm1, %v182_v35  ;;  %v383_v59 = vpack.c.bf16 %v1257_v23, %v373_v57  ;;  %v1276_v63 = vld [vmem:[%s1611_s27 + $0x80] sm:$0xff]  ;;  %v1290_v10 = vld [vmem:[%s1611_s27 + $0x91] sm:$0xff] }
  0x1f   : > { %v819_v4 = vpack.c.bf16 %v1277_v0, %v1276_v63  ;;  %v495_v13 = vpack.c.bf16 %v1276_v63, %v179_v56 }
  0x22   : > { %1411 = vmatmul.mubr.msk.bf16.vlgmr.msra.gmra.mrb[0].mxu0 %vm206_vm1, %v708_v39 }
  0x23   : > { %1419 = vmatpush3.bf16.msra.mxu0 %v839_v43  ;;  %1414 = vmatprep.mubr.msk.bf16.mxu0 %vm206_vm1, %v709_v42 }
  0x24   : > { %1522 = vmatprep.subr.msk.bf16.mxu0 %vm219_vm0, %v933_v46 }
  0x25   : > { %1371 = vmatmul.mubr.msk.bf16.vlgmr.msra.gmra.mrb[0].mxu1 %vm206_vm1, %v183_v48 }
  0x26   : > { %1379 = vmatpush3.bf16.msra.mxu1 %v406_v52  ;;  %1374 = vmatprep.mubr.msk.bf16.mxu1 %vm206_vm1, %v184_v51 }
  0x27   : > { %1517 = vmatprep.subr.msk.bf16.mxu1 %vm219_vm0, %v501_v53 }
  0x2a   : > { %1415 = vmatmul.mubr.msk.bf16.gmra.mrb[4].mxu0 %vm206_vm1, %v710_v54 }
  0x2b   : > { %1420 = vmatprep.mubr.msk.bf16.mxu0 %vm206_vm1, %v183_v48 }
  0x2d   : > { %1375 = vmatmul.mubr.msk.bf16.gmra.mrb[4].mxu1 %vm206_vm1, %v185_v58 }
  0x2e   : > { %1380 = vmatprep.mubr.msk.bf16.mxu1 %vm206_vm1, %v383_v59 }
  0x32   : > { %1421 = vmatmul.mubr.msk.bf16.vlgmr.msra.gmra.mrb[0].mxu0 %vm206_vm1, %v184_v51 }
  0x33   : > { %1429 = vmatpush3.bf16.msra.mxu0 %v947_v60  ;;  %1424 = vmatprep.mubr.msk.bf16.mxu0 %vm206_vm1, %v185_v58 }
  0x34   : > { %1523 = vmatprep.subr.msk.bf16.mxu0 %vm219_vm0, %v1541_v61 }
  0x35   : > { %1381 = vmatmul.mubr.msk.bf16.vlgmr.msra.gmra.mrb[0].mxu1 %vm206_vm1, %v384_v62 }
  0x36   : > { %1389 = vmatpush3.bf16.msra.mxu1 %v515_v3  ;;  %1384 = vmatprep.mubr.msk.bf16.mxu1 %vm206_vm1, %v385_v1 }
  0x37   : > { %1519 = vmatprep.subr.msk.bf16.mxu1 %vm219_vm0, %v1584_v2  ;;  %v1289_v2 = vld [vmem:[%s1611_s27 + $0x81] sm:$0xff] }
  0x38   : > { %v927_v12 = vpack.c.bf16 %v1290_v10, %v1289_v2  ;;  %v603_v15 = vpack.c.bf16 %v1289_v2, %v1643_v29 }
  0x3a   : > { %1425 = vmatmul.mubr.msk.bf16.gmra.mrb[4].mxu0 %vm206_vm1, %v819_v4 }
  0x3b   : > { %1430 = vmatprep.mubr.msk.bf16.mxu0 %vm206_vm1, %v1626_v19 }
  0x3d   : > { %1385 = vmatmul.mubr.msk.bf16.gmra.mrb[4].mxu1 %vm206_vm1, %v386_v6 }
  0x3e   : > { %1390 = vmatprep.mubr.msk.bf16.mxu1 %vm206_vm1, %v492_v7 }
  0x42   : > { %1431 = vmatmul.mubr.msk.bf16.vlgmr.msra.gmra.mrb[0].mxu0 %vm206_vm1, %v1630_v22  ;;  %v1309_v22 = vld [vmem:[%s1769_s2] ss:$0 sm:$0xff] }
  0x43   : > { %1439 = vmatpush3.bf16.msra.mxu0 %v1054_v8  ;;  %1434 = vmatprep.mubr.msk.bf16.mxu0 %vm206_vm1, %v1656_v32 }
  0x45   : > { %1391 = vmatmul.mubr.msk.bf16.vlgmr.msra.gmra.mrb[0].mxu1 %vm206_vm1, %v493_v9 }
  0x46   : > { %1449 = vmatpush3.bf16.msra.mxu1 %v1597_v5  ;;  %1394 = vmatprep.mubr.msk.bf16.mxu1 %vm206_vm1, %v494_v11  ;;  %v1303_v5 = vld [vmem:[%s1611_s27 + $0x92] sm:$0xff] }
  0x47   : > { %v1035_v16 = vpack.c.bf16 %v1303_v5, %v1681_v50 }
  0x4a   : > { %1435 = vmatmul.mubr.msk.bf16.gmra.mrb[4].mxu0 %vm206_vm1, %v927_v12 }
  0x4b   : > { %1440 = vmatprep.mubr.msk.bf16.mxu0 %vm206_vm1, %v384_v62 }
  0x4d   : > { %1395 = vmatmul.mubr.msk.bf16.gmra.mrb[4].mxu1 %vm206_vm1, %v495_v13 }
  0x4e   : > { %1404 = vmatprep.mubr.msk.bf16.mxu1 %vm206_vm1, %v602_v14 }
  0x52   : > { %1441 = vmatmul.mubr.msk.bf16.vlgmr.msra.gmra.mrb[0].mxu0 %vm206_vm1, %v385_v1 }
  0x53   : > { %1444 = vmatprep.mubr.msk.bf16.mxu0 %vm206_vm1, %v386_v6 }
  0x59   : > { %1405 = vmatmul.mubr.msk.bf16.vlgmr.msra.gmra.mrb[4].mxu1 %vm206_vm1, %v603_v15 }
  0x5a   : > { %1445 = vmatmul.mubr.msk.bf16.gmra.mrb[4].mxu0 %vm206_vm1, %v1035_v16 }
 0x118   : > { %v1392_v17 = vpop.f32.mrb[0].mxu1 }
 0x119   : > { %v551_v19 = vpop.f32.mrb[1].mxu1 }
 0x11a   : > { %v1393_v18 = vpop.f32.mrb[2].mxu1 }
 0x11b   : > { %v554_v20 = vpop.f32.mrb[3].mxu1 }
 0x125   : > { %v1442_v21 = vpop.f32.mrb[0].mxu0 }
 0x126   : > { %v1450_v23 = vadd.f32 %v1442_v21, %v1392_v17  ;;  %v1090_v24 = vpop.f32.mrb[1].mxu0 }
 0x127   : > { %v1451_v25 = vadd.f32 %v1090_v24, %v551_v19  ;;  %v1443_v26 = vpop.f32.mrb[2].mxu0 }
 0x128   : > { %v1138_v27 = vadd.f32 %v1450_v23, %v1309_v22  ;;  %v1452_v28 = vadd.f32 %v1443_v26, %v1393_v18  ;;  %v1093_v29 = vpop.f32.mrb[3].mxu0 }
 0x129   : > { %v1136_v30 = vadd.f32 %v1451_v25, %v1309_v22  ;;  %v1453_v31 = vadd.f32 %v1093_v29, %v554_v20 }
 0x12a   : > { %1147 = vst.msk [vmem:[%s1746_s16 + $0x10] sm:$0xff] %vm1144_vm2, %v1138_v27  ;;  %v1139_v32 = vadd.f32 %v1452_v28, %v1309_v22 }
 0x12b   : > { %1145 = vst.msk [vmem:[%s1746_s16] sm:$0xff] %vm1144_vm2, %v1136_v30  ;;  %v1137_v33 = vadd.f32 %v1453_v31, %v1309_v22 }
 0x12c   : > { %1148 = vst.msk [vmem:[%s1746_s16 + $0x18] sm:$0xff] %vm1144_vm2, %v1139_v32  ;;  %v1406_v34 = vpop.f32.mrb[4].mxu1 }
 0x12d   : > { %1146 = vst.msk [vmem:[%s1746_s16 + $0x8] sm:$0xff] %vm1144_vm2, %v1137_v33  ;;  %v1446_v35 = vpop.f32.mrb[4].mxu0  ;;  %v674_v37 = vpop.f32.mrb[5].mxu1 }
 0x12e   : > { %v1454_v36 = vadd.f32 %v1446_v35, %v1406_v34  ;;  %v1106_v38 = vpop.f32.mrb[5].mxu0  ;;  %v1407_v40 = vpop.f32.mrb[6].mxu1 }
 0x12f   : > { %v1455_v39 = vadd.f32 %v1106_v38, %v674_v37  ;;  %v1447_v41 = vpop.f32.mrb[6].mxu0  ;;  %v677_v44 = vpop.f32.mrb[7].mxu1 }
 0x130   : > { %v1142_v42 = vadd.f32 %v1454_v36, %v1309_v22  ;;  %v1456_v43 = vadd.f32 %v1447_v41, %v1407_v40  ;;  %v1109_v45 = vpop.f32.mrb[7].mxu0 }
 0x131   : > { %v1140_v46 = vadd.f32 %v1455_v39, %v1309_v22  ;;  %v1457_v47 = vadd.f32 %v1109_v45, %v677_v44 }
 0x132   : > { %1151 = vst.msk [vmem:[%s1746_s16 + $0x30] sm:$0xff] %vm1144_vm2, %v1142_v42  ;;  %v1143_v48 = vadd.f32 %v1456_v43, %v1309_v22 }
 0x133   : > { %1149 = vst.msk [vmem:[%s1746_s16 + $0x20] sm:$0xff] %vm1144_vm2, %v1140_v46  ;;  %v1141_v49 = vadd.f32 %v1457_v47, %v1309_v22 }
 0x134   : > { %1152 = vst.msk [vmem:[%s1746_s16 + $0x38] sm:$0xff] %vm1144_vm2, %v1143_v48 }
 0x135   : > { %1150 = vst.msk [vmem:[%s1746_s16 + $0x28] sm:$0xff] %vm1144_vm2, %v1141_v49 }
 0x136 PF: > { %s13_s12 = sadd.s32 1, %s1548_s12  }
 0x137   : > { %p10_p4 = scmp.ge.s32.totalorder %s13_s12, 4  }
 0x139   :  { %12 = sbr.rel (!%p10_p4) target bundleno = 1 (0x1), region = 64 }

</bundles_post_ra>
